<compile_context>
chip_gen: v5e
topology: v5e:2x2
jax: 0.10.0
libtpu: 0.0.40
codegen_flags: <defaults>
</compile_context>

<pallas_src>
import functools

import numpy as np
import jax
import jax.numpy as jnp
from jax import lax
from jax.experimental import pallas as pl
from jax.experimental.pallas import tpu as pltpu

# ---- CBAM(in_channels=32, reduction_ratio=16, kernel_size=7) hyper-params ----
C_IN = 32
REDUCTION = 16
C_RED = max(1, C_IN // REDUCTION)   # 2
KSIZE = 7
PAD = KSIZE // 2                    # 3
LANE = 128


def _cbam_kernel(x_ref, w1_ref, w2t_ref, rmask_ref, cmask_ref, wsp_ref, o_ref,
                 *, H, W, HW):
    # x_ref:     (NB, C, HWP)    lane-dense input block (HWP = H*W padded to 128)
    # w1_ref:    (C_red, C, 1)   fc1 weight (row r = weights of reduced chan r)
    # w2t_ref:   (C_red, C, 1)   fc2 weight, transposed (row r = column r of fc2)
    # rmask_ref: (K, 1, HWP)     row-validity mask per kernel row (f32 0/1)
    # cmask_ref: (K, 1, HWP)     col-validity mask per kernel col (f32 0/1)
    # wsp_ref:   (2*K*K,)        7x7 spatial conv weight, flattened, SMEM scalars
    # o_ref:     (NB, C, HWP)
    NB, C, HWP = x_ref.shape
    CR = w1_ref.shape[0]

    x = x_ref[...].astype(jnp.float32)                         # (NB, C, HWP)

    # ---------------- Channel attention ----------------
    # Mean over the true spatial extent (pad lanes are zeros -> sum unaffected).
    avg_c = jnp.sum(x, axis=-1, keepdims=True) * (1.0 / float(HW))  # (NB, C, 1)
    if HWP > HW:
        lane_idx = lax.broadcasted_iota(jnp.int32, (1, 1, HWP), 2)
        x_for_max = jnp.where(lane_idx < HW, x, -jnp.inf)
    else:
        x_for_max = x
    max_c = jnp.max(x_for_max, axis=-1, keepdims=True)          # (NB, C, 1)

    w1 = w1_ref[...].astype(jnp.float32)                        # (CR, C, 1)
    w2t = w2t_ref[...].astype(jnp.float32)                      # (CR, C, 1)

    def mlp(p):
        # Shared MLP (Conv1x1 -> ReLU -> Conv1x1, no bias) on the VPU:
        # C_red is tiny (2), so each layer is a couple of reduce/FMA ops; this
        # avoids serialized MXU round-trips for degenerate matmul shapes.
        out = jnp.zeros_like(p)                                  # (NB, C, 1)
        for r in range(CR):
            hr = jnp.sum(p * w1[r:r + 1], axis=1, keepdims=True)   # (NB, 1, 1)
            hr = jnp.maximum(hr, 0.0)
            out = out + hr * w2t[r:r + 1]                        # (NB, C, 1)
        return out

    ca = jax.nn.sigmoid(mlp(avg_c) + mlp(max_c))                 # (NB, C, 1)
    x_ca = x * ca                                                # (NB, C, HWP)

    # ---------------- Spatial attention ----------------
    avg_sp = jnp.mean(x_ca, axis=1, keepdims=True)               # (NB, 1, HWP)
    max_sp = jnp.max(x_ca, axis=1, keepdims=True)                # (NB, 1, HWP)

    rm_all = rmask_ref[...]                                      # (K, 1, HWP)
    cm_all = cmask_ref[...]                                      # (K, 1, HWP)

    # Per-batch flat planes (leading-dim squeeze is layout-free).
    a_pl = [avg_sp[n] for n in range(NB)]                        # each (1, HWP)
    m_pl = [max_sp[n] for n in range(NB)]
    acc_e = [jnp.zeros((1, HWP), jnp.float32) for _ in range(NB)]
    acc_o = [jnp.zeros((1, HWP), jnp.float32) for _ in range(NB)]

    # 7x7 cross-correlation, fully unrolled, in the flat lane-dense layout.
    # Each tap (kh, kw) reads in[p + (kh-PAD)*W + (kw-PAD)] via a lane roll
    # (XLU slot, overlaps the VALU FMAs) and zeroes out-of-image positions
    # with the host-precomputed boundary masks.  Two accumulator chains per
    # batch element keep the VALU busy.
    tap = 0
    for kh in range(KSIZE):
        rm = rm_all[kh]                                          # (1, HWP)
        for kw in range(KSIZE):
            m = rm * cm_all[kw]                                  # (1, HWP)
            wa = wsp_ref[kh * KSIZE + kw]                        # avg-plane tap
            wm = wsp_ref[KSIZE * KSIZE + kh * KSIZE + kw]        # max-plane tap
            s = (kh - PAD) * W + (kw - PAD)
            sh = (-s) % HWP                                      # roll amount
            for n in range(NB):
                if sh == 0:
                    a_sh, m_sh = a_pl[n], m_pl[n]
                else:
                    a_sh = pltpu.roll(a_pl[n], sh, axis=1)
                    m_sh = pltpu.roll(m_pl[n], sh, axis=1)
                contrib = m * (wa * a_sh + wm * m_sh)
                if tap % 2 == 0:
                    acc_e[n] = acc_e[n] + contrib
                else:
                    acc_o[n] = acc_o[n] + contrib
            tap += 1

    for n in range(NB):
        sa = jax.nn.sigmoid(acc_e[n] + acc_o[n])                 # (1, HWP)
        # Sublane-broadcast sa over C and store one unmasked lane-dense tile.
        o_ref[n] = (x_ca[n] * sa).astype(o_ref.dtype)


def _build_masks(H, W, HW, HWP):
    """Static row/col validity masks for the flattened 7x7 conv (host-side)."""
    p = np.arange(HWP)
    r = p // W
    c = p % W
    in_img = p < HW
    rmask = np.zeros((KSIZE, 1, HWP), np.float32)
    cmask = np.zeros((KSIZE, 1, HWP), np.float32)
    for k in range(KSIZE):
        d = k - PAD
        rmask[k, 0] = ((r + d >= 0) & (r + d < H) & in_img).astype(np.float32)
        cmask[k, 0] = ((c + d >= 0) & (c + d < W) & in_img).astype(np.float32)
    return jnp.asarray(rmask), jnp.asarray(cmask)


def _pick_nb(n, cap=8):
    """Largest divisor of n that is <= cap (sublane tile).  The per-batch
    spatial-conv work is Python-unrolled, so NB is kept modest."""
    nb = 1
    for d in range(1, min(n, cap) + 1):
        if n % d == 0:
            nb = d
    return nb


def cbam_pallas(x, w1, w2, wsp, nb=None):
    # x: (N, C, H, W); w1: (C_red, C[,1,1]); w2: (C, C_red[,1,1]); wsp: (1,2,K,K)
    N, C, H, W = x.shape
    HW = H * W
    HWP = ((HW + LANE - 1) // LANE) * LANE          # lane-dense last dim

    w1m = w1.reshape(w1.shape[0], -1).astype(jnp.float32)   # (C_red, C)
    w2m = w2.reshape(w2.shape[0], -1).astype(jnp.float32)   # (C, C_red)
    Cr = w1m.shape[0]
    w1k = w1m.reshape(Cr, C, 1)                              # fc1 rows
    w2tk = jnp.transpose(w2m).reshape(Cr, C, 1)              # fc2 columns
    wsp_flat = wsp.reshape(-1).astype(jnp.float32)           # (2*K*K,)

    rmask, cmask = _build_masks(H, W, HW, HWP)

    if nb is None:
        nb = _pick_nb(N)
    assert N % nb == 0

    x_flat = x.reshape(N, C, HW)
    if HWP != HW:
        # Zero-pad the flat spatial dim; reductions in-kernel account for it.
        x_flat = jnp.pad(x_flat, ((0, 0), (0, 0), (0, HWP - HW)))

    kernel = functools.partial(_cbam_kernel, H=H, W=W, HW=HW)

    out = pl.pallas_call(
        kernel,
        out_shape=jax.ShapeDtypeStruct((N, C, HWP), x.dtype),
        grid=(N // nb,),
        in_specs=[
            pl.BlockSpec((nb, C, HWP), lambda i: (i, 0, 0)),
            pl.BlockSpec((Cr, C, 1), lambda i: (0, 0, 0)),
            pl.BlockSpec((Cr, C, 1), lambda i: (0, 0, 0)),
            pl.BlockSpec((KSIZE, 1, HWP), lambda i: (0, 0, 0)),
            pl.BlockSpec((KSIZE, 1, HWP), lambda i: (0, 0, 0)),
            pl.BlockSpec(memory_space=pltpu.MemorySpace.SMEM),
        ],
        out_specs=pl.BlockSpec((nb, C, HWP), lambda i: (i, 0, 0)),
        compiler_params=pltpu.CompilerParams(dimension_semantics=("parallel",)),
    )(x_flat, w1k, w2tk, rmask, cmask, wsp_flat)

    if HWP != HW:
        out = out[:, :, :HW]
    return out.reshape(N, C, H, W)


# ---------------- pure-JAX reference (for verification) ----------------
def cbam_ref(x, w1, w2, wsp):
    w1m = w1.reshape(w1.shape[0], -1)
    w2m = w2.reshape(w2.shape[0], -1)
    avg = jnp.mean(x, axis=(2, 3))                  # (N, C)
    mx = jnp.max(x, axis=(2, 3))                    # (N, C)

    def fc(p):
        h = jnp.maximum(p @ w1m.T, 0.0)             # (N, C_red)
        return h @ w2m.T                            # (N, C)

    ca = jax.nn.sigmoid(fc(avg) + fc(mx))[:, :, None, None]
    x = x * ca
    avg_sp = jnp.mean(x, axis=1, keepdims=True)
    max_sp = jnp.max(x, axis=1, keepdims=True)
    inp = jnp.concatenate([avg_sp, max_sp], axis=1)  # (N, 2, H, W)
    conv = jax.lax.conv_general_dilated(
        inp, wsp, window_strides=(1, 1), padding="SAME",
        dimension_numbers=("NCHW", "OIHW", "NCHW"))
    sa = jax.nn.sigmoid(conv)
    return x * sa


if __name__ == "__main__":
    N, H, W = 2, 16, 16
    key = jax.random.PRNGKey(0)
    kx, k1, k2, k3 = jax.random.split(key, 4)

    x = jax.random.normal(kx, (N, C_IN, H, W), jnp.float32)
    # parameters with the shapes nn.Conv2d(..., bias=False) implies (1x1 convs squeezed)
    fc1_w = 0.1 * jax.random.normal(k1, (C_RED, C_IN), jnp.float32)        # (C_red, C, 1, 1) squeezed
    fc2_w = 0.1 * jax.random.normal(k2, (C_IN, C_RED), jnp.float32)        # (C, C_red, 1, 1) squeezed
    sp_w = 0.1 * jax.random.normal(k3, (1, 2, KSIZE, KSIZE), jnp.float32)  # (1, 2, 7, 7)

    out = jax.block_until_ready(cbam_pallas(x, fc1_w, fc2_w, sp_w))
    ref = jax.block_until_ready(cbam_ref(x, fc1_w, fc2_w, sp_w))

    max_err = float(jnp.max(jnp.abs(out - ref)))
    assert max_err < 5e-3, f"mismatch vs reference: {max_err}"

    print("KERNEL_OK")
</pallas_src>

<mosaic_0001>
module attributes {stable_mosaic.version = 11 : i64} {
  func.func @_cbam_kernel(%arg0: i32, %arg1: memref<2x32x256xf32, #tpu.memory_space<vmem>>, %arg2: memref<2x32x1xf32, #tpu.memory_space<vmem>>, %arg3: memref<2x32x1xf32, #tpu.memory_space<vmem>>, %arg4: memref<7x1x256xf32, #tpu.memory_space<vmem>>, %arg5: memref<7x1x256xf32, #tpu.memory_space<vmem>>, %arg6: memref<98xf32, #tpu.memory_space<smem>>, %arg7: memref<2x32x256xf32, #tpu.memory_space<vmem>>) attributes {dimension_semantics = [#tpu.dimension_semantics<parallel>], iteration_bounds = array<i64: 1>, scalar_prefetch = 0 : i64, scratch_operands = 0 : i64, tpu.core_type = #tpu.core_type<tc>, window_params = [{transform_indices = @transform_0, window_bounds = array<i64: 2, 32, 256>}, {pipeline_mode = #tpu.pipeline_mode<synchronous>, transform_indices = @transform_1, window_bounds = array<i64: 2, 32, 1>}, {pipeline_mode = #tpu.pipeline_mode<synchronous>, transform_indices = @transform_2, window_bounds = array<i64: 2, 32, 1>}, {pipeline_mode = #tpu.pipeline_mode<synchronous>, transform_indices = @transform_3, window_bounds = array<i64: 7, 1, 256>}, {pipeline_mode = #tpu.pipeline_mode<synchronous>, transform_indices = @transform_4, window_bounds = array<i64: 7, 1, 256>}, {transform_indices = @transform_5, window_bounds = array<i64: 98>}, {transform_indices = @transform_6, window_bounds = array<i64: 2, 32, 256>}]} {
    %c0 = arith.constant 0 : index
    %c0_0 = arith.constant 0 : index
    %c0_1 = arith.constant 0 : index
    %0 = vector.load %arg1[%c0, %c0_0, %c0_1] : memref<2x32x256xf32, #tpu.memory_space<vmem>>, vector<2x32x256xf32>
    %cst = arith.constant dense<0.000000e+00> : vector<2x32xf32>
    %1 = vector.multi_reduction <add>, %0, %cst [2] : vector<2x32x256xf32> to vector<2x32xf32>
    %2 = vector.shape_cast %1 : vector<2x32xf32> to vector<2x32x1xf32>
    %cst_2 = arith.constant 3.906250e-03 : f32
    %3 = vector.broadcast %cst_2 : f32 to vector<2x32x1xf32>
    %4 = arith.mulf %2, %3 : vector<2x32x1xf32>
    %cst_3 = arith.constant dense<0xFF800000> : vector<2x32xf32>
    %5 = vector.multi_reduction <maximumf>, %0, %cst_3 [2] : vector<2x32x256xf32> to vector<2x32xf32>
    %6 = vector.shape_cast %5 : vector<2x32xf32> to vector<2x32x1xf32>
    %c0_4 = arith.constant 0 : index
    %c0_5 = arith.constant 0 : index
    %c0_6 = arith.constant 0 : index
    %7 = vector.load %arg2[%c0_4, %c0_5, %c0_6] : memref<2x32x1xf32, #tpu.memory_space<vmem>>, vector<2x32x1xf32>
    %c0_7 = arith.constant 0 : index
    %c0_8 = arith.constant 0 : index
    %c0_9 = arith.constant 0 : index
    %8 = vector.load %arg3[%c0_7, %c0_8, %c0_9] : memref<2x32x1xf32, #tpu.memory_space<vmem>>, vector<2x32x1xf32>
    %cst_10 = arith.constant 0.000000e+00 : f32
    %9 = vector.broadcast %cst_10 : f32 to vector<2x32x1xf32>
    %10 = vector.extract_strided_slice %7 {offsets = [0, 0, 0], sizes = [1, 32, 1], strides = [1, 1, 1]} : vector<2x32x1xf32> to vector<1x32x1xf32>
    %11 = vector.broadcast %10 : vector<1x32x1xf32> to vector<2x32x1xf32>
    %12 = arith.mulf %4, %11 : vector<2x32x1xf32>
    %cst_11 = arith.constant dense<0.000000e+00> : vector<2x1xf32>
    %13 = vector.multi_reduction <add>, %12, %cst_11 [1] : vector<2x32x1xf32> to vector<2x1xf32>
    %14 = vector.shape_cast %13 : vector<2x1xf32> to vector<2x1x1xf32>
    %cst_12 = arith.constant 0.000000e+00 : f32
    %15 = vector.broadcast %cst_12 : f32 to vector<2x1x1xf32>
    %16 = arith.maximumf %14, %15 : vector<2x1x1xf32>
    %17 = vector.extract_strided_slice %8 {offsets = [0, 0, 0], sizes = [1, 32, 1], strides = [1, 1, 1]} : vector<2x32x1xf32> to vector<1x32x1xf32>
    %18 = vector.broadcast %16 : vector<2x1x1xf32> to vector<2x32x1xf32>
    %19 = vector.broadcast %17 : vector<1x32x1xf32> to vector<2x32x1xf32>
    %20 = arith.mulf %18, %19 : vector<2x32x1xf32>
    %21 = arith.addf %9, %20 : vector<2x32x1xf32>
    %22 = vector.extract_strided_slice %7 {offsets = [1, 0, 0], sizes = [1, 32, 1], strides = [1, 1, 1]} : vector<2x32x1xf32> to vector<1x32x1xf32>
    %23 = vector.broadcast %22 : vector<1x32x1xf32> to vector<2x32x1xf32>
    %24 = arith.mulf %4, %23 : vector<2x32x1xf32>
    %cst_13 = arith.constant dense<0.000000e+00> : vector<2x1xf32>
    %25 = vector.multi_reduction <add>, %24, %cst_13 [1] : vector<2x32x1xf32> to vector<2x1xf32>
    %26 = vector.shape_cast %25 : vector<2x1xf32> to vector<2x1x1xf32>
    %cst_14 = arith.constant 0.000000e+00 : f32
    %27 = vector.broadcast %cst_14 : f32 to vector<2x1x1xf32>
    %28 = arith.maximumf %26, %27 : vector<2x1x1xf32>
    %29 = vector.extract_strided_slice %8 {offsets = [1, 0, 0], sizes = [1, 32, 1], strides = [1, 1, 1]} : vector<2x32x1xf32> to vector<1x32x1xf32>
    %30 = vector.broadcast %28 : vector<2x1x1xf32> to vector<2x32x1xf32>
    %31 = vector.broadcast %29 : vector<1x32x1xf32> to vector<2x32x1xf32>
    %32 = arith.mulf %30, %31 : vector<2x32x1xf32>
    %33 = arith.addf %21, %32 : vector<2x32x1xf32>
    %cst_15 = arith.constant 0.000000e+00 : f32
    %34 = vector.broadcast %cst_15 : f32 to vector<2x32x1xf32>
    %35 = vector.extract_strided_slice %7 {offsets = [0, 0, 0], sizes = [1, 32, 1], strides = [1, 1, 1]} : vector<2x32x1xf32> to vector<1x32x1xf32>
    %36 = vector.broadcast %35 : vector<1x32x1xf32> to vector<2x32x1xf32>
    %37 = arith.mulf %6, %36 : vector<2x32x1xf32>
    %cst_16 = arith.constant dense<0.000000e+00> : vector<2x1xf32>
    %38 = vector.multi_reduction <add>, %37, %cst_16 [1] : vector<2x32x1xf32> to vector<2x1xf32>
    %39 = vector.shape_cast %38 : vector<2x1xf32> to vector<2x1x1xf32>
    %cst_17 = arith.constant 0.000000e+00 : f32
    %40 = vector.broadcast %cst_17 : f32 to vector<2x1x1xf32>
    %41 = arith.maximumf %39, %40 : vector<2x1x1xf32>
    %42 = vector.extract_strided_slice %8 {offsets = [0, 0, 0], sizes = [1, 32, 1], strides = [1, 1, 1]} : vector<2x32x1xf32> to vector<1x32x1xf32>
    %43 = vector.broadcast %41 : vector<2x1x1xf32> to vector<2x32x1xf32>
    %44 = vector.broadcast %42 : vector<1x32x1xf32> to vector<2x32x1xf32>
    %45 = arith.mulf %43, %44 : vector<2x32x1xf32>
    %46 = arith.addf %34, %45 : vector<2x32x1xf32>
    %47 = vector.extract_strided_slice %7 {offsets = [1, 0, 0], sizes = [1, 32, 1], strides = [1, 1, 1]} : vector<2x32x1xf32> to vector<1x32x1xf32>
    %48 = vector.broadcast %47 : vector<1x32x1xf32> to vector<2x32x1xf32>
    %49 = arith.mulf %6, %48 : vector<2x32x1xf32>
    %cst_18 = arith.constant dense<0.000000e+00> : vector<2x1xf32>
    %50 = vector.multi_reduction <add>, %49, %cst_18 [1] : vector<2x32x1xf32> to vector<2x1xf32>
    %51 = vector.shape_cast %50 : vector<2x1xf32> to vector<2x1x1xf32>
    %cst_19 = arith.constant 0.000000e+00 : f32
    %52 = vector.broadcast %cst_19 : f32 to vector<2x1x1xf32>
    %53 = arith.maximumf %51, %52 : vector<2x1x1xf32>
    %54 = vector.extract_strided_slice %8 {offsets = [1, 0, 0], sizes = [1, 32, 1], strides = [1, 1, 1]} : vector<2x32x1xf32> to vector<1x32x1xf32>
    %55 = vector.broadcast %53 : vector<2x1x1xf32> to vector<2x32x1xf32>
    %56 = vector.broadcast %54 : vector<1x32x1xf32> to vector<2x32x1xf32>
    %57 = arith.mulf %55, %56 : vector<2x32x1xf32>
    %58 = arith.addf %46, %57 : vector<2x32x1xf32>
    %59 = arith.addf %33, %58 : vector<2x32x1xf32>
    %60 = arith.negf %59 : vector<2x32x1xf32>
    %61 = math.exp %60 : vector<2x32x1xf32>
    %cst_20 = arith.constant 1.000000e+00 : f32
    %62 = vector.broadcast %cst_20 : f32 to vector<2x32x1xf32>
    %63 = arith.addf %62, %61 : vector<2x32x1xf32>
    %64 = arith.divf %62, %63 : vector<2x32x1xf32>
    %65 = vector.broadcast %64 : vector<2x32x1xf32> to vector<2x32x256xf32>
    %66 = arith.mulf %0, %65 : vector<2x32x256xf32>
    %cst_21 = arith.constant dense<0.000000e+00> : vector<2x256xf32>
    %67 = vector.multi_reduction <add>, %66, %cst_21 [1] : vector<2x32x256xf32> to vector<2x256xf32>
    %68 = vector.shape_cast %67 : vector<2x256xf32> to vector<2x1x256xf32>
    %cst_22 = arith.constant 3.200000e+01 : f32
    %69 = vector.broadcast %cst_22 : f32 to vector<2x1x256xf32>
    %70 = arith.divf %68, %69 : vector<2x1x256xf32>
    %cst_23 = arith.constant dense<0xFF800000> : vector<2x256xf32>
    %71 = vector.multi_reduction <maximumf>, %66, %cst_23 [1] : vector<2x32x256xf32> to vector<2x256xf32>
    %72 = vector.shape_cast %71 : vector<2x256xf32> to vector<2x1x256xf32>
    %c0_24 = arith.constant 0 : index
    %c0_25 = arith.constant 0 : index
    %c0_26 = arith.constant 0 : index
    %73 = vector.load %arg4[%c0_24, %c0_25, %c0_26] : memref<7x1x256xf32, #tpu.memory_space<vmem>>, vector<7x1x256xf32>
    %c0_27 = arith.constant 0 : index
    %c0_28 = arith.constant 0 : index
    %c0_29 = arith.constant 0 : index
    %74 = vector.load %arg5[%c0_27, %c0_28, %c0_29] : memref<7x1x256xf32, #tpu.memory_space<vmem>>, vector<7x1x256xf32>
    %75 = vector.extract_strided_slice %70 {offsets = [0, 0, 0], sizes = [1, 1, 256], strides = [1, 1, 1]} : vector<2x1x256xf32> to vector<1x1x256xf32>
    %76 = vector.shape_cast %75 : vector<1x1x256xf32> to vector<1x256xf32>
    %77 = vector.extract_strided_slice %70 {offsets = [1, 0, 0], sizes = [1, 1, 256], strides = [1, 1, 1]} : vector<2x1x256xf32> to vector<1x1x256xf32>
    %78 = vector.shape_cast %77 : vector<1x1x256xf32> to vector<1x256xf32>
    %79 = vector.extract_strided_slice %72 {offsets = [0, 0, 0], sizes = [1, 1, 256], strides = [1, 1, 1]} : vector<2x1x256xf32> to vector<1x1x256xf32>
    %80 = vector.shape_cast %79 : vector<1x1x256xf32> to vector<1x256xf32>
    %81 = vector.extract_strided_slice %72 {offsets = [1, 0, 0], sizes = [1, 1, 256], strides = [1, 1, 1]} : vector<2x1x256xf32> to vector<1x1x256xf32>
    %82 = vector.shape_cast %81 : vector<1x1x256xf32> to vector<1x256xf32>
    %cst_30 = arith.constant 0.000000e+00 : f32
    %83 = vector.broadcast %cst_30 : f32 to vector<1x256xf32>
    %cst_31 = arith.constant 0.000000e+00 : f32
    %84 = vector.broadcast %cst_31 : f32 to vector<1x256xf32>
    %cst_32 = arith.constant 0.000000e+00 : f32
    %85 = vector.broadcast %cst_32 : f32 to vector<1x256xf32>
    %cst_33 = arith.constant 0.000000e+00 : f32
    %86 = vector.broadcast %cst_33 : f32 to vector<1x256xf32>
    %87 = vector.extract_strided_slice %73 {offsets = [0, 0, 0], sizes = [1, 1, 256], strides = [1, 1, 1]} : vector<7x1x256xf32> to vector<1x1x256xf32>
    %88 = vector.shape_cast %87 : vector<1x1x256xf32> to vector<1x256xf32>
    %89 = vector.extract_strided_slice %74 {offsets = [0, 0, 0], sizes = [1, 1, 256], strides = [1, 1, 1]} : vector<7x1x256xf32> to vector<1x1x256xf32>
    %90 = vector.shape_cast %89 : vector<1x1x256xf32> to vector<1x256xf32>
    %91 = arith.mulf %88, %90 : vector<1x256xf32>
    %c0_34 = arith.constant 0 : index
    %92 = memref.load %arg6[%c0_34] : memref<98xf32, #tpu.memory_space<smem>>
    %c49 = arith.constant 49 : index
    %93 = memref.load %arg6[%c49] : memref<98xf32, #tpu.memory_space<smem>>
    %c51_i32 = arith.constant 51 : i32
    %94 = tpu.dynamic_rotate %76 by %c51_i32 dim 1 : vector<1x256xf32>, i32 -> vector<1x256xf32>
    %c51_i32_35 = arith.constant 51 : i32
    %95 = tpu.dynamic_rotate %80 by %c51_i32_35 dim 1 : vector<1x256xf32>, i32 -> vector<1x256xf32>
    %96 = vector.broadcast %92 : f32 to vector<1x256xf32>
    %97 = arith.mulf %96, %94 : vector<1x256xf32>
    %98 = vector.broadcast %93 : f32 to vector<1x256xf32>
    %99 = arith.mulf %98, %95 : vector<1x256xf32>
    %100 = arith.addf %97, %99 : vector<1x256xf32>
    %101 = arith.mulf %91, %100 : vector<1x256xf32>
    %102 = arith.addf %83, %101 : vector<1x256xf32>
    %c51_i32_36 = arith.constant 51 : i32
    %103 = tpu.dynamic_rotate %78 by %c51_i32_36 dim 1 : vector<1x256xf32>, i32 -> vector<1x256xf32>
    %c51_i32_37 = arith.constant 51 : i32
    %104 = tpu.dynamic_rotate %82 by %c51_i32_37 dim 1 : vector<1x256xf32>, i32 -> vector<1x256xf32>
    %105 = vector.broadcast %92 : f32 to vector<1x256xf32>
    %106 = arith.mulf %105, %103 : vector<1x256xf32>
    %107 = vector.broadcast %93 : f32 to vector<1x256xf32>
    %108 = arith.mulf %107, %104 : vector<1x256xf32>
    %109 = arith.addf %106, %108 : vector<1x256xf32>
    %110 = arith.mulf %91, %109 : vector<1x256xf32>
    %111 = arith.addf %84, %110 : vector<1x256xf32>
    %112 = vector.extract_strided_slice %74 {offsets = [1, 0, 0], sizes = [1, 1, 256], strides = [1, 1, 1]} : vector<7x1x256xf32> to vector<1x1x256xf32>
    %113 = vector.shape_cast %112 : vector<1x1x256xf32> to vector<1x256xf32>
    %114 = arith.mulf %88, %113 : vector<1x256xf32>
    %c1 = arith.constant 1 : index
    %115 = memref.load %arg6[%c1] : memref<98xf32, #tpu.memory_space<smem>>
    %c50 = arith.constant 50 : index
    %116 = memref.load %arg6[%c50] : memref<98xf32, #tpu.memory_space<smem>>
    %c50_i32 = arith.constant 50 : i32
    %117 = tpu.dynamic_rotate %76 by %c50_i32 dim 1 : vector<1x256xf32>, i32 -> vector<1x256xf32>
    %c50_i32_38 = arith.constant 50 : i32
    %118 = tpu.dynamic_rotate %80 by %c50_i32_38 dim 1 : vector<1x256xf32>, i32 -> vector<1x256xf32>
    %119 = vector.broadcast %115 : f32 to vector<1x256xf32>
    %120 = arith.mulf %119, %117 : vector<1x256xf32>
    %121 = vector.broadcast %116 : f32 to vector<1x256xf32>
    %122 = arith.mulf %121, %118 : vector<1x256xf32>
    %123 = arith.addf %120, %122 : vector<1x256xf32>
    %124 = arith.mulf %114, %123 : vector<1x256xf32>
    %125 = arith.addf %85, %124 : vector<1x256xf32>
    %c50_i32_39 = arith.constant 50 : i32
    %126 = tpu.dynamic_rotate %78 by %c50_i32_39 dim 1 : vector<1x256xf32>, i32 -> vector<1x256xf32>
    %c50_i32_40 = arith.constant 50 : i32
    %127 = tpu.dynamic_rotate %82 by %c50_i32_40 dim 1 : vector<1x256xf32>, i32 -> vector<1x256xf32>
    %128 = vector.broadcast %115 : f32 to vector<1x256xf32>
    %129 = arith.mulf %128, %126 : vector<1x256xf32>
    %130 = vector.broadcast %116 : f32 to vector<1x256xf32>
    %131 = arith.mulf %130, %127 : vector<1x256xf32>
    %132 = arith.addf %129, %131 : vector<1x256xf32>
    %133 = arith.mulf %114, %132 : vector<1x256xf32>
    %134 = arith.addf %86, %133 : vector<1x256xf32>
    %135 = vector.extract_strided_slice %74 {offsets = [2, 0, 0], sizes = [1, 1, 256], strides = [1, 1, 1]} : vector<7x1x256xf32> to vector<1x1x256xf32>
    %136 = vector.shape_cast %135 : vector<1x1x256xf32> to vector<1x256xf32>
    %137 = arith.mulf %88, %136 : vector<1x256xf32>
    %c2 = arith.constant 2 : index
    %138 = memref.load %arg6[%c2] : memref<98xf32, #tpu.memory_space<smem>>
    %c51 = arith.constant 51 : index
    %139 = memref.load %arg6[%c51] : memref<98xf32, #tpu.memory_space<smem>>
    %c49_i32 = arith.constant 49 : i32
    %140 = tpu.dynamic_rotate %76 by %c49_i32 dim 1 : vector<1x256xf32>, i32 -> vector<1x256xf32>
    %c49_i32_41 = arith.constant 49 : i32
    %141 = tpu.dynamic_rotate %80 by %c49_i32_41 dim 1 : vector<1x256xf32>, i32 -> vector<1x256xf32>
    %142 = vector.broadcast %138 : f32 to vector<1x256xf32>
    %143 = arith.mulf %142, %140 : vector<1x256xf32>
    %144 = vector.broadcast %139 : f32 to vector<1x256xf32>
    %145 = arith.mulf %144, %141 : vector<1x256xf32>
    %146 = arith.addf %143, %145 : vector<1x256xf32>
    %147 = arith.mulf %137, %146 : vector<1x256xf32>
    %148 = arith.addf %102, %147 : vector<1x256xf32>
    %c49_i32_42 = arith.constant 49 : i32
    %149 = tpu.dynamic_rotate %78 by %c49_i32_42 dim 1 : vector<1x256xf32>, i32 -> vector<1x256xf32>
    %c49_i32_43 = arith.constant 49 : i32
    %150 = tpu.dynamic_rotate %82 by %c49_i32_43 dim 1 : vector<1x256xf32>, i32 -> vector<1x256xf32>
    %151 = vector.broadcast %138 : f32 to vector<1x256xf32>
    %152 = arith.mulf %151, %149 : vector<1x256xf32>
    %153 = vector.broadcast %139 : f32 to vector<1x256xf32>
    %154 = arith.mulf %153, %150 : vector<1x256xf32>
    %155 = arith.addf %152, %154 : vector<1x256xf32>
    %156 = arith.mulf %137, %155 : vector<1x256xf32>
    %157 = arith.addf %111, %156 : vector<1x256xf32>
    %158 = vector.extract_strided_slice %74 {offsets = [3, 0, 0], sizes = [1, 1, 256], strides = [1, 1, 1]} : vector<7x1x256xf32> to vector<1x1x256xf32>
    %159 = vector.shape_cast %158 : vector<1x1x256xf32> to vector<1x256xf32>
    %160 = arith.mulf %88, %159 : vector<1x256xf32>
    %c3 = arith.constant 3 : index
    %161 = memref.load %arg6[%c3] : memref<98xf32, #tpu.memory_space<smem>>
    %c52 = arith.constant 52 : index
    %162 = memref.load %arg6[%c52] : memref<98xf32, #tpu.memory_space<smem>>
    %c48_i32 = arith.constant 48 : i32
    %163 = tpu.dynamic_rotate %76 by %c48_i32 dim 1 : vector<1x256xf32>, i32 -> vector<1x256xf32>
    %c48_i32_44 = arith.constant 48 : i32
    %164 = tpu.dynamic_rotate %80 by %c48_i32_44 dim 1 : vector<1x256xf32>, i32 -> vector<1x256xf32>
    %165 = vector.broadcast %161 : f32 to vector<1x256xf32>
    %166 = arith.mulf %165, %163 : vector<1x256xf32>
    %167 = vector.broadcast %162 : f32 to vector<1x256xf32>
    %168 = arith.mulf %167, %164 : vector<1x256xf32>
    %169 = arith.addf %166, %168 : vector<1x256xf32>
    %170 = arith.mulf %160, %169 : vector<1x256xf32>
    %171 = arith.addf %125, %170 : vector<1x256xf32>
    %c48_i32_45 = arith.constant 48 : i32
    %172 = tpu.dynamic_rotate %78 by %c48_i32_45 dim 1 : vector<1x256xf32>, i32 -> vector<1x256xf32>
    %c48_i32_46 = arith.constant 48 : i32
    %173 = tpu.dynamic_rotate %82 by %c48_i32_46 dim 1 : vector<1x256xf32>, i32 -> vector<1x256xf32>
    %174 = vector.broadcast %161 : f32 to vector<1x256xf32>
    %175 = arith.mulf %174, %172 : vector<1x256xf32>
    %176 = vector.broadcast %162 : f32 to vector<1x256xf32>
    %177 = arith.mulf %176, %173 : vector<1x256xf32>
    %178 = arith.addf %175, %177 : vector<1x256xf32>
    %179 = arith.mulf %160, %178 : vector<1x256xf32>
    %180 = arith.addf %134, %179 : vector<1x256xf32>
    %181 = vector.extract_strided_slice %74 {offsets = [4, 0, 0], sizes = [1, 1, 256], strides = [1, 1, 1]} : vector<7x1x256xf32> to vector<1x1x256xf32>
    %182 = vector.shape_cast %181 : vector<1x1x256xf32> to vector<1x256xf32>
    %183 = arith.mulf %88, %182 : vector<1x256xf32>
    %c4 = arith.constant 4 : index
    %184 = memref.load %arg6[%c4] : memref<98xf32, #tpu.memory_space<smem>>
    %c53 = arith.constant 53 : index
    %185 = memref.load %arg6[%c53] : memref<98xf32, #tpu.memory_space<smem>>
    %c47_i32 = arith.constant 47 : i32
    %186 = tpu.dynamic_rotate %76 by %c47_i32 dim 1 : vector<1x256xf32>, i32 -> vector<1x256xf32>
    %c47_i32_47 = arith.constant 47 : i32
    %187 = tpu.dynamic_rotate %80 by %c47_i32_47 dim 1 : vector<1x256xf32>, i32 -> vector<1x256xf32>
    %188 = vector.broadcast %184 : f32 to vector<1x256xf32>
    %189 = arith.mulf %188, %186 : vector<1x256xf32>
    %190 = vector.broadcast %185 : f32 to vector<1x256xf32>
    %191 = arith.mulf %190, %187 : vector<1x256xf32>
    %192 = arith.addf %189, %191 : vector<1x256xf32>
    %193 = arith.mulf %183, %192 : vector<1x256xf32>
    %194 = arith.addf %148, %193 : vector<1x256xf32>
    %c47_i32_48 = arith.constant 47 : i32
    %195 = tpu.dynamic_rotate %78 by %c47_i32_48 dim 1 : vector<1x256xf32>, i32 -> vector<1x256xf32>
    %c47_i32_49 = arith.constant 47 : i32
    %196 = tpu.dynamic_rotate %82 by %c47_i32_49 dim 1 : vector<1x256xf32>, i32 -> vector<1x256xf32>
    %197 = vector.broadcast %184 : f32 to vector<1x256xf32>
    %198 = arith.mulf %197, %195 : vector<1x256xf32>
    %199 = vector.broadcast %185 : f32 to vector<1x256xf32>
    %200 = arith.mulf %199, %196 : vector<1x256xf32>
    %201 = arith.addf %198, %200 : vector<1x256xf32>
    %202 = arith.mulf %183, %201 : vector<1x256xf32>
    %203 = arith.addf %157, %202 : vector<1x256xf32>
    %204 = vector.extract_strided_slice %74 {offsets = [5, 0, 0], sizes = [1, 1, 256], strides = [1, 1, 1]} : vector<7x1x256xf32> to vector<1x1x256xf32>
    %205 = vector.shape_cast %204 : vector<1x1x256xf32> to vector<1x256xf32>
    %206 = arith.mulf %88, %205 : vector<1x256xf32>
    %c5 = arith.constant 5 : index
    %207 = memref.load %arg6[%c5] : memref<98xf32, #tpu.memory_space<smem>>
    %c54 = arith.constant 54 : index
    %208 = memref.load %arg6[%c54] : memref<98xf32, #tpu.memory_space<smem>>
    %c46_i32 = arith.constant 46 : i32
    %209 = tpu.dynamic_rotate %76 by %c46_i32 dim 1 : vector<1x256xf32>, i32 -> vector<1x256xf32>
    %c46_i32_50 = arith.constant 46 : i32
    %210 = tpu.dynamic_rotate %80 by %c46_i32_50 dim 1 : vector<1x256xf32>, i32 -> vector<1x256xf32>
    %211 = vector.broadcast %207 : f32 to vector<1x256xf32>
    %212 = arith.mulf %211, %209 : vector<1x256xf32>
    %213 = vector.broadcast %208 : f32 to vector<1x256xf32>
    %214 = arith.mulf %213, %210 : vector<1x256xf32>
    %215 = arith.addf %212, %214 : vector<1x256xf32>
    %216 = arith.mulf %206, %215 : vector<1x256xf32>
    %217 = arith.addf %171, %216 : vector<1x256xf32>
    %c46_i32_51 = arith.constant 46 : i32
    %218 = tpu.dynamic_rotate %78 by %c46_i32_51 dim 1 : vector<1x256xf32>, i32 -> vector<1x256xf32>
    %c46_i32_52 = arith.constant 46 : i32
    %219 = tpu.dynamic_rotate %82 by %c46_i32_52 dim 1 : vector<1x256xf32>, i32 -> vector<1x256xf32>
    %220 = vector.broadcast %207 : f32 to vector<1x256xf32>
    %221 = arith.mulf %220, %218 : vector<1x256xf32>
    %222 = vector.broadcast %208 : f32 to vector<1x256xf32>
    %223 = arith.mulf %222, %219 : vector<1x256xf32>
    %224 = arith.addf %221, %223 : vector<1x256xf32>
    %225 = arith.mulf %206, %224 : vector<1x256xf32>
    %226 = arith.addf %180, %225 : vector<1x256xf32>
    %227 = vector.extract_strided_slice %74 {offsets = [6, 0, 0], sizes = [1, 1, 256], strides = [1, 1, 1]} : vector<7x1x256xf32> to vector<1x1x256xf32>
    %228 = vector.shape_cast %227 : vector<1x1x256xf32> to vector<1x256xf32>
    %229 = arith.mulf %88, %228 : vector<1x256xf32>
    %c6 = arith.constant 6 : index
    %230 = memref.load %arg6[%c6] : memref<98xf32, #tpu.memory_space<smem>>
    %c55 = arith.constant 55 : index
    %231 = memref.load %arg6[%c55] : memref<98xf32, #tpu.memory_space<smem>>
    %c45_i32 = arith.constant 45 : i32
    %232 = tpu.dynamic_rotate %76 by %c45_i32 dim 1 : vector<1x256xf32>, i32 -> vector<1x256xf32>
    %c45_i32_53 = arith.constant 45 : i32
    %233 = tpu.dynamic_rotate %80 by %c45_i32_53 dim 1 : vector<1x256xf32>, i32 -> vector<1x256xf32>
    %234 = vector.broadcast %230 : f32 to vector<1x256xf32>
    %235 = arith.mulf %234, %232 : vector<1x256xf32>
    %236 = vector.broadcast %231 : f32 to vector<1x256xf32>
    %237 = arith.mulf %236, %233 : vector<1x256xf32>
    %238 = arith.addf %235, %237 : vector<1x256xf32>
    %239 = arith.mulf %229, %238 : vector<1x256xf32>
    %240 = arith.addf %194, %239 : vector<1x256xf32>
    %c45_i32_54 = arith.constant 45 : i32
    %241 = tpu.dynamic_rotate %78 by %c45_i32_54 dim 1 : vector<1x256xf32>, i32 -> vector<1x256xf32>
    %c45_i32_55 = arith.constant 45 : i32
    %242 = tpu.dynamic_rotate %82 by %c45_i32_55 dim 1 : vector<1x256xf32>, i32 -> vector<1x256xf32>
    %243 = vector.broadcast %230 : f32 to vector<1x256xf32>
    %244 = arith.mulf %243, %241 : vector<1x256xf32>
    %245 = vector.broadcast %231 : f32 to vector<1x256xf32>
    %246 = arith.mulf %245, %242 : vector<1x256xf32>
    %247 = arith.addf %244, %246 : vector<1x256xf32>
    %248 = arith.mulf %229, %247 : vector<1x256xf32>
    %249 = arith.addf %203, %248 : vector<1x256xf32>
    %250 = vector.extract_strided_slice %73 {offsets = [1, 0, 0], sizes = [1, 1, 256], strides = [1, 1, 1]} : vector<7x1x256xf32> to vector<1x1x256xf32>
    %251 = vector.shape_cast %250 : vector<1x1x256xf32> to vector<1x256xf32>
    %252 = vector.extract_strided_slice %74 {offsets = [0, 0, 0], sizes = [1, 1, 256], strides = [1, 1, 1]} : vector<7x1x256xf32> to vector<1x1x256xf32>
    %253 = vector.shape_cast %252 : vector<1x1x256xf32> to vector<1x256xf32>
    %254 = arith.mulf %251, %253 : vector<1x256xf32>
    %c7 = arith.constant 7 : index
    %255 = memref.load %arg6[%c7] : memref<98xf32, #tpu.memory_space<smem>>
    %c56 = arith.constant 56 : index
    %256 = memref.load %arg6[%c56] : memref<98xf32, #tpu.memory_space<smem>>
    %c35_i32 = arith.constant 35 : i32
    %257 = tpu.dynamic_rotate %76 by %c35_i32 dim 1 : vector<1x256xf32>, i32 -> vector<1x256xf32>
    %c35_i32_56 = arith.constant 35 : i32
    %258 = tpu.dynamic_rotate %80 by %c35_i32_56 dim 1 : vector<1x256xf32>, i32 -> vector<1x256xf32>
    %259 = vector.broadcast %255 : f32 to vector<1x256xf32>
    %260 = arith.mulf %259, %257 : vector<1x256xf32>
    %261 = vector.broadcast %256 : f32 to vector<1x256xf32>
    %262 = arith.mulf %261, %258 : vector<1x256xf32>
    %263 = arith.addf %260, %262 : vector<1x256xf32>
    %264 = arith.mulf %254, %263 : vector<1x256xf32>
    %265 = arith.addf %217, %264 : vector<1x256xf32>
    %c35_i32_57 = arith.constant 35 : i32
    %266 = tpu.dynamic_rotate %78 by %c35_i32_57 dim 1 : vector<1x256xf32>, i32 -> vector<1x256xf32>
    %c35_i32_58 = arith.constant 35 : i32
    %267 = tpu.dynamic_rotate %82 by %c35_i32_58 dim 1 : vector<1x256xf32>, i32 -> vector<1x256xf32>
    %268 = vector.broadcast %255 : f32 to vector<1x256xf32>
    %269 = arith.mulf %268, %266 : vector<1x256xf32>
    %270 = vector.broadcast %256 : f32 to vector<1x256xf32>
    %271 = arith.mulf %270, %267 : vector<1x256xf32>
    %272 = arith.addf %269, %271 : vector<1x256xf32>
    %273 = arith.mulf %254, %272 : vector<1x256xf32>
    %274 = arith.addf %226, %273 : vector<1x256xf32>
    %275 = vector.extract_strided_slice %74 {offsets = [1, 0, 0], sizes = [1, 1, 256], strides = [1, 1, 1]} : vector<7x1x256xf32> to vector<1x1x256xf32>
    %276 = vector.shape_cast %275 : vector<1x1x256xf32> to vector<1x256xf32>
    %277 = arith.mulf %251, %276 : vector<1x256xf32>
    %c8 = arith.constant 8 : index
    %278 = memref.load %arg6[%c8] : memref<98xf32, #tpu.memory_space<smem>>
    %c57 = arith.constant 57 : index
    %279 = memref.load %arg6[%c57] : memref<98xf32, #tpu.memory_space<smem>>
    %c34_i32 = arith.constant 34 : i32
    %280 = tpu.dynamic_rotate %76 by %c34_i32 dim 1 : vector<1x256xf32>, i32 -> vector<1x256xf32>
    %c34_i32_59 = arith.constant 34 : i32
    %281 = tpu.dynamic_rotate %80 by %c34_i32_59 dim 1 : vector<1x256xf32>, i32 -> vector<1x256xf32>
    %282 = vector.broadcast %278 : f32 to vector<1x256xf32>
    %283 = arith.mulf %282, %280 : vector<1x256xf32>
    %284 = vector.broadcast %279 : f32 to vector<1x256xf32>
    %285 = arith.mulf %284, %281 : vector<1x256xf32>
    %286 = arith.addf %283, %285 : vector<1x256xf32>
    %287 = arith.mulf %277, %286 : vector<1x256xf32>
    %288 = arith.addf %240, %287 : vector<1x256xf32>
    %c34_i32_60 = arith.constant 34 : i32
    %289 = tpu.dynamic_rotate %78 by %c34_i32_60 dim 1 : vector<1x256xf32>, i32 -> vector<1x256xf32>
    %c34_i32_61 = arith.constant 34 : i32
    %290 = tpu.dynamic_rotate %82 by %c34_i32_61 dim 1 : vector<1x256xf32>, i32 -> vector<1x256xf32>
    %291 = vector.broadcast %278 : f32 to vector<1x256xf32>
    %292 = arith.mulf %291, %289 : vector<1x256xf32>
    %293 = vector.broadcast %279 : f32 to vector<1x256xf32>
    %294 = arith.mulf %293, %290 : vector<1x256xf32>
    %295 = arith.addf %292, %294 : vector<1x256xf32>
    %296 = arith.mulf %277, %295 : vector<1x256xf32>
    %297 = arith.addf %249, %296 : vector<1x256xf32>
    %298 = vector.extract_strided_slice %74 {offsets = [2, 0, 0], sizes = [1, 1, 256], strides = [1, 1, 1]} : vector<7x1x256xf32> to vector<1x1x256xf32>
    %299 = vector.shape_cast %298 : vector<1x1x256xf32> to vector<1x256xf32>
    %300 = arith.mulf %251, %299 : vector<1x256xf32>
    %c9 = arith.constant 9 : index
    %301 = memref.load %arg6[%c9] : memref<98xf32, #tpu.memory_space<smem>>
    %c58 = arith.constant 58 : index
    %302 = memref.load %arg6[%c58] : memref<98xf32, #tpu.memory_space<smem>>
    %c33_i32 = arith.constant 33 : i32
    %303 = tpu.dynamic_rotate %76 by %c33_i32 dim 1 : vector<1x256xf32>, i32 -> vector<1x256xf32>
    %c33_i32_62 = arith.constant 33 : i32
    %304 = tpu.dynamic_rotate %80 by %c33_i32_62 dim 1 : vector<1x256xf32>, i32 -> vector<1x256xf32>
    %305 = vector.broadcast %301 : f32 to vector<1x256xf32>
    %306 = arith.mulf %305, %303 : vector<1x256xf32>
    %307 = vector.broadcast %302 : f32 to vector<1x256xf32>
    %308 = arith.mulf %307, %304 : vector<1x256xf32>
    %309 = arith.addf %306, %308 : vector<1x256xf32>
    %310 = arith.mulf %300, %309 : vector<1x256xf32>
    %311 = arith.addf %265, %310 : vector<1x256xf32>
    %c33_i32_63 = arith.constant 33 : i32
    %312 = tpu.dynamic_rotate %78 by %c33_i32_63 dim 1 : vector<1x256xf32>, i32 -> vector<1x256xf32>
    %c33_i32_64 = arith.constant 33 : i32
    %313 = tpu.dynamic_rotate %82 by %c33_i32_64 dim 1 : vector<1x256xf32>, i32 -> vector<1x256xf32>
    %314 = vector.broadcast %301 : f32 to vector<1x256xf32>
    %315 = arith.mulf %314, %312 : vector<1x256xf32>
    %316 = vector.broadcast %302 : f32 to vector<1x256xf32>
    %317 = arith.mulf %316, %313 : vector<1x256xf32>
    %318 = arith.addf %315, %317 : vector<1x256xf32>
    %319 = arith.mulf %300, %318 : vector<1x256xf32>
    %320 = arith.addf %274, %319 : vector<1x256xf32>
    %321 = vector.extract_strided_slice %74 {offsets = [3, 0, 0], sizes = [1, 1, 256], strides = [1, 1, 1]} : vector<7x1x256xf32> to vector<1x1x256xf32>
    %322 = vector.shape_cast %321 : vector<1x1x256xf32> to vector<1x256xf32>
    %323 = arith.mulf %251, %322 : vector<1x256xf32>
    %c10 = arith.constant 10 : index
    %324 = memref.load %arg6[%c10] : memref<98xf32, #tpu.memory_space<smem>>
    %c59 = arith.constant 59 : index
    %325 = memref.load %arg6[%c59] : memref<98xf32, #tpu.memory_space<smem>>
    %c32_i32 = arith.constant 32 : i32
    %326 = tpu.dynamic_rotate %76 by %c32_i32 dim 1 : vector<1x256xf32>, i32 -> vector<1x256xf32>
    %c32_i32_65 = arith.constant 32 : i32
    %327 = tpu.dynamic_rotate %80 by %c32_i32_65 dim 1 : vector<1x256xf32>, i32 -> vector<1x256xf32>
    %328 = vector.broadcast %324 : f32 to vector<1x256xf32>
    %329 = arith.mulf %328, %326 : vector<1x256xf32>
    %330 = vector.broadcast %325 : f32 to vector<1x256xf32>
    %331 = arith.mulf %330, %327 : vector<1x256xf32>
    %332 = arith.addf %329, %331 : vector<1x256xf32>
    %333 = arith.mulf %323, %332 : vector<1x256xf32>
    %334 = arith.addf %288, %333 : vector<1x256xf32>
    %c32_i32_66 = arith.constant 32 : i32
    %335 = tpu.dynamic_rotate %78 by %c32_i32_66 dim 1 : vector<1x256xf32>, i32 -> vector<1x256xf32>
    %c32_i32_67 = arith.constant 32 : i32
    %336 = tpu.dynamic_rotate %82 by %c32_i32_67 dim 1 : vector<1x256xf32>, i32 -> vector<1x256xf32>
    %337 = vector.broadcast %324 : f32 to vector<1x256xf32>
    %338 = arith.mulf %337, %335 : vector<1x256xf32>
    %339 = vector.broadcast %325 : f32 to vector<1x256xf32>
    %340 = arith.mulf %339, %336 : vector<1x256xf32>
    %341 = arith.addf %338, %340 : vector<1x256xf32>
    %342 = arith.mulf %323, %341 : vector<1x256xf32>
    %343 = arith.addf %297, %342 : vector<1x256xf32>
    %344 = vector.extract_strided_slice %74 {offsets = [4, 0, 0], sizes = [1, 1, 256], strides = [1, 1, 1]} : vector<7x1x256xf32> to vector<1x1x256xf32>
    %345 = vector.shape_cast %344 : vector<1x1x256xf32> to vector<1x256xf32>
    %346 = arith.mulf %251, %345 : vector<1x256xf32>
    %c11 = arith.constant 11 : index
    %347 = memref.load %arg6[%c11] : memref<98xf32, #tpu.memory_space<smem>>
    %c60 = arith.constant 60 : index
    %348 = memref.load %arg6[%c60] : memref<98xf32, #tpu.memory_space<smem>>
    %c31_i32 = arith.constant 31 : i32
    %349 = tpu.dynamic_rotate %76 by %c31_i32 dim 1 : vector<1x256xf32>, i32 -> vector<1x256xf32>
    %c31_i32_68 = arith.constant 31 : i32
    %350 = tpu.dynamic_rotate %80 by %c31_i32_68 dim 1 : vector<1x256xf32>, i32 -> vector<1x256xf32>
    %351 = vector.broadcast %347 : f32 to vector<1x256xf32>
    %352 = arith.mulf %351, %349 : vector<1x256xf32>
    %353 = vector.broadcast %348 : f32 to vector<1x256xf32>
    %354 = arith.mulf %353, %350 : vector<1x256xf32>
    %355 = arith.addf %352, %354 : vector<1x256xf32>
    %356 = arith.mulf %346, %355 : vector<1x256xf32>
    %357 = arith.addf %311, %356 : vector<1x256xf32>
    %c31_i32_69 = arith.constant 31 : i32
    %358 = tpu.dynamic_rotate %78 by %c31_i32_69 dim 1 : vector<1x256xf32>, i32 -> vector<1x256xf32>
    %c31_i32_70 = arith.constant 31 : i32
    %359 = tpu.dynamic_rotate %82 by %c31_i32_70 dim 1 : vector<1x256xf32>, i32 -> vector<1x256xf32>
    %360 = vector.broadcast %347 : f32 to vector<1x256xf32>
    %361 = arith.mulf %360, %358 : vector<1x256xf32>
    %362 = vector.broadcast %348 : f32 to vector<1x256xf32>
    %363 = arith.mulf %362, %359 : vector<1x256xf32>
    %364 = arith.addf %361, %363 : vector<1x256xf32>
    %365 = arith.mulf %346, %364 : vector<1x256xf32>
    %366 = arith.addf %320, %365 : vector<1x256xf32>
    %367 = vector.extract_strided_slice %74 {offsets = [5, 0, 0], sizes = [1, 1, 256], strides = [1, 1, 1]} : vector<7x1x256xf32> to vector<1x1x256xf32>
    %368 = vector.shape_cast %367 : vector<1x1x256xf32> to vector<1x256xf32>
    %369 = arith.mulf %251, %368 : vector<1x256xf32>
    %c12 = arith.constant 12 : index
    %370 = memref.load %arg6[%c12] : memref<98xf32, #tpu.memory_space<smem>>
    %c61 = arith.constant 61 : index
    %371 = memref.load %arg6[%c61] : memref<98xf32, #tpu.memory_space<smem>>
    %c30_i32 = arith.constant 30 : i32
    %372 = tpu.dynamic_rotate %76 by %c30_i32 dim 1 : vector<1x256xf32>, i32 -> vector<1x256xf32>
    %c30_i32_71 = arith.constant 30 : i32
    %373 = tpu.dynamic_rotate %80 by %c30_i32_71 dim 1 : vector<1x256xf32>, i32 -> vector<1x256xf32>
    %374 = vector.broadcast %370 : f32 to vector<1x256xf32>
    %375 = arith.mulf %374, %372 : vector<1x256xf32>
    %376 = vector.broadcast %371 : f32 to vector<1x256xf32>
    %377 = arith.mulf %376, %373 : vector<1x256xf32>
    %378 = arith.addf %375, %377 : vector<1x256xf32>
    %379 = arith.mulf %369, %378 : vector<1x256xf32>
    %380 = arith.addf %334, %379 : vector<1x256xf32>
    %c30_i32_72 = arith.constant 30 : i32
    %381 = tpu.dynamic_rotate %78 by %c30_i32_72 dim 1 : vector<1x256xf32>, i32 -> vector<1x256xf32>
    %c30_i32_73 = arith.constant 30 : i32
    %382 = tpu.dynamic_rotate %82 by %c30_i32_73 dim 1 : vector<1x256xf32>, i32 -> vector<1x256xf32>
    %383 = vector.broadcast %370 : f32 to vector<1x256xf32>
    %384 = arith.mulf %383, %381 : vector<1x256xf32>
    %385 = vector.broadcast %371 : f32 to vector<1x256xf32>
    %386 = arith.mulf %385, %382 : vector<1x256xf32>
    %387 = arith.addf %384, %386 : vector<1x256xf32>
    %388 = arith.mulf %369, %387 : vector<1x256xf32>
    %389 = arith.addf %343, %388 : vector<1x256xf32>
    %390 = vector.extract_strided_slice %74 {offsets = [6, 0, 0], sizes = [1, 1, 256], strides = [1, 1, 1]} : vector<7x1x256xf32> to vector<1x1x256xf32>
    %391 = vector.shape_cast %390 : vector<1x1x256xf32> to vector<1x256xf32>
    %392 = arith.mulf %251, %391 : vector<1x256xf32>
    %c13 = arith.constant 13 : index
    %393 = memref.load %arg6[%c13] : memref<98xf32, #tpu.memory_space<smem>>
    %c62 = arith.constant 62 : index
    %394 = memref.load %arg6[%c62] : memref<98xf32, #tpu.memory_space<smem>>
    %c29_i32 = arith.constant 29 : i32
    %395 = tpu.dynamic_rotate %76 by %c29_i32 dim 1 : vector<1x256xf32>, i32 -> vector<1x256xf32>
    %c29_i32_74 = arith.constant 29 : i32
    %396 = tpu.dynamic_rotate %80 by %c29_i32_74 dim 1 : vector<1x256xf32>, i32 -> vector<1x256xf32>
    %397 = vector.broadcast %393 : f32 to vector<1x256xf32>
    %398 = arith.mulf %397, %395 : vector<1x256xf32>
    %399 = vector.broadcast %394 : f32 to vector<1x256xf32>
    %400 = arith.mulf %399, %396 : vector<1x256xf32>
    %401 = arith.addf %398, %400 : vector<1x256xf32>
    %402 = arith.mulf %392, %401 : vector<1x256xf32>
    %403 = arith.addf %357, %402 : vector<1x256xf32>
    %c29_i32_75 = arith.constant 29 : i32
    %404 = tpu.dynamic_rotate %78 by %c29_i32_75 dim 1 : vector<1x256xf32>, i32 -> vector<1x256xf32>
    %c29_i32_76 = arith.constant 29 : i32
    %405 = tpu.dynamic_rotate %82 by %c29_i32_76 dim 1 : vector<1x256xf32>, i32 -> vector<1x256xf32>
    %406 = vector.broadcast %393 : f32 to vector<1x256xf32>
    %407 = arith.mulf %406, %404 : vector<1x256xf32>
    %408 = vector.broadcast %394 : f32 to vector<1x256xf32>
    %409 = arith.mulf %408, %405 : vector<1x256xf32>
    %410 = arith.addf %407, %409 : vector<1x256xf32>
    %411 = arith.mulf %392, %410 : vector<1x256xf32>
    %412 = arith.addf %366, %411 : vector<1x256xf32>
    %413 = vector.extract_strided_slice %73 {offsets = [2, 0, 0], sizes = [1, 1, 256], strides = [1, 1, 1]} : vector<7x1x256xf32> to vector<1x1x256xf32>
    %414 = vector.shape_cast %413 : vector<1x1x256xf32> to vector<1x256xf32>
    %415 = vector.extract_strided_slice %74 {offsets = [0, 0, 0], sizes = [1, 1, 256], strides = [1, 1, 1]} : vector<7x1x256xf32> to vector<1x1x256xf32>
    %416 = vector.shape_cast %415 : vector<1x1x256xf32> to vector<1x256xf32>
    %417 = arith.mulf %414, %416 : vector<1x256xf32>
    %c14 = arith.constant 14 : index
    %418 = memref.load %arg6[%c14] : memref<98xf32, #tpu.memory_space<smem>>
    %c63 = arith.constant 63 : index
    %419 = memref.load %arg6[%c63] : memref<98xf32, #tpu.memory_space<smem>>
    %c19_i32 = arith.constant 19 : i32
    %420 = tpu.dynamic_rotate %76 by %c19_i32 dim 1 : vector<1x256xf32>, i32 -> vector<1x256xf32>
    %c19_i32_77 = arith.constant 19 : i32
    %421 = tpu.dynamic_rotate %80 by %c19_i32_77 dim 1 : vector<1x256xf32>, i32 -> vector<1x256xf32>
    %422 = vector.broadcast %418 : f32 to vector<1x256xf32>
    %423 = arith.mulf %422, %420 : vector<1x256xf32>
    %424 = vector.broadcast %419 : f32 to vector<1x256xf32>
    %425 = arith.mulf %424, %421 : vector<1x256xf32>
    %426 = arith.addf %423, %425 : vector<1x256xf32>
    %427 = arith.mulf %417, %426 : vector<1x256xf32>
    %428 = arith.addf %380, %427 : vector<1x256xf32>
    %c19_i32_78 = arith.constant 19 : i32
    %429 = tpu.dynamic_rotate %78 by %c19_i32_78 dim 1 : vector<1x256xf32>, i32 -> vector<1x256xf32>
    %c19_i32_79 = arith.constant 19 : i32
    %430 = tpu.dynamic_rotate %82 by %c19_i32_79 dim 1 : vector<1x256xf32>, i32 -> vector<1x256xf32>
    %431 = vector.broadcast %418 : f32 to vector<1x256xf32>
    %432 = arith.mulf %431, %429 : vector<1x256xf32>
    %433 = vector.broadcast %419 : f32 to vector<1x256xf32>
    %434 = arith.mulf %433, %430 : vector<1x256xf32>
    %435 = arith.addf %432, %434 : vector<1x256xf32>
    %436 = arith.mulf %417, %435 : vector<1x256xf32>
    %437 = arith.addf %389, %436 : vector<1x256xf32>
    %438 = vector.extract_strided_slice %74 {offsets = [1, 0, 0], sizes = [1, 1, 256], strides = [1, 1, 1]} : vector<7x1x256xf32> to vector<1x1x256xf32>
    %439 = vector.shape_cast %438 : vector<1x1x256xf32> to vector<1x256xf32>
    %440 = arith.mulf %414, %439 : vector<1x256xf32>
    %c15 = arith.constant 15 : index
    %441 = memref.load %arg6[%c15] : memref<98xf32, #tpu.memory_space<smem>>
    %c64 = arith.constant 64 : index
    %442 = memref.load %arg6[%c64] : memref<98xf32, #tpu.memory_space<smem>>
    %c18_i32 = arith.constant 18 : i32
    %443 = tpu.dynamic_rotate %76 by %c18_i32 dim 1 : vector<1x256xf32>, i32 -> vector<1x256xf32>
    %c18_i32_80 = arith.constant 18 : i32
    %444 = tpu.dynamic_rotate %80 by %c18_i32_80 dim 1 : vector<1x256xf32>, i32 -> vector<1x256xf32>
    %445 = vector.broadcast %441 : f32 to vector<1x256xf32>
    %446 = arith.mulf %445, %443 : vector<1x256xf32>
    %447 = vector.broadcast %442 : f32 to vector<1x256xf32>
    %448 = arith.mulf %447, %444 : vector<1x256xf32>
    %449 = arith.addf %446, %448 : vector<1x256xf32>
    %450 = arith.mulf %440, %449 : vector<1x256xf32>
    %451 = arith.addf %403, %450 : vector<1x256xf32>
    %c18_i32_81 = arith.constant 18 : i32
    %452 = tpu.dynamic_rotate %78 by %c18_i32_81 dim 1 : vector<1x256xf32>, i32 -> vector<1x256xf32>
    %c18_i32_82 = arith.constant 18 : i32
    %453 = tpu.dynamic_rotate %82 by %c18_i32_82 dim 1 : vector<1x256xf32>, i32 -> vector<1x256xf32>
    %454 = vector.broadcast %441 : f32 to vector<1x256xf32>
    %455 = arith.mulf %454, %452 : vector<1x256xf32>
    %456 = vector.broadcast %442 : f32 to vector<1x256xf32>
    %457 = arith.mulf %456, %453 : vector<1x256xf32>
    %458 = arith.addf %455, %457 : vector<1x256xf32>
    %459 = arith.mulf %440, %458 : vector<1x256xf32>
    %460 = arith.addf %412, %459 : vector<1x256xf32>
    %461 = vector.extract_strided_slice %74 {offsets = [2, 0, 0], sizes = [1, 1, 256], strides = [1, 1, 1]} : vector<7x1x256xf32> to vector<1x1x256xf32>
    %462 = vector.shape_cast %461 : vector<1x1x256xf32> to vector<1x256xf32>
    %463 = arith.mulf %414, %462 : vector<1x256xf32>
    %c16 = arith.constant 16 : index
    %464 = memref.load %arg6[%c16] : memref<98xf32, #tpu.memory_space<smem>>
    %c65 = arith.constant 65 : index
    %465 = memref.load %arg6[%c65] : memref<98xf32, #tpu.memory_space<smem>>
    %c17_i32 = arith.constant 17 : i32
    %466 = tpu.dynamic_rotate %76 by %c17_i32 dim 1 : vector<1x256xf32>, i32 -> vector<1x256xf32>
    %c17_i32_83 = arith.constant 17 : i32
    %467 = tpu.dynamic_rotate %80 by %c17_i32_83 dim 1 : vector<1x256xf32>, i32 -> vector<1x256xf32>
    %468 = vector.broadcast %464 : f32 to vector<1x256xf32>
    %469 = arith.mulf %468, %466 : vector<1x256xf32>
    %470 = vector.broadcast %465 : f32 to vector<1x256xf32>
    %471 = arith.mulf %470, %467 : vector<1x256xf32>
    %472 = arith.addf %469, %471 : vector<1x256xf32>
    %473 = arith.mulf %463, %472 : vector<1x256xf32>
    %474 = arith.addf %428, %473 : vector<1x256xf32>
    %c17_i32_84 = arith.constant 17 : i32
    %475 = tpu.dynamic_rotate %78 by %c17_i32_84 dim 1 : vector<1x256xf32>, i32 -> vector<1x256xf32>
    %c17_i32_85 = arith.constant 17 : i32
    %476 = tpu.dynamic_rotate %82 by %c17_i32_85 dim 1 : vector<1x256xf32>, i32 -> vector<1x256xf32>
    %477 = vector.broadcast %464 : f32 to vector<1x256xf32>
    %478 = arith.mulf %477, %475 : vector<1x256xf32>
    %479 = vector.broadcast %465 : f32 to vector<1x256xf32>
    %480 = arith.mulf %479, %476 : vector<1x256xf32>
    %481 = arith.addf %478, %480 : vector<1x256xf32>
    %482 = arith.mulf %463, %481 : vector<1x256xf32>
    %483 = arith.addf %437, %482 : vector<1x256xf32>
    %484 = vector.extract_strided_slice %74 {offsets = [3, 0, 0], sizes = [1, 1, 256], strides = [1, 1, 1]} : vector<7x1x256xf32> to vector<1x1x256xf32>
    %485 = vector.shape_cast %484 : vector<1x1x256xf32> to vector<1x256xf32>
    %486 = arith.mulf %414, %485 : vector<1x256xf32>
    %c17 = arith.constant 17 : index
    %487 = memref.load %arg6[%c17] : memref<98xf32, #tpu.memory_space<smem>>
    %c66 = arith.constant 66 : index
    %488 = memref.load %arg6[%c66] : memref<98xf32, #tpu.memory_space<smem>>
    %c16_i32 = arith.constant 16 : i32
    %489 = tpu.dynamic_rotate %76 by %c16_i32 dim 1 : vector<1x256xf32>, i32 -> vector<1x256xf32>
    %c16_i32_86 = arith.constant 16 : i32
    %490 = tpu.dynamic_rotate %80 by %c16_i32_86 dim 1 : vector<1x256xf32>, i32 -> vector<1x256xf32>
    %491 = vector.broadcast %487 : f32 to vector<1x256xf32>
    %492 = arith.mulf %491, %489 : vector<1x256xf32>
    %493 = vector.broadcast %488 : f32 to vector<1x256xf32>
    %494 = arith.mulf %493, %490 : vector<1x256xf32>
    %495 = arith.addf %492, %494 : vector<1x256xf32>
    %496 = arith.mulf %486, %495 : vector<1x256xf32>
    %497 = arith.addf %451, %496 : vector<1x256xf32>
    %c16_i32_87 = arith.constant 16 : i32
    %498 = tpu.dynamic_rotate %78 by %c16_i32_87 dim 1 : vector<1x256xf32>, i32 -> vector<1x256xf32>
    %c16_i32_88 = arith.constant 16 : i32
    %499 = tpu.dynamic_rotate %82 by %c16_i32_88 dim 1 : vector<1x256xf32>, i32 -> vector<1x256xf32>
    %500 = vector.broadcast %487 : f32 to vector<1x256xf32>
    %501 = arith.mulf %500, %498 : vector<1x256xf32>
    %502 = vector.broadcast %488 : f32 to vector<1x256xf32>
    %503 = arith.mulf %502, %499 : vector<1x256xf32>
    %504 = arith.addf %501, %503 : vector<1x256xf32>
    %505 = arith.mulf %486, %504 : vector<1x256xf32>
    %506 = arith.addf %460, %505 : vector<1x256xf32>
    %507 = vector.extract_strided_slice %74 {offsets = [4, 0, 0], sizes = [1, 1, 256], strides = [1, 1, 1]} : vector<7x1x256xf32> to vector<1x1x256xf32>
    %508 = vector.shape_cast %507 : vector<1x1x256xf32> to vector<1x256xf32>
    %509 = arith.mulf %414, %508 : vector<1x256xf32>
    %c18 = arith.constant 18 : index
    %510 = memref.load %arg6[%c18] : memref<98xf32, #tpu.memory_space<smem>>
    %c67 = arith.constant 67 : index
    %511 = memref.load %arg6[%c67] : memref<98xf32, #tpu.memory_space<smem>>
    %c15_i32 = arith.constant 15 : i32
    %512 = tpu.dynamic_rotate %76 by %c15_i32 dim 1 : vector<1x256xf32>, i32 -> vector<1x256xf32>
    %c15_i32_89 = arith.constant 15 : i32
    %513 = tpu.dynamic_rotate %80 by %c15_i32_89 dim 1 : vector<1x256xf32>, i32 -> vector<1x256xf32>
    %514 = vector.broadcast %510 : f32 to vector<1x256xf32>
    %515 = arith.mulf %514, %512 : vector<1x256xf32>
    %516 = vector.broadcast %511 : f32 to vector<1x256xf32>
    %517 = arith.mulf %516, %513 : vector<1x256xf32>
    %518 = arith.addf %515, %517 : vector<1x256xf32>
    %519 = arith.mulf %509, %518 : vector<1x256xf32>
    %520 = arith.addf %474, %519 : vector<1x256xf32>
    %c15_i32_90 = arith.constant 15 : i32
    %521 = tpu.dynamic_rotate %78 by %c15_i32_90 dim 1 : vector<1x256xf32>, i32 -> vector<1x256xf32>
    %c15_i32_91 = arith.constant 15 : i32
    %522 = tpu.dynamic_rotate %82 by %c15_i32_91 dim 1 : vector<1x256xf32>, i32 -> vector<1x256xf32>
    %523 = vector.broadcast %510 : f32 to vector<1x256xf32>
    %524 = arith.mulf %523, %521 : vector<1x256xf32>
    %525 = vector.broadcast %511 : f32 to vector<1x256xf32>
    %526 = arith.mulf %525, %522 : vector<1x256xf32>
    %527 = arith.addf %524, %526 : vector<1x256xf32>
    %528 = arith.mulf %509, %527 : vector<1x256xf32>
    %529 = arith.addf %483, %528 : vector<1x256xf32>
    %530 = vector.extract_strided_slice %74 {offsets = [5, 0, 0], sizes = [1, 1, 256], strides = [1, 1, 1]} : vector<7x1x256xf32> to vector<1x1x256xf32>
    %531 = vector.shape_cast %530 : vector<1x1x256xf32> to vector<1x256xf32>
    %532 = arith.mulf %414, %531 : vector<1x256xf32>
    %c19 = arith.constant 19 : index
    %533 = memref.load %arg6[%c19] : memref<98xf32, #tpu.memory_space<smem>>
    %c68 = arith.constant 68 : index
    %534 = memref.load %arg6[%c68] : memref<98xf32, #tpu.memory_space<smem>>
    %c14_i32 = arith.constant 14 : i32
    %535 = tpu.dynamic_rotate %76 by %c14_i32 dim 1 : vector<1x256xf32>, i32 -> vector<1x256xf32>
    %c14_i32_92 = arith.constant 14 : i32
    %536 = tpu.dynamic_rotate %80 by %c14_i32_92 dim 1 : vector<1x256xf32>, i32 -> vector<1x256xf32>
    %537 = vector.broadcast %533 : f32 to vector<1x256xf32>
    %538 = arith.mulf %537, %535 : vector<1x256xf32>
    %539 = vector.broadcast %534 : f32 to vector<1x256xf32>
    %540 = arith.mulf %539, %536 : vector<1x256xf32>
    %541 = arith.addf %538, %540 : vector<1x256xf32>
    %542 = arith.mulf %532, %541 : vector<1x256xf32>
    %543 = arith.addf %497, %542 : vector<1x256xf32>
    %c14_i32_93 = arith.constant 14 : i32
    %544 = tpu.dynamic_rotate %78 by %c14_i32_93 dim 1 : vector<1x256xf32>, i32 -> vector<1x256xf32>
    %c14_i32_94 = arith.constant 14 : i32
    %545 = tpu.dynamic_rotate %82 by %c14_i32_94 dim 1 : vector<1x256xf32>, i32 -> vector<1x256xf32>
    %546 = vector.broadcast %533 : f32 to vector<1x256xf32>
    %547 = arith.mulf %546, %544 : vector<1x256xf32>
    %548 = vector.broadcast %534 : f32 to vector<1x256xf32>
    %549 = arith.mulf %548, %545 : vector<1x256xf32>
    %550 = arith.addf %547, %549 : vector<1x256xf32>
    %551 = arith.mulf %532, %550 : vector<1x256xf32>
    %552 = arith.addf %506, %551 : vector<1x256xf32>
    %553 = vector.extract_strided_slice %74 {offsets = [6, 0, 0], sizes = [1, 1, 256], strides = [1, 1, 1]} : vector<7x1x256xf32> to vector<1x1x256xf32>
    %554 = vector.shape_cast %553 : vector<1x1x256xf32> to vector<1x256xf32>
    %555 = arith.mulf %414, %554 : vector<1x256xf32>
    %c20 = arith.constant 20 : index
    %556 = memref.load %arg6[%c20] : memref<98xf32, #tpu.memory_space<smem>>
    %c69 = arith.constant 69 : index
    %557 = memref.load %arg6[%c69] : memref<98xf32, #tpu.memory_space<smem>>
    %c13_i32 = arith.constant 13 : i32
    %558 = tpu.dynamic_rotate %76 by %c13_i32 dim 1 : vector<1x256xf32>, i32 -> vector<1x256xf32>
    %c13_i32_95 = arith.constant 13 : i32
    %559 = tpu.dynamic_rotate %80 by %c13_i32_95 dim 1 : vector<1x256xf32>, i32 -> vector<1x256xf32>
    %560 = vector.broadcast %556 : f32 to vector<1x256xf32>
    %561 = arith.mulf %560, %558 : vector<1x256xf32>
    %562 = vector.broadcast %557 : f32 to vector<1x256xf32>
    %563 = arith.mulf %562, %559 : vector<1x256xf32>
    %564 = arith.addf %561, %563 : vector<1x256xf32>
    %565 = arith.mulf %555, %564 : vector<1x256xf32>
    %566 = arith.addf %520, %565 : vector<1x256xf32>
    %c13_i32_96 = arith.constant 13 : i32
    %567 = tpu.dynamic_rotate %78 by %c13_i32_96 dim 1 : vector<1x256xf32>, i32 -> vector<1x256xf32>
    %c13_i32_97 = arith.constant 13 : i32
    %568 = tpu.dynamic_rotate %82 by %c13_i32_97 dim 1 : vector<1x256xf32>, i32 -> vector<1x256xf32>
    %569 = vector.broadcast %556 : f32 to vector<1x256xf32>
    %570 = arith.mulf %569, %567 : vector<1x256xf32>
    %571 = vector.broadcast %557 : f32 to vector<1x256xf32>
    %572 = arith.mulf %571, %568 : vector<1x256xf32>
    %573 = arith.addf %570, %572 : vector<1x256xf32>
    %574 = arith.mulf %555, %573 : vector<1x256xf32>
    %575 = arith.addf %529, %574 : vector<1x256xf32>
    %576 = vector.extract_strided_slice %73 {offsets = [3, 0, 0], sizes = [1, 1, 256], strides = [1, 1, 1]} : vector<7x1x256xf32> to vector<1x1x256xf32>
    %577 = vector.shape_cast %576 : vector<1x1x256xf32> to vector<1x256xf32>
    %578 = vector.extract_strided_slice %74 {offsets = [0, 0, 0], sizes = [1, 1, 256], strides = [1, 1, 1]} : vector<7x1x256xf32> to vector<1x1x256xf32>
    %579 = vector.shape_cast %578 : vector<1x1x256xf32> to vector<1x256xf32>
    %580 = arith.mulf %577, %579 : vector<1x256xf32>
    %c21 = arith.constant 21 : index
    %581 = memref.load %arg6[%c21] : memref<98xf32, #tpu.memory_space<smem>>
    %c70 = arith.constant 70 : index
    %582 = memref.load %arg6[%c70] : memref<98xf32, #tpu.memory_space<smem>>
    %c3_i32 = arith.constant 3 : i32
    %583 = tpu.dynamic_rotate %76 by %c3_i32 dim 1 : vector<1x256xf32>, i32 -> vector<1x256xf32>
    %c3_i32_98 = arith.constant 3 : i32
    %584 = tpu.dynamic_rotate %80 by %c3_i32_98 dim 1 : vector<1x256xf32>, i32 -> vector<1x256xf32>
    %585 = vector.broadcast %581 : f32 to vector<1x256xf32>
    %586 = arith.mulf %585, %583 : vector<1x256xf32>
    %587 = vector.broadcast %582 : f32 to vector<1x256xf32>
    %588 = arith.mulf %587, %584 : vector<1x256xf32>
    %589 = arith.addf %586, %588 : vector<1x256xf32>
    %590 = arith.mulf %580, %589 : vector<1x256xf32>
    %591 = arith.addf %543, %590 : vector<1x256xf32>
    %c3_i32_99 = arith.constant 3 : i32
    %592 = tpu.dynamic_rotate %78 by %c3_i32_99 dim 1 : vector<1x256xf32>, i32 -> vector<1x256xf32>
    %c3_i32_100 = arith.constant 3 : i32
    %593 = tpu.dynamic_rotate %82 by %c3_i32_100 dim 1 : vector<1x256xf32>, i32 -> vector<1x256xf32>
    %594 = vector.broadcast %581 : f32 to vector<1x256xf32>
    %595 = arith.mulf %594, %592 : vector<1x256xf32>
    %596 = vector.broadcast %582 : f32 to vector<1x256xf32>
    %597 = arith.mulf %596, %593 : vector<1x256xf32>
    %598 = arith.addf %595, %597 : vector<1x256xf32>
    %599 = arith.mulf %580, %598 : vector<1x256xf32>
    %600 = arith.addf %552, %599 : vector<1x256xf32>
    %601 = vector.extract_strided_slice %74 {offsets = [1, 0, 0], sizes = [1, 1, 256], strides = [1, 1, 1]} : vector<7x1x256xf32> to vector<1x1x256xf32>
    %602 = vector.shape_cast %601 : vector<1x1x256xf32> to vector<1x256xf32>
    %603 = arith.mulf %577, %602 : vector<1x256xf32>
    %c22 = arith.constant 22 : index
    %604 = memref.load %arg6[%c22] : memref<98xf32, #tpu.memory_space<smem>>
    %c71 = arith.constant 71 : index
    %605 = memref.load %arg6[%c71] : memref<98xf32, #tpu.memory_space<smem>>
    %c2_i32 = arith.constant 2 : i32
    %606 = tpu.dynamic_rotate %76 by %c2_i32 dim 1 : vector<1x256xf32>, i32 -> vector<1x256xf32>
    %c2_i32_101 = arith.constant 2 : i32
    %607 = tpu.dynamic_rotate %80 by %c2_i32_101 dim 1 : vector<1x256xf32>, i32 -> vector<1x256xf32>
    %608 = vector.broadcast %604 : f32 to vector<1x256xf32>
    %609 = arith.mulf %608, %606 : vector<1x256xf32>
    %610 = vector.broadcast %605 : f32 to vector<1x256xf32>
    %611 = arith.mulf %610, %607 : vector<1x256xf32>
    %612 = arith.addf %609, %611 : vector<1x256xf32>
    %613 = arith.mulf %603, %612 : vector<1x256xf32>
    %614 = arith.addf %566, %613 : vector<1x256xf32>
    %c2_i32_102 = arith.constant 2 : i32
    %615 = tpu.dynamic_rotate %78 by %c2_i32_102 dim 1 : vector<1x256xf32>, i32 -> vector<1x256xf32>
    %c2_i32_103 = arith.constant 2 : i32
    %616 = tpu.dynamic_rotate %82 by %c2_i32_103 dim 1 : vector<1x256xf32>, i32 -> vector<1x256xf32>
    %617 = vector.broadcast %604 : f32 to vector<1x256xf32>
    %618 = arith.mulf %617, %615 : vector<1x256xf32>
    %619 = vector.broadcast %605 : f32 to vector<1x256xf32>
    %620 = arith.mulf %619, %616 : vector<1x256xf32>
    %621 = arith.addf %618, %620 : vector<1x256xf32>
    %622 = arith.mulf %603, %621 : vector<1x256xf32>
    %623 = arith.addf %575, %622 : vector<1x256xf32>
    %624 = vector.extract_strided_slice %74 {offsets = [2, 0, 0], sizes = [1, 1, 256], strides = [1, 1, 1]} : vector<7x1x256xf32> to vector<1x1x256xf32>
    %625 = vector.shape_cast %624 : vector<1x1x256xf32> to vector<1x256xf32>
    %626 = arith.mulf %577, %625 : vector<1x256xf32>
    %c23 = arith.constant 23 : index
    %627 = memref.load %arg6[%c23] : memref<98xf32, #tpu.memory_space<smem>>
    %c72 = arith.constant 72 : index
    %628 = memref.load %arg6[%c72] : memref<98xf32, #tpu.memory_space<smem>>
    %c1_i32 = arith.constant 1 : i32
    %629 = tpu.dynamic_rotate %76 by %c1_i32 dim 1 : vector<1x256xf32>, i32 -> vector<1x256xf32>
    %c1_i32_104 = arith.constant 1 : i32
    %630 = tpu.dynamic_rotate %80 by %c1_i32_104 dim 1 : vector<1x256xf32>, i32 -> vector<1x256xf32>
    %631 = vector.broadcast %627 : f32 to vector<1x256xf32>
    %632 = arith.mulf %631, %629 : vector<1x256xf32>
    %633 = vector.broadcast %628 : f32 to vector<1x256xf32>
    %634 = arith.mulf %633, %630 : vector<1x256xf32>
    %635 = arith.addf %632, %634 : vector<1x256xf32>
    %636 = arith.mulf %626, %635 : vector<1x256xf32>
    %637 = arith.addf %591, %636 : vector<1x256xf32>
    %c1_i32_105 = arith.constant 1 : i32
    %638 = tpu.dynamic_rotate %78 by %c1_i32_105 dim 1 : vector<1x256xf32>, i32 -> vector<1x256xf32>
    %c1_i32_106 = arith.constant 1 : i32
    %639 = tpu.dynamic_rotate %82 by %c1_i32_106 dim 1 : vector<1x256xf32>, i32 -> vector<1x256xf32>
    %640 = vector.broadcast %627 : f32 to vector<1x256xf32>
    %641 = arith.mulf %640, %638 : vector<1x256xf32>
    %642 = vector.broadcast %628 : f32 to vector<1x256xf32>
    %643 = arith.mulf %642, %639 : vector<1x256xf32>
    %644 = arith.addf %641, %643 : vector<1x256xf32>
    %645 = arith.mulf %626, %644 : vector<1x256xf32>
    %646 = arith.addf %600, %645 : vector<1x256xf32>
    %647 = vector.extract_strided_slice %74 {offsets = [3, 0, 0], sizes = [1, 1, 256], strides = [1, 1, 1]} : vector<7x1x256xf32> to vector<1x1x256xf32>
    %648 = vector.shape_cast %647 : vector<1x1x256xf32> to vector<1x256xf32>
    %649 = arith.mulf %577, %648 : vector<1x256xf32>
    %c24 = arith.constant 24 : index
    %650 = memref.load %arg6[%c24] : memref<98xf32, #tpu.memory_space<smem>>
    %c73 = arith.constant 73 : index
    %651 = memref.load %arg6[%c73] : memref<98xf32, #tpu.memory_space<smem>>
    %652 = vector.broadcast %650 : f32 to vector<1x256xf32>
    %653 = arith.mulf %652, %76 : vector<1x256xf32>
    %654 = vector.broadcast %651 : f32 to vector<1x256xf32>
    %655 = arith.mulf %654, %80 : vector<1x256xf32>
    %656 = arith.addf %653, %655 : vector<1x256xf32>
    %657 = arith.mulf %649, %656 : vector<1x256xf32>
    %658 = arith.addf %614, %657 : vector<1x256xf32>
    %659 = vector.broadcast %650 : f32 to vector<1x256xf32>
    %660 = arith.mulf %659, %78 : vector<1x256xf32>
    %661 = vector.broadcast %651 : f32 to vector<1x256xf32>
    %662 = arith.mulf %661, %82 : vector<1x256xf32>
    %663 = arith.addf %660, %662 : vector<1x256xf32>
    %664 = arith.mulf %649, %663 : vector<1x256xf32>
    %665 = arith.addf %623, %664 : vector<1x256xf32>
    %666 = vector.extract_strided_slice %74 {offsets = [4, 0, 0], sizes = [1, 1, 256], strides = [1, 1, 1]} : vector<7x1x256xf32> to vector<1x1x256xf32>
    %667 = vector.shape_cast %666 : vector<1x1x256xf32> to vector<1x256xf32>
    %668 = arith.mulf %577, %667 : vector<1x256xf32>
    %c25 = arith.constant 25 : index
    %669 = memref.load %arg6[%c25] : memref<98xf32, #tpu.memory_space<smem>>
    %c74 = arith.constant 74 : index
    %670 = memref.load %arg6[%c74] : memref<98xf32, #tpu.memory_space<smem>>
    %c255_i32 = arith.constant 255 : i32
    %671 = tpu.dynamic_rotate %76 by %c255_i32 dim 1 : vector<1x256xf32>, i32 -> vector<1x256xf32>
    %c255_i32_107 = arith.constant 255 : i32
    %672 = tpu.dynamic_rotate %80 by %c255_i32_107 dim 1 : vector<1x256xf32>, i32 -> vector<1x256xf32>
    %673 = vector.broadcast %669 : f32 to vector<1x256xf32>
    %674 = arith.mulf %673, %671 : vector<1x256xf32>
    %675 = vector.broadcast %670 : f32 to vector<1x256xf32>
    %676 = arith.mulf %675, %672 : vector<1x256xf32>
    %677 = arith.addf %674, %676 : vector<1x256xf32>
    %678 = arith.mulf %668, %677 : vector<1x256xf32>
    %679 = arith.addf %637, %678 : vector<1x256xf32>
    %c255_i32_108 = arith.constant 255 : i32
    %680 = tpu.dynamic_rotate %78 by %c255_i32_108 dim 1 : vector<1x256xf32>, i32 -> vector<1x256xf32>
    %c255_i32_109 = arith.constant 255 : i32
    %681 = tpu.dynamic_rotate %82 by %c255_i32_109 dim 1 : vector<1x256xf32>, i32 -> vector<1x256xf32>
    %682 = vector.broadcast %669 : f32 to vector<1x256xf32>
    %683 = arith.mulf %682, %680 : vector<1x256xf32>
    %684 = vector.broadcast %670 : f32 to vector<1x256xf32>
    %685 = arith.mulf %684, %681 : vector<1x256xf32>
    %686 = arith.addf %683, %685 : vector<1x256xf32>
    %687 = arith.mulf %668, %686 : vector<1x256xf32>
    %688 = arith.addf %646, %687 : vector<1x256xf32>
    %689 = vector.extract_strided_slice %74 {offsets = [5, 0, 0], sizes = [1, 1, 256], strides = [1, 1, 1]} : vector<7x1x256xf32> to vector<1x1x256xf32>
    %690 = vector.shape_cast %689 : vector<1x1x256xf32> to vector<1x256xf32>
    %691 = arith.mulf %577, %690 : vector<1x256xf32>
    %c26 = arith.constant 26 : index
    %692 = memref.load %arg6[%c26] : memref<98xf32, #tpu.memory_space<smem>>
    %c75 = arith.constant 75 : index
    %693 = memref.load %arg6[%c75] : memref<98xf32, #tpu.memory_space<smem>>
    %c254_i32 = arith.constant 254 : i32
    %694 = tpu.dynamic_rotate %76 by %c254_i32 dim 1 : vector<1x256xf32>, i32 -> vector<1x256xf32>
    %c254_i32_110 = arith.constant 254 : i32
    %695 = tpu.dynamic_rotate %80 by %c254_i32_110 dim 1 : vector<1x256xf32>, i32 -> vector<1x256xf32>
    %696 = vector.broadcast %692 : f32 to vector<1x256xf32>
    %697 = arith.mulf %696, %694 : vector<1x256xf32>
    %698 = vector.broadcast %693 : f32 to vector<1x256xf32>
    %699 = arith.mulf %698, %695 : vector<1x256xf32>
    %700 = arith.addf %697, %699 : vector<1x256xf32>
    %701 = arith.mulf %691, %700 : vector<1x256xf32>
    %702 = arith.addf %658, %701 : vector<1x256xf32>
    %c254_i32_111 = arith.constant 254 : i32
    %703 = tpu.dynamic_rotate %78 by %c254_i32_111 dim 1 : vector<1x256xf32>, i32 -> vector<1x256xf32>
    %c254_i32_112 = arith.constant 254 : i32
    %704 = tpu.dynamic_rotate %82 by %c254_i32_112 dim 1 : vector<1x256xf32>, i32 -> vector<1x256xf32>
    %705 = vector.broadcast %692 : f32 to vector<1x256xf32>
    %706 = arith.mulf %705, %703 : vector<1x256xf32>
    %707 = vector.broadcast %693 : f32 to vector<1x256xf32>
    %708 = arith.mulf %707, %704 : vector<1x256xf32>
    %709 = arith.addf %706, %708 : vector<1x256xf32>
    %710 = arith.mulf %691, %709 : vector<1x256xf32>
    %711 = arith.addf %665, %710 : vector<1x256xf32>
    %712 = vector.extract_strided_slice %74 {offsets = [6, 0, 0], sizes = [1, 1, 256], strides = [1, 1, 1]} : vector<7x1x256xf32> to vector<1x1x256xf32>
    %713 = vector.shape_cast %712 : vector<1x1x256xf32> to vector<1x256xf32>
    %714 = arith.mulf %577, %713 : vector<1x256xf32>
    %c27 = arith.constant 27 : index
    %715 = memref.load %arg6[%c27] : memref<98xf32, #tpu.memory_space<smem>>
    %c76 = arith.constant 76 : index
    %716 = memref.load %arg6[%c76] : memref<98xf32, #tpu.memory_space<smem>>
    %c253_i32 = arith.constant 253 : i32
    %717 = tpu.dynamic_rotate %76 by %c253_i32 dim 1 : vector<1x256xf32>, i32 -> vector<1x256xf32>
    %c253_i32_113 = arith.constant 253 : i32
    %718 = tpu.dynamic_rotate %80 by %c253_i32_113 dim 1 : vector<1x256xf32>, i32 -> vector<1x256xf32>
    %719 = vector.broadcast %715 : f32 to vector<1x256xf32>
    %720 = arith.mulf %719, %717 : vector<1x256xf32>
    %721 = vector.broadcast %716 : f32 to vector<1x256xf32>
    %722 = arith.mulf %721, %718 : vector<1x256xf32>
    %723 = arith.addf %720, %722 : vector<1x256xf32>
    %724 = arith.mulf %714, %723 : vector<1x256xf32>
    %725 = arith.addf %679, %724 : vector<1x256xf32>
    %c253_i32_114 = arith.constant 253 : i32
    %726 = tpu.dynamic_rotate %78 by %c253_i32_114 dim 1 : vector<1x256xf32>, i32 -> vector<1x256xf32>
    %c253_i32_115 = arith.constant 253 : i32
    %727 = tpu.dynamic_rotate %82 by %c253_i32_115 dim 1 : vector<1x256xf32>, i32 -> vector<1x256xf32>
    %728 = vector.broadcast %715 : f32 to vector<1x256xf32>
    %729 = arith.mulf %728, %726 : vector<1x256xf32>
    %730 = vector.broadcast %716 : f32 to vector<1x256xf32>
    %731 = arith.mulf %730, %727 : vector<1x256xf32>
    %732 = arith.addf %729, %731 : vector<1x256xf32>
    %733 = arith.mulf %714, %732 : vector<1x256xf32>
    %734 = arith.addf %688, %733 : vector<1x256xf32>
    %735 = vector.extract_strided_slice %73 {offsets = [4, 0, 0], sizes = [1, 1, 256], strides = [1, 1, 1]} : vector<7x1x256xf32> to vector<1x1x256xf32>
    %736 = vector.shape_cast %735 : vector<1x1x256xf32> to vector<1x256xf32>
    %737 = vector.extract_strided_slice %74 {offsets = [0, 0, 0], sizes = [1, 1, 256], strides = [1, 1, 1]} : vector<7x1x256xf32> to vector<1x1x256xf32>
    %738 = vector.shape_cast %737 : vector<1x1x256xf32> to vector<1x256xf32>
    %739 = arith.mulf %736, %738 : vector<1x256xf32>
    %c28 = arith.constant 28 : index
    %740 = memref.load %arg6[%c28] : memref<98xf32, #tpu.memory_space<smem>>
    %c77 = arith.constant 77 : index
    %741 = memref.load %arg6[%c77] : memref<98xf32, #tpu.memory_space<smem>>
    %c243_i32 = arith.constant 243 : i32
    %742 = tpu.dynamic_rotate %76 by %c243_i32 dim 1 : vector<1x256xf32>, i32 -> vector<1x256xf32>
    %c243_i32_116 = arith.constant 243 : i32
    %743 = tpu.dynamic_rotate %80 by %c243_i32_116 dim 1 : vector<1x256xf32>, i32 -> vector<1x256xf32>
    %744 = vector.broadcast %740 : f32 to vector<1x256xf32>
    %745 = arith.mulf %744, %742 : vector<1x256xf32>
    %746 = vector.broadcast %741 : f32 to vector<1x256xf32>
    %747 = arith.mulf %746, %743 : vector<1x256xf32>
    %748 = arith.addf %745, %747 : vector<1x256xf32>
    %749 = arith.mulf %739, %748 : vector<1x256xf32>
    %750 = arith.addf %702, %749 : vector<1x256xf32>
    %c243_i32_117 = arith.constant 243 : i32
    %751 = tpu.dynamic_rotate %78 by %c243_i32_117 dim 1 : vector<1x256xf32>, i32 -> vector<1x256xf32>
    %c243_i32_118 = arith.constant 243 : i32
    %752 = tpu.dynamic_rotate %82 by %c243_i32_118 dim 1 : vector<1x256xf32>, i32 -> vector<1x256xf32>
    %753 = vector.broadcast %740 : f32 to vector<1x256xf32>
    %754 = arith.mulf %753, %751 : vector<1x256xf32>
    %755 = vector.broadcast %741 : f32 to vector<1x256xf32>
    %756 = arith.mulf %755, %752 : vector<1x256xf32>
    %757 = arith.addf %754, %756 : vector<1x256xf32>
    %758 = arith.mulf %739, %757 : vector<1x256xf32>
    %759 = arith.addf %711, %758 : vector<1x256xf32>
    %760 = vector.extract_strided_slice %74 {offsets = [1, 0, 0], sizes = [1, 1, 256], strides = [1, 1, 1]} : vector<7x1x256xf32> to vector<1x1x256xf32>
    %761 = vector.shape_cast %760 : vector<1x1x256xf32> to vector<1x256xf32>
    %762 = arith.mulf %736, %761 : vector<1x256xf32>
    %c29 = arith.constant 29 : index
    %763 = memref.load %arg6[%c29] : memref<98xf32, #tpu.memory_space<smem>>
    %c78 = arith.constant 78 : index
    %764 = memref.load %arg6[%c78] : memref<98xf32, #tpu.memory_space<smem>>
    %c242_i32 = arith.constant 242 : i32
    %765 = tpu.dynamic_rotate %76 by %c242_i32 dim 1 : vector<1x256xf32>, i32 -> vector<1x256xf32>
    %c242_i32_119 = arith.constant 242 : i32
    %766 = tpu.dynamic_rotate %80 by %c242_i32_119 dim 1 : vector<1x256xf32>, i32 -> vector<1x256xf32>
    %767 = vector.broadcast %763 : f32 to vector<1x256xf32>
    %768 = arith.mulf %767, %765 : vector<1x256xf32>
    %769 = vector.broadcast %764 : f32 to vector<1x256xf32>
    %770 = arith.mulf %769, %766 : vector<1x256xf32>
    %771 = arith.addf %768, %770 : vector<1x256xf32>
    %772 = arith.mulf %762, %771 : vector<1x256xf32>
    %773 = arith.addf %725, %772 : vector<1x256xf32>
    %c242_i32_120 = arith.constant 242 : i32
    %774 = tpu.dynamic_rotate %78 by %c242_i32_120 dim 1 : vector<1x256xf32>, i32 -> vector<1x256xf32>
    %c242_i32_121 = arith.constant 242 : i32
    %775 = tpu.dynamic_rotate %82 by %c242_i32_121 dim 1 : vector<1x256xf32>, i32 -> vector<1x256xf32>
    %776 = vector.broadcast %763 : f32 to vector<1x256xf32>
    %777 = arith.mulf %776, %774 : vector<1x256xf32>
    %778 = vector.broadcast %764 : f32 to vector<1x256xf32>
    %779 = arith.mulf %778, %775 : vector<1x256xf32>
    %780 = arith.addf %777, %779 : vector<1x256xf32>
    %781 = arith.mulf %762, %780 : vector<1x256xf32>
    %782 = arith.addf %734, %781 : vector<1x256xf32>
    %783 = vector.extract_strided_slice %74 {offsets = [2, 0, 0], sizes = [1, 1, 256], strides = [1, 1, 1]} : vector<7x1x256xf32> to vector<1x1x256xf32>
    %784 = vector.shape_cast %783 : vector<1x1x256xf32> to vector<1x256xf32>
    %785 = arith.mulf %736, %784 : vector<1x256xf32>
    %c30 = arith.constant 30 : index
    %786 = memref.load %arg6[%c30] : memref<98xf32, #tpu.memory_space<smem>>
    %c79 = arith.constant 79 : index
    %787 = memref.load %arg6[%c79] : memref<98xf32, #tpu.memory_space<smem>>
    %c241_i32 = arith.constant 241 : i32
    %788 = tpu.dynamic_rotate %76 by %c241_i32 dim 1 : vector<1x256xf32>, i32 -> vector<1x256xf32>
    %c241_i32_122 = arith.constant 241 : i32
    %789 = tpu.dynamic_rotate %80 by %c241_i32_122 dim 1 : vector<1x256xf32>, i32 -> vector<1x256xf32>
    %790 = vector.broadcast %786 : f32 to vector<1x256xf32>
    %791 = arith.mulf %790, %788 : vector<1x256xf32>
    %792 = vector.broadcast %787 : f32 to vector<1x256xf32>
    %793 = arith.mulf %792, %789 : vector<1x256xf32>
    %794 = arith.addf %791, %793 : vector<1x256xf32>
    %795 = arith.mulf %785, %794 : vector<1x256xf32>
    %796 = arith.addf %750, %795 : vector<1x256xf32>
    %c241_i32_123 = arith.constant 241 : i32
    %797 = tpu.dynamic_rotate %78 by %c241_i32_123 dim 1 : vector<1x256xf32>, i32 -> vector<1x256xf32>
    %c241_i32_124 = arith.constant 241 : i32
    %798 = tpu.dynamic_rotate %82 by %c241_i32_124 dim 1 : vector<1x256xf32>, i32 -> vector<1x256xf32>
    %799 = vector.broadcast %786 : f32 to vector<1x256xf32>
    %800 = arith.mulf %799, %797 : vector<1x256xf32>
    %801 = vector.broadcast %787 : f32 to vector<1x256xf32>
    %802 = arith.mulf %801, %798 : vector<1x256xf32>
    %803 = arith.addf %800, %802 : vector<1x256xf32>
    %804 = arith.mulf %785, %803 : vector<1x256xf32>
    %805 = arith.addf %759, %804 : vector<1x256xf32>
    %806 = vector.extract_strided_slice %74 {offsets = [3, 0, 0], sizes = [1, 1, 256], strides = [1, 1, 1]} : vector<7x1x256xf32> to vector<1x1x256xf32>
    %807 = vector.shape_cast %806 : vector<1x1x256xf32> to vector<1x256xf32>
    %808 = arith.mulf %736, %807 : vector<1x256xf32>
    %c31 = arith.constant 31 : index
    %809 = memref.load %arg6[%c31] : memref<98xf32, #tpu.memory_space<smem>>
    %c80 = arith.constant 80 : index
    %810 = memref.load %arg6[%c80] : memref<98xf32, #tpu.memory_space<smem>>
    %c240_i32 = arith.constant 240 : i32
    %811 = tpu.dynamic_rotate %76 by %c240_i32 dim 1 : vector<1x256xf32>, i32 -> vector<1x256xf32>
    %c240_i32_125 = arith.constant 240 : i32
    %812 = tpu.dynamic_rotate %80 by %c240_i32_125 dim 1 : vector<1x256xf32>, i32 -> vector<1x256xf32>
    %813 = vector.broadcast %809 : f32 to vector<1x256xf32>
    %814 = arith.mulf %813, %811 : vector<1x256xf32>
    %815 = vector.broadcast %810 : f32 to vector<1x256xf32>
    %816 = arith.mulf %815, %812 : vector<1x256xf32>
    %817 = arith.addf %814, %816 : vector<1x256xf32>
    %818 = arith.mulf %808, %817 : vector<1x256xf32>
    %819 = arith.addf %773, %818 : vector<1x256xf32>
    %c240_i32_126 = arith.constant 240 : i32
    %820 = tpu.dynamic_rotate %78 by %c240_i32_126 dim 1 : vector<1x256xf32>, i32 -> vector<1x256xf32>
    %c240_i32_127 = arith.constant 240 : i32
    %821 = tpu.dynamic_rotate %82 by %c240_i32_127 dim 1 : vector<1x256xf32>, i32 -> vector<1x256xf32>
    %822 = vector.broadcast %809 : f32 to vector<1x256xf32>
    %823 = arith.mulf %822, %820 : vector<1x256xf32>
    %824 = vector.broadcast %810 : f32 to vector<1x256xf32>
    %825 = arith.mulf %824, %821 : vector<1x256xf32>
    %826 = arith.addf %823, %825 : vector<1x256xf32>
    %827 = arith.mulf %808, %826 : vector<1x256xf32>
    %828 = arith.addf %782, %827 : vector<1x256xf32>
    %829 = vector.extract_strided_slice %74 {offsets = [4, 0, 0], sizes = [1, 1, 256], strides = [1, 1, 1]} : vector<7x1x256xf32> to vector<1x1x256xf32>
    %830 = vector.shape_cast %829 : vector<1x1x256xf32> to vector<1x256xf32>
    %831 = arith.mulf %736, %830 : vector<1x256xf32>
    %c32 = arith.constant 32 : index
    %832 = memref.load %arg6[%c32] : memref<98xf32, #tpu.memory_space<smem>>
    %c81 = arith.constant 81 : index
    %833 = memref.load %arg6[%c81] : memref<98xf32, #tpu.memory_space<smem>>
    %c239_i32 = arith.constant 239 : i32
    %834 = tpu.dynamic_rotate %76 by %c239_i32 dim 1 : vector<1x256xf32>, i32 -> vector<1x256xf32>
    %c239_i32_128 = arith.constant 239 : i32
    %835 = tpu.dynamic_rotate %80 by %c239_i32_128 dim 1 : vector<1x256xf32>, i32 -> vector<1x256xf32>
    %836 = vector.broadcast %832 : f32 to vector<1x256xf32>
    %837 = arith.mulf %836, %834 : vector<1x256xf32>
    %838 = vector.broadcast %833 : f32 to vector<1x256xf32>
    %839 = arith.mulf %838, %835 : vector<1x256xf32>
    %840 = arith.addf %837, %839 : vector<1x256xf32>
    %841 = arith.mulf %831, %840 : vector<1x256xf32>
    %842 = arith.addf %796, %841 : vector<1x256xf32>
    %c239_i32_129 = arith.constant 239 : i32
    %843 = tpu.dynamic_rotate %78 by %c239_i32_129 dim 1 : vector<1x256xf32>, i32 -> vector<1x256xf32>
    %c239_i32_130 = arith.constant 239 : i32
    %844 = tpu.dynamic_rotate %82 by %c239_i32_130 dim 1 : vector<1x256xf32>, i32 -> vector<1x256xf32>
    %845 = vector.broadcast %832 : f32 to vector<1x256xf32>
    %846 = arith.mulf %845, %843 : vector<1x256xf32>
    %847 = vector.broadcast %833 : f32 to vector<1x256xf32>
    %848 = arith.mulf %847, %844 : vector<1x256xf32>
    %849 = arith.addf %846, %848 : vector<1x256xf32>
    %850 = arith.mulf %831, %849 : vector<1x256xf32>
    %851 = arith.addf %805, %850 : vector<1x256xf32>
    %852 = vector.extract_strided_slice %74 {offsets = [5, 0, 0], sizes = [1, 1, 256], strides = [1, 1, 1]} : vector<7x1x256xf32> to vector<1x1x256xf32>
    %853 = vector.shape_cast %852 : vector<1x1x256xf32> to vector<1x256xf32>
    %854 = arith.mulf %736, %853 : vector<1x256xf32>
    %c33 = arith.constant 33 : index
    %855 = memref.load %arg6[%c33] : memref<98xf32, #tpu.memory_space<smem>>
    %c82 = arith.constant 82 : index
    %856 = memref.load %arg6[%c82] : memref<98xf32, #tpu.memory_space<smem>>
    %c238_i32 = arith.constant 238 : i32
    %857 = tpu.dynamic_rotate %76 by %c238_i32 dim 1 : vector<1x256xf32>, i32 -> vector<1x256xf32>
    %c238_i32_131 = arith.constant 238 : i32
    %858 = tpu.dynamic_rotate %80 by %c238_i32_131 dim 1 : vector<1x256xf32>, i32 -> vector<1x256xf32>
    %859 = vector.broadcast %855 : f32 to vector<1x256xf32>
    %860 = arith.mulf %859, %857 : vector<1x256xf32>
    %861 = vector.broadcast %856 : f32 to vector<1x256xf32>
    %862 = arith.mulf %861, %858 : vector<1x256xf32>
    %863 = arith.addf %860, %862 : vector<1x256xf32>
    %864 = arith.mulf %854, %863 : vector<1x256xf32>
    %865 = arith.addf %819, %864 : vector<1x256xf32>
    %c238_i32_132 = arith.constant 238 : i32
    %866 = tpu.dynamic_rotate %78 by %c238_i32_132 dim 1 : vector<1x256xf32>, i32 -> vector<1x256xf32>
    %c238_i32_133 = arith.constant 238 : i32
    %867 = tpu.dynamic_rotate %82 by %c238_i32_133 dim 1 : vector<1x256xf32>, i32 -> vector<1x256xf32>
    %868 = vector.broadcast %855 : f32 to vector<1x256xf32>
    %869 = arith.mulf %868, %866 : vector<1x256xf32>
    %870 = vector.broadcast %856 : f32 to vector<1x256xf32>
    %871 = arith.mulf %870, %867 : vector<1x256xf32>
    %872 = arith.addf %869, %871 : vector<1x256xf32>
    %873 = arith.mulf %854, %872 : vector<1x256xf32>
    %874 = arith.addf %828, %873 : vector<1x256xf32>
    %875 = vector.extract_strided_slice %74 {offsets = [6, 0, 0], sizes = [1, 1, 256], strides = [1, 1, 1]} : vector<7x1x256xf32> to vector<1x1x256xf32>
    %876 = vector.shape_cast %875 : vector<1x1x256xf32> to vector<1x256xf32>
    %877 = arith.mulf %736, %876 : vector<1x256xf32>
    %c34 = arith.constant 34 : index
    %878 = memref.load %arg6[%c34] : memref<98xf32, #tpu.memory_space<smem>>
    %c83 = arith.constant 83 : index
    %879 = memref.load %arg6[%c83] : memref<98xf32, #tpu.memory_space<smem>>
    %c237_i32 = arith.constant 237 : i32
    %880 = tpu.dynamic_rotate %76 by %c237_i32 dim 1 : vector<1x256xf32>, i32 -> vector<1x256xf32>
    %c237_i32_134 = arith.constant 237 : i32
    %881 = tpu.dynamic_rotate %80 by %c237_i32_134 dim 1 : vector<1x256xf32>, i32 -> vector<1x256xf32>
    %882 = vector.broadcast %878 : f32 to vector<1x256xf32>
    %883 = arith.mulf %882, %880 : vector<1x256xf32>
    %884 = vector.broadcast %879 : f32 to vector<1x256xf32>
    %885 = arith.mulf %884, %881 : vector<1x256xf32>
    %886 = arith.addf %883, %885 : vector<1x256xf32>
    %887 = arith.mulf %877, %886 : vector<1x256xf32>
    %888 = arith.addf %842, %887 : vector<1x256xf32>
    %c237_i32_135 = arith.constant 237 : i32
    %889 = tpu.dynamic_rotate %78 by %c237_i32_135 dim 1 : vector<1x256xf32>, i32 -> vector<1x256xf32>
    %c237_i32_136 = arith.constant 237 : i32
    %890 = tpu.dynamic_rotate %82 by %c237_i32_136 dim 1 : vector<1x256xf32>, i32 -> vector<1x256xf32>
    %891 = vector.broadcast %878 : f32 to vector<1x256xf32>
    %892 = arith.mulf %891, %889 : vector<1x256xf32>
    %893 = vector.broadcast %879 : f32 to vector<1x256xf32>
    %894 = arith.mulf %893, %890 : vector<1x256xf32>
    %895 = arith.addf %892, %894 : vector<1x256xf32>
    %896 = arith.mulf %877, %895 : vector<1x256xf32>
    %897 = arith.addf %851, %896 : vector<1x256xf32>
    %898 = vector.extract_strided_slice %73 {offsets = [5, 0, 0], sizes = [1, 1, 256], strides = [1, 1, 1]} : vector<7x1x256xf32> to vector<1x1x256xf32>
    %899 = vector.shape_cast %898 : vector<1x1x256xf32> to vector<1x256xf32>
    %900 = vector.extract_strided_slice %74 {offsets = [0, 0, 0], sizes = [1, 1, 256], strides = [1, 1, 1]} : vector<7x1x256xf32> to vector<1x1x256xf32>
    %901 = vector.shape_cast %900 : vector<1x1x256xf32> to vector<1x256xf32>
    %902 = arith.mulf %899, %901 : vector<1x256xf32>
    %c35 = arith.constant 35 : index
    %903 = memref.load %arg6[%c35] : memref<98xf32, #tpu.memory_space<smem>>
    %c84 = arith.constant 84 : index
    %904 = memref.load %arg6[%c84] : memref<98xf32, #tpu.memory_space<smem>>
    %c227_i32 = arith.constant 227 : i32
    %905 = tpu.dynamic_rotate %76 by %c227_i32 dim 1 : vector<1x256xf32>, i32 -> vector<1x256xf32>
    %c227_i32_137 = arith.constant 227 : i32
    %906 = tpu.dynamic_rotate %80 by %c227_i32_137 dim 1 : vector<1x256xf32>, i32 -> vector<1x256xf32>
    %907 = vector.broadcast %903 : f32 to vector<1x256xf32>
    %908 = arith.mulf %907, %905 : vector<1x256xf32>
    %909 = vector.broadcast %904 : f32 to vector<1x256xf32>
    %910 = arith.mulf %909, %906 : vector<1x256xf32>
    %911 = arith.addf %908, %910 : vector<1x256xf32>
    %912 = arith.mulf %902, %911 : vector<1x256xf32>
    %913 = arith.addf %865, %912 : vector<1x256xf32>
    %c227_i32_138 = arith.constant 227 : i32
    %914 = tpu.dynamic_rotate %78 by %c227_i32_138 dim 1 : vector<1x256xf32>, i32 -> vector<1x256xf32>
    %c227_i32_139 = arith.constant 227 : i32
    %915 = tpu.dynamic_rotate %82 by %c227_i32_139 dim 1 : vector<1x256xf32>, i32 -> vector<1x256xf32>
    %916 = vector.broadcast %903 : f32 to vector<1x256xf32>
    %917 = arith.mulf %916, %914 : vector<1x256xf32>
    %918 = vector.broadcast %904 : f32 to vector<1x256xf32>
    %919 = arith.mulf %918, %915 : vector<1x256xf32>
    %920 = arith.addf %917, %919 : vector<1x256xf32>
    %921 = arith.mulf %902, %920 : vector<1x256xf32>
    %922 = arith.addf %874, %921 : vector<1x256xf32>
    %923 = vector.extract_strided_slice %74 {offsets = [1, 0, 0], sizes = [1, 1, 256], strides = [1, 1, 1]} : vector<7x1x256xf32> to vector<1x1x256xf32>
    %924 = vector.shape_cast %923 : vector<1x1x256xf32> to vector<1x256xf32>
    %925 = arith.mulf %899, %924 : vector<1x256xf32>
    %c36 = arith.constant 36 : index
    %926 = memref.load %arg6[%c36] : memref<98xf32, #tpu.memory_space<smem>>
    %c85 = arith.constant 85 : index
    %927 = memref.load %arg6[%c85] : memref<98xf32, #tpu.memory_space<smem>>
    %c226_i32 = arith.constant 226 : i32
    %928 = tpu.dynamic_rotate %76 by %c226_i32 dim 1 : vector<1x256xf32>, i32 -> vector<1x256xf32>
    %c226_i32_140 = arith.constant 226 : i32
    %929 = tpu.dynamic_rotate %80 by %c226_i32_140 dim 1 : vector<1x256xf32>, i32 -> vector<1x256xf32>
    %930 = vector.broadcast %926 : f32 to vector<1x256xf32>
    %931 = arith.mulf %930, %928 : vector<1x256xf32>
    %932 = vector.broadcast %927 : f32 to vector<1x256xf32>
    %933 = arith.mulf %932, %929 : vector<1x256xf32>
    %934 = arith.addf %931, %933 : vector<1x256xf32>
    %935 = arith.mulf %925, %934 : vector<1x256xf32>
    %936 = arith.addf %888, %935 : vector<1x256xf32>
    %c226_i32_141 = arith.constant 226 : i32
    %937 = tpu.dynamic_rotate %78 by %c226_i32_141 dim 1 : vector<1x256xf32>, i32 -> vector<1x256xf32>
    %c226_i32_142 = arith.constant 226 : i32
    %938 = tpu.dynamic_rotate %82 by %c226_i32_142 dim 1 : vector<1x256xf32>, i32 -> vector<1x256xf32>
    %939 = vector.broadcast %926 : f32 to vector<1x256xf32>
    %940 = arith.mulf %939, %937 : vector<1x256xf32>
    %941 = vector.broadcast %927 : f32 to vector<1x256xf32>
    %942 = arith.mulf %941, %938 : vector<1x256xf32>
    %943 = arith.addf %940, %942 : vector<1x256xf32>
    %944 = arith.mulf %925, %943 : vector<1x256xf32>
    %945 = arith.addf %897, %944 : vector<1x256xf32>
    %946 = vector.extract_strided_slice %74 {offsets = [2, 0, 0], sizes = [1, 1, 256], strides = [1, 1, 1]} : vector<7x1x256xf32> to vector<1x1x256xf32>
    %947 = vector.shape_cast %946 : vector<1x1x256xf32> to vector<1x256xf32>
    %948 = arith.mulf %899, %947 : vector<1x256xf32>
    %c37 = arith.constant 37 : index
    %949 = memref.load %arg6[%c37] : memref<98xf32, #tpu.memory_space<smem>>
    %c86 = arith.constant 86 : index
    %950 = memref.load %arg6[%c86] : memref<98xf32, #tpu.memory_space<smem>>
    %c225_i32 = arith.constant 225 : i32
    %951 = tpu.dynamic_rotate %76 by %c225_i32 dim 1 : vector<1x256xf32>, i32 -> vector<1x256xf32>
    %c225_i32_143 = arith.constant 225 : i32
    %952 = tpu.dynamic_rotate %80 by %c225_i32_143 dim 1 : vector<1x256xf32>, i32 -> vector<1x256xf32>
    %953 = vector.broadcast %949 : f32 to vector<1x256xf32>
    %954 = arith.mulf %953, %951 : vector<1x256xf32>
    %955 = vector.broadcast %950 : f32 to vector<1x256xf32>
    %956 = arith.mulf %955, %952 : vector<1x256xf32>
    %957 = arith.addf %954, %956 : vector<1x256xf32>
    %958 = arith.mulf %948, %957 : vector<1x256xf32>
    %959 = arith.addf %913, %958 : vector<1x256xf32>
    %c225_i32_144 = arith.constant 225 : i32
    %960 = tpu.dynamic_rotate %78 by %c225_i32_144 dim 1 : vector<1x256xf32>, i32 -> vector<1x256xf32>
    %c225_i32_145 = arith.constant 225 : i32
    %961 = tpu.dynamic_rotate %82 by %c225_i32_145 dim 1 : vector<1x256xf32>, i32 -> vector<1x256xf32>
    %962 = vector.broadcast %949 : f32 to vector<1x256xf32>
    %963 = arith.mulf %962, %960 : vector<1x256xf32>
    %964 = vector.broadcast %950 : f32 to vector<1x256xf32>
    %965 = arith.mulf %964, %961 : vector<1x256xf32>
    %966 = arith.addf %963, %965 : vector<1x256xf32>
    %967 = arith.mulf %948, %966 : vector<1x256xf32>
    %968 = arith.addf %922, %967 : vector<1x256xf32>
    %969 = vector.extract_strided_slice %74 {offsets = [3, 0, 0], sizes = [1, 1, 256], strides = [1, 1, 1]} : vector<7x1x256xf32> to vector<1x1x256xf32>
    %970 = vector.shape_cast %969 : vector<1x1x256xf32> to vector<1x256xf32>
    %971 = arith.mulf %899, %970 : vector<1x256xf32>
    %c38 = arith.constant 38 : index
    %972 = memref.load %arg6[%c38] : memref<98xf32, #tpu.memory_space<smem>>
    %c87 = arith.constant 87 : index
    %973 = memref.load %arg6[%c87] : memref<98xf32, #tpu.memory_space<smem>>
    %c224_i32 = arith.constant 224 : i32
    %974 = tpu.dynamic_rotate %76 by %c224_i32 dim 1 : vector<1x256xf32>, i32 -> vector<1x256xf32>
    %c224_i32_146 = arith.constant 224 : i32
    %975 = tpu.dynamic_rotate %80 by %c224_i32_146 dim 1 : vector<1x256xf32>, i32 -> vector<1x256xf32>
    %976 = vector.broadcast %972 : f32 to vector<1x256xf32>
    %977 = arith.mulf %976, %974 : vector<1x256xf32>
    %978 = vector.broadcast %973 : f32 to vector<1x256xf32>
    %979 = arith.mulf %978, %975 : vector<1x256xf32>
    %980 = arith.addf %977, %979 : vector<1x256xf32>
    %981 = arith.mulf %971, %980 : vector<1x256xf32>
    %982 = arith.addf %936, %981 : vector<1x256xf32>
    %c224_i32_147 = arith.constant 224 : i32
    %983 = tpu.dynamic_rotate %78 by %c224_i32_147 dim 1 : vector<1x256xf32>, i32 -> vector<1x256xf32>
    %c224_i32_148 = arith.constant 224 : i32
    %984 = tpu.dynamic_rotate %82 by %c224_i32_148 dim 1 : vector<1x256xf32>, i32 -> vector<1x256xf32>
    %985 = vector.broadcast %972 : f32 to vector<1x256xf32>
    %986 = arith.mulf %985, %983 : vector<1x256xf32>
    %987 = vector.broadcast %973 : f32 to vector<1x256xf32>
    %988 = arith.mulf %987, %984 : vector<1x256xf32>
    %989 = arith.addf %986, %988 : vector<1x256xf32>
    %990 = arith.mulf %971, %989 : vector<1x256xf32>
    %991 = arith.addf %945, %990 : vector<1x256xf32>
    %992 = vector.extract_strided_slice %74 {offsets = [4, 0, 0], sizes = [1, 1, 256], strides = [1, 1, 1]} : vector<7x1x256xf32> to vector<1x1x256xf32>
    %993 = vector.shape_cast %992 : vector<1x1x256xf32> to vector<1x256xf32>
    %994 = arith.mulf %899, %993 : vector<1x256xf32>
    %c39 = arith.constant 39 : index
    %995 = memref.load %arg6[%c39] : memref<98xf32, #tpu.memory_space<smem>>
    %c88 = arith.constant 88 : index
    %996 = memref.load %arg6[%c88] : memref<98xf32, #tpu.memory_space<smem>>
    %c223_i32 = arith.constant 223 : i32
    %997 = tpu.dynamic_rotate %76 by %c223_i32 dim 1 : vector<1x256xf32>, i32 -> vector<1x256xf32>
    %c223_i32_149 = arith.constant 223 : i32
    %998 = tpu.dynamic_rotate %80 by %c223_i32_149 dim 1 : vector<1x256xf32>, i32 -> vector<1x256xf32>
    %999 = vector.broadcast %995 : f32 to vector<1x256xf32>
    %1000 = arith.mulf %999, %997 : vector<1x256xf32>
    %1001 = vector.broadcast %996 : f32 to vector<1x256xf32>
    %1002 = arith.mulf %1001, %998 : vector<1x256xf32>
    %1003 = arith.addf %1000, %1002 : vector<1x256xf32>
    %1004 = arith.mulf %994, %1003 : vector<1x256xf32>
    %1005 = arith.addf %959, %1004 : vector<1x256xf32>
    %c223_i32_150 = arith.constant 223 : i32
    %1006 = tpu.dynamic_rotate %78 by %c223_i32_150 dim 1 : vector<1x256xf32>, i32 -> vector<1x256xf32>
    %c223_i32_151 = arith.constant 223 : i32
    %1007 = tpu.dynamic_rotate %82 by %c223_i32_151 dim 1 : vector<1x256xf32>, i32 -> vector<1x256xf32>
    %1008 = vector.broadcast %995 : f32 to vector<1x256xf32>
    %1009 = arith.mulf %1008, %1006 : vector<1x256xf32>
    %1010 = vector.broadcast %996 : f32 to vector<1x256xf32>
    %1011 = arith.mulf %1010, %1007 : vector<1x256xf32>
    %1012 = arith.addf %1009, %1011 : vector<1x256xf32>
    %1013 = arith.mulf %994, %1012 : vector<1x256xf32>
    %1014 = arith.addf %968, %1013 : vector<1x256xf32>
    %1015 = vector.extract_strided_slice %74 {offsets = [5, 0, 0], sizes = [1, 1, 256], strides = [1, 1, 1]} : vector<7x1x256xf32> to vector<1x1x256xf32>
    %1016 = vector.shape_cast %1015 : vector<1x1x256xf32> to vector<1x256xf32>
    %1017 = arith.mulf %899, %1016 : vector<1x256xf32>
    %c40 = arith.constant 40 : index
    %1018 = memref.load %arg6[%c40] : memref<98xf32, #tpu.memory_space<smem>>
    %c89 = arith.constant 89 : index
    %1019 = memref.load %arg6[%c89] : memref<98xf32, #tpu.memory_space<smem>>
    %c222_i32 = arith.constant 222 : i32
    %1020 = tpu.dynamic_rotate %76 by %c222_i32 dim 1 : vector<1x256xf32>, i32 -> vector<1x256xf32>
    %c222_i32_152 = arith.constant 222 : i32
    %1021 = tpu.dynamic_rotate %80 by %c222_i32_152 dim 1 : vector<1x256xf32>, i32 -> vector<1x256xf32>
    %1022 = vector.broadcast %1018 : f32 to vector<1x256xf32>
    %1023 = arith.mulf %1022, %1020 : vector<1x256xf32>
    %1024 = vector.broadcast %1019 : f32 to vector<1x256xf32>
    %1025 = arith.mulf %1024, %1021 : vector<1x256xf32>
    %1026 = arith.addf %1023, %1025 : vector<1x256xf32>
    %1027 = arith.mulf %1017, %1026 : vector<1x256xf32>
    %1028 = arith.addf %982, %1027 : vector<1x256xf32>
    %c222_i32_153 = arith.constant 222 : i32
    %1029 = tpu.dynamic_rotate %78 by %c222_i32_153 dim 1 : vector<1x256xf32>, i32 -> vector<1x256xf32>
    %c222_i32_154 = arith.constant 222 : i32
    %1030 = tpu.dynamic_rotate %82 by %c222_i32_154 dim 1 : vector<1x256xf32>, i32 -> vector<1x256xf32>
    %1031 = vector.broadcast %1018 : f32 to vector<1x256xf32>
    %1032 = arith.mulf %1031, %1029 : vector<1x256xf32>
    %1033 = vector.broadcast %1019 : f32 to vector<1x256xf32>
    %1034 = arith.mulf %1033, %1030 : vector<1x256xf32>
    %1035 = arith.addf %1032, %1034 : vector<1x256xf32>
    %1036 = arith.mulf %1017, %1035 : vector<1x256xf32>
    %1037 = arith.addf %991, %1036 : vector<1x256xf32>
    %1038 = vector.extract_strided_slice %74 {offsets = [6, 0, 0], sizes = [1, 1, 256], strides = [1, 1, 1]} : vector<7x1x256xf32> to vector<1x1x256xf32>
    %1039 = vector.shape_cast %1038 : vector<1x1x256xf32> to vector<1x256xf32>
    %1040 = arith.mulf %899, %1039 : vector<1x256xf32>
    %c41 = arith.constant 41 : index
    %1041 = memref.load %arg6[%c41] : memref<98xf32, #tpu.memory_space<smem>>
    %c90 = arith.constant 90 : index
    %1042 = memref.load %arg6[%c90] : memref<98xf32, #tpu.memory_space<smem>>
    %c221_i32 = arith.constant 221 : i32
    %1043 = tpu.dynamic_rotate %76 by %c221_i32 dim 1 : vector<1x256xf32>, i32 -> vector<1x256xf32>
    %c221_i32_155 = arith.constant 221 : i32
    %1044 = tpu.dynamic_rotate %80 by %c221_i32_155 dim 1 : vector<1x256xf32>, i32 -> vector<1x256xf32>
    %1045 = vector.broadcast %1041 : f32 to vector<1x256xf32>
    %1046 = arith.mulf %1045, %1043 : vector<1x256xf32>
    %1047 = vector.broadcast %1042 : f32 to vector<1x256xf32>
    %1048 = arith.mulf %1047, %1044 : vector<1x256xf32>
    %1049 = arith.addf %1046, %1048 : vector<1x256xf32>
    %1050 = arith.mulf %1040, %1049 : vector<1x256xf32>
    %1051 = arith.addf %1005, %1050 : vector<1x256xf32>
    %c221_i32_156 = arith.constant 221 : i32
    %1052 = tpu.dynamic_rotate %78 by %c221_i32_156 dim 1 : vector<1x256xf32>, i32 -> vector<1x256xf32>
    %c221_i32_157 = arith.constant 221 : i32
    %1053 = tpu.dynamic_rotate %82 by %c221_i32_157 dim 1 : vector<1x256xf32>, i32 -> vector<1x256xf32>
    %1054 = vector.broadcast %1041 : f32 to vector<1x256xf32>
    %1055 = arith.mulf %1054, %1052 : vector<1x256xf32>
    %1056 = vector.broadcast %1042 : f32 to vector<1x256xf32>
    %1057 = arith.mulf %1056, %1053 : vector<1x256xf32>
    %1058 = arith.addf %1055, %1057 : vector<1x256xf32>
    %1059 = arith.mulf %1040, %1058 : vector<1x256xf32>
    %1060 = arith.addf %1014, %1059 : vector<1x256xf32>
    %1061 = vector.extract_strided_slice %73 {offsets = [6, 0, 0], sizes = [1, 1, 256], strides = [1, 1, 1]} : vector<7x1x256xf32> to vector<1x1x256xf32>
    %1062 = vector.shape_cast %1061 : vector<1x1x256xf32> to vector<1x256xf32>
    %1063 = vector.extract_strided_slice %74 {offsets = [0, 0, 0], sizes = [1, 1, 256], strides = [1, 1, 1]} : vector<7x1x256xf32> to vector<1x1x256xf32>
    %1064 = vector.shape_cast %1063 : vector<1x1x256xf32> to vector<1x256xf32>
    %1065 = arith.mulf %1062, %1064 : vector<1x256xf32>
    %c42 = arith.constant 42 : index
    %1066 = memref.load %arg6[%c42] : memref<98xf32, #tpu.memory_space<smem>>
    %c91 = arith.constant 91 : index
    %1067 = memref.load %arg6[%c91] : memref<98xf32, #tpu.memory_space<smem>>
    %c211_i32 = arith.constant 211 : i32
    %1068 = tpu.dynamic_rotate %76 by %c211_i32 dim 1 : vector<1x256xf32>, i32 -> vector<1x256xf32>
    %c211_i32_158 = arith.constant 211 : i32
    %1069 = tpu.dynamic_rotate %80 by %c211_i32_158 dim 1 : vector<1x256xf32>, i32 -> vector<1x256xf32>
    %1070 = vector.broadcast %1066 : f32 to vector<1x256xf32>
    %1071 = arith.mulf %1070, %1068 : vector<1x256xf32>
    %1072 = vector.broadcast %1067 : f32 to vector<1x256xf32>
    %1073 = arith.mulf %1072, %1069 : vector<1x256xf32>
    %1074 = arith.addf %1071, %1073 : vector<1x256xf32>
    %1075 = arith.mulf %1065, %1074 : vector<1x256xf32>
    %1076 = arith.addf %1028, %1075 : vector<1x256xf32>
    %c211_i32_159 = arith.constant 211 : i32
    %1077 = tpu.dynamic_rotate %78 by %c211_i32_159 dim 1 : vector<1x256xf32>, i32 -> vector<1x256xf32>
    %c211_i32_160 = arith.constant 211 : i32
    %1078 = tpu.dynamic_rotate %82 by %c211_i32_160 dim 1 : vector<1x256xf32>, i32 -> vector<1x256xf32>
    %1079 = vector.broadcast %1066 : f32 to vector<1x256xf32>
    %1080 = arith.mulf %1079, %1077 : vector<1x256xf32>
    %1081 = vector.broadcast %1067 : f32 to vector<1x256xf32>
    %1082 = arith.mulf %1081, %1078 : vector<1x256xf32>
    %1083 = arith.addf %1080, %1082 : vector<1x256xf32>
    %1084 = arith.mulf %1065, %1083 : vector<1x256xf32>
    %1085 = arith.addf %1037, %1084 : vector<1x256xf32>
    %1086 = vector.extract_strided_slice %74 {offsets = [1, 0, 0], sizes = [1, 1, 256], strides = [1, 1, 1]} : vector<7x1x256xf32> to vector<1x1x256xf32>
    %1087 = vector.shape_cast %1086 : vector<1x1x256xf32> to vector<1x256xf32>
    %1088 = arith.mulf %1062, %1087 : vector<1x256xf32>
    %c43 = arith.constant 43 : index
    %1089 = memref.load %arg6[%c43] : memref<98xf32, #tpu.memory_space<smem>>
    %c92 = arith.constant 92 : index
    %1090 = memref.load %arg6[%c92] : memref<98xf32, #tpu.memory_space<smem>>
    %c210_i32 = arith.constant 210 : i32
    %1091 = tpu.dynamic_rotate %76 by %c210_i32 dim 1 : vector<1x256xf32>, i32 -> vector<1x256xf32>
    %c210_i32_161 = arith.constant 210 : i32
    %1092 = tpu.dynamic_rotate %80 by %c210_i32_161 dim 1 : vector<1x256xf32>, i32 -> vector<1x256xf32>
    %1093 = vector.broadcast %1089 : f32 to vector<1x256xf32>
    %1094 = arith.mulf %1093, %1091 : vector<1x256xf32>
    %1095 = vector.broadcast %1090 : f32 to vector<1x256xf32>
    %1096 = arith.mulf %1095, %1092 : vector<1x256xf32>
    %1097 = arith.addf %1094, %1096 : vector<1x256xf32>
    %1098 = arith.mulf %1088, %1097 : vector<1x256xf32>
    %1099 = arith.addf %1051, %1098 : vector<1x256xf32>
    %c210_i32_162 = arith.constant 210 : i32
    %1100 = tpu.dynamic_rotate %78 by %c210_i32_162 dim 1 : vector<1x256xf32>, i32 -> vector<1x256xf32>
    %c210_i32_163 = arith.constant 210 : i32
    %1101 = tpu.dynamic_rotate %82 by %c210_i32_163 dim 1 : vector<1x256xf32>, i32 -> vector<1x256xf32>
    %1102 = vector.broadcast %1089 : f32 to vector<1x256xf32>
    %1103 = arith.mulf %1102, %1100 : vector<1x256xf32>
    %1104 = vector.broadcast %1090 : f32 to vector<1x256xf32>
    %1105 = arith.mulf %1104, %1101 : vector<1x256xf32>
    %1106 = arith.addf %1103, %1105 : vector<1x256xf32>
    %1107 = arith.mulf %1088, %1106 : vector<1x256xf32>
    %1108 = arith.addf %1060, %1107 : vector<1x256xf32>
    %1109 = vector.extract_strided_slice %74 {offsets = [2, 0, 0], sizes = [1, 1, 256], strides = [1, 1, 1]} : vector<7x1x256xf32> to vector<1x1x256xf32>
    %1110 = vector.shape_cast %1109 : vector<1x1x256xf32> to vector<1x256xf32>
    %1111 = arith.mulf %1062, %1110 : vector<1x256xf32>
    %c44 = arith.constant 44 : index
    %1112 = memref.load %arg6[%c44] : memref<98xf32, #tpu.memory_space<smem>>
    %c93 = arith.constant 93 : index
    %1113 = memref.load %arg6[%c93] : memref<98xf32, #tpu.memory_space<smem>>
    %c209_i32 = arith.constant 209 : i32
    %1114 = tpu.dynamic_rotate %76 by %c209_i32 dim 1 : vector<1x256xf32>, i32 -> vector<1x256xf32>
    %c209_i32_164 = arith.constant 209 : i32
    %1115 = tpu.dynamic_rotate %80 by %c209_i32_164 dim 1 : vector<1x256xf32>, i32 -> vector<1x256xf32>
    %1116 = vector.broadcast %1112 : f32 to vector<1x256xf32>
    %1117 = arith.mulf %1116, %1114 : vector<1x256xf32>
    %1118 = vector.broadcast %1113 : f32 to vector<1x256xf32>
    %1119 = arith.mulf %1118, %1115 : vector<1x256xf32>
    %1120 = arith.addf %1117, %1119 : vector<1x256xf32>
    %1121 = arith.mulf %1111, %1120 : vector<1x256xf32>
    %1122 = arith.addf %1076, %1121 : vector<1x256xf32>
    %c209_i32_165 = arith.constant 209 : i32
    %1123 = tpu.dynamic_rotate %78 by %c209_i32_165 dim 1 : vector<1x256xf32>, i32 -> vector<1x256xf32>
    %c209_i32_166 = arith.constant 209 : i32
    %1124 = tpu.dynamic_rotate %82 by %c209_i32_166 dim 1 : vector<1x256xf32>, i32 -> vector<1x256xf32>
    %1125 = vector.broadcast %1112 : f32 to vector<1x256xf32>
    %1126 = arith.mulf %1125, %1123 : vector<1x256xf32>
    %1127 = vector.broadcast %1113 : f32 to vector<1x256xf32>
    %1128 = arith.mulf %1127, %1124 : vector<1x256xf32>
    %1129 = arith.addf %1126, %1128 : vector<1x256xf32>
    %1130 = arith.mulf %1111, %1129 : vector<1x256xf32>
    %1131 = arith.addf %1085, %1130 : vector<1x256xf32>
    %1132 = vector.extract_strided_slice %74 {offsets = [3, 0, 0], sizes = [1, 1, 256], strides = [1, 1, 1]} : vector<7x1x256xf32> to vector<1x1x256xf32>
    %1133 = vector.shape_cast %1132 : vector<1x1x256xf32> to vector<1x256xf32>
    %1134 = arith.mulf %1062, %1133 : vector<1x256xf32>
    %c45 = arith.constant 45 : index
    %1135 = memref.load %arg6[%c45] : memref<98xf32, #tpu.memory_space<smem>>
    %c94 = arith.constant 94 : index
    %1136 = memref.load %arg6[%c94] : memref<98xf32, #tpu.memory_space<smem>>
    %c208_i32 = arith.constant 208 : i32
    %1137 = tpu.dynamic_rotate %76 by %c208_i32 dim 1 : vector<1x256xf32>, i32 -> vector<1x256xf32>
    %c208_i32_167 = arith.constant 208 : i32
    %1138 = tpu.dynamic_rotate %80 by %c208_i32_167 dim 1 : vector<1x256xf32>, i32 -> vector<1x256xf32>
    %1139 = vector.broadcast %1135 : f32 to vector<1x256xf32>
    %1140 = arith.mulf %1139, %1137 : vector<1x256xf32>
    %1141 = vector.broadcast %1136 : f32 to vector<1x256xf32>
    %1142 = arith.mulf %1141, %1138 : vector<1x256xf32>
    %1143 = arith.addf %1140, %1142 : vector<1x256xf32>
    %1144 = arith.mulf %1134, %1143 : vector<1x256xf32>
    %1145 = arith.addf %1099, %1144 : vector<1x256xf32>
    %c208_i32_168 = arith.constant 208 : i32
    %1146 = tpu.dynamic_rotate %78 by %c208_i32_168 dim 1 : vector<1x256xf32>, i32 -> vector<1x256xf32>
    %c208_i32_169 = arith.constant 208 : i32
    %1147 = tpu.dynamic_rotate %82 by %c208_i32_169 dim 1 : vector<1x256xf32>, i32 -> vector<1x256xf32>
    %1148 = vector.broadcast %1135 : f32 to vector<1x256xf32>
    %1149 = arith.mulf %1148, %1146 : vector<1x256xf32>
    %1150 = vector.broadcast %1136 : f32 to vector<1x256xf32>
    %1151 = arith.mulf %1150, %1147 : vector<1x256xf32>
    %1152 = arith.addf %1149, %1151 : vector<1x256xf32>
    %1153 = arith.mulf %1134, %1152 : vector<1x256xf32>
    %1154 = arith.addf %1108, %1153 : vector<1x256xf32>
    %1155 = vector.extract_strided_slice %74 {offsets = [4, 0, 0], sizes = [1, 1, 256], strides = [1, 1, 1]} : vector<7x1x256xf32> to vector<1x1x256xf32>
    %1156 = vector.shape_cast %1155 : vector<1x1x256xf32> to vector<1x256xf32>
    %1157 = arith.mulf %1062, %1156 : vector<1x256xf32>
    %c46 = arith.constant 46 : index
    %1158 = memref.load %arg6[%c46] : memref<98xf32, #tpu.memory_space<smem>>
    %c95 = arith.constant 95 : index
    %1159 = memref.load %arg6[%c95] : memref<98xf32, #tpu.memory_space<smem>>
    %c207_i32 = arith.constant 207 : i32
    %1160 = tpu.dynamic_rotate %76 by %c207_i32 dim 1 : vector<1x256xf32>, i32 -> vector<1x256xf32>
    %c207_i32_170 = arith.constant 207 : i32
    %1161 = tpu.dynamic_rotate %80 by %c207_i32_170 dim 1 : vector<1x256xf32>, i32 -> vector<1x256xf32>
    %1162 = vector.broadcast %1158 : f32 to vector<1x256xf32>
    %1163 = arith.mulf %1162, %1160 : vector<1x256xf32>
    %1164 = vector.broadcast %1159 : f32 to vector<1x256xf32>
    %1165 = arith.mulf %1164, %1161 : vector<1x256xf32>
    %1166 = arith.addf %1163, %1165 : vector<1x256xf32>
    %1167 = arith.mulf %1157, %1166 : vector<1x256xf32>
    %1168 = arith.addf %1122, %1167 : vector<1x256xf32>
    %c207_i32_171 = arith.constant 207 : i32
    %1169 = tpu.dynamic_rotate %78 by %c207_i32_171 dim 1 : vector<1x256xf32>, i32 -> vector<1x256xf32>
    %c207_i32_172 = arith.constant 207 : i32
    %1170 = tpu.dynamic_rotate %82 by %c207_i32_172 dim 1 : vector<1x256xf32>, i32 -> vector<1x256xf32>
    %1171 = vector.broadcast %1158 : f32 to vector<1x256xf32>
    %1172 = arith.mulf %1171, %1169 : vector<1x256xf32>
    %1173 = vector.broadcast %1159 : f32 to vector<1x256xf32>
    %1174 = arith.mulf %1173, %1170 : vector<1x256xf32>
    %1175 = arith.addf %1172, %1174 : vector<1x256xf32>
    %1176 = arith.mulf %1157, %1175 : vector<1x256xf32>
    %1177 = arith.addf %1131, %1176 : vector<1x256xf32>
    %1178 = vector.extract_strided_slice %74 {offsets = [5, 0, 0], sizes = [1, 1, 256], strides = [1, 1, 1]} : vector<7x1x256xf32> to vector<1x1x256xf32>
    %1179 = vector.shape_cast %1178 : vector<1x1x256xf32> to vector<1x256xf32>
    %1180 = arith.mulf %1062, %1179 : vector<1x256xf32>
    %c47 = arith.constant 47 : index
    %1181 = memref.load %arg6[%c47] : memref<98xf32, #tpu.memory_space<smem>>
    %c96 = arith.constant 96 : index
    %1182 = memref.load %arg6[%c96] : memref<98xf32, #tpu.memory_space<smem>>
    %c206_i32 = arith.constant 206 : i32
    %1183 = tpu.dynamic_rotate %76 by %c206_i32 dim 1 : vector<1x256xf32>, i32 -> vector<1x256xf32>
    %c206_i32_173 = arith.constant 206 : i32
    %1184 = tpu.dynamic_rotate %80 by %c206_i32_173 dim 1 : vector<1x256xf32>, i32 -> vector<1x256xf32>
    %1185 = vector.broadcast %1181 : f32 to vector<1x256xf32>
    %1186 = arith.mulf %1185, %1183 : vector<1x256xf32>
    %1187 = vector.broadcast %1182 : f32 to vector<1x256xf32>
    %1188 = arith.mulf %1187, %1184 : vector<1x256xf32>
    %1189 = arith.addf %1186, %1188 : vector<1x256xf32>
    %1190 = arith.mulf %1180, %1189 : vector<1x256xf32>
    %1191 = arith.addf %1145, %1190 : vector<1x256xf32>
    %c206_i32_174 = arith.constant 206 : i32
    %1192 = tpu.dynamic_rotate %78 by %c206_i32_174 dim 1 : vector<1x256xf32>, i32 -> vector<1x256xf32>
    %c206_i32_175 = arith.constant 206 : i32
    %1193 = tpu.dynamic_rotate %82 by %c206_i32_175 dim 1 : vector<1x256xf32>, i32 -> vector<1x256xf32>
    %1194 = vector.broadcast %1181 : f32 to vector<1x256xf32>
    %1195 = arith.mulf %1194, %1192 : vector<1x256xf32>
    %1196 = vector.broadcast %1182 : f32 to vector<1x256xf32>
    %1197 = arith.mulf %1196, %1193 : vector<1x256xf32>
    %1198 = arith.addf %1195, %1197 : vector<1x256xf32>
    %1199 = arith.mulf %1180, %1198 : vector<1x256xf32>
    %1200 = arith.addf %1154, %1199 : vector<1x256xf32>
    %1201 = vector.extract_strided_slice %74 {offsets = [6, 0, 0], sizes = [1, 1, 256], strides = [1, 1, 1]} : vector<7x1x256xf32> to vector<1x1x256xf32>
    %1202 = vector.shape_cast %1201 : vector<1x1x256xf32> to vector<1x256xf32>
    %1203 = arith.mulf %1062, %1202 : vector<1x256xf32>
    %c48 = arith.constant 48 : index
    %1204 = memref.load %arg6[%c48] : memref<98xf32, #tpu.memory_space<smem>>
    %c97 = arith.constant 97 : index
    %1205 = memref.load %arg6[%c97] : memref<98xf32, #tpu.memory_space<smem>>
    %c205_i32 = arith.constant 205 : i32
    %1206 = tpu.dynamic_rotate %76 by %c205_i32 dim 1 : vector<1x256xf32>, i32 -> vector<1x256xf32>
    %c205_i32_176 = arith.constant 205 : i32
    %1207 = tpu.dynamic_rotate %80 by %c205_i32_176 dim 1 : vector<1x256xf32>, i32 -> vector<1x256xf32>
    %1208 = vector.broadcast %1204 : f32 to vector<1x256xf32>
    %1209 = arith.mulf %1208, %1206 : vector<1x256xf32>
    %1210 = vector.broadcast %1205 : f32 to vector<1x256xf32>
    %1211 = arith.mulf %1210, %1207 : vector<1x256xf32>
    %1212 = arith.addf %1209, %1211 : vector<1x256xf32>
    %1213 = arith.mulf %1203, %1212 : vector<1x256xf32>
    %1214 = arith.addf %1168, %1213 : vector<1x256xf32>
    %c205_i32_177 = arith.constant 205 : i32
    %1215 = tpu.dynamic_rotate %78 by %c205_i32_177 dim 1 : vector<1x256xf32>, i32 -> vector<1x256xf32>
    %c205_i32_178 = arith.constant 205 : i32
    %1216 = tpu.dynamic_rotate %82 by %c205_i32_178 dim 1 : vector<1x256xf32>, i32 -> vector<1x256xf32>
    %1217 = vector.broadcast %1204 : f32 to vector<1x256xf32>
    %1218 = arith.mulf %1217, %1215 : vector<1x256xf32>
    %1219 = vector.broadcast %1205 : f32 to vector<1x256xf32>
    %1220 = arith.mulf %1219, %1216 : vector<1x256xf32>
    %1221 = arith.addf %1218, %1220 : vector<1x256xf32>
    %1222 = arith.mulf %1203, %1221 : vector<1x256xf32>
    %1223 = arith.addf %1177, %1222 : vector<1x256xf32>
    %1224 = arith.addf %1214, %1191 : vector<1x256xf32>
    %1225 = arith.negf %1224 : vector<1x256xf32>
    %1226 = math.exp %1225 : vector<1x256xf32>
    %cst_179 = arith.constant 1.000000e+00 : f32
    %1227 = vector.broadcast %cst_179 : f32 to vector<1x256xf32>
    %1228 = arith.addf %1227, %1226 : vector<1x256xf32>
    %1229 = arith.divf %1227, %1228 : vector<1x256xf32>
    %1230 = vector.extract_strided_slice %66 {offsets = [0, 0, 0], sizes = [1, 32, 256], strides = [1, 1, 1]} : vector<2x32x256xf32> to vector<1x32x256xf32>
    %1231 = vector.shape_cast %1230 : vector<1x32x256xf32> to vector<32x256xf32>
    %1232 = vector.broadcast %1229 : vector<1x256xf32> to vector<32x256xf32>
    %1233 = arith.mulf %1231, %1232 : vector<32x256xf32>
    %c0_180 = arith.constant 0 : index
    %c0_181 = arith.constant 0 : index
    %c0_182 = arith.constant 0 : index
    %1234 = vector.load %arg7[%c0_180, %c0_181, %c0_182] : memref<2x32x256xf32, #tpu.memory_space<vmem>>, vector<1x32x256xf32>
    %1235 = vector.shape_cast %1234 : vector<1x32x256xf32> to vector<32x256xf32>
    %1236 = vector.shape_cast %1233 : vector<32x256xf32> to vector<1x32x256xf32>
    tpu.vector_store %arg7[%c0_180, %c0_181, %c0_182], %1236 {strides = array<i32>} : memref<2x32x256xf32, #tpu.memory_space<vmem>>, vector<1x32x256xf32>,
    %1237 = arith.addf %1223, %1200 : vector<1x256xf32>
    %1238 = arith.negf %1237 : vector<1x256xf32>
    %1239 = math.exp %1238 : vector<1x256xf32>
    %cst_183 = arith.constant 1.000000e+00 : f32
    %1240 = vector.broadcast %cst_183 : f32 to vector<1x256xf32>
    %1241 = arith.addf %1240, %1239 : vector<1x256xf32>
    %1242 = arith.divf %1240, %1241 : vector<1x256xf32>
    %1243 = vector.extract_strided_slice %66 {offsets = [1, 0, 0], sizes = [1, 32, 256], strides = [1, 1, 1]} : vector<2x32x256xf32> to vector<1x32x256xf32>
    %1244 = vector.shape_cast %1243 : vector<1x32x256xf32> to vector<32x256xf32>
    %1245 = vector.broadcast %1242 : vector<1x256xf32> to vector<32x256xf32>
    %1246 = arith.mulf %1244, %1245 : vector<32x256xf32>
    %c1_184 = arith.constant 1 : index
    %c0_185 = arith.constant 0 : index
    %c0_186 = arith.constant 0 : index
    %1247 = vector.load %arg7[%c1_184, %c0_185, %c0_186] : memref<2x32x256xf32, #tpu.memory_space<vmem>>, vector<1x32x256xf32>
    %1248 = vector.shape_cast %1247 : vector<1x32x256xf32> to vector<32x256xf32>
    %1249 = vector.shape_cast %1246 : vector<32x256xf32> to vector<1x32x256xf32>
    tpu.vector_store %arg7[%c1_184, %c0_185, %c0_186], %1249 {strides = array<i32>} : memref<2x32x256xf32, #tpu.memory_space<vmem>>, vector<1x32x256xf32>,
    return
  }
  func.func @transform_0(%arg0: i32) -> (i32, i32, i32) {
    %c0_i32 = arith.constant 0 : i32
    %c0_i32_0 = arith.constant 0 : i32
    %c0_i32_1 = arith.constant 0 : i32
    return %arg0, %c0_i32, %c0_i32_0 : i32, i32, i32
  }
  func.func @transform_1(%arg0: i32) -> (i32, i32, i32) {
    %c0_i32 = arith.constant 0 : i32
    %c0_i32_0 = arith.constant 0 : i32
    %c0_i32_1 = arith.constant 0 : i32
    %c0_i32_2 = arith.constant 0 : i32
    return %c0_i32, %c0_i32_0, %c0_i32_1 : i32, i32, i32
  }
  func.func @transform_2(%arg0: i32) -> (i32, i32, i32) {
    %c0_i32 = arith.constant 0 : i32
    %c0_i32_0 = arith.constant 0 : i32
    %c0_i32_1 = arith.constant 0 : i32
    %c0_i32_2 = arith.constant 0 : i32
    return %c0_i32, %c0_i32_0, %c0_i32_1 : i32, i32, i32
  }
  func.func @transform_3(%arg0: i32) -> (i32, i32, i32) {
    %c0_i32 = arith.constant 0 : i32
    %c0_i32_0 = arith.constant 0 : i32
    %c0_i32_1 = arith.constant 0 : i32
    %c0_i32_2 = arith.constant 0 : i32
    return %c0_i32, %c0_i32_0, %c0_i32_1 : i32, i32, i32
  }
  func.func @transform_4(%arg0: i32) -> (i32, i32, i32) {
    %c0_i32 = arith.constant 0 : i32
    %c0_i32_0 = arith.constant 0 : i32
    %c0_i32_1 = arith.constant 0 : i32
    %c0_i32_2 = arith.constant 0 : i32
    return %c0_i32, %c0_i32_0, %c0_i32_1 : i32, i32, i32
  }
  func.func @transform_5(%arg0: i32) -> i32 {
    %c0_i32 = arith.constant 0 : i32
    %c0_i32_0 = arith.constant 0 : i32
    return %c0_i32 : i32
  }
  func.func @transform_6(%arg0: i32) -> (i32, i32, i32) {
    %c0_i32 = arith.constant 0 : i32
    %c0_i32_0 = arith.constant 0 : i32
    %c0_i32_1 = arith.constant 0 : i32
    return %arg0, %c0_i32, %c0_i32_0 : i32, i32, i32
  }
}

</mosaic_0001>

<bundles_post_ra>
// kernel: tpu_custom_call.1
= control target key start
LH: loop header
LB: loop body
LE: loop exit
PB: predicated region body
PF: predicated region fallthrough
CT: control target
= control target key end

     0   :  { %11 = vsyncpa [#allocation3], 0  ;;  %s8103_s0 = inlined_call_operand.vmem [shape: f32[2,32,256], index: 0, kind: input, shape index: {}]   ;;  %s8104_s1 = inlined_call_operand.vmem [shape: f32[2,32,1], index: 1, kind: input, shape index: {}]   ;;  %s8105_s2 = inlined_call_operand.vmem [shape: f32[2,32,1], index: 2, kind: input, shape index: {}]   ;;  %s8106_s3 = inlined_call_operand.hbm [shape: f32[7,1,256], index: 3, kind: input, shape index: {}]   ;;  %s8107_s4 = inlined_call_operand.hbm [shape: f32[7,1,256], index: 4, kind: input, shape index: {}]   ;;  %s8108_s5 = inlined_call_operand.vmem [shape: f32[98], index: 5, kind: input, shape index: {}]   ;;  %s8109_s6 = inlined_call_operand.hbm [shape: f32[2,32,256], index: 6, kind: output, shape index: {}]  }
   0x1   :  { %12 = vsyncpa [#allocation7], 0 }
   0x2   :  { %13 = vsyncpa [#allocation5], 0 }
   0x3   :  { %14 = vsyncpa [#allocation4], 0  ;;  %s25_s23 = sshll.u32 %s8106_s3, 4  ;;  %s3821_s24 = smov [#allocation2]   ;;  %s26_s23 = int_to_ptr.hbm [resolvable:$true] %s25_s23 }
   0x4   :  { %s27_s25 = sshll.u32 %s3821_s24, 4  ;;  %s38_s28 = sshll.u32 %s8107_s4, 4  ;;  %s28_s25 = int_to_ptr.vmem [resolvable:$true] %s27_s25  ;;  %s39_s28 = int_to_ptr.hbm [resolvable:$true] %s38_s28 }
   0x5   :  { %s3822_s29 = smov 32   ;;  %s3823_s30 = smov 2  }
   0x6   :  { %33 = dma.hbm_to_vmem [thread:$0]  %s26_s23, 224, %s28_s25, [#allocation3], %s3822_s29, %s3822_s29, %s3823_s30  }
   0x7   :  { %s3824_s7 = smov [#allocation6]   ;;  %s52_s3 = sshll.u32 %s8108_s5, 4  ;;  %s53_s3 = int_to_ptr.vmem [resolvable:$true] %s52_s3 }
   0x8   :  { %s40_s8 = sshll.u32 %s3824_s7, 4  ;;  %s3825_s4 = smov [#allocation8]   ;;  %s41_s8 = int_to_ptr.vmem [resolvable:$true] %s40_s8 }
   0x9   :  { %46 = dma.hbm_to_vmem [thread:$0]  %s39_s28, 224, %s41_s8, [#allocation7], %s3822_s29, %s3822_s29, %s3823_s30  }
   0xa   :  { %55 = dma.vmem_to_smem %s53_s3, 16, %s3825_s4, [#allocation5]  }
   0xb   :  { %3813 = dma.done.wait [#allocation3], 224  }
   0xc   :  { %3814 = vsyncadd [#allocation3], 4294967072 }
   0xd   :  { %3815 = dma.done.wait [#allocation7], 224  }
   0xe   :  { %3816 = vsyncadd [#allocation7], 4294967072 }
   0xf   :  { %3817 = dma.done.wait [#allocation5], 16  }
  0x10   :  { %3818 = vsyncadd [#allocation5], 4294967280 }
  0x11   :  { %68 = sfence }
  0x12   :  { %v3929_v0 = vld [vmem:[%s8103_s0 + $0x40] sm:$0xff]  ;;  %v3934_v1 = vld [vmem:[%s8103_s0 + $0x48] sm:$0xff]  ;;  %v3965_v9 = vld [vmem:[%s8103_s0 + $0x50] sm:$0xff]  ;;  %vm165_vm0 = vcmask 7168   ;;  %s3828_s21 = smov 50   ;;  %s3829_s22 = smov 49  }
  0x13   :  { %v3939_v2 = vld [vmem:[%s8103_s0 + $0x20] sm:$0xff]  ;;  %v97_v3 = vadd.f32 %v3934_v1, %v3929_v0  ;;  %v3946_v4 = vld [vmem:[%s8103_s0 + $0x28] sm:$0xff]  ;;  %v3970_v10 = vld [vmem:[%s8103_s0 + $0x58] sm:$0xff]  ;;  %v129_v30 = vmax.f32 %v3929_v0, %v3934_v1  ;;  %s3830_s23 = smov 48   ;;  %s3831_s24 = smov 47  }
  0x14   :  { %v3951_v5 = vld [vmem:[%s8103_s0] sm:$0xff]  ;;  %v3956_v6 = vld [vmem:[%s8103_s0 + $0x8] sm:$0xff]  ;;  %v91_v7 = vadd.f32 %v3946_v4, %v3939_v2  ;;  %v3975_v11 = vld [vmem:[%s8103_s0 + $0x30] sm:$0xff]  ;;  %v100_v15 = vadd.f32 %v3970_v10, %v3965_v9  ;;  %v123_v26 = vmax.f32 %v3939_v2, %v3946_v4  ;;  %v132_v29 = vmax.f32 %v3965_v9, %v3970_v10  ;;  %s3832_s25 = smov 46   ;;  %s3833_s26 = smov 45  }
  0x15   :  { %v85_v8 = vadd.f32 %v3956_v6, %v3951_v5  ;;  %98 = vadd.xlane.f32.xlu2 %v97_v3  ;;  %v3980_v12 = vld [vmem:[%s8103_s0 + $0x38] sm:$0xff]  ;;  %v3985_v13 = vld [vmem:[%s8103_s0 + $0x10] sm:$0xff]  ;;  %v4011_v20 = vld [vmem:[%s8103_s0 + $0x60] sm:$0xff]  ;;  %v117_v22 = vmax.f32 %v3951_v5, %v3956_v6  ;;  %s3834_s27 = smov 35   ;;  %s3835_s28 = smov 34  }
  0x16   :  { %92 = vadd.xlane.f32.xlu1 %v91_v7  ;;  %v3990_v14 = vld [vmem:[%s8103_s0 + $0x18] sm:$0xff]  ;;  %v94_v16 = vadd.f32 %v3980_v12, %v3975_v11  ;;  %v4001_v18 = vld [vmem:[%s8103_s0 + $0x70] sm:$0xff]  ;;  %v4016_v21 = vld [vmem:[%s8103_s0 + $0x68] sm:$0xff]  ;;  %v126_v25 = vmax.f32 %v3975_v11, %v3980_v12  ;;  %s3837_s7 = smov 33   ;;  %s3838_s8 = smov 31  }
  0x17   :  { %86 = vadd.xlane.f32.xlu0 %v85_v8  ;;  %v88_v17 = vadd.f32 %v3990_v14, %v3985_v13  ;;  %v4006_v19 = vld [vmem:[%s8103_s0 + $0x78] sm:$0xff]  ;;  %v103_v24 = vadd.f32 %v4016_v21, %v4011_v20  ;;  %v120_v27 = vmax.f32 %v3985_v13, %v3990_v14  ;;  %v135_v28 = vmax.f32 %v4011_v20, %v4016_v21  ;;  %v4041_v36 = vld [vmem:[%s8104_s1] sm:$0xff]  ;;  %v4051_v40 = vld [vmem:[%s8104_s1 + $0x10] sm:$0xff]  ;;  %s3840_s9 = smov 29   ;;  %s3842_s10 = smov 18  }
  0x18   :  { %8349 = vst [vmem:[#allocation14_spill] sm:$0xff] %v4006_v19  ;;  %v106_v23 = vadd.f32 %v4006_v19, %v4001_v18  ;;  %v138_v31 = vmax.f32 %v4001_v18, %v4006_v19  ;;  %v4046_v37 = vld [vmem:[%s8104_s1 + $0x20] sm:$0xff]  ;;  %v4056_v42 = vld [vmem:[%s8104_s1 + $0x8] sm:$0xff]  ;;  %v4066_v46 = vld [vmem:[%s8104_s1 + $0x30] sm:$0xff]  ;;  %s3843_s3 = smov 17   ;;  %s3844_s4 = smov 16  }
  0x19   :  { %v4061_v43 = vld [vmem:[%s8104_s1 + $0x28] sm:$0xff]  ;;  %v4073_v49 = vld [vmem:[%s8104_s1 + $0x18] sm:$0xff]  ;;  %s3845_s11 = smov 15   ;;  %s3846_s12 = smov 14  }
  0x1a   :  { %v4078_v50 = vld [vmem:[%s8104_s1 + $0x38] sm:$0xff]  ;;  %s3841_s1 = smov 19   ;;  %s3847_s5 = smov 13  }
  0x1b   :  { %s3848_s13 = smov 3   ;;  %s3849_s14 = smov 1  }
  0x1c   :  { %s3851_s15 = smov 126   ;;  %s3560_s16 = sld [smem:[#allocation8 + $0x18]] }
  0x1d   :  { %101 = vadd.xlane.f32.xlu2 %v100_v15  ;;  %s3561_s0 = sld [smem:[#allocation8 + $0x49]]  ;;  %s3852_s17 = smov 125  }
  0x1e   :  { %95 = vadd.xlane.f32.xlu1 %v94_v16  ;;  %s3513_s18 = sld [smem:[#allocation8 + $0x31]] }
  0x1f   :  { %89 = vadd.xlane.f32.xlu0 %v88_v17  ;;  %s5019_s19 = sld [smem:[#allocation8 + $0x32]] }
  0x20   :  { %s5025_s20 = sld [smem:[#allocation8 + $0x33]] }
  0x25   :  { %118 = vmax.xlane.f32.xlu2 %v117_v22 }
  0x26   :  { %107 = vadd.xlane.f32.xlu1 %v106_v23 }
  0x27   :  { %104 = vadd.xlane.f32.xlu0 %v103_v24 }
  0x2d   :  { %127 = vmax.xlane.f32.xlu2 %v126_v25 }
  0x2e   :  { %124 = vmax.xlane.f32.xlu1 %v123_v26 }
  0x2f   :  { %121 = vmax.xlane.f32.xlu0 %v120_v27 }
  0x35   :  { %136 = vmax.xlane.f32.xlu2 %v135_v28 }
  0x36   :  { %133 = vmax.xlane.f32.xlu1 %v132_v29 }
  0x37   :  { %130 = vmax.xlane.f32.xlu0 %v129_v30 }
  0x3f   :  { %139 = vmax.xlane.f32.xlu0 %v138_v31 }
  0x88   :  { %v99_v32 = vpop.xlane.xlu2 %98 }
  0x89   :  { %v93_v33 = vpop.xlane.xlu1 %92  ;;  %v113_v39 = vmul.f32 0.00390625, %v99_v32 }
  0x8a   :  { %v87_v34 = vpop.xlane.xlu0 %86  ;;  %v111_v41 = vmul.f32 0.00390625, %v93_v33 }
  0x8b   :  { %v109_v35 = vmul.f32 0.00390625, %v87_v34  ;;  %v161_v60 = vmul.f32 %v4041_v36, %v113_v39  ;;  %v214_v15 = vmul.f32 %v4046_v37, %v113_v39 }
  0x8c   :  { %v159_v56 = vmul.f32 %v4051_v40, %v111_v41  ;;  %v212_v57 = vmul.f32 %v4066_v46, %v111_v41 }
  0x8d   :  { %v157_v47 = vmul.f32 %v4041_v36, %v109_v35  ;;  %v210_v48 = vmul.f32 %v4046_v37, %v109_v35  ;;  %v179_v33 = vsel %vm165_vm0, %v161_v60, 0.0 }
  0x8e   :  { %v169_v23 = vsel %vm165_vm0, %v159_v56, 0.0  ;;  %v221_v24 = vsel %vm165_vm0, %v212_v57, 0.0 }
  0x8f   :  { %v166_v61 = vsel %vm165_vm0, %v157_v47, 0.0  ;;  %v218_v62 = vsel %vm165_vm0, %v210_v48, 0.0 }
  0x90   :  { %v102_v38 = vpop.xlane.xlu2 %101 }
  0x91   :  { %v96_v44 = vpop.xlane.xlu1 %95  ;;  %v114_v53 = vmul.f32 0.00390625, %v102_v38 }
  0x92   :  { %v90_v45 = vpop.xlane.xlu0 %89  ;;  %v112_v51 = vmul.f32 0.00390625, %v96_v44 }
  0x93   :  { %v110_v52 = vmul.f32 0.00390625, %v90_v45  ;;  %v162_v63 = vmul.f32 %v4056_v42, %v114_v53  ;;  %v215_v3 = vmul.f32 %v4061_v43, %v114_v53  ;;  %v231_v45 = vsel %vm165_vm0, %v214_v15, 0.0 }
  0x94   :  { %v160_v58 = vmul.f32 %v4073_v49, %v112_v51  ;;  %v213_v59 = vmul.f32 %v4078_v50, %v112_v51 }
  0x95   :  { %v158_v54 = vmul.f32 %v4056_v42, %v110_v52  ;;  %v211_v55 = vmul.f32 %v4061_v43, %v110_v52  ;;  %v180_v34 = vsel %vm165_vm0, %v162_v63, 0.0  ;;  %v232_v35 = vsel %vm165_vm0, %v215_v3, 0.0 }
  0x96   :  { %v171_v25 = vsel %vm165_vm0, %v160_v58, 0.0  ;;  %v223_v26 = vsel %vm165_vm0, %v213_v59, 0.0  ;;  %v181_v52 = vadd.f32 %v180_v34, %v179_v33  ;;  %v233_v53 = vadd.f32 %v232_v35, %v231_v45 }
  0x97   :  { %v167_v7 = vsel %vm165_vm0, %v158_v54, 0.0  ;;  %v219_v8 = vsel %vm165_vm0, %v211_v55, 0.0 }
  0x98   :  { %v168_v16 = vadd.f32 %v167_v7, %v166_v61  ;;  %v220_v17 = vadd.f32 %v219_v8, %v218_v62  ;;  %v119_v22 = vpop.xlane.xlu2 %118 }
  0x99   :  { %v108_v27 = vpop.xlane.xlu1 %107  ;;  %v262_v51 = vmul.f32 %v4041_v36, %v119_v22  ;;  %v314_v8 = vmul.f32 %v4046_v37, %v119_v22 }
  0x9a   :  { %v105_v28 = vpop.xlane.xlu0 %104  ;;  %v170_v29 = vadd.f32 %v169_v23, %v168_v16  ;;  %v222_v30 = vadd.f32 %v221_v24, %v220_v17  ;;  %v116_v31 = vmul.f32 0.00390625, %v108_v27 }
  0x9b   :  { %v115_v32 = vmul.f32 0.00390625, %v105_v28  ;;  %v270_v7 = vsel %vm165_vm0, %v262_v51, 0.0  ;;  %v322_v35 = vsel %vm165_vm0, %v314_v8, 0.0 }
  0x9c   :  { %v172_v38 = vadd.f32 %v171_v25, %v170_v29  ;;  %v224_v39 = vadd.f32 %v223_v26, %v222_v30  ;;  %v164_v41 = vmul.f32 %v4073_v49, %v116_v31  ;;  %v217_v44 = vmul.f32 %v4078_v50, %v116_v31 }
  0x9d   :  { %v163_v47 = vmul.f32 %v4051_v40, %v115_v32  ;;  %v216_v48 = vmul.f32 %v4066_v46, %v115_v32 }
  0x9e   :  { %v173_v54 = vrot.slane %v172_v38, 4  ;;  %v225_v55 = vrot.slane %v224_v39, 4  ;;  %v184_v56 = vsel %vm165_vm0, %v164_v41, 0.0  ;;  %v236_v57 = vsel %vm165_vm0, %v217_v44, 0.0 }
  0x9f   :  { %v182_v58 = vsel %vm165_vm0, %v163_v47, 0.0  ;;  %v234_v59 = vsel %vm165_vm0, %v216_v48, 0.0 }
  0xa0   :  { %v174_v60 = vadd.f32 %v173_v54, %v172_v38  ;;  %v226_v61 = vadd.f32 %v225_v55, %v224_v39  ;;  %v183_v62 = vadd.f32 %v182_v58, %v181_v52  ;;  %v235_v63 = vadd.f32 %v234_v59, %v233_v53  ;;  %v128_v3 = vpop.xlane.xlu2 %127 }
  0xa1   :  { %v125_v15 = vpop.xlane.xlu1 %124  ;;  %v265_v17 = vmul.f32 %v4073_v49, %v128_v3  ;;  %v317_v23 = vmul.f32 %v4078_v50, %v128_v3 }
  0xa2   :  { %v122_v16 = vpop.xlane.xlu0 %121  ;;  %v175_v24 = vrot.slane %v174_v60, 2  ;;  %v227_v25 = vrot.slane %v226_v61, 2  ;;  %v185_v26 = vadd.f32 %v184_v56, %v183_v62  ;;  %v237_v27 = vadd.f32 %v236_v57, %v235_v63 }
  0xa3   :  { %v264_v28 = vmul.f32 %v4051_v40, %v125_v15  ;;  %v316_v29 = vmul.f32 %v4066_v46, %v125_v15  ;;  %v263_v30 = vmul.f32 %v4056_v42, %v122_v16  ;;  %v315_v31 = vmul.f32 %v4061_v43, %v122_v16 }
  0xa4   :  { %v176_v32 = vadd.f32 %v175_v24, %v174_v60  ;;  %v228_v22 = vadd.f32 %v227_v25, %v226_v61  ;;  %v186_v33 = vrot.slane %v185_v26, 4  ;;  %v238_v34 = vrot.slane %v237_v27, 4 }
  0xa5   :  { %v273_v38 = vsel %vm165_vm0, %v264_v28, 0.0  ;;  %v271_v39 = vsel %vm165_vm0, %v263_v30, 0.0  ;;  %v323_v41 = vsel %vm165_vm0, %v315_v31, 0.0  ;;  %v325_v48 = vsel %vm165_vm0, %v316_v29, 0.0 }
  0xa6   :  { %v177_v44 = vrot.slane %v176_v32, 1  ;;  %v187_v45 = vadd.f32 %v186_v33, %v185_v26  ;;  %v239_v47 = vadd.f32 %v238_v34, %v237_v27  ;;  %v272_v51 = vadd.f32 %v271_v39, %v270_v7 }
  0xa7   :  { %v324_v52 = vadd.f32 %v323_v41, %v322_v35  ;;  %v229_v53 = vrot.slane %v228_v22, 1  ;;  %v275_v54 = vsel %vm165_vm0, %v265_v17, 0.0  ;;  %v327_v55 = vsel %vm165_vm0, %v317_v23, 0.0  ;;  %v4145_v41 = vld [vmem:[%s8105_s2 + $0x30] sm:$0xff] }
  0xa8   :  { %v137_v56 = vpop.xlane.xlu2 %136  ;;  %v274_v57 = vadd.f32 %v273_v38, %v272_v51  ;;  %v178_v61 = vadd.f32 %v177_v44, %v176_v32  ;;  %v188_v62 = vrot.slane %v187_v45, 2  ;;  %v240_v63 = vrot.slane %v239_v47, 2 }
  0xa9   :  { %v326_v58 = vadd.f32 %v325_v48, %v324_v52  ;;  %v134_v59 = vpop.xlane.xlu1 %133  ;;  %v230_v16 = vadd.f32 %v229_v53, %v228_v22  ;;  %v268_v23 = vmul.f32 %v4051_v40, %v137_v56  ;;  %v320_v28 = vmul.f32 %v4066_v46, %v137_v56  ;;  %v4140_v46 = vld [vmem:[%s8105_s2 + $0x10] sm:$0xff] }
  0xaa   :  { %v131_v60 = vpop.xlane.xlu0 %130  ;;  %v276_v3 = vadd.f32 %v275_v54, %v274_v57  ;;  %v267_v15 = vmul.f32 %v4056_v42, %v134_v59  ;;  %v319_v7 = vmul.f32 %v4061_v43, %v134_v59  ;;  %v189_v29 = vadd.f32 %v188_v62, %v187_v45  ;;  %v4160_v59 = vld [vmem:[%s8105_s2 + $0x28] sm:$0xff] }
  0xab   :  { %v328_v8 = vadd.f32 %v327_v55, %v326_v58  ;;  %v266_v24 = vmul.f32 %v4041_v36, %v131_v60  ;;  %v318_v17 = vmul.f32 %v4046_v37, %v131_v60  ;;  %v241_v31 = vadd.f32 %v240_v63, %v239_v47  ;;  %v4153_v55 = vld [vmem:[%s8105_s2 + $0x8] sm:$0xff]  ;;  %v4167_v63 = vld [vmem:[%s8105_s2] sm:$0xff] }
  0xac   :  { %v277_v25 = vrot.slane %v276_v3, 4  ;;  %v284_v27 = vsel %vm165_vm0, %v267_v15, 0.0  ;;  %v336_v30 = vsel %vm165_vm0, %v319_v7, 0.0  ;;  %v192_v37 = vmax.f32 %v178_v61, 0.0 }
  0xad   :  { %v329_v26 = vrot.slane %v328_v8, 4  ;;  %v283_v42 = vsel %vm165_vm0, %v266_v24, 0.0  ;;  %v335_v43 = vsel %vm165_vm0, %v318_v17, 0.0  ;;  %v286_v40 = vsel %vm165_vm0, %v268_v23, 0.0  ;;  %v4182_v24 = vld [vmem:[%s8105_s2 + $0x38] sm:$0xff] }
  0xae   :  { %v278_v32 = vadd.f32 %v277_v25, %v276_v3  ;;  %v285_v22 = vadd.f32 %v284_v27, %v283_v42  ;;  %v244_v33 = vmax.f32 %v230_v16, 0.0  ;;  %v337_v38 = vadd.f32 %v336_v30, %v335_v43  ;;  %v4172_v3 = vld [vmem:[%s8105_s2 + $0x20] sm:$0xff]  ;;  %v4177_v16 = vld [vmem:[%s8105_s2 + $0x18] sm:$0xff]  ;;  %s3827_s2 = smov 51  }
  0xaf   :  { %v330_v36 = vadd.f32 %v329_v26, %v328_v8  ;;  %v338_v44 = vsel %vm165_vm0, %v320_v28, 0.0  ;;  %v190_v45 = vrot.slane %v189_v29, 1  ;;  %v242_v47 = vrot.slane %v241_v31, 1 }
  0xb0   :  { %v279_v34 = vrot.slane %v278_v32, 2  ;;  %v287_v48 = vadd.f32 %v286_v40, %v285_v22  ;;  %v339_v56 = vadd.f32 %v338_v44, %v337_v38  ;;  %v196_v57 = vmul.f32 %v192_v37, %v4140_v46 }
  0xb1   :  { %v331_v35 = vrot.slane %v330_v36, 2  ;;  %v248_v58 = vmul.f32 %v244_v33, %v4145_v41  ;;  %v3826_v62 = vmov 0   ;;  %v191_v8 = vadd.f32 %v190_v45, %v189_v29 }
  0xb2   :  { %v140_v39 = vpop.xlane.xlu0 %139  ;;  %v280_v51 = vadd.f32 %v279_v34, %v278_v32  ;;  %3669 = vset.pattern.permute.xlu0 %v3826_v62  ;;  %3668 = vset.pattern.permute.xlu2 %v3826_v62  ;;  %v243_v17 = vadd.f32 %v242_v47, %v241_v31  ;;  %v195_v26 = vmul.f32 %v192_v37, %v4153_v55 }
  0xb3   :  { %v332_v52 = vadd.f32 %v331_v35, %v330_v36  ;;  %v269_v53 = vmul.f32 %v4073_v49, %v140_v39  ;;  %v321_v54 = vmul.f32 %v4078_v50, %v140_v39  ;;  %3667 = vset.pattern.permute.xlu1 %v3826_v62  ;;  %v256_v29 = vadd.f32 %v248_v58, %v196_v57 }
  0xb4   :  { %v281_v60 = vrot.slane %v280_v51, 1  ;;  %v247_v30 = vmul.f32 %v244_v33, %v4160_v59  ;;  %v194_v32 = vmul.f32 %v192_v37, %v4167_v63  ;;  %v246_v36 = vmul.f32 %v244_v33, %v4172_v3 }
  0xb5   :  { %v333_v61 = vrot.slane %v332_v52, 1  ;;  %v288_v49 = vsel %vm165_vm0, %v269_v53, 0.0  ;;  %v340_v50 = vsel %vm165_vm0, %v321_v54, 0.0  ;;  %v197_v34 = vmul.f32 %v192_v37, %v4177_v16 }
  0xb6   :  { %v289_v15 = vadd.f32 %v288_v49, %v287_v48  ;;  %v341_v7 = vadd.f32 %v340_v50, %v339_v56  ;;  %v282_v23 = vadd.f32 %v281_v60, %v280_v51  ;;  %v249_v31 = vmul.f32 %v244_v33, %v4182_v24 }
  0xb7   :  { %v334_v25 = vadd.f32 %v333_v61, %v332_v52  ;;  %v255_v53 = vadd.f32 %v247_v30, %v195_v26  ;;  %v254_v33 = vadd.f32 %v246_v36, %v194_v32  ;;  %v193_v50 = vmax.f32 %v191_v8, 0.0 }
  0xb8   :  { %v290_v27 = vrot.slane %v289_v15, 4  ;;  %v342_v28 = vrot.slane %v341_v7, 4  ;;  %v296_v42 = vmax.f32 %v282_v23, 0.0  ;;  %v257_v49 = vadd.f32 %v249_v31, %v197_v34 }
  0xb9   :  { %v348_v43 = vmax.f32 %v334_v25, 0.0  ;;  %v245_v23 = vmax.f32 %v243_v17, 0.0  ;;  %v198_v32 = vmul.f32 %v193_v50, %v4167_v63  ;;  %v199_v8 = vmul.f32 %v193_v50, %v4153_v55 }
  0xba   :  { %v291_v22 = vadd.f32 %v290_v27, %v289_v15  ;;  %v343_v40 = vadd.f32 %v342_v28, %v341_v7  ;;  %v298_v35 = vmul.f32 %v296_v42, %v4167_v63  ;;  %v299_v38 = vmul.f32 %v296_v42, %v4153_v55 }
  0xbb   :  { %v300_v39 = vmul.f32 %v296_v42, %v4140_v46  ;;  %v301_v44 = vmul.f32 %v296_v42, %v4177_v16  ;;  %v350_v45 = vmul.f32 %v348_v43, %v4172_v3  ;;  %v351_v47 = vmul.f32 %v348_v43, %v4160_v59 }
  0xbc   :  { %v352_v48 = vmul.f32 %v348_v43, %v4145_v41  ;;  %v353_v51 = vmul.f32 %v348_v43, %v4182_v24  ;;  %v292_v52 = vrot.slane %v291_v22, 2  ;;  %v344_v37 = vrot.slane %v343_v40, 2 }
  0xbd   :  { %v359_v56 = vadd.f32 %v351_v47, %v299_v38  ;;  %v358_v57 = vadd.f32 %v350_v45, %v298_v35  ;;  %v250_v17 = vmul.f32 %v245_v23, %v4172_v3  ;;  %v251_v34 = vmul.f32 %v245_v23, %v4160_v59 }
  0xbe   :  { %v360_v54 = vadd.f32 %v352_v48, %v300_v39  ;;  %v361_v58 = vadd.f32 %v353_v51, %v301_v44  ;;  %v293_v60 = vadd.f32 %v292_v52, %v291_v22  ;;  %v345_v61 = vadd.f32 %v344_v37, %v343_v40 }
  0xbf   :  { %v367_v15 = vadd.f32 %v359_v56, %v255_v53  ;;  %v366_v7 = vadd.f32 %v358_v57, %v254_v33  ;;  %v252_v39 = vmul.f32 %v245_v23, %v4145_v41  ;;  %v258_v51 = vadd.f32 %v250_v17, %v198_v32 }
  0xc0   :  { %v368_v62 = vadd.f32 %v360_v54, %v256_v29  ;;  %v294_v25 = vrot.slane %v293_v60, 1  ;;  %v346_v27 = vrot.slane %v345_v61, 1  ;;  %v369_v28 = vadd.f32 %v361_v58, %v257_v49 }
  0xc1   :  { %v3506_v43 = vmul.f32 -1.442695, %v367_v15  ;;  %v3505_v19 = vmul.f32 -1.442695, %v366_v7  ;;  %v200_v29 = vmul.f32 %v193_v50, %v4140_v46  ;;  %v201_v57 = vmul.f32 %v193_v50, %v4177_v16 }
  0xc2   :  { %v3507_v42 = vmul.f32 -1.442695, %v368_v62  ;;  %v295_v26 = vadd.f32 %v294_v25, %v293_v60  ;;  %v347_v30 = vadd.f32 %v346_v27, %v345_v61  ;;  %v3508_v40 = vmul.f32 -1.442695, %v369_v28 }
  0xc3   :  { %v260_v56 = vadd.f32 %v252_v39, %v200_v29  ;;  %v253_v60 = vmul.f32 %v245_v23, %v4182_v24 }
  0xc4   :  { %3670 = vpow2.f32 %v3507_v42  ;;  %v297_v36 = vmax.f32 %v295_v26, 0.0  ;;  %v349_v22 = vmax.f32 %v347_v30, 0.0 }
  0xc5   :  { %3672 = vpow2.f32 %v3506_v43  ;;  %v261_v50 = vadd.f32 %v253_v60, %v201_v57 }
  0xc6   :  { %3674 = vpow2.f32 %v3505_v19  ;;  %v302_v31 = vmul.f32 %v297_v36, %v4167_v63  ;;  %v303_v35 = vmul.f32 %v297_v36, %v4153_v55  ;;  %v304_v38 = vmul.f32 %v297_v36, %v4140_v46 }
  0xc7   :  { %v354_v44 = vmul.f32 %v349_v22, %v4172_v3  ;;  %v355_v45 = vmul.f32 %v349_v22, %v4160_v59  ;;  %v356_v47 = vmul.f32 %v349_v22, %v4145_v41  ;;  %3676 = vpow2.f32 %v3508_v40 }
  0xc8   :  { %v259_v63 = vadd.f32 %v251_v34, %v199_v8  ;;  %v305_v3 = vmul.f32 %v297_v36, %v4177_v16  ;;  %v357_v59 = vmul.f32 %v349_v22, %v4182_v24 }
  0xc9   :  { %v362_v19 = vadd.f32 %v354_v44, %v302_v31  ;;  %v363_v52 = vadd.f32 %v355_v45, %v303_v35  ;;  %v364_v33 = vadd.f32 %v356_v47, %v304_v38 }
  0xca   :  { %v3671_v48 = vpop.eup %3670  ;;  %v365_v25 = vadd.f32 %v357_v59, %v305_v3 }
  0xcb   :  { %v3673_v37 = vpop.eup %3672  ;;  %v400_v53 = vadd.f32 1.0, %v3671_v48  ;;  %v370_v46 = vadd.f32 %v362_v19, %v258_v51  ;;  %v371_v41 = vadd.f32 %v363_v52, %v259_v63  ;;  %v372_v62 = vadd.f32 %v364_v33, %v260_v56 }
  0xcc   :  { %v3675_v55 = vpop.eup %3674  ;;  %v4210_v54 = vadd.f32 1.0, %v3673_v37  ;;  %v373_v30 = vadd.f32 %v365_v25, %v261_v50 }
  0xcd   :  { %3678 = vrcp.f32 %v400_v53  ;;  %v3677_v58 = vpop.eup %3676  ;;  %v4217_v61 = vadd.f32 1.0, %v3675_v55  ;;  %v3509_v49 = vmul.f32 -1.442695, %v370_v46  ;;  %v3510_v7 = vmul.f32 -1.442695, %v371_v41 }
  0xce   :  { %3680 = vrcp.f32 %v4210_v54  ;;  %v4219_v15 = vadd.f32 1.0, %v3677_v58  ;;  %v445_v28 = vand.u32 2147483647, %v400_v53  ;;  %v3511_v16 = vmul.f32 -1.442695, %v372_v62 }
  0xcf   :  { %3682 = vrcp.f32 %v4217_v61  ;;  %v447_v24 = vand.u32 2147483648, %v400_v53  ;;  %v432_v26 = vand.u32 2147483648, %v4210_v54  ;;  %vm441_vm1 = vweird.f32 %v400_v53 }
  0xd0   :  { %3684 = vrcp.f32 %v4219_v15  ;;  %vm426_vm2 = vweird.f32 %v4210_v54  ;;  %vm4226_vm3 = vcmp.eq.f32.partialorder %v445_v28, 8.507059e+37  ;;  %v430_v8 = vand.u32 2147483647, %v4210_v54 }
  0xd1   :  { %3686 = vpow2.f32 %v3509_v49  ;;  %v3512_v29 = vmul.f32 -1.442695, %v373_v30  ;;  %v448_v31 = vor.u32 1.1754944e-38, %v447_v24  ;;  %v433_v44 = vor.u32 1.1754944e-38, %v432_v26 }
  0xd2   :  { %3688 = vpow2.f32 %v3510_v7  ;;  %v415_v51 = vand.u32 2147483647, %v4217_v61  ;;  %v417_v63 = vand.u32 2147483648, %v4217_v61  ;;  %vm431_vm9 = vcmp.eq.f32.partialorder %v430_v8, 8.507059e+37 }
  0xd3   :  { %v3679_v27 = vpop.eup %3678  ;;  %3690 = vpow2.f32 %v3511_v16  ;;  %vm411_vm10 = vweird.f32 %v4217_v61  ;;  %v462_v7 = vand.u32 2147483648, %v4219_v15  ;;  %vm456_vm14 = vweird.f32 %v4219_v15 }
  0xd4   :  { %v3681_v42 = vpop.eup %3680  ;;  %v437_v43 = vmul.f32 %v3679_v27, %v400_v53  ;;  %vm442_vm4 = vweird.f32 %v3679_v27  ;;  %3692 = vpow2.f32 %v3512_v29  ;;  %vm416_vm13 = vcmp.eq.f32.partialorder %v415_v51, 8.507059e+37 }
  0xd5   :  { %v422_v23 = vmul.f32 %v3681_v42, %v4210_v54  ;;  %v3683_v36 = vpop.eup %3682  ;;  %vm427_vm5 = vweird.f32 %v3681_v42  ;;  %vm443_vm6 = vmor %vm441_vm1, %vm442_vm4  ;;  %v418_v54 = vor.u32 1.1754944e-38, %v417_v63 }
  0xd6   :  { %v438_v32 = vsub.f32 1.0, %v437_v43  ;;  %v3685_v17 = vpop.eup %3684  ;;  %v407_v35 = vmul.f32 %v3683_v36, %v4217_v61  ;;  %vm428_vm7 = vmor %vm426_vm2, %vm427_vm5  ;;  %vm412_vm8 = vweird.f32 %v3683_v36  ;;  %v460_v61 = vand.u32 2147483647, %v4219_v15 }
  0xd7   :  { %v423_v40 = vsub.f32 1.0, %v422_v23  ;;  %v3687_v38 = vpop.eup %3686  ;;  %v452_v45 = vmul.f32 %v3685_v17, %v4219_v15  ;;  %vm413_vm11 = vmor %vm411_vm10, %vm412_vm8  ;;  %vm457_vm12 = vweird.f32 %v3685_v17 }
  0xd8   :  { %v439_v34 = vmul.f32 %v3679_v27, %v438_v32  ;;  %v408_v48 = vsub.f32 1.0, %v407_v35  ;;  %v402_v19 = vadd.f32 1.0, %v3687_v38  ;;  %v3689_v52 = vpop.eup %3688  ;;  %vm458_vm15 = vmor %vm456_vm14, %vm457_vm12  ;;  %vm461_vm0 = vcmp.eq.f32.partialorder %v460_v61, 8.507059e+37 }
  0xd9   :  { %v424_v39 = vmul.f32 %v3681_v42, %v423_v40  ;;  %v453_v33 = vsub.f32 1.0, %v452_v45  ;;  %v3691_v55 = vpop.eup %3690  ;;  %v4242_v58 = vadd.f32 1.0, %v3689_v52 }
  0xda   :  { %v440_v47 = vadd.f32 %v3679_v27, %v439_v34  ;;  %v409_v56 = vmul.f32 %v3683_v36, %v408_v48  ;;  %3694 = vrcp.f32 %v402_v19  ;;  %v4244_v49 = vadd.f32 1.0, %v3691_v55  ;;  %v3693_v25 = vpop.eup %3692 }
  0xdb   :  { %v425_v37 = vadd.f32 %v3681_v42, %v424_v39  ;;  %v454_v53 = vmul.f32 %v3685_v17, %v453_v33  ;;  %3696 = vrcp.f32 %v4242_v58  ;;  %v405_v43 = vadd.f32 1.0, %v3693_v25 }
  0xdc   :  { %v444_v46 = vsel %vm443_vm6, %v3679_v27, %v440_v47  ;;  %v410_v57 = vadd.f32 %v3683_v36, %v409_v56  ;;  %3698 = vrcp.f32 %v4244_v49  ;;  %v475_v30 = vand.u32 2147483647, %v402_v19 }
  0xdd   :  { %v449_v3 = vsel %vm4226_vm3, %v448_v31, %v444_v46  ;;  %v429_v59 = vsel %vm428_vm7, %v3681_v42, %v425_v37  ;;  %v455_v60 = vadd.f32 %v3685_v17, %v454_v53  ;;  %v463_v42 = vor.u32 1.1754944e-38, %v462_v7 }
  0xde   :  { %538 = vperm.xlu0 %3669, %v449_v3   ;;  %v434_v41 = vsel %vm431_vm9, %v433_v44, %v429_v59  ;;  %v414_v62 = vsel %vm413_vm11, %v3683_v36, %v410_v57  ;;  %v477_v32 = vand.u32 2147483648, %v402_v19  ;;  %3700 = vrcp.f32 %v405_v43 }
  0xdf   :  { %533 = vperm.xlu2 %3668, %v434_v41   ;;  %v419_v27 = vsel %vm416_vm13, %v418_v54, %v414_v62  ;;  %v459_v16 = vsel %vm458_vm15, %v3685_v17, %v455_v60  ;;  %vm471_vm2 = vweird.f32 %v402_v19  ;;  %vm476_vm4 = vcmp.eq.f32.partialorder %v475_v30, 8.507059e+37 }
  0xe0   :  { %v3695_v28 = vpop.eup %3694  ;;  %528 = vperm.xlu1 %3667, %v419_v27   ;;  %v464_v26 = vsel %vm461_vm0, %v463_v42, %v459_v16  ;;  %v478_v17 = vor.u32 1.1754944e-38, %v477_v32  ;;  %v490_v34 = vand.u32 2147483647, %v4242_v58  ;;  %v492_v31 = vand.u32 2147483648, %v4242_v58 }
  0xe1   :  { %v467_v50 = vmul.f32 %v3695_v28, %v402_v19  ;;  %v3697_v23 = vpop.eup %3696  ;;  %vm472_vm1 = vweird.f32 %v3695_v28  ;;  %vm486_vm6 = vweird.f32 %v4242_v58  ;;  %vm501_vm9 = vweird.f32 %v4244_v49 }
  0xe2   :  { %v482_v15 = vmul.f32 %v3697_v23, %v4242_v58  ;;  %v3699_v22 = vpop.eup %3698  ;;  %vm473_vm3 = vmor %vm471_vm2, %vm472_vm1  ;;  %vm487_vm5 = vweird.f32 %v3697_v23  ;;  %v493_v19 = vor.u32 1.1754944e-38, %v492_v31  ;;  %v505_v52 = vand.u32 2147483647, %v4244_v49 }
  0xe3   :  { %v468_v24 = vsub.f32 1.0, %v467_v50  ;;  %v497_v29 = vmul.f32 %v3699_v22, %v4244_v49  ;;  %vm502_vm7 = vweird.f32 %v3699_v22  ;;  %vm488_vm8 = vmor %vm486_vm6, %vm487_vm5  ;;  %v507_v37 = vand.u32 2147483648, %v4244_v49 }
  0xe4   :  { %v483_v8 = vsub.f32 1.0, %v482_v15  ;;  %v3701_v44 = vpop.eup %3700  ;;  %vm491_vm10 = vcmp.eq.f32.partialorder %v490_v34, 8.507059e+37  ;;  %vm503_vm11 = vmor %vm501_vm9, %vm502_vm7  ;;  %v522_v53 = vand.u32 2147483648, %v405_v43  ;;  %vm506_vm13 = vcmp.eq.f32.partialorder %v505_v52, 8.507059e+37 }
  0xe5   :  { %v469_v36 = vmul.f32 %v3695_v28, %v468_v24  ;;  %v498_v39 = vsub.f32 1.0, %v497_v29  ;;  %v512_v51 = vmul.f32 %v3701_v44, %v405_v43  ;;  %vm517_vm12 = vweird.f32 %v3701_v44 }
  0xe6   :  { %v484_v38 = vmul.f32 %v3697_v23, %v483_v8  ;;  %v508_v59 = vor.u32 1.1754944e-38, %v507_v37  ;;  %vm516_vm14 = vweird.f32 %v405_v43  ;;  %v520_v57 = vand.u32 2147483647, %v405_v43 }
  0xe7   :  { %543 = vperm.xlu2 %3668, %v464_v26   ;;  %v470_v40 = vadd.f32 %v3695_v28, %v469_v36  ;;  %v499_v48 = vmul.f32 %v3699_v22, %v498_v39  ;;  %v513_v55 = vsub.f32 1.0, %v512_v51  ;;  %vm518_vm15 = vmor %vm516_vm14, %vm517_vm12  ;;  %v523_v60 = vor.u32 1.1754944e-38, %v522_v53  ;;  %v8368_v51 = vld [vmem:[#allocation14_spill] sm:$0xff] }
  0xe8   :  { %v485_v47 = vadd.f32 %v3697_v23, %v484_v38  ;;  %vm521_vm0 = vcmp.eq.f32.partialorder %v520_v57, 8.507059e+37 }
  0xe9   :  { %v474_v35 = vsel %vm473_vm3, %v3695_v28, %v470_v40  ;;  %v500_v33 = vadd.f32 %v3699_v22, %v499_v48  ;;  %v514_v3 = vmul.f32 %v3701_v44, %v513_v55  ;;  %vm708_vm3 = vcmask 1040384  }
  0xea   :  { %v479_v45 = vsel %vm476_vm4, %v478_v17, %v474_v35  ;;  %v489_v63 = vsel %vm488_vm8, %v3697_v23, %v485_v47 }
  0xeb   :  { %548 = vperm.xlu1 %3667, %v479_v45   ;;  %v494_v46 = vsel %vm491_vm10, %v493_v19, %v489_v63  ;;  %v504_v56 = vsel %vm503_vm11, %v3699_v22, %v500_v33  ;;  %v515_v41 = vadd.f32 %v3701_v44, %v514_v3 }
  0xec   :  { %v509_v58 = vsel %vm506_vm13, %v508_v59, %v504_v56 }
  0xed   :  { %v519_v54 = vsel %vm518_vm15, %v3701_v44, %v515_v41 }
  0xee   :  { %v524_v49 = vsel %vm521_vm0, %v523_v60, %v519_v54 }
  0xef   :  { %553 = vperm.xlu2 %3668, %v494_v46  }
  0xf3   :  { %558 = vperm.xlu1 %3667, %v509_v58  }
  0xf7   :  { %563 = vperm.xlu2 %3668, %v524_v49  }
 0x139   :  { %v534_v62 = vpop.permute.xlu2 %533 }
 0x13a   :  { %v4260_v61 = vmul.f32 %v534_v62, %v3985_v13  ;;  %v4263_v28 = vmul.f32 %v534_v62, %v3990_v14 }
 0x13c   :  { %8352 = vst [vmem:[#allocation15_spill] sm:$0xff] %v4260_v61 }
 0x13d   :  { %8353 = vst [vmem:[#allocation16_spill] sm:$0xff] %v4263_v28 }
 0x141   :  { %v544_v7 = vpop.permute.xlu2 %543 }
 0x142   :  { %v4282_v14 = vmul.f32 %v544_v7, %v3975_v11 }
 0x144   :  { %8358 = vst [vmem:[#allocation21_spill] sm:$0xff] %v4282_v14 }
 0x149   :  { %v554_v32 = vpop.permute.xlu2 %553 }
 0x14a   :  { %v4298_v35 = vmul.f32 %v554_v32, %v3965_v9  ;;  %v4301_v38 = vmul.f32 %v554_v32, %v3970_v10 }
 0x14c   :  { %8362 = vst [vmem:[#allocation25_spill] sm:$0xff] %v4298_v35 }
 0x14d   :  { %8363 = vst [vmem:[#allocation26_spill] sm:$0xff] %v4301_v38 }
 0x150   :  { %v539_v27 = vpop.permute.xlu0 %538 }
 0x151   :  { %v4276_v24 = vmul.f32 %v539_v27, %v3939_v2  ;;  %v4279_v13 = vmul.f32 %v539_v27, %v3946_v4  ;;  %v564_v39 = vpop.permute.xlu2 %563  ;;  %v3836_v27 = vmov 32.0  }
 0x152   :  { %v529_v25 = vpop.permute.xlu1 %528  ;;  %v4322_v10 = vmul.f32 %v564_v39, %v4001_v18  ;;  %v4325_v19 = vmul.f32 %v564_v39, %v8368_v51  ;;  %3702 = vrcp.f32 %v3836_v27 }
 0x153   :  { %v4266_v16 = vmul.f32 %v529_v25, %v3951_v5  ;;  %v4269_v50 = vmul.f32 %v529_v25, %v3956_v6  ;;  %8356 = vst [vmem:[#allocation19_spill] sm:$0xff] %v4276_v24  ;;  %v4285_v5 = vmul.f32 %v544_v7, %v3980_v12 }
 0x154   :  { %8357 = vst [vmem:[#allocation20_spill] sm:$0xff] %v4279_v13 }
 0x155   :  { %8354 = vst [vmem:[#allocation17_spill] sm:$0xff] %v4266_v16  ;;  %v629_v42 = vmax.f32 %v4266_v16, %v4260_v61  ;;  %v638_v43 = vmax.f32 %v4269_v50, %v4263_v28  ;;  %v582_v62 = vadd.f32 %v4260_v61, %v4266_v16  ;;  %v591_v7 = vadd.f32 %v4263_v28, %v4269_v50 }
 0x156   :  { %8355 = vst [vmem:[#allocation18_spill] sm:$0xff] %v4269_v50 }
 0x157   :  { %8359 = vst [vmem:[#allocation22_spill] sm:$0xff] %v4285_v5  ;;  %v630_v6 = vmax.f32 %v629_v42, %v4276_v24  ;;  %v639_v23 = vmax.f32 %v638_v43, %v4279_v13  ;;  %v583_v42 = vadd.f32 %v582_v62, %v4276_v24  ;;  %v592_v43 = vadd.f32 %v591_v7, %v4279_v13 }
 0x158   :  { %8367 = vst [vmem:[#allocation30_spill] sm:$0xff] %v4322_v10 }
 0x159   :  { %v631_v26 = vmax.f32 %v630_v6, %v4282_v14  ;;  %v640_v30 = vmax.f32 %v639_v23, %v4285_v5  ;;  %8369 = vst [vmem:[#allocation14_spill] sm:$0xff] %v4325_v19  ;;  %v584_v23 = vadd.f32 %v583_v42, %v4282_v14 }
 0x15b   :  { %v632_v2 = vrot.slane %v631_v26, 4  ;;  %v641_v36 = vrot.slane %v640_v30, 4 }
 0x15d   :  { %v633_v15 = vmax.f32 %v631_v26, %v632_v2  ;;  %v642_v4 = vmax.f32 %v640_v30, %v641_v36  ;;  %v549_v22 = vpop.permute.xlu1 %548  ;;  %v593_v26 = vadd.f32 %v592_v43, %v4285_v5  ;;  %v3703_v30 = vpop.eup %3702 }
 0x15e   :  { %v4292_v12 = vmul.f32 %v549_v22, %v3929_v0  ;;  %v4295_v17 = vmul.f32 %v549_v22, %v3934_v1  ;;  %vm623_vm1 = vweird.f32 %v3703_v30 }
 0x15f   :  { %v634_v40 = vrot.slane %v633_v15, 2  ;;  %v643_v11 = vrot.slane %v642_v4, 2  ;;  %v594_v22 = vrot.slane %v593_v26, 4 }
 0x160   :  { %8360 = vst [vmem:[#allocation23_spill] sm:$0xff] %v4292_v12  ;;  %v647_v0 = vmax.f32 %v4292_v12, %v4298_v35  ;;  %v656_v1 = vmax.f32 %v4295_v17, %v4301_v38  ;;  %v609_v54 = vadd.f32 %v4301_v38, %v4295_v17  ;;  %v600_v36 = vadd.f32 %v4298_v35, %v4292_v12 }
 0x161   :  { %v635_v8 = vmax.f32 %v633_v15, %v634_v40  ;;  %v644_v29 = vmax.f32 %v642_v4, %v643_v11  ;;  %8361 = vst [vmem:[#allocation24_spill] sm:$0xff] %v4295_v17  ;;  %v619_v15 = vmul.f32 32.0, %v3703_v30  ;;  %v585_v4 = vrot.slane %v584_v23, 4 }
 0x163   :  { %v636_v34 = vrot.slane %v635_v8, 1  ;;  %v645_v31 = vrot.slane %v644_v29, 1 }
 0x165   :  { %v4303_v44 = vmax.f32 %v635_v8, %v636_v34  ;;  %v4305_v45 = vmax.f32 %v644_v29, %v645_v31  ;;  %v559_v47 = vpop.permute.xlu1 %558  ;;  %v620_v8 = vsub.f32 1.0, %v619_v15  ;;  %v586_v29 = vadd.f32 %v585_v4, %v584_v23 }
 0x166   :  { %v4312_v48 = vmul.f32 %v559_v47, %v4011_v20  ;;  %v4315_v9 = vmul.f32 %v559_v47, %v4016_v21  ;;  %v595_v34 = vadd.f32 %v594_v22, %v593_v26 }
 0x167   :  { %8364 = vst [vmem:[#allocation27_spill] sm:$0xff] %v4305_v45  ;;  %693 = vrot.lane.b32.xlu1 %v4305_v45, %s3827_s2  ;;  %691 = vrot.lane.b32.xlu2 %v4303_v44, %s3827_s2 }
 0x168   :  { %8365 = vst [vmem:[#allocation28_spill] sm:$0xff] %v4312_v48  ;;  %v648_v52 = vmax.f32 %v647_v0, %v4312_v48  ;;  %v657_v20 = vmax.f32 %v656_v1, %v4315_v9  ;;  %v610_v60 = vadd.f32 %v609_v54, %v4315_v9  ;;  %v601_v40 = vadd.f32 %v600_v36, %v4312_v48 }
 0x169   :  { %8366 = vst [vmem:[#allocation29_spill] sm:$0xff] %v4315_v9  ;;  %v621_v0 = vmul.f32 %v3703_v30, %v620_v8  ;;  %v587_v1 = vrot.slane %v586_v29, 2  ;;  %v596_v51 = vrot.slane %v595_v34, 2 }
 0x16a   :  { %v649_v21 = vmax.f32 %v648_v52, %v4322_v10  ;;  %v658_v37 = vmax.f32 %v657_v20, %v4325_v19  ;;  %v611_v25 = vadd.f32 %v610_v60, %v4325_v19  ;;  %v602_v31 = vadd.f32 %v601_v40, %v4322_v10 }
 0x16c   :  { %v650_v63 = vrot.slane %v649_v21, 4  ;;  %v659_v33 = vrot.slane %v658_v37, 4  ;;  %v612_v6 = vrot.slane %v611_v25, 4  ;;  %v603_v52 = vrot.slane %v602_v31, 4 }
 0x16e   :  { %v651_v55 = vmax.f32 %v649_v21, %v650_v63  ;;  %v660_v46 = vmax.f32 %v658_v37, %v659_v33  ;;  %v613_v32 = vadd.f32 %v612_v6, %v611_v25  ;;  %v622_v21 = vadd.f32 %v3703_v30, %v621_v0 }
 0x16f   :  { %750 = vrot.lane.b32.xlu2 %v4305_v45, %s3828_s21  ;;  %v588_v37 = vadd.f32 %v587_v1, %v586_v29  ;;  %v597_v63 = vadd.f32 %v596_v51, %v595_v34  ;;  %v604_v33 = vadd.f32 %v603_v52, %v602_v31 }
 0x170   :  { %v652_v18 = vrot.slane %v651_v55, 2  ;;  %v661_v56 = vrot.slane %v660_v46, 2  ;;  %v614_v11 = vrot.slane %v613_v32, 2 }
 0x172   :  { %v653_v3 = vmax.f32 %v651_v55, %v652_v18  ;;  %v662_v59 = vmax.f32 %v660_v46, %v661_v56  ;;  %v615_v39 = vadd.f32 %v614_v11, %v613_v32  ;;  %v624_v18 = vsel %vm623_vm1, %v3703_v30, %v622_v21 }
 0x173   :  { %v589_v56 = vrot.slane %v588_v37, 1 }
 0x174   :  { %v654_v53 = vrot.slane %v653_v3, 1  ;;  %v663_v41 = vrot.slane %v662_v59, 1  ;;  %v616_v20 = vrot.slane %v615_v39, 1 }
 0x176   :  { %v4333_v57 = vmax.f32 %v653_v3, %v654_v53  ;;  %v4335_v58 = vmax.f32 %v662_v59, %v663_v41  ;;  %v617_v55 = vadd.f32 %v616_v20, %v615_v39  ;;  %v598_v3 = vrot.slane %v597_v63, 1 }
 0x177   :  { %v605_v59 = vrot.slane %v604_v33, 2  ;;  %v590_v41 = vadd.f32 %v589_v56, %v588_v37 }
 0x178   :  { %8370 = vst [vmem:[#allocation31_spill] sm:$0xff] %v4333_v57  ;;  %721 = vrot.lane.b32.xlu0 %v4335_v58, %s3827_s2  ;;  %719 = vrot.lane.b32.xlu1 %v4333_v57, %s3827_s2  ;;  %v4439_v53 = vmul.f32 %v624_v18, %v617_v55  ;;  %v599_v54 = vadd.f32 %v598_v3, %v597_v63 }
 0x179   :  { %8371 = vst [vmem:[#allocation32_spill] sm:$0xff] %v4335_v58  ;;  %775 = vrot.lane.b32.xlu2 %v4333_v57, %s3828_s21  ;;  %v606_v60 = vadd.f32 %v605_v59, %v604_v33  ;;  %v4451_v25 = vmul.f32 %v624_v18, %v590_v41 }
 0x17a   :  { %v4453_v27 = vmul.f32 %v624_v18, %v599_v54 }
 0x17b   :  { %8372 = vst [vmem:[#allocation33_spill] sm:$0xff] %v4451_v25  ;;  %v607_v42 = vrot.slane %v606_v60, 1 }
 0x17d   :  { %v608_v43 = vadd.f32 %v607_v42, %v606_v60 }
 0x17f   :  { %v4467_v30 = vmul.f32 %v624_v18, %v608_v43 }
 0x180   :  { %777 = vrot.lane.b32.xlu1 %v4335_v58, %s3828_s21  ;;  %748 = vrot.lane.b32.xlu0 %v4303_v44, %s3828_s21 }
 0x181   :  { %833 = vrot.lane.b32.xlu2 %v4335_v58, %s3829_s22  ;;  %8373 = vst [vmem:[#allocation34_spill] sm:$0xff] %v4467_v30 }
 0x188   :  { %804 = vrot.lane.b32.xlu1 %v4303_v44, %s3829_s22  ;;  %806 = vrot.lane.b32.xlu0 %v4305_v45, %s3829_s22 }
 0x189   :  { %860 = vrot.lane.b32.xlu2 %v4303_v44, %s3830_s23 }
 0x190   :  { %862 = vrot.lane.b32.xlu1 %v4305_v45, %s3830_s23  ;;  %831 = vrot.lane.b32.xlu0 %v4333_v57, %s3829_s22 }
 0x191   :  { %918 = vrot.lane.b32.xlu2 %v4305_v45, %s3831_s24 }
 0x198   :  { %887 = vrot.lane.b32.xlu1 %v4333_v57, %s3830_s23  ;;  %889 = vrot.lane.b32.xlu0 %v4335_v58, %s3830_s23 }
 0x199   :  { %943 = vrot.lane.b32.xlu2 %v4333_v57, %s3831_s24 }
 0x1a0   :  { %945 = vrot.lane.b32.xlu1 %v4335_v58, %s3831_s24  ;;  %916 = vrot.lane.b32.xlu0 %v4303_v44, %s3831_s24 }
 0x1a1   :  { %1001 = vrot.lane.b32.xlu2 %v4335_v58, %s3832_s25 }
 0x1a8   :  { %972 = vrot.lane.b32.xlu1 %v4303_v44, %s3832_s25  ;;  %974 = vrot.lane.b32.xlu0 %v4305_v45, %s3832_s25 }
 0x1a9   :  { %1028 = vrot.lane.b32.xlu2 %v4303_v44, %s3833_s26 }
 0x1b0   :  { %1030 = vrot.lane.b32.xlu1 %v4305_v45, %s3833_s26  ;;  %999 = vrot.lane.b32.xlu0 %v4333_v57, %s3832_s25 }
 0x1b1   :  { %1086 = vrot.lane.b32.xlu2 %v4305_v45, %s3834_s27 }
 0x1b8   :  { %1055 = vrot.lane.b32.xlu1 %v4333_v57, %s3833_s26  ;;  %1057 = vrot.lane.b32.xlu0 %v4335_v58, %s3833_s26 }
 0x1b9   :  { %1111 = vrot.lane.b32.xlu2 %v4333_v57, %s3834_s27 }
 0x1c0   :  { %1113 = vrot.lane.b32.xlu1 %v4335_v58, %s3834_s27  ;;  %1084 = vrot.lane.b32.xlu0 %v4303_v44, %s3834_s27 }
 0x1c1   :  { %1169 = vrot.lane.b32.xlu2 %v4335_v58, %s3835_s28  ;;  %v4400_v49 = vpop.permute.xlu2 %691 }
 0x1c8   :  { %1140 = vrot.lane.b32.xlu1 %v4303_v44, %s3835_s28  ;;  %1142 = vrot.lane.b32.xlu0 %v4305_v45, %s3835_s28 }
 0x1c9   :  { %1196 = vrot.lane.b32.xlu2 %v4303_v44, %s3837_s7  ;;  %v4417_v2 = vpop.permute.xlu2 %750 }
 0x1d0   :  { %1198 = vrot.lane.b32.xlu1 %v4305_v45, %s3837_s7  ;;  %1167 = vrot.lane.b32.xlu0 %v4333_v57, %s3835_s28 }
 0x1d1   :  { %1254 = vrot.lane.b32.xlu2 %v4305_v45, %s3822_s29 }
 0x1d3   :  { %v4429_v47 = vpop.permute.xlu2 %775 }
 0x1d8   :  { %1223 = vrot.lane.b32.xlu1 %v4333_v57, %s3837_s7  ;;  %1225 = vrot.lane.b32.xlu0 %v4335_v58, %s3837_s7 }
 0x1d9   :  { %1279 = vrot.lane.b32.xlu2 %v4333_v57, %s3822_s29  ;;  %v4447_v62 = vpop.permute.xlu1 %693 }
 0x1db   :  { %v4437_v46 = vpop.permute.xlu2 %833 }
 0x1e0   :  { %1281 = vrot.lane.b32.xlu1 %v4335_v58, %s3822_s29  ;;  %1252 = vrot.lane.b32.xlu0 %v4303_v44, %s3822_s29 }
 0x1e1   :  { %715 = vrot.lane.b32.xlu2 %v4439_v53, %s3827_s2 }
 0x1e3   :  { %v4449_v7 = vpop.permute.xlu2 %860 }
 0x1e8   :  { %684 = vrot.lane.b32.xlu0 %v4453_v27, %s3827_s2  ;;  %682 = vrot.lane.b32.xlu1 %v4451_v25, %s3827_s2 }
 0x1e9   :  { %741 = vrot.lane.b32.xlu2 %v4451_v25, %s3828_s21 }
 0x1ea   :  { %v4461_v6 = vpop.permute.xlu1 %719  ;;  %v4463_v23 = vpop.permute.xlu0 %721 }
 0x1eb   :  { %v4465_v26 = vpop.permute.xlu2 %918 }
 0x1f0   :  { %713 = vrot.lane.b32.xlu0 %v4467_v30, %s3827_s2  ;;  %743 = vrot.lane.b32.xlu1 %v4453_v27, %s3828_s21  ;;  %s5031_s2 = sld [smem:[#allocation8 + $0x34]] }
 0x1f1   :  { %799 = vrot.lane.b32.xlu2 %v4453_v27, %s3829_s22 }
 0x1f2   :  { %v4475_v32 = vpop.permute.xlu1 %777  ;;  %v4477_v36 = vpop.permute.xlu0 %748 }
 0x1f3   :  { %v4479_v15 = vpop.permute.xlu2 %943 }
 0x1f8   :  { %771 = vrot.lane.b32.xlu0 %v4439_v53, %s3828_s21  ;;  %769 = vrot.lane.b32.xlu1 %v4467_v30, %s3828_s21  ;;  %s5037_s21 = sld [smem:[#allocation8 + $0x35]] }
 0x1f9   :  { %825 = vrot.lane.b32.xlu2 %v4467_v30, %s3829_s22 }
 0x1fa   :  { %v4487_v4 = vpop.permute.xlu1 %804  ;;  %v4489_v22 = vpop.permute.xlu0 %806 }
 0x1fb   :  { %v4491_v40 = vpop.permute.xlu2 %1001 }
 0x200   :  { %797 = vrot.lane.b32.xlu0 %v4451_v25, %s3829_s22  ;;  %827 = vrot.lane.b32.xlu1 %v4439_v53, %s3829_s22  ;;  %s5049_s22 = sld [smem:[#allocation8 + $0x36]] }
 0x201   :  { %883 = vrot.lane.b32.xlu2 %v4439_v53, %s3830_s23 }
 0x202   :  { %v4499_v11 = vpop.permute.xlu1 %862  ;;  %v4501_v8 = vpop.permute.xlu0 %831 }
 0x203   :  { %v4503_v29 = vpop.permute.xlu2 %1028 }
 0x208   :  { %855 = vrot.lane.b32.xlu0 %v4453_v27, %s3830_s23  ;;  %853 = vrot.lane.b32.xlu1 %v4451_v25, %s3830_s23 }
 0x209   :  { %909 = vrot.lane.b32.xlu2 %v4451_v25, %s3831_s24 }
 0x20a   :  { %v4511_v34 = vpop.permute.xlu1 %887  ;;  %v4513_v31 = vpop.permute.xlu0 %889 }
 0x20b   :  { %v4515_v39 = vpop.permute.xlu2 %1086 }
 0x210   :  { %881 = vrot.lane.b32.xlu0 %v4467_v30, %s3830_s23  ;;  %911 = vrot.lane.b32.xlu1 %v4453_v27, %s3831_s24  ;;  %s5076_s23 = sld [smem:[#allocation8 + $0x37]] }
 0x211   :  { %967 = vrot.lane.b32.xlu2 %v4453_v27, %s3832_s25 }
 0x212   :  { %v4523_v0 = vpop.permute.xlu1 %945  ;;  %v4525_v1 = vpop.permute.xlu0 %916 }
 0x213   :  { %v4527_v51 = vpop.permute.xlu2 %1111 }
 0x218   :  { %939 = vrot.lane.b32.xlu0 %v4439_v53, %s3831_s24  ;;  %937 = vrot.lane.b32.xlu1 %v4467_v30, %s3831_s24  ;;  %s5114_s24 = sld [smem:[#allocation8 + $0x38]] }
 0x219   :  { %993 = vrot.lane.b32.xlu2 %v4467_v30, %s3832_s25 }
 0x21a   :  { %v4535_v52 = vpop.permute.xlu1 %972  ;;  %v4537_v20 = vpop.permute.xlu0 %974 }
 0x21b   :  { %v4539_v21 = vpop.permute.xlu2 %1169 }
 0x220   :  { %965 = vrot.lane.b32.xlu0 %v4451_v25, %s3832_s25  ;;  %995 = vrot.lane.b32.xlu1 %v4439_v53, %s3832_s25  ;;  %s5160_s25 = sld [smem:[#allocation8 + $0x39]] }
 0x221   :  { %1051 = vrot.lane.b32.xlu2 %v4439_v53, %s3833_s26 }
 0x222   :  { %v4547_v37 = vpop.permute.xlu1 %1030  ;;  %v4549_v63 = vpop.permute.xlu0 %999 }
 0x223   :  { %v4551_v33 = vpop.permute.xlu2 %1196 }
 0x228   :  { %1023 = vrot.lane.b32.xlu0 %v4453_v27, %s3833_s26  ;;  %1021 = vrot.lane.b32.xlu1 %v4451_v25, %s3833_s26 }
 0x229   :  { %1077 = vrot.lane.b32.xlu2 %v4451_v25, %s3834_s27 }
 0x22a   :  { %v4559_v55 = vpop.permute.xlu1 %1055  ;;  %v4561_v18 = vpop.permute.xlu0 %1057 }
 0x22b   :  { %v4563_v56 = vpop.permute.xlu2 %1254 }
 0x22c   :  { %8374 = vst [vmem:[#allocation35_spill] sm:$0xff] %v4563_v56 }
 0x230   :  { %1049 = vrot.lane.b32.xlu0 %v4467_v30, %s3833_s26  ;;  %1079 = vrot.lane.b32.xlu1 %v4453_v27, %s3834_s27  ;;  %s3853_s26 = smov 115  }
 0x231   :  { %1135 = vrot.lane.b32.xlu2 %v4453_v27, %s3835_s28 }
 0x232   :  { %v4571_v3 = vpop.permute.xlu1 %1113  ;;  %v4573_v59 = vpop.permute.xlu0 %1084 }
 0x233   :  { %v4575_v41 = vpop.permute.xlu2 %1279 }
 0x234   :  { %8375 = vst [vmem:[#allocation36_spill] sm:$0xff] %v4575_v41 }
 0x238   :  { %1107 = vrot.lane.b32.xlu0 %v4439_v53, %s3834_s27  ;;  %1105 = vrot.lane.b32.xlu1 %v4467_v30, %s3834_s27  ;;  %s5174_s27 = sld [smem:[#allocation8 + $0x3a]] }
 0x239   :  { %1161 = vrot.lane.b32.xlu2 %v4467_v30, %s3835_s28 }
 0x23a   :  { %v4583_v54 = vpop.permute.xlu1 %1140  ;;  %v4585_v60 = vpop.permute.xlu0 %1142 }
 0x23b   :  { %v4587_v42 = vpop.permute.xlu2 %715 }
 0x23c   :  { %8376 = vst [vmem:[#allocation37_spill] sm:$0xff] %v4587_v42 }
 0x240   :  { %1133 = vrot.lane.b32.xlu0 %v4451_v25, %s3835_s28  ;;  %1163 = vrot.lane.b32.xlu1 %v4439_v53, %s3835_s28  ;;  %s5212_s28 = sld [smem:[#allocation8 + $0x3b]] }
 0x241   :  { %1219 = vrot.lane.b32.xlu2 %v4439_v53, %s3837_s7 }
 0x242   :  { %v4595_v43 = vpop.permute.xlu1 %1198  ;;  %v4597_v19 = vpop.permute.xlu0 %1167 }
 0x243   :  { %v4599_v10 = vpop.permute.xlu2 %741 }
 0x244   :  { %8377 = vst [vmem:[#allocation38_spill] sm:$0xff] %v4599_v10 }
 0x248   :  { %1191 = vrot.lane.b32.xlu0 %v4453_v27, %s3837_s7  ;;  %1189 = vrot.lane.b32.xlu1 %v4451_v25, %s3837_s7 }
 0x249   :  { %1245 = vrot.lane.b32.xlu2 %v4451_v25, %s3822_s29 }
 0x24a   :  { %v4607_v9 = vpop.permute.xlu1 %1223  ;;  %v4609_v48 = vpop.permute.xlu0 %1225 }
 0x24b   :  { %v4611_v38 = vpop.permute.xlu2 %799 }
 0x24c   :  { %8378 = vst [vmem:[#allocation39_spill] sm:$0xff] %v4611_v38 }
 0x250   :  { %1217 = vrot.lane.b32.xlu0 %v4467_v30, %s3837_s7  ;;  %1247 = vrot.lane.b32.xlu1 %v4453_v27, %s3822_s29  ;;  %s5251_s7 = sld [smem:[#allocation8]] }
 0x251   :  { %1303 = vrot.lane.b32.xlu2 %v4453_v27, %s3838_s8 }
 0x252   :  { %v4618_v35 = vpop.permute.xlu1 %1281  ;;  %v4620_v17 = vpop.permute.xlu0 %1252 }
 0x253   :  { %8379 = vst [vmem:[#allocation40_spill] sm:$0xff] %v4620_v17  ;;  %v4622_v12 = vpop.permute.xlu2 %825 }
 0x254   :  { %8380 = vst [vmem:[#allocation41_spill] sm:$0xff] %v4622_v12 }
 0x258   :  { %1275 = vrot.lane.b32.xlu0 %v4439_v53, %s3822_s29  ;;  %1273 = vrot.lane.b32.xlu1 %v4467_v30, %s3822_s29  ;;  %s3839_s29 = smov 30  }
 0x259   :  { %1329 = vrot.lane.b32.xlu2 %v4467_v30, %s3838_s8 }
 0x25a   :  { %v4629_v5 = vpop.permute.xlu1 %682  ;;  %v4631_v14 = vpop.permute.xlu0 %684 }
 0x25b   :  { %8381 = vst [vmem:[#allocation42_spill] sm:$0xff] %v4629_v5  ;;  %v4633_v13 = vpop.permute.xlu2 %883 }
 0x25c   :  { %8382 = vst [vmem:[#allocation43_spill] sm:$0xff] %v4631_v14  ;;  %v700_v14 = vstv %s3513_s18  ;;  %s5842_s18 = sld [smem:[#allocation8 + $0xc]] }
 0x25d   :  { %8383 = vst [vmem:[#allocation44_spill] sm:$0xff] %v4633_v13 }
 0x260   :  { %1301 = vrot.lane.b32.xlu0 %v4451_v25, %s3838_s8  ;;  %1308 = vrot.lane.b32.xlu1 %v4303_v44, %s3838_s8 }
 0x261   :  { %1337 = vrot.lane.b32.xlu2 %v4335_v58, %s3838_s8 }
 0x262   :  { %v4638_v24 = vpop.permute.xlu1 %743  ;;  %v4640_v28 = vpop.permute.xlu0 %713 }
 0x263   :  { %8384 = vst [vmem:[#allocation45_spill] sm:$0xff] %v4638_v24  ;;  %v4642_v61 = vpop.permute.xlu2 %909 }
 0x264   :  { %8385 = vst [vmem:[#allocation46_spill] sm:$0xff] %v4640_v28 }
 0x265   :  { %8386 = vst [vmem:[#allocation47_spill] sm:$0xff] %v4642_v61 }
 0x268   :  { %1310 = vrot.lane.b32.xlu0 %v4305_v45, %s3838_s8  ;;  %1331 = vrot.lane.b32.xlu1 %v4439_v53, %s3838_s8 }
 0x269   :  { %1364 = vrot.lane.b32.xlu2 %v4303_v44, %s3839_s29 }
 0x26a   :  { %v4647_v50 = vpop.permute.xlu1 %769  ;;  %v4649_v16 = vpop.permute.xlu0 %771 }
 0x26b   :  { %8387 = vst [vmem:[#allocation48_spill] sm:$0xff] %v4647_v50  ;;  %v4651_v13 = vpop.permute.xlu2 %967 }
 0x26c   :  { %8388 = vst [vmem:[#allocation49_spill] sm:$0xff] %v4649_v16 }
 0x26d   :  { %8389 = vst [vmem:[#allocation50_spill] sm:$0xff] %v4651_v13 }
 0x270   :  { %1335 = vrot.lane.b32.xlu0 %v4333_v57, %s3838_s8  ;;  %1357 = vrot.lane.b32.xlu1 %v4451_v25, %s3839_s29  ;;  %s5274_s8 = sld [smem:[#allocation8 + $0x1]] }
 0x271   :  { %1387 = vrot.lane.b32.xlu2 %v4439_v53, %s3839_s29 }
 0x272   :  { %v4656_v61 = vpop.permute.xlu1 %827  ;;  %v4658_v38 = vpop.permute.xlu0 %797 }
 0x273   :  { %8390 = vst [vmem:[#allocation51_spill] sm:$0xff] %v4656_v61  ;;  %v4660_v28 = vpop.permute.xlu2 %993 }
 0x274   :  { %8391 = vst [vmem:[#allocation52_spill] sm:$0xff] %v4658_v38 }
 0x275   :  { %8392 = vst [vmem:[#allocation53_spill] sm:$0xff] %v4660_v28 }
 0x278   :  { %1359 = vrot.lane.b32.xlu0 %v4453_v27, %s3839_s29  ;;  %1366 = vrot.lane.b32.xlu1 %v4305_v45, %s3839_s29 }
 0x279   :  { %1413 = vrot.lane.b32.xlu2 %v4451_v25, %s3840_s9 }
 0x27a   :  { %v4665_v13 = vpop.permute.xlu1 %853  ;;  %v4667_v50 = vpop.permute.xlu0 %855 }
 0x27b   :  { %8393 = vst [vmem:[#allocation54_spill] sm:$0xff] %v4665_v13  ;;  %v4669_v16 = vpop.permute.xlu2 %1051 }
 0x27c   :  { %8394 = vst [vmem:[#allocation55_spill] sm:$0xff] %v4667_v50 }
 0x27d   :  { %8395 = vst [vmem:[#allocation56_spill] sm:$0xff] %v4669_v16 }
 0x280   :  { %1385 = vrot.lane.b32.xlu0 %v4467_v30, %s3839_s29  ;;  %1391 = vrot.lane.b32.xlu1 %v4333_v57, %s3839_s29 }
 0x281   :  { %1422 = vrot.lane.b32.xlu2 %v4305_v45, %s3840_s9 }
 0x282   :  { %v4674_v28 = vpop.permute.xlu1 %911  ;;  %v4676_v38 = vpop.permute.xlu0 %881 }
 0x283   :  { %8396 = vst [vmem:[#allocation57_spill] sm:$0xff] %v4674_v28  ;;  %v4678_v42 = vpop.permute.xlu2 %1077 }
 0x284   :  { %8397 = vst [vmem:[#allocation58_spill] sm:$0xff] %v4676_v38 }
 0x285   :  { %8398 = vst [vmem:[#allocation59_spill] sm:$0xff] %v4678_v42 }
 0x288   :  { %1393 = vrot.lane.b32.xlu0 %v4335_v58, %s3839_s29  ;;  %1415 = vrot.lane.b32.xlu1 %v4453_v27, %s3840_s9  ;;  %s5306_s29 = sld [smem:[#allocation8 + $0x2]] }
 0x289   :  { %1447 = vrot.lane.b32.xlu2 %v4333_v57, %s3840_s9 }
 0x28a   :  { %v4683_v13 = vpop.permute.xlu1 %937  ;;  %v4685_v16 = vpop.permute.xlu0 %939 }
 0x28b   :  { %8399 = vst [vmem:[#allocation60_spill] sm:$0xff] %v4683_v13  ;;  %v4687_v50 = vpop.permute.xlu2 %1135 }
 0x28c   :  { %8400 = vst [vmem:[#allocation61_spill] sm:$0xff] %v4685_v16 }
 0x28d   :  { %8401 = vst [vmem:[#allocation62_spill] sm:$0xff] %v4687_v50 }
 0x290   :  { %1420 = vrot.lane.b32.xlu0 %v4303_v44, %s3840_s9  ;;  %1441 = vrot.lane.b32.xlu1 %v4467_v30, %s3840_s9 }
 0x291   :  { %1471 = vrot.lane.b32.xlu2 %v4453_v27, %s3841_s1 }
 0x292   :  { %v4692_v42 = vpop.permute.xlu1 %995  ;;  %v4694_v38 = vpop.permute.xlu0 %965 }
 0x293   :  { %8402 = vst [vmem:[#allocation63_spill] sm:$0xff] %v4692_v42  ;;  %v4696_v28 = vpop.permute.xlu2 %1161 }
 0x294   :  { %8403 = vst [vmem:[#allocation64_spill] sm:$0xff] %v4694_v38 }
 0x295   :  { %8404 = vst [vmem:[#allocation65_spill] sm:$0xff] %v4696_v28 }
 0x298   :  { %1443 = vrot.lane.b32.xlu0 %v4439_v53, %s3840_s9  ;;  %1449 = vrot.lane.b32.xlu1 %v4335_v58, %s3840_s9  ;;  %s3854_s9 = smov 114  }
 0x299   :  { %1497 = vrot.lane.b32.xlu2 %v4467_v30, %s3841_s1 }
 0x29a   :  { %v4701_v50 = vpop.permute.xlu1 %1021  ;;  %v4703_v13 = vpop.permute.xlu0 %1023 }
 0x29b   :  { %8405 = vst [vmem:[#allocation66_spill] sm:$0xff] %v4701_v50  ;;  %v4705_v16 = vpop.permute.xlu2 %1219 }
 0x29c   :  { %8406 = vst [vmem:[#allocation67_spill] sm:$0xff] %v4703_v13 }
 0x29d   :  { %8407 = vst [vmem:[#allocation68_spill] sm:$0xff] %v4705_v16 }
 0x2a0   :  { %1469 = vrot.lane.b32.xlu0 %v4451_v25, %s3841_s1  ;;  %1476 = vrot.lane.b32.xlu1 %v4303_v44, %s3841_s1 }
 0x2a1   :  { %1505 = vrot.lane.b32.xlu2 %v4335_v58, %s3841_s1 }
 0x2a2   :  { %v4710_v38 = vpop.permute.xlu1 %1079  ;;  %v4712_v28 = vpop.permute.xlu0 %1049 }
 0x2a3   :  { %8408 = vst [vmem:[#allocation69_spill] sm:$0xff] %v4710_v38  ;;  %v4714_v42 = vpop.permute.xlu2 %1245 }
 0x2a4   :  { %8409 = vst [vmem:[#allocation70_spill] sm:$0xff] %v4712_v28 }
 0x2a5   :  { %8410 = vst [vmem:[#allocation71_spill] sm:$0xff] %v4714_v42 }
 0x2a8   :  { %1478 = vrot.lane.b32.xlu0 %v4305_v45, %s3841_s1  ;;  %1499 = vrot.lane.b32.xlu1 %v4439_v53, %s3841_s1 }
 0x2a9   :  { %1532 = vrot.lane.b32.xlu2 %v4303_v44, %s3842_s10 }
 0x2aa   :  { %v4719_v16 = vpop.permute.xlu1 %1105  ;;  %v4721_v50 = vpop.permute.xlu0 %1107 }
 0x2ab   :  { %8411 = vst [vmem:[#allocation72_spill] sm:$0xff] %v4719_v16  ;;  %v4723_v13 = vpop.permute.xlu2 %1303 }
 0x2ac   :  { %8412 = vst [vmem:[#allocation73_spill] sm:$0xff] %v4721_v50 }
 0x2ad   :  { %8413 = vst [vmem:[#allocation74_spill] sm:$0xff] %v4723_v13 }
 0x2b0   :  { %1503 = vrot.lane.b32.xlu0 %v4333_v57, %s3841_s1  ;;  %1525 = vrot.lane.b32.xlu1 %v4451_v25, %s3842_s10  ;;  %s5386_s1 = sld [smem:[#allocation8 + $0x3]] }
 0x2b1   :  { %1555 = vrot.lane.b32.xlu2 %v4439_v53, %s3842_s10 }
 0x2b2   :  { %v4728_v42 = vpop.permute.xlu1 %1163  ;;  %v4730_v28 = vpop.permute.xlu0 %1133 }
 0x2b3   :  { %8414 = vst [vmem:[#allocation75_spill] sm:$0xff] %v4728_v42  ;;  %v4732_v38 = vpop.permute.xlu2 %1329 }
 0x2b4   :  { %8415 = vst [vmem:[#allocation76_spill] sm:$0xff] %v4730_v28 }
 0x2b5   :  { %8416 = vst [vmem:[#allocation77_spill] sm:$0xff] %v4732_v38 }
 0x2b8   :  { %1527 = vrot.lane.b32.xlu0 %v4453_v27, %s3842_s10  ;;  %1534 = vrot.lane.b32.xlu1 %v4305_v45, %s3842_s10 }
 0x2b9   :  { %1581 = vrot.lane.b32.xlu2 %v4451_v25, %s3843_s3 }
 0x2ba   :  { %v4737_v13 = vpop.permute.xlu1 %1189  ;;  %v4739_v16 = vpop.permute.xlu0 %1191 }
 0x2bb   :  { %8417 = vst [vmem:[#allocation78_spill] sm:$0xff] %v4737_v13  ;;  %v4741_v50 = vpop.permute.xlu2 %1337 }
 0x2bc   :  { %8418 = vst [vmem:[#allocation79_spill] sm:$0xff] %v4739_v16 }
 0x2bd   :  { %8419 = vst [vmem:[#allocation80_spill] sm:$0xff] %v4741_v50 }
 0x2c0   :  { %1553 = vrot.lane.b32.xlu0 %v4467_v30, %s3842_s10  ;;  %1559 = vrot.lane.b32.xlu1 %v4333_v57, %s3842_s10 }
 0x2c1   :  { %1590 = vrot.lane.b32.xlu2 %v4305_v45, %s3843_s3 }
 0x2c2   :  { %v4746_v38 = vpop.permute.xlu1 %1247  ;;  %v4748_v28 = vpop.permute.xlu0 %1217 }
 0x2c3   :  { %8420 = vst [vmem:[#allocation81_spill] sm:$0xff] %v4746_v38  ;;  %v4750_v42 = vpop.permute.xlu2 %1364 }
 0x2c4   :  { %8421 = vst [vmem:[#allocation82_spill] sm:$0xff] %v4748_v28 }
 0x2c5   :  { %8422 = vst [vmem:[#allocation83_spill] sm:$0xff] %v4750_v42 }
 0x2c8   :  { %1561 = vrot.lane.b32.xlu0 %v4335_v58, %s3842_s10  ;;  %1583 = vrot.lane.b32.xlu1 %v4453_v27, %s3843_s3  ;;  %s5452_s10 = sld [smem:[#allocation8 + $0x4]] }
 0x2c9   :  { %1615 = vrot.lane.b32.xlu2 %v4333_v57, %s3843_s3 }
 0x2ca   :  { %v4755_v13 = vpop.permute.xlu1 %1273  ;;  %v4757_v50 = vpop.permute.xlu0 %1275 }
 0x2cb   :  { %8423 = vst [vmem:[#allocation84_spill] sm:$0xff] %v4755_v13  ;;  %v4759_v16 = vpop.permute.xlu2 %1387 }
 0x2cc   :  { %8424 = vst [vmem:[#allocation85_spill] sm:$0xff] %v4757_v50 }
 0x2cd   :  { %8425 = vst [vmem:[#allocation86_spill] sm:$0xff] %v4759_v16 }
 0x2d0   :  { %1588 = vrot.lane.b32.xlu0 %v4303_v44, %s3843_s3  ;;  %1609 = vrot.lane.b32.xlu1 %v4467_v30, %s3843_s3 }
 0x2d1   :  { %1639 = vrot.lane.b32.xlu2 %v4453_v27, %s3844_s4 }
 0x2d2   :  { %v4765_v42 = vpop.permute.xlu1 %1308  ;;  %v4767_v28 = vpop.permute.xlu0 %1301 }
 0x2d3   :  { %8426 = vst [vmem:[#allocation87_spill] sm:$0xff] %v4765_v42  ;;  %v4769_v38 = vpop.permute.xlu2 %1413 }
 0x2d4   :  { %8427 = vst [vmem:[#allocation88_spill] sm:$0xff] %v4767_v28 }
 0x2d5   :  { %8428 = vst [vmem:[#allocation89_spill] sm:$0xff] %v4769_v38 }
 0x2d8   :  { %1611 = vrot.lane.b32.xlu0 %v4439_v53, %s3843_s3  ;;  %1617 = vrot.lane.b32.xlu1 %v4335_v58, %s3843_s3  ;;  %s5535_s3 = sld [smem:[#allocation8 + $0x5]] }
 0x2d9   :  { %1665 = vrot.lane.b32.xlu2 %v4467_v30, %s3844_s4 }
 0x2da   :  { %v4775_v16 = vpop.permute.xlu1 %1331  ;;  %v4777_v13 = vpop.permute.xlu0 %1310 }
 0x2db   :  { %8429 = vst [vmem:[#allocation90_spill] sm:$0xff] %v4775_v16  ;;  %v4779_v50 = vpop.permute.xlu2 %1422 }
 0x2dc   :  { %8430 = vst [vmem:[#allocation91_spill] sm:$0xff] %v4777_v13 }
 0x2dd   :  { %8431 = vst [vmem:[#allocation92_spill] sm:$0xff] %v4779_v50 }
 0x2e0   :  { %1637 = vrot.lane.b32.xlu0 %v4451_v25, %s3844_s4  ;;  %1644 = vrot.lane.b32.xlu1 %v4303_v44, %s3844_s4 }
 0x2e1   :  { %1673 = vrot.lane.b32.xlu2 %v4335_v58, %s3844_s4 }
 0x2e2   :  { %v4787_v38 = vpop.permute.xlu1 %1357  ;;  %v4789_v28 = vpop.permute.xlu0 %1335 }
 0x2e3   :  { %8432 = vst [vmem:[#allocation93_spill] sm:$0xff] %v4787_v38  ;;  %v4791_v42 = vpop.permute.xlu2 %1447 }
 0x2e4   :  { %8433 = vst [vmem:[#allocation94_spill] sm:$0xff] %v4789_v28 }
 0x2e5   :  { %8434 = vst [vmem:[#allocation95_spill] sm:$0xff] %v4791_v42 }
 0x2e8   :  { %1646 = vrot.lane.b32.xlu0 %v4305_v45, %s3844_s4  ;;  %1667 = vrot.lane.b32.xlu1 %v4439_v53, %s3844_s4 }
 0x2e9   :  { %1700 = vrot.lane.b32.xlu2 %v4303_v44, %s3845_s11 }
 0x2ea   :  { %v4798_v50 = vpop.permute.xlu1 %1366  ;;  %v4800_v16 = vpop.permute.xlu0 %1359 }
 0x2eb   :  { %8435 = vst [vmem:[#allocation96_spill] sm:$0xff] %v4798_v50  ;;  %v4802_v13 = vpop.permute.xlu2 %1471 }
 0x2ec   :  { %8436 = vst [vmem:[#allocation97_spill] sm:$0xff] %v4800_v16 }
 0x2ed   :  { %8437 = vst [vmem:[#allocation98_spill] sm:$0xff] %v4802_v13 }
 0x2f0   :  { %1671 = vrot.lane.b32.xlu0 %v4333_v57, %s3844_s4  ;;  %1693 = vrot.lane.b32.xlu1 %v4451_v25, %s3845_s11 }
 0x2f1   :  { %1723 = vrot.lane.b32.xlu2 %v4439_v53, %s3845_s11 }
 0x2f2   :  { %v4808_v42 = vpop.permute.xlu1 %1391  ;;  %v4810_v38 = vpop.permute.xlu0 %1385 }
 0x2f3   :  { %8438 = vst [vmem:[#allocation99_spill] sm:$0xff] %v4808_v42  ;;  %v4812_v28 = vpop.permute.xlu2 %1497 }
 0x2f4   :  { %8439 = vst [vmem:[#allocation100_spill] sm:$0xff] %v4810_v38 }
 0x2f5   :  { %8440 = vst [vmem:[#allocation101_spill] sm:$0xff] %v4812_v28 }
 0x2f8   :  { %1695 = vrot.lane.b32.xlu0 %v4453_v27, %s3845_s11  ;;  %1702 = vrot.lane.b32.xlu1 %v4305_v45, %s3845_s11 }
 0x2f9   :  { %1749 = vrot.lane.b32.xlu2 %v4451_v25, %s3846_s12 }
 0x2fa   :  { %v4817_v13 = vpop.permute.xlu1 %1415  ;;  %v4819_v16 = vpop.permute.xlu0 %1393 }
 0x2fb   :  { %8441 = vst [vmem:[#allocation102_spill] sm:$0xff] %v4817_v13  ;;  %v4821_v50 = vpop.permute.xlu2 %1505 }
 0x2fc   :  { %8442 = vst [vmem:[#allocation103_spill] sm:$0xff] %v4819_v16 }
 0x2fd   :  { %8443 = vst [vmem:[#allocation104_spill] sm:$0xff] %v4821_v50 }
 0x300   :  { %1727 = vrot.lane.b32.xlu1 %v4333_v57, %s3845_s11  ;;  %1721 = vrot.lane.b32.xlu0 %v4467_v30, %s3845_s11 }
 0x301   :  { %1758 = vrot.lane.b32.xlu2 %v4305_v45, %s3846_s12 }
 0x302   :  { %v4826_v28 = vpop.permute.xlu1 %1441  ;;  %v4828_v42 = vpop.permute.xlu0 %1420 }
 0x303   :  { %8444 = vst [vmem:[#allocation105_spill] sm:$0xff] %v4826_v28  ;;  %v4830_v38 = vpop.permute.xlu2 %1532 }
 0x304   :  { %8445 = vst [vmem:[#allocation106_spill] sm:$0xff] %v4828_v42 }
 0x305   :  { %8446 = vst [vmem:[#allocation107_spill] sm:$0xff] %v4830_v38 }
 0x308   :  { %1751 = vrot.lane.b32.xlu1 %v4453_v27, %s3846_s12  ;;  %1729 = vrot.lane.b32.xlu0 %v4335_v58, %s3845_s11  ;;  %s5553_s11 = sld [smem:[#allocation8 + $0x6]] }
 0x309   :  { %1783 = vrot.lane.b32.xlu2 %v4333_v57, %s3846_s12 }
 0x30a   :  { %v4835_v13 = vpop.permute.xlu1 %1449  ;;  %v4837_v50 = vpop.permute.xlu0 %1443 }
 0x30b   :  { %8447 = vst [vmem:[#allocation108_spill] sm:$0xff] %v4835_v13  ;;  %v4839_v16 = vpop.permute.xlu2 %1555 }
 0x30c   :  { %8448 = vst [vmem:[#allocation109_spill] sm:$0xff] %v4837_v50 }
 0x30d   :  { %8449 = vst [vmem:[#allocation110_spill] sm:$0xff] %v4839_v16 }
 0x310   :  { %1777 = vrot.lane.b32.xlu1 %v4467_v30, %s3846_s12  ;;  %1756 = vrot.lane.b32.xlu0 %v4303_v44, %s3846_s12 }
 0x311   :  { %1807 = vrot.lane.b32.xlu2 %v4453_v27, %s3847_s5 }
 0x312   :  { %v4844_v38 = vpop.permute.xlu1 %1476  ;;  %v4846_v28 = vpop.permute.xlu0 %1469 }
 0x313   :  { %8450 = vst [vmem:[#allocation111_spill] sm:$0xff] %v4844_v38  ;;  %v4848_v42 = vpop.permute.xlu2 %1581 }
 0x314   :  { %8451 = vst [vmem:[#allocation112_spill] sm:$0xff] %v4846_v28 }
 0x315   :  { %8452 = vst [vmem:[#allocation113_spill] sm:$0xff] %v4848_v42 }
 0x318   :  { %1785 = vrot.lane.b32.xlu1 %v4335_v58, %s3846_s12  ;;  %1779 = vrot.lane.b32.xlu0 %v4439_v53, %s3846_s12  ;;  %s5588_s12 = sld [smem:[#allocation8 + $0x7]] }
 0x319   :  { %1833 = vrot.lane.b32.xlu2 %v4467_v30, %s3847_s5 }
 0x31a   :  { %v4853_v16 = vpop.permute.xlu1 %1499  ;;  %v4855_v50 = vpop.permute.xlu0 %1478 }
 0x31b   :  { %8453 = vst [vmem:[#allocation114_spill] sm:$0xff] %v4853_v16  ;;  %v4857_v13 = vpop.permute.xlu2 %1590 }
 0x31c   :  { %8454 = vst [vmem:[#allocation115_spill] sm:$0xff] %v4855_v50 }
 0x31d   :  { %8455 = vst [vmem:[#allocation116_spill] sm:$0xff] %v4857_v13 }
 0x320   :  { %1812 = vrot.lane.b32.xlu1 %v4303_v44, %s3847_s5  ;;  %1805 = vrot.lane.b32.xlu0 %v4451_v25, %s3847_s5 }
 0x321   :  { %1841 = vrot.lane.b32.xlu2 %v4335_v58, %s3847_s5 }
 0x322   :  { %v4862_v28 = vpop.permute.xlu1 %1525  ;;  %v4864_v42 = vpop.permute.xlu0 %1503 }
 0x323   :  { %8456 = vst [vmem:[#allocation117_spill] sm:$0xff] %v4862_v28  ;;  %v4866_v38 = vpop.permute.xlu2 %1615 }
 0x324   :  { %8457 = vst [vmem:[#allocation118_spill] sm:$0xff] %v4864_v42 }
 0x325   :  { %8458 = vst [vmem:[#allocation119_spill] sm:$0xff] %v4866_v38 }
 0x328   :  { %1835 = vrot.lane.b32.xlu1 %v4439_v53, %s3847_s5  ;;  %1814 = vrot.lane.b32.xlu0 %v4305_v45, %s3847_s5 }
 0x329   :  { %1868 = vrot.lane.b32.xlu2 %v4303_v44, %s3848_s13 }
 0x32a   :  { %v4871_v13 = vpop.permute.xlu1 %1534  ;;  %v4873_v16 = vpop.permute.xlu0 %1527 }
 0x32b   :  { %8459 = vst [vmem:[#allocation120_spill] sm:$0xff] %v4871_v13  ;;  %v4875_v50 = vpop.permute.xlu2 %1639 }
 0x32c   :  { %8460 = vst [vmem:[#allocation121_spill] sm:$0xff] %v4873_v16 }
 0x32d   :  { %8461 = vst [vmem:[#allocation122_spill] sm:$0xff] %v4875_v50 }
 0x330   :  { %1861 = vrot.lane.b32.xlu1 %v4451_v25, %s3848_s13  ;;  %1839 = vrot.lane.b32.xlu0 %v4333_v57, %s3847_s5  ;;  %s3855_s5 = smov 113  }
 0x331   :  { %1891 = vrot.lane.b32.xlu2 %v4439_v53, %s3848_s13 }
 0x332   :  { %v4880_v38 = vpop.permute.xlu1 %1559  ;;  %v4882_v28 = vpop.permute.xlu0 %1553 }
 0x333   :  { %8462 = vst [vmem:[#allocation123_spill] sm:$0xff] %v4880_v38  ;;  %v4884_v42 = vpop.permute.xlu2 %1665 }
 0x334   :  { %8463 = vst [vmem:[#allocation124_spill] sm:$0xff] %v4882_v28 }
 0x335   :  { %8464 = vst [vmem:[#allocation125_spill] sm:$0xff] %v4884_v42 }
 0x338   :  { %1870 = vrot.lane.b32.xlu1 %v4305_v45, %s3848_s13  ;;  %1863 = vrot.lane.b32.xlu0 %v4453_v27, %s3848_s13 }
 0x339   :  { %1917 = vrot.lane.b32.xlu2 %v4451_v25, %s3823_s30 }
 0x33a   :  { %v4890_v50 = vpop.permute.xlu1 %1583  ;;  %v4892_v16 = vpop.permute.xlu0 %1561 }
 0x33b   :  { %8465 = vst [vmem:[#allocation126_spill] sm:$0xff] %v4890_v50  ;;  %v4894_v13 = vpop.permute.xlu2 %1673 }
 0x33c   :  { %8466 = vst [vmem:[#allocation127_spill] sm:$0xff] %v4892_v16 }
 0x33d   :  { %8467 = vst [vmem:[#allocation128_spill] sm:$0xff] %v4894_v13 }
 0x340   :  { %1895 = vrot.lane.b32.xlu1 %v4333_v57, %s3848_s13  ;;  %1889 = vrot.lane.b32.xlu0 %v4467_v30, %s3848_s13 }
 0x341   :  { %1926 = vrot.lane.b32.xlu2 %v4305_v45, %s3823_s30 }
 0x342   :  { %v4900_v42 = vpop.permute.xlu1 %1609  ;;  %v4902_v38 = vpop.permute.xlu0 %1588 }
 0x343   :  { %8468 = vst [vmem:[#allocation129_spill] sm:$0xff] %v4900_v42  ;;  %v4904_v28 = vpop.permute.xlu2 %1700 }
 0x344   :  { %8469 = vst [vmem:[#allocation130_spill] sm:$0xff] %v4902_v38 }
 0x345   :  { %8470 = vst [vmem:[#allocation131_spill] sm:$0xff] %v4904_v28 }
 0x348   :  { %1919 = vrot.lane.b32.xlu1 %v4453_v27, %s3823_s30  ;;  %1897 = vrot.lane.b32.xlu0 %v4335_v58, %s3848_s13  ;;  %s5670_s13 = sld [smem:[#allocation8 + $0x8]] }
 0x349   :  { %1951 = vrot.lane.b32.xlu2 %v4333_v57, %s3823_s30 }
 0x34a   :  { %v4911_v13 = vpop.permute.xlu1 %1617  ;;  %v4913_v50 = vpop.permute.xlu0 %1611 }
 0x34b   :  { %8471 = vst [vmem:[#allocation132_spill] sm:$0xff] %v4911_v13  ;;  %v4915_v16 = vpop.permute.xlu2 %1723 }
 0x34c   :  { %8472 = vst [vmem:[#allocation133_spill] sm:$0xff] %v4913_v50 }
 0x34d   :  { %8473 = vst [vmem:[#allocation134_spill] sm:$0xff] %v4915_v16 }
 0x350   :  { %1945 = vrot.lane.b32.xlu1 %v4467_v30, %s3823_s30  ;;  %1924 = vrot.lane.b32.xlu0 %v4303_v44, %s3823_s30 }
 0x351   :  { %1975 = vrot.lane.b32.xlu2 %v4453_v27, %s3849_s14 }
 0x352   :  { %v4922_v28 = vpop.permute.xlu1 %1644  ;;  %v4924_v42 = vpop.permute.xlu0 %1637 }
 0x353   :  { %8474 = vst [vmem:[#allocation135_spill] sm:$0xff] %v4922_v28  ;;  %v4926_v38 = vpop.permute.xlu2 %1749 }
 0x354   :  { %8475 = vst [vmem:[#allocation136_spill] sm:$0xff] %v4924_v42 }
 0x355   :  { %8476 = vst [vmem:[#allocation137_spill] sm:$0xff] %v4926_v38 }
 0x358   :  { %1953 = vrot.lane.b32.xlu1 %v4335_v58, %s3823_s30  ;;  %1947 = vrot.lane.b32.xlu0 %v4439_v53, %s3823_s30  ;;  %s3850_s30 = smov 127  }
 0x359   :  { %2001 = vrot.lane.b32.xlu2 %v4467_v30, %s3849_s14 }
 0x35a   :  { %v4933_v16 = vpop.permute.xlu1 %1667  ;;  %v4935_v50 = vpop.permute.xlu0 %1646 }
 0x35b   :  { %8477 = vst [vmem:[#allocation138_spill] sm:$0xff] %v4933_v16  ;;  %v4937_v13 = vpop.permute.xlu2 %1758 }
 0x35c   :  { %8478 = vst [vmem:[#allocation139_spill] sm:$0xff] %v4935_v50 }
 0x35d   :  { %8479 = vst [vmem:[#allocation140_spill] sm:$0xff] %v4937_v13 }
 0x360   :  { %1980 = vrot.lane.b32.xlu1 %v4303_v44, %s3849_s14  ;;  %1973 = vrot.lane.b32.xlu0 %v4451_v25, %s3849_s14 }
 0x361   :  { %2009 = vrot.lane.b32.xlu2 %v4335_v58, %s3849_s14 }
 0x362   :  { %v4942_v38 = vpop.permute.xlu1 %1693  ;;  %v4944_v42 = vpop.permute.xlu0 %1671 }
 0x363   :  { %8480 = vst [vmem:[#allocation141_spill] sm:$0xff] %v4942_v38  ;;  %v4946_v28 = vpop.permute.xlu2 %1783 }
 0x364   :  { %8481 = vst [vmem:[#allocation142_spill] sm:$0xff] %v4944_v42 }
 0x365   :  { %8482 = vst [vmem:[#allocation143_spill] sm:$0xff] %v4946_v28 }
 0x368   :  { %2003 = vrot.lane.b32.xlu1 %v4439_v53, %s3849_s14  ;;  %1982 = vrot.lane.b32.xlu0 %v4305_v45, %s3849_s14 }
 0x369   :  { %2067 = vrot.lane.b32.xlu2 %v4303_v44, %s3850_s30 }
 0x36a   :  { %v4951_v13 = vpop.permute.xlu1 %1702  ;;  %v4953_v16 = vpop.permute.xlu0 %1695 }
 0x36b   :  { %8483 = vst [vmem:[#allocation144_spill] sm:$0xff] %v4951_v13  ;;  %v4955_v50 = vpop.permute.xlu2 %1807 }
 0x36c   :  { %8484 = vst [vmem:[#allocation145_spill] sm:$0xff] %v4953_v16 }
 0x36d   :  { %8485 = vst [vmem:[#allocation146_spill] sm:$0xff] %v4955_v50 }
 0x370   :  { %2060 = vrot.lane.b32.xlu1 %v4451_v25, %s3850_s30  ;;  %2007 = vrot.lane.b32.xlu0 %v4333_v57, %s3849_s14  ;;  %s5683_s14 = sld [smem:[#allocation8 + $0x9]] }
 0x371   :  { %2090 = vrot.lane.b32.xlu2 %v4439_v53, %s3850_s30 }
 0x372   :  { %v4960_v28 = vpop.permute.xlu1 %1727  ;;  %v4962_v38 = vpop.permute.xlu0 %1721 }
 0x373   :  { %8486 = vst [vmem:[#allocation147_spill] sm:$0xff] %v4960_v28  ;;  %v4964_v42 = vpop.permute.xlu2 %1833 }
 0x374   :  { %8487 = vst [vmem:[#allocation148_spill] sm:$0xff] %v4962_v38 }
 0x375   :  { %8488 = vst [vmem:[#allocation149_spill] sm:$0xff] %v4964_v42 }
 0x378   :  { %2069 = vrot.lane.b32.xlu1 %v4305_v45, %s3850_s30  ;;  %2062 = vrot.lane.b32.xlu0 %v4453_v27, %s3850_s30 }
 0x379   :  { %2116 = vrot.lane.b32.xlu2 %v4451_v25, %s3851_s15 }
 0x37a   :  { %v4970_v50 = vpop.permute.xlu1 %1751  ;;  %v4972_v16 = vpop.permute.xlu0 %1729 }
 0x37b   :  { %8489 = vst [vmem:[#allocation150_spill] sm:$0xff] %v4970_v50  ;;  %v4974_v13 = vpop.permute.xlu2 %1841 }
 0x37c   :  { %8490 = vst [vmem:[#allocation151_spill] sm:$0xff] %v4972_v16 }
 0x37d   :  { %8491 = vst [vmem:[#allocation152_spill] sm:$0xff] %v4974_v13 }
 0x380   :  { %2094 = vrot.lane.b32.xlu1 %v4333_v57, %s3850_s30  ;;  %2088 = vrot.lane.b32.xlu0 %v4467_v30, %s3850_s30 }
 0x381   :  { %2125 = vrot.lane.b32.xlu2 %v4305_v45, %s3851_s15 }
 0x382   :  { %v4980_v42 = vpop.permute.xlu1 %1777  ;;  %v4982_v38 = vpop.permute.xlu0 %1756 }
 0x383   :  { %8492 = vst [vmem:[#allocation153_spill] sm:$0xff] %v4980_v42  ;;  %v4984_v28 = vpop.permute.xlu2 %1868 }
 0x384   :  { %8493 = vst [vmem:[#allocation154_spill] sm:$0xff] %v4982_v38  ;;  %v2032_v38 = vstv %s3561_s0  ;;  %s5805_s0 = sld [smem:[#allocation8 + $0xb]] }
 0x385   :  { %8494 = vst [vmem:[#allocation155_spill] sm:$0xff] %v4984_v28  ;;  %v2034_v61 = vmul.f32 %v2032_v38, %v4305_v45  ;;  %v2046_v5 = vmul.f32 %v2032_v38, %v4333_v57 }
 0x388   :  { %2118 = vrot.lane.b32.xlu1 %v4453_v27, %s3851_s15  ;;  %2096 = vrot.lane.b32.xlu0 %v4335_v58, %s3850_s30  ;;  %s5769_s30 = sld [smem:[#allocation8 + $0xa]] }
 0x389   :  { %2150 = vrot.lane.b32.xlu2 %v4333_v57, %s3851_s15 }
 0x38a   :  { %v4991_v13 = vpop.permute.xlu1 %1785  ;;  %v4993_v50 = vpop.permute.xlu0 %1779 }
 0x38b   :  { %8495 = vst [vmem:[#allocation156_spill] sm:$0xff] %v4991_v13  ;;  %v4995_v16 = vpop.permute.xlu2 %1891  ;;  %v2029_v13 = vstv %s3560_s16  ;;  %s3856_s16 = smov 112  }
 0x38c   :  { %8496 = vst [vmem:[#allocation157_spill] sm:$0xff] %v4993_v50  ;;  %v2031_v12 = vmul.f32 %v2029_v13, %v4453_v27  ;;  %v2030_v56 = vmul.f32 %v2029_v13, %v4451_v25  ;;  %v2044_v17 = vmul.f32 %v2029_v13, %v4467_v30 }
 0x38d   :  { %8497 = vst [vmem:[#allocation158_spill] sm:$0xff] %v4995_v16  ;;  %v686_v16 = vlaneseq }
 0x38f   :  { %v5015_v10 = vand.u32 127, %v686_v16  ;;  %v5033_v16 = vld [vmem:[#allocation6 + $0x6] sm:$0x3] }
 0x390   :  { %2144 = vrot.lane.b32.xlu1 %v4467_v30, %s3851_s15  ;;  %2123 = vrot.lane.b32.xlu0 %v4303_v44, %s3851_s15 }
 0x391   :  { %2174 = vrot.lane.b32.xlu2 %v4453_v27, %s3852_s17  ;;  %vm688_vm2 = vcmp.lt.s32.totalorder %v5015_v10, 51  ;;  %vm745_vm4 = vcmp.lt.s32.totalorder %v5015_v10, 50  ;;  %vm801_vm5 = vcmp.lt.s32.totalorder %v5015_v10, 49  ;;  %vm857_vm6 = vcmp.lt.s32.totalorder %v5015_v10, 48 }
 0x392   :  { %v5003_v28 = vpop.permute.xlu1 %1812  ;;  %v5005_v42 = vpop.permute.xlu0 %1805  ;;  %v695_v41 = vsel %vm688_vm2, %v4400_v49, %v4447_v62  ;;  %vm913_vm7 = vcmp.lt.s32.totalorder %v5015_v10, 47  ;;  %vm969_vm8 = vcmp.lt.s32.totalorder %v5015_v10, 46  ;;  %vm1025_vm9 = vcmp.lt.s32.totalorder %v5015_v10, 45 }
 0x393   :  { %8498 = vst [vmem:[#allocation159_spill] sm:$0xff] %v5003_v28  ;;  %v5007_v50 = vpop.permute.xlu2 %1917  ;;  %vm1081_vm10 = vcmp.lt.s32.totalorder %v5015_v10, 35  ;;  %vm1137_vm11 = vcmp.lt.s32.totalorder %v5015_v10, 34  ;;  %vm1193_vm12 = vcmp.lt.s32.totalorder %v5015_v10, 33  ;;  %vm1249_vm13 = vcmp.lt.s32.totalorder %v5015_v10, 32 }
 0x394   :  { %8499 = vst [vmem:[#allocation160_spill] sm:$0xff] %v5005_v42  ;;  %v2036_v42 = vadd.f32 %v2034_v61, %v2031_v12  ;;  %v2033_v61 = vmul.f32 %v2032_v38, %v4303_v44  ;;  %vm1305_vm14 = vcmp.lt.s32.totalorder %v5015_v10, 31  ;;  %vm1361_vm15 = vcmp.lt.s32.totalorder %v5015_v10, 30 }
 0x395   :  { %8500 = vst [vmem:[#allocation161_spill] sm:$0xff] %v5007_v50  ;;  %vm1417_vm0 = vcmp.lt.s32.totalorder %v5015_v10, 29  ;;  %vm1473_vm1 = vcmp.lt.s32.totalorder %v5015_v10, 19 }
 0x396   :  { %v2039_v12 = vrot.slane %v2036_v42, 7  ;;  %v696_v42 = vsel %vm688_vm2, %v4447_v62, %v4400_v49  ;;  %v5065_v62 = vadd.f32 %v2046_v5, %v2044_v17 }
 0x397   :  { %v5084_v17 = vmul.f32 %v700_v14, %v696_v42 }
 0x398   :  { %2152 = vrot.lane.b32.xlu1 %v4335_v58, %s3851_s15  ;;  %2146 = vrot.lane.b32.xlu0 %v4439_v53, %s3851_s15  ;;  %8506 = vst [vmem:[#allocation167_spill] sm:$0xff] %v5065_v62  ;;  %s5797_s15 = sld [smem:[#allocation8 + $0x3c]] }
 0x399   :  { %2200 = vrot.lane.b32.xlu2 %v4467_v30, %s3852_s17  ;;  %v757_v30 = vstv %s5019_s19  ;;  %s3857_s19 = smov 111  }
 0x39a   :  { %v5021_v50 = vpop.permute.xlu1 %1835  ;;  %v5023_v28 = vpop.permute.xlu0 %1814 }
 0x39b   :  { %8501 = vst [vmem:[#allocation162_spill] sm:$0xff] %v5021_v50  ;;  %v5027_v24 = vpop.permute.xlu2 %1926  ;;  %v668_v50 = vld [vmem:[#allocation2 + $0x6] sm:$0x3] }
 0x39c   :  { %8502 = vst [vmem:[#allocation163_spill] sm:$0xff] %v5023_v28  ;;  %v2045_v28 = vmul.f32 %v2029_v13, %v4439_v53  ;;  %v2047_v13 = vmul.f32 %v2032_v38, %v4335_v58  ;;  %v724_v38 = vsel %vm688_vm2, %v4463_v23, %v4461_v6 }
 0x39d   :  { %8503 = vst [vmem:[#allocation164_spill] sm:$0xff] %v5027_v24  ;;  %v2035_v24 = vadd.f32 %v2033_v61, %v2030_v56  ;;  %v5060_v56 = vmul.f32 %v5033_v16, %v668_v50  ;;  %v723_v61 = vsel %vm688_vm2, %v4461_v6, %v4463_v23  ;;  %v779_v6 = vsel %vm745_vm4, %v4429_v47, %v4475_v32 }
 0x39e   :  { %v5082_v5 = vadd.f32 %v2047_v13, %v2045_v28  ;;  %v780_v28 = vsel %vm745_vm4, %v4475_v32, %v4429_v47  ;;  %v752_v23 = vsel %vm745_vm4, %v4477_v36, %v4417_v2  ;;  %v5108_v42 = vmul.f32 %v724_v38, %v700_v14 }
 0x39f   :  { %8504 = vst [vmem:[#allocation165_spill] sm:$0xff] %v5060_v56  ;;  %v5063_v49 = vsel %vm708_vm3, %v2035_v24, %v2039_v12  ;;  %v5086_v12 = vmul.f32 %v700_v14, %v695_v41  ;;  %v753_v41 = vsel %vm745_vm4, %v4417_v2, %v4477_v36  ;;  %v5110_v13 = vmul.f32 %v723_v61, %v700_v14 }
 0x3a0   :  { %2179 = vrot.lane.b32.xlu1 %v4303_v44, %s3852_s17  ;;  %2172 = vrot.lane.b32.xlu0 %v4451_v25, %s3852_s17  ;;  %8505 = vst [vmem:[#allocation166_spill] sm:$0xff] %v5063_v49  ;;  %v813_v49 = vstv %s5025_s20  ;;  %v808_v47 = vsel %vm801_vm5, %v4487_v4, %v4489_v22  ;;  %v809_v2 = vsel %vm801_vm5, %v4489_v22, %v4487_v4  ;;  %v925_v32 = vstv %s5037_s21  ;;  %s5949_s20 = sld [smem:[#allocation8 + $0xd]] }
 0x3a1   :  { %2208 = vrot.lane.b32.xlu2 %v4335_v58, %s3852_s17  ;;  %8509 = vst [vmem:[#allocation170_spill] sm:$0xff] %v5082_v5  ;;  %v5126_v14 = vmul.f32 %v780_v28, %v757_v30  ;;  %v5128_v36 = vmul.f32 %v779_v6, %v757_v30  ;;  %v5130_v61 = vmul.f32 %v757_v30, %v753_v41  ;;  %v981_v22 = vstv %s5049_s22  ;;  %s5990_s21 = sld [smem:[#allocation8 + $0x3f]] }
 0x3a2   :  { %v5078_v50 = vpop.permute.xlu1 %1861  ;;  %v5080_v24 = vpop.permute.xlu0 %1839  ;;  %v5132_v38 = vmul.f32 %v757_v30, %v752_v23  ;;  %v865_v4 = vsel %vm857_vm6, %v4499_v11, %v4449_v7  ;;  %v5148_v30 = vmul.f32 %v813_v49, %v809_v2  ;;  %v5150_v6 = vmul.f32 %v813_v49, %v808_v47  ;;  %s6011_s22 = sld [smem:[#allocation8 + $0xe]] }
 0x3a3   :  { %8507 = vst [vmem:[#allocation168_spill] sm:$0xff] %v5078_v50  ;;  %v5090_v56 = vpop.permute.xlu2 %1951  ;;  %v864_v50 = vsel %vm857_vm6, %v4449_v7, %v4499_v11  ;;  %v835_v28 = vsel %vm801_vm5, %v4501_v8, %v4437_v46  ;;  %v836_v7 = vsel %vm801_vm5, %v4437_v46, %v4501_v8  ;;  %v891_v11 = vsel %vm857_vm6, %v4511_v34, %v4513_v31 }
 0x3a4   :  { %8508 = vst [vmem:[#allocation169_spill] sm:$0xff] %v5080_v24  ;;  %v892_v23 = vsel %vm857_vm6, %v4513_v31, %v4511_v34  ;;  %v1037_v41 = vstv %s5076_s23  ;;  %v947_v24 = vsel %vm913_vm7, %v4479_v15, %v4523_v0  ;;  %v948_v34 = vsel %vm913_vm7, %v4523_v0, %v4479_v15  ;;  %s6049_s23 = sld [smem:[#allocation8 + $0x40]] }
 0x3a5   :  { %8510 = vst [vmem:[#allocation171_spill] sm:$0xff] %v5090_v56  ;;  %v869_v56 = vstv %s5031_s2  ;;  %v5194_v62 = vmul.f32 %v836_v7, %v813_v49  ;;  %v1093_v15 = vstv %s5114_s24  ;;  %v5214_v0 = vmul.f32 %v948_v34, %v925_v32  ;;  %s5971_s2 = sld [smem:[#allocation8 + $0x3e]] }
 0x3a6   :  { %v5180_v47 = vmul.f32 %v869_v56, %v865_v4  ;;  %v5182_v2 = vmul.f32 %v869_v56, %v864_v50  ;;  %v920_v50 = vsel %vm913_vm7, %v4525_v1, %v4465_v26  ;;  %v921_v4 = vsel %vm913_vm7, %v4465_v26, %v4525_v1  ;;  %s6066_s24 = sld [smem:[#allocation8 + $0xf]] }
 0x3a7   :  { %v5208_v5 = vmul.f32 %v891_v11, %v869_v56  ;;  %8514 = vst [vmem:[#allocation175_spill] sm:$0xff] %v5214_v0  ;;  %v977_v26 = vsel %vm969_vm8, %v4537_v20, %v4535_v52  ;;  %v5226_v1 = vmul.f32 %v925_v32, %v921_v4  ;;  %v1033_v7 = vsel %vm1025_vm9, %v4547_v37, %v4503_v29 }
 0x3a8   :  { %2202 = vrot.lane.b32.xlu1 %v4439_v53, %s3852_s17  ;;  %2181 = vrot.lane.b32.xlu0 %v4305_v45, %s3852_s17  ;;  %v5268_v11 = vmul.f32 %v1037_v41, %v1033_v7  ;;  %v1205_v34 = vstv %s5174_s27  ;;  %s6214_s27 = sld [smem:[#allocation8 + $0x10]] }
 0x3a9   :  { %2235 = vrot.lane.b32.xlu2 %v4303_v44, %s3853_s26 }
 0x3aa   :  { %v5176_v46 = vpop.permute.xlu1 %1870  ;;  %v5178_v8 = vpop.permute.xlu0 %1863  ;;  %8517 = vst [vmem:[#allocation178_spill] sm:$0xff] %v5268_v11  ;;  %v8554_v11 = vld [vmem:[#allocation52_spill] sm:$0xff] }
 0x3ab   :  { %8511 = vst [vmem:[#allocation172_spill] sm:$0xff] %v5176_v46  ;;  %v5192_v31 = vpop.permute.xlu2 %1975  ;;  %v5196_v46 = vmul.f32 %v835_v28, %v813_v49  ;;  %v5216_v49 = vmul.f32 %v947_v24, %v925_v32  ;;  %v976_v28 = vsel %vm969_vm8, %v4535_v52, %v4537_v20  ;;  %v1032_v24 = vsel %vm1025_vm9, %v4503_v29, %v4547_v37 }
 0x3ac   :  { %8512 = vst [vmem:[#allocation173_spill] sm:$0xff] %v5178_v8  ;;  %v5206_v8 = vmul.f32 %v892_v23, %v869_v56  ;;  %v5228_v56 = vmul.f32 %v925_v32, %v920_v50  ;;  %v1003_v52 = vsel %vm969_vm8, %v4549_v63, %v4491_v40  ;;  %v1004_v20 = vsel %vm969_vm8, %v4491_v40, %v4549_v63 }
 0x3ad   :  { %8513 = vst [vmem:[#allocation174_spill] sm:$0xff] %v5192_v31  ;;  %v1060_v32 = vsel %vm1025_vm9, %v4561_v18, %v4559_v55  ;;  %v5257_v29 = vmul.f32 %v981_v22, %v977_v26  ;;  %v5259_v37 = vmul.f32 %v981_v22, %v976_v28  ;;  %v1059_v40 = vsel %vm1025_vm9, %v4559_v55, %v4561_v18 }
 0x3ae   :  { %v1149_v63 = vstv %s5160_s25  ;;  %v5270_v23 = vmul.f32 %v1037_v41, %v1032_v24  ;;  %v5280_v28 = vmul.f32 %v1004_v20, %v981_v22  ;;  %v5282_v55 = vmul.f32 %v1003_v52, %v981_v22  ;;  %s3858_s25 = smov 110  }
 0x3af   :  { %8515 = vst [vmem:[#allocation176_spill] sm:$0xff] %v5257_v29  ;;  %v5284_v18 = vmul.f32 %v1060_v32, %v1037_v41  ;;  %v1116_v26 = vsel %vm1081_vm10, %v4571_v3, %v4527_v51  ;;  %v5292_v7 = vmul.f32 %v1059_v40, %v1037_v41  ;;  %v1115_v31 = vsel %vm1081_vm10, %v4527_v51, %v4571_v3  ;;  %v5334_v32 = vld [vmem:[#allocation6] sm:$0x3] }
 0x3b0   :  { %2228 = vrot.lane.b32.xlu1 %v4451_v25, %s3853_s26  ;;  %2206 = vrot.lane.b32.xlu0 %v4333_v57, %s3852_s17  ;;  %8516 = vst [vmem:[#allocation177_spill] sm:$0xff] %v5259_v37  ;;  %v1088_v22 = vsel %vm1081_vm10, %v4573_v59, %v4515_v39  ;;  %v1089_v52 = vsel %vm1081_vm10, %v4515_v39, %v4573_v59  ;;  %v1261_v3 = vstv %s5212_s28  ;;  %s5829_s17 = sld [smem:[#allocation8 + $0x3d]] }
 0x3b1   :  { %2258 = vrot.lane.b32.xlu2 %v4439_v53, %s3853_s26  ;;  %8518 = vst [vmem:[#allocation179_spill] sm:$0xff] %v5270_v23  ;;  %v1144_v41 = vsel %vm1137_vm11, %v4583_v54, %v4585_v60  ;;  %v1145_v51 = vsel %vm1137_vm11, %v4585_v60, %v4583_v54  ;;  %v5318_v20 = vmul.f32 %v1116_v26, %v1093_v15  ;;  %v5332_v60 = vld [vmem:[#allocation2] sm:$0x3]  ;;  %s6228_s28 = sld [smem:[#allocation8 + $0x42]] }
 0x3b2   :  { %v5276_v50 = vpop.permute.xlu1 %1895  ;;  %v5278_v4 = vpop.permute.xlu0 %1889  ;;  %8521 = vst [vmem:[#allocation182_spill] sm:$0xff] %v5280_v28  ;;  %v1200_v39 = vsel %vm1193_vm12, %v4551_v33, %v4595_v43  ;;  %v1201_v59 = vsel %vm1193_vm12, %v4595_v43, %v4551_v33  ;;  %v1172_v54 = vsel %vm1137_vm11, %v4539_v21, %v4597_v19  ;;  %v5336_v40 = vmul.f32 %v1115_v31, %v1093_v15  ;;  %v5346_v43 = vld [vmem:[#allocation6 + $0x2] sm:$0x3] }
 0x3b3   :  { %8519 = vst [vmem:[#allocation180_spill] sm:$0xff] %v5276_v50  ;;  %v5290_v24 = vpop.permute.xlu2 %2001  ;;  %v5338_v26 = vmul.f32 %v1093_v15, %v1089_v52  ;;  %v1171_v33 = vsel %vm1137_vm11, %v4597_v19, %v4539_v21  ;;  %v5350_v50 = vmul.f32 %v1149_v63, %v1144_v41  ;;  %v1228_v31 = vsel %vm1193_vm12, %v4609_v48, %v4607_v9 }
 0x3b4   :  { %8520 = vst [vmem:[#allocation181_spill] sm:$0xff] %v5278_v4  ;;  %v5348_v4 = vmul.f32 %v1149_v63, %v1145_v51  ;;  %v5357_v52 = vstv %s5251_s7  ;;  %v5363_v19 = vmul.f32 %v1205_v34, %v1201_v59  ;;  %v5365_v21 = vmul.f32 %v1205_v34, %v1200_v39  ;;  %s6247_s7 = sld [smem:[#allocation8 + $0x11]] }
 0x3b5   :  { %8522 = vst [vmem:[#allocation183_spill] sm:$0xff] %v5284_v18  ;;  %v5375_v41 = vmul.f32 %v1171_v33, %v1149_v63  ;;  %v1227_v51 = vsel %vm1193_vm12, %v4607_v9, %v4609_v48  ;;  %v5383_v39 = vmul.f32 %v5346_v43, %v5332_v60  ;;  %v754_v59 = vstv %s5274_s8  ;;  %v8541_v9 = vld [vmem:[#allocation43_spill] sm:$0xff]  ;;  %s6271_s8 = sld [smem:[#allocation8 + $0x43]] }
 0x3b6   :  { %8523 = vst [vmem:[#allocation184_spill] sm:$0xff] %v5290_v24  ;;  %v5340_v24 = vmul.f32 %v1093_v15, %v1088_v22  ;;  %v5367_v15 = vmul.f32 %v1172_v54, %v1149_v63  ;;  %v5371_v22 = vmul.f32 %v5334_v32, %v5332_v60  ;;  %v8540_v63 = vld [vmem:[#allocation36_spill] sm:$0xff]  ;;  %v8548_v18 = vld [vmem:[#allocation51_spill] sm:$0xff] }
 0x3b7   :  { %8524 = vst [vmem:[#allocation185_spill] sm:$0xff] %v5292_v7  ;;  %v1283_v33 = vsel %vm1249_vm13, %v8540_v63, %v4618_v35  ;;  %v1284_v48 = vsel %vm1249_vm13, %v4618_v35, %v8540_v63  ;;  %v8549_v35 = vld [vmem:[#allocation41_spill] sm:$0xff] }
 0x3b8   :  { %8525 = vst [vmem:[#allocation186_spill] sm:$0xff] %v5318_v20  ;;  %2237 = vrot.lane.b32.xlu1 %v4305_v45, %s3853_s26  ;;  %2230 = vrot.lane.b32.xlu0 %v4453_v27, %s3853_s26  ;;  %v810_v20 = vstv %s5306_s29  ;;  %v829_v63 = vsel %vm801_vm5, %v8549_v35, %v8548_v18  ;;  %v5435_v28 = vmul.f32 %v1284_v48, %v1261_v3  ;;  %s6284_s29 = sld [smem:[#allocation8 + $0x12]] }
 0x3b9   :  { %8526 = vst [vmem:[#allocation187_spill] sm:$0xff] %v5334_v32  ;;  %2284 = vrot.lane.b32.xlu2 %v4451_v25, %s3854_s9  ;;  %v8551_v25 = vld [vmem:[#allocation37_spill] sm:$0xff]  ;;  %v5446_v32 = vld [vmem:[#allocation6 + $0x4] sm:$0x3]  ;;  %v5448_v0 = vmul.f32 %v1283_v33, %v1261_v3 }
 0x3ba   :  { %8527 = vst [vmem:[#allocation188_spill] sm:$0xff] %v5336_v40  ;;  %v5388_v54 = vpop.permute.xlu1 %1919  ;;  %v8552_v40 = vld [vmem:[#allocation46_spill] sm:$0xff] }
 0x3bb   :  { %8528 = vst [vmem:[#allocation189_spill] sm:$0xff] %v5338_v26  ;;  %v5421_v26 = vmul.f32 %v1227_v51, %v1205_v34  ;;  %v717_v7 = vsel %vm688_vm2, %v8552_v40, %v8551_v25 }
 0x3bc   :  { %8529 = vst [vmem:[#allocation190_spill] sm:$0xff] %v5340_v24  ;;  %v8553_v24 = vld [vmem:[#allocation39_spill] sm:$0xff] }
 0x3bd   :  { %8530 = vst [vmem:[#allocation191_spill] sm:$0xff] %v5346_v43  ;;  %v802_v29 = vsel %vm801_vm5, %v8554_v11, %v8553_v24 }
 0x3be   :  { %8531 = vst [vmem:[#allocation192_spill] sm:$0xff] %v5348_v4  ;;  %v5392_v4 = vmul.f32 %v1228_v31, %v1205_v34  ;;  %v8545_v31 = vld [vmem:[#allocation35_spill] sm:$0xff] }
 0x3bf   :  { %8532 = vst [vmem:[#allocation193_spill] sm:$0xff] %v5350_v50  ;;  %v8547_v50 = vld [vmem:[#allocation38_spill] sm:$0xff] }
 0x3c0   :  { %8533 = vst [vmem:[#allocation194_spill] sm:$0xff] %v5363_v19  ;;  %v5390_v19 = vpop.permute.xlu0 %1897  ;;  %2262 = vrot.lane.b32.xlu1 %v4333_v57, %s3853_s26 }
 0x3c1   :  { %8534 = vst [vmem:[#allocation195_spill] sm:$0xff] %v5365_v21  ;;  %v8546_v21 = vld [vmem:[#allocation45_spill] sm:$0xff]  ;;  %2293 = vrot.lane.b32.xlu2 %v4305_v45, %s3854_s9 }
 0x3c2   :  { %8535 = vst [vmem:[#allocation196_spill] sm:$0xff] %v5367_v15  ;;  %v8542_v15 = vld [vmem:[#allocation42_spill] sm:$0xff] }
 0x3c3   :  { %8536 = vst [vmem:[#allocation197_spill] sm:$0xff] %v5375_v41  ;;  %v689_v43 = vsel %vm688_vm2, %v8542_v15, %v8541_v9  ;;  %v746_v41 = vsel %vm745_vm4, %v8547_v50, %v8546_v21  ;;  %v690_v34 = vsel %vm688_vm2, %v8541_v9, %v8542_v15  ;;  %v812_v15 = vmul.f32 %v810_v20, %v802_v29  ;;  %v8559_v9 = vld [vmem:[#allocation34_spill] sm:$0xff] }
 0x3c4   :  { %8537 = vst [vmem:[#allocation198_spill] sm:$0xff] %v5388_v54  ;;  %v5406_v54 = vpop.permute.xlu2 %2009  ;;  %v699_v51 = vmul.f32 %v5357_v52, %v689_v43  ;;  %v756_v48 = vmul.f32 %v754_v59, %v746_v41  ;;  %v726_v43 = vmul.f32 %v717_v7, %v5357_v52  ;;  %2256 = vrot.lane.b32.xlu0 %v8559_v9, %s3853_s26 }
 0x3c5   :  { %8538 = vst [vmem:[#allocation199_spill] sm:$0xff] %v5390_v19  ;;  %v8544_v19 = vld [vmem:[#allocation40_spill] sm:$0xff]  ;;  %v698_v33 = vmul.f32 %v5357_v52, %v690_v34  ;;  %v718_v7 = vsel %vm688_vm2, %v8551_v25, %v8552_v40  ;;  %v803_v25 = vsel %vm801_vm5, %v8553_v24, %v8554_v11  ;;  %v8562_v40 = vld [vmem:[#allocation55_spill] sm:$0xff]  ;;  %v8563_v34 = vld [vmem:[#allocation54_spill] sm:$0xff]  ;;  %vm1529_vm2 = vcmp.lt.s32.totalorder %v5015_v10, 18 }
 0x3c6   :  { %8539 = vst [vmem:[#allocation200_spill] sm:$0xff] %v5392_v4  ;;  %v1257_v4 = vsel %vm1249_vm13, %v8545_v31, %v8544_v19  ;;  %v704_v29 = vadd.f32 %v5086_v12, %v699_v51 }
 0x3c7   :  { %8543 = vst [vmem:[#allocation36_spill] sm:$0xff] %v5406_v54  ;;  %v1256_v54 = vsel %vm1249_vm13, %v8544_v19, %v8545_v31  ;;  %v8556_v19 = vld [vmem:[#allocation49_spill] sm:$0xff]  ;;  %v8557_v31 = vld [vmem:[#allocation48_spill] sm:$0xff]  ;;  %v5450_v23 = vmul.f32 %v1261_v3, %v1257_v4  ;;  %v747_v4 = vsel %vm745_vm4, %v8546_v21, %v8547_v50  ;;  %v830_v50 = vsel %vm801_vm5, %v8548_v18, %v8549_v35  ;;  %v5484_v21 = vpop.permute.xlu1 %1945 }
 0x3c8   :  { %8550 = vst [vmem:[#allocation43_spill] sm:$0xff] %v5421_v26  ;;  %v773_v26 = vsel %vm745_vm4, %v8557_v31, %v8556_v19  ;;  %v5454_v37 = vmul.f32 %v1261_v3, %v1256_v54  ;;  %v5468_v3 = vmul.f32 %v5446_v32, %v5332_v60  ;;  %v5486_v54 = vpop.permute.xlu0 %1924  ;;  %v858_v18 = vsel %vm857_vm6, %v8563_v34, %v8562_v40 }
 0x3c9   :  { %8555 = vst [vmem:[#allocation42_spill] sm:$0xff] %v5435_v28  ;;  %v838_v28 = vmul.f32 %v829_v63, %v810_v20  ;;  %v782_v41 = vmul.f32 %v773_v26, %v754_v59  ;;  %v5482_v26 = vstv %s5386_s1  ;;  %v761_v63 = vadd.f32 %v5132_v38, %v756_v48  ;;  %2286 = vrot.lane.b32.xlu1 %v4453_v27, %s3854_s9  ;;  %s6419_s1 = sld [smem:[#allocation8 + $0x44]] }
 0x3ca   :  { %8558 = vst [vmem:[#allocation40_spill] sm:$0xff] %v5450_v23  ;;  %v755_v51 = vmul.f32 %v754_v59, %v747_v4  ;;  %v774_v38 = vsel %vm745_vm4, %v8556_v19, %v8557_v31  ;;  %v703_v11 = vadd.f32 %v5084_v17, %v698_v33  ;;  %v837_v24 = vmul.f32 %v830_v50, %v810_v20  ;;  %v8566_v33 = vld [vmem:[#allocation47_spill] sm:$0xff] }
 0x3cb   :  { %8560 = vst [vmem:[#allocation35_spill] sm:$0xff] %v5484_v21  ;;  %v842_v12 = vadd.f32 %v5196_v46, %v838_v28  ;;  %v817_v46 = vadd.f32 %v5150_v6, %v812_v15  ;;  %v786_v28 = vadd.f32 %v5128_v36, %v782_v41  ;;  %v5510_v48 = vmul.f32 %v5033_v16, %v5332_v60  ;;  %v8565_v15 = vld [vmem:[#allocation57_spill] sm:$0xff] }
 0x3cc   :  { %8561 = vst [vmem:[#allocation45_spill] sm:$0xff] %v5486_v54  ;;  %v5498_v35 = vpop.permute.xlu2 %2067  ;;  %v730_v54 = vadd.f32 %v5110_v13, %v726_v43  ;;  %v725_v4 = vmul.f32 %v718_v7, %v5357_v52  ;;  %v811_v13 = vmul.f32 %v810_v20, %v803_v25  ;;  %v868_v43 = vmul.f32 %v5482_v26, %v858_v18 }
 0x3cd   :  { %8564 = vst [vmem:[#allocation38_spill] sm:$0xff] %v5498_v35  ;;  %v707_v35 = vrot.slane %v704_v29, 7  ;;  %v764_v21 = vrot.slane %v761_v63, 7  ;;  %v781_v23 = vmul.f32 %v774_v38, %v754_v59  ;;  %v845_v19 = vrot.slane %v842_v12, 7  ;;  %2264 = vrot.lane.b32.xlu0 %v4335_v58, %s3853_s26  ;;  %v8567_v59 = vld [vmem:[#allocation44_spill] sm:$0xff]  ;;  %v8568_v29 = vld [vmem:[#allocation58_spill] sm:$0xff]  ;;  %2318 = vrot.lane.b32.xlu2 %v4333_v57, %s3854_s9 }
 0x3ce   :  { %v5515_v31 = vstv %s5452_s10  ;;  %v760_v17 = vadd.f32 %v5130_v61, %v755_v51  ;;  %v733_v6 = vrot.slane %v730_v54, 7  ;;  %v820_v36 = vrot.slane %v817_v46, 7  ;;  %v5543_v12 = vld [vmem:[#allocation6 + $0x8] sm:$0x3]  ;;  %s6204_s26 = sld [smem:[#allocation8 + $0x41]] }
 0x3cf   :  { %v914_v41 = vsel %vm913_vm7, %v8566_v33, %v8565_v15  ;;  %v789_v20 = vrot.slane %v786_v28, 7  ;;  %v841_v52 = vadd.f32 %v5194_v62, %v837_v24  ;;  %v859_v61 = vsel %vm857_vm6, %v8562_v40, %v8563_v34  ;;  %v5545_v25 = vpop.permute.xlu1 %1953  ;;  %v8573_v28 = vld [vmem:[#allocation60_spill] sm:$0xff]  ;;  %s6429_s10 = sld [smem:[#allocation8 + $0x13]] }
 0x3d0   :  { %v885_v7 = vsel %vm857_vm6, %v8568_v29, %v8567_v59  ;;  %v709_v50 = vsel %vm708_vm3, %v703_v11, %v707_v35  ;;  %v729_v54 = vadd.f32 %v5108_v42, %v725_v4  ;;  %v816_v62 = vadd.f32 %v5148_v30, %v811_v13  ;;  %8569 = vst [vmem:[#allocation51_spill] sm:$0xff] %v5545_v25  ;;  %v5547_v40 = vpop.permute.xlu0 %1947  ;;  %v8572_v11 = vld [vmem:[#allocation61_spill] sm:$0xff] }
 0x3d1   :  { %v873_v63 = vadd.f32 %v5182_v2, %v868_v43  ;;  %8570 = vst [vmem:[#allocation41_spill] sm:$0xff] %v5547_v40  ;;  %v765_v34 = vsel %vm708_vm3, %v760_v17, %v764_v21  ;;  %v785_v18 = vadd.f32 %v5126_v14, %v781_v23  ;;  %v846_v51 = vsel %vm708_vm3, %v841_v52, %v845_v19 }
 0x3d2   :  { %v924_v35 = vmul.f32 %v5515_v31, %v914_v41  ;;  %v734_v30 = vsel %vm708_vm3, %v729_v54, %v733_v6  ;;  %v821_v2 = vsel %vm708_vm3, %v816_v62, %v820_v36  ;;  %v867_v38 = vmul.f32 %v5482_v26, %v859_v61  ;;  %2312 = vrot.lane.b32.xlu1 %v8559_v9, %s3854_s9  ;;  %v8578_v62 = vld [vmem:[#allocation50_spill] sm:$0xff] }
 0x3d3   :  { %v894_v46 = vmul.f32 %v885_v7, %v5482_v26  ;;  %v711_v21 = vmul.f32 %v709_v50, %v5371_v22  ;;  %v790_v14 = vsel %vm708_vm3, %v785_v18, %v789_v20  ;;  %v5565_v23 = vmul.f32 %v5543_v12, %v5332_v60  ;;  %v5586_v20 = vld [vmem:[#allocation6 + $0xa] sm:$0x3] }
 0x3d4   :  { %v5555_v42 = vpop.permute.xlu2 %2090  ;;  %v941_v24 = vsel %vm913_vm7, %v8573_v28, %v8572_v11  ;;  %v848_v4 = vmul.f32 %v846_v51, %v5468_v3  ;;  %v876_v13 = vrot.slane %v873_v63, 7  ;;  %v915_v43 = vsel %vm913_vm7, %v8565_v15, %v8566_v33  ;;  %v8579_v63 = vld [vmem:[#allocation64_spill] sm:$0xff]  ;;  %v8580_v51 = vld [vmem:[#allocation67_spill] sm:$0xff] }
 0x3d5   :  { %8571 = vst [vmem:[#allocation37_spill] sm:$0xff] %v5555_v42  ;;  %v886_v19 = vsel %vm857_vm6, %v8567_v59, %v8568_v29  ;;  %v5581_v17 = vmul.f32 %v765_v34, %v5383_v39  ;;  %v736_v6 = vmul.f32 %v734_v30, %v5371_v22  ;;  %v823_v36 = vmul.f32 %v821_v2, %v5468_v3  ;;  %v8574_v29 = vld [vmem:[#allocation63_spill] sm:$0xff] }
 0x3d6   :  { %v929_v41 = vadd.f32 %v5228_v56, %v924_v35  ;;  %v872_v15 = vadd.f32 %v5180_v47, %v867_v38  ;;  %v898_v33 = vadd.f32 %v5208_v5, %v894_v46  ;;  %v950_v52 = vmul.f32 %v941_v24, %v5515_v31  ;;  %2291 = vrot.lane.b32.xlu0 %v4303_v44, %s3854_s9  ;;  %v8581_v35 = vld [vmem:[#allocation66_spill] sm:$0xff] }
 0x3d7   :  { %v5598_v22 = vmul.f32 %v790_v14, %v5383_v39  ;;  %v923_v56 = vmul.f32 %v5515_v31, %v915_v43  ;;  %v893_v3 = vmul.f32 %v886_v19, %v5482_v26  ;;  %v978_v61 = vstv %s5535_s3  ;;  %2342 = vrot.lane.b32.xlu2 %v4453_v27, %s3855_s5  ;;  %v8575_v39 = vld [vmem:[#allocation53_spill] sm:$0xff]  ;;  %v5616_v50 = vpop.permute.xlu1 %1980  ;;  %s6471_s3 = sld [smem:[#allocation8 + $0x45]] }
 0x3d8   :  { %v5605_v5 = vadd.f32 %v848_v4, %v736_v6  ;;  %v877_v47 = vsel %vm708_vm3, %v872_v15, %v876_v13  ;;  %v5610_v59 = vmul.f32 %v5586_v20, %v5332_v60  ;;  %v997_v7 = vsel %vm969_vm8, %v8575_v39, %v8574_v29  ;;  %8576 = vst [vmem:[#allocation46_spill] sm:$0xff] %v5616_v50  ;;  %v5618_v26 = vpop.permute.xlu0 %1973 }
 0x3d9   :  { %8577 = vst [vmem:[#allocation39_spill] sm:$0xff] %v5618_v26  ;;  %v932_v54 = vrot.slane %v929_v41, 7  ;;  %v970_v34 = vsel %vm969_vm8, %v8579_v63, %v8578_v62  ;;  %v5625_v18 = vstv %s5553_s11  ;;  %v1026_v30 = vsel %vm1025_vm9, %v8581_v35, %v8580_v51  ;;  %s6496_s11 = sld [smem:[#allocation8 + $0x14]] }
 0x3da   :  { %v5633_v38 = vadd.f32 %v823_v36, %v711_v21  ;;  %v901_v46 = vrot.slane %v898_v33, 7  ;;  %v942_v14 = vsel %vm913_vm7, %v8572_v11, %v8573_v28  ;;  %v954_v24 = vadd.f32 %v5216_v49, %v950_v52  ;;  %v5654_v36 = vld [vmem:[#allocation6 + $0xc] sm:$0x3]  ;;  %2320 = vrot.lane.b32.xlu1 %v4335_v58, %s3854_s9 }
 0x3db   :  { %v879_v4 = vmul.f32 %v877_v47, %v5510_v48  ;;  %v928_v13 = vadd.f32 %v5226_v1, %v923_v56  ;;  %v897_v43 = vadd.f32 %v5206_v8, %v893_v3  ;;  %v1006_v19 = vmul.f32 %v997_v7, %v978_v61  ;;  %v8583_v52 = vld [vmem:[#allocation69_spill] sm:$0xff]  ;;  %v8584_v56 = vld [vmem:[#allocation59_spill] sm:$0xff]  ;;  %v8585_v47 = vld [vmem:[#allocation56_spill] sm:$0xff] }
 0x3dc   :  { %v5631_v2 = vpop.permute.xlu2 %2116  ;;  %v998_v21 = vsel %vm969_vm8, %v8574_v29, %v8575_v39  ;;  %v971_v6 = vsel %vm969_vm8, %v8578_v62, %v8579_v63  ;;  %v980_v11 = vmul.f32 %v978_v61, %v970_v34  ;;  %v1036_v49 = vmul.f32 %v5625_v18, %v1026_v30  ;;  %v8586_v29 = vld [vmem:[#allocation70_spill] sm:$0xff]  ;;  %v8587_v63 = vld [vmem:[#allocation73_spill] sm:$0xff]  ;;  %v8588_v34 = vld [vmem:[#allocation72_spill] sm:$0xff] }
 0x3dd   :  { %8582 = vst [vmem:[#allocation52_spill] sm:$0xff] %v5631_v2  ;;  %v933_v28 = vsel %vm708_vm3, %v928_v13, %v932_v54  ;;  %v949_v1 = vmul.f32 %v942_v14, %v5515_v31  ;;  %v1027_v8 = vsel %vm1025_vm9, %v8580_v51, %v8581_v35  ;;  %v1090_v41 = vstv %s5588_s12  ;;  %v5677_v62 = vld [vmem:[#allocation2 + $0x2] sm:$0x3]  ;;  %v8589_v35 = vld [vmem:[#allocation177_spill] sm:$0xff]  ;;  %s6513_s12 = sld [smem:[#allocation8 + $0x46]] }
 0x3de   :  { %v902_v15 = vsel %vm708_vm3, %v897_v43, %v901_v46  ;;  %v957_v33 = vrot.slane %v954_v24, 7  ;;  %v1082_v3 = vsel %vm1081_vm10, %v8584_v56, %v8583_v52  ;;  %v1053_v31 = vsel %vm1025_vm9, %v8586_v29, %v8585_v47  ;;  %2314 = vrot.lane.b32.xlu0 %v4439_v53, %s3854_s9  ;;  %s3859_s9 = smov 109  }
 0x3df   :  { %v1005_v39 = vmul.f32 %v998_v21, %v978_v61  ;;  %v1010_v7 = vadd.f32 %v5282_v55, %v1006_v19  ;;  %v979_v54 = vmul.f32 %v978_v61, %v971_v6  ;;  %v1109_v51 = vsel %vm1081_vm10, %v8588_v34, %v8587_v63  ;;  %2368 = vrot.lane.b32.xlu2 %v8559_v9, %s3855_s5  ;;  %v8590_v61 = vld [vmem:[#allocation179_spill] sm:$0xff]  ;;  %v5694_v24 = vpop.permute.xlu1 %2003 }
 0x3e0   :  { %v985_v30 = vadd.f32 %v8589_v35, %v980_v11  ;;  %v5690_v46 = vmul.f32 %v5654_v36, %v5332_v60  ;;  %v1035_v55 = vmul.f32 %v5625_v18, %v1027_v8  ;;  %v1041_v14 = vadd.f32 %v8590_v61, %v1036_v49  ;;  %8591 = vst [vmem:[#allocation49_spill] sm:$0xff] %v5694_v24  ;;  %v5696_v13 = vpop.permute.xlu0 %1982  ;;  %v8593_v19 = vld [vmem:[#allocation175_spill] sm:$0xff]  ;;  %v8598_v24 = vld [vmem:[#allocation178_spill] sm:$0xff] }
 0x3e1   :  { %8592 = vst [vmem:[#allocation48_spill] sm:$0xff] %v5696_v13  ;;  %v5699_v43 = vadd.f32 %v879_v4, %v5581_v17  ;;  %v953_v21 = vadd.f32 %v8593_v19, %v949_v1  ;;  %v1092_v6 = vmul.f32 %v1090_v41, %v1082_v3  ;;  %v1062_v11 = vmul.f32 %v1053_v31, %v5625_v18  ;;  %v8595_v49 = vld [vmem:[#allocation187_spill] sm:$0xff]  ;;  %v8596_v4 = vld [vmem:[#allocation182_spill] sm:$0xff]  ;;  %v8597_v3 = vld [vmem:[#allocation176_spill] sm:$0xff] }
 0x3e2   :  { %v935_v60 = vmul.f32 %v933_v28, %v5565_v23  ;;  %v904_v8 = vmul.f32 %v902_v15, %v5510_v48  ;;  %v5709_v61 = vmul.f32 %v8595_v49, %v5677_v62  ;;  %v1118_v2 = vmul.f32 %v1109_v51, %v1090_v41  ;;  %v8599_v15 = vld [vmem:[#allocation190_spill] sm:$0xff]  ;;  %v8601_v51 = vld [vmem:[#allocation188_spill] sm:$0xff]  ;;  %2347 = vrot.lane.b32.xlu1 %v4303_v44, %s3855_s5 }
 0x3e3   :  { %v958_v17 = vsel %vm708_vm3, %v953_v21, %v957_v33  ;;  %v1009_v42 = vadd.f32 %v8596_v4, %v1005_v39  ;;  %v1013_v1 = vrot.slane %v1010_v7, 7  ;;  %v984_v19 = vadd.f32 %v8597_v3, %v979_v54  ;;  %v8600_v39 = vld [vmem:[#allocation185_spill] sm:$0xff]  ;;  %v8605_v21 = vld [vmem:[#allocation76_spill] sm:$0xff] }
 0x3e4   :  { %v5703_v35 = vpop.permute.xlu2 %2125  ;;  %v988_v31 = vrot.slane %v985_v30, 7  ;;  %v1044_v28 = vrot.slane %v1041_v14, 7  ;;  %v1083_v48 = vsel %vm1081_vm10, %v8583_v52, %v8584_v56  ;;  %v1097_v26 = vadd.f32 %v8599_v15, %v1092_v6  ;;  %v8602_v14 = vld [vmem:[#allocation75_spill] sm:$0xff]  ;;  %v8604_v56 = vld [vmem:[#allocation62_spill] sm:$0xff] }
 0x3e5   :  { %8594 = vst [vmem:[#allocation34_spill] sm:$0xff] %v5703_v35  ;;  %v1040_v35 = vadd.f32 %v8598_v24, %v1035_v55  ;;  %v1054_v33 = vsel %vm1025_vm9, %v8585_v47, %v8586_v29  ;;  %v1066_v7 = vadd.f32 %v8600_v39, %v1062_v11  ;;  %v1110_v54 = vsel %vm1081_vm10, %v8587_v63, %v8588_v34  ;;  %v8603_v24 = vld [vmem:[#allocation65_spill] sm:$0xff]  ;;  %v8607_v6 = vld [vmem:[#allocation79_spill] sm:$0xff]  ;;  %v8608_v11 = vld [vmem:[#allocation78_spill] sm:$0xff] }
 0x3e6   :  { %v1122_v30 = vadd.f32 %v8601_v51, %v1118_v2  ;;  %v1146_v55 = vstv %s5670_s13  ;;  %v1165_v52 = vsel %vm1137_vm11, %v8603_v24, %v8602_v14  ;;  %v1138_v47 = vsel %vm1137_vm11, %v8605_v21, %v8604_v56  ;;  %v8606_v29 = vld [vmem:[#allocation33_spill] sm:$0xff]  ;;  %s6526_s13 = sld [smem:[#allocation8 + $0x15]] }
 0x3e7   :  { %2340 = vrot.lane.b32.xlu0 %v8606_v29, %s3855_s5  ;;  %v1014_v63 = vsel %vm708_vm3, %v1009_v42, %v1013_v1  ;;  %v1091_v2 = vmul.f32 %v1090_v41, %v1083_v48  ;;  %v5745_v34 = vstv %s5683_s14  ;;  %v1194_v4 = vsel %vm1193_vm12, %v8608_v11, %v8607_v6  ;;  %2376 = vrot.lane.b32.xlu2 %v4335_v58, %s3855_s5  ;;  %v5756_v50 = vpop.permute.xlu1 %2060  ;;  %s6598_s14 = sld [smem:[#allocation8 + $0x47]] }
 0x3e8   :  { %v989_v3 = vsel %vm708_vm3, %v984_v19, %v988_v31  ;;  %v1045_v15 = vsel %vm708_vm3, %v1040_v35, %v1044_v28  ;;  %v1061_v39 = vmul.f32 %v1054_v33, %v5625_v18  ;;  %v1117_v51 = vmul.f32 %v1110_v54, %v1090_v41  ;;  %8609 = vst [vmem:[#allocation55_spill] sm:$0xff] %v5756_v50  ;;  %v5758_v42 = vpop.permute.xlu0 %2007  ;;  %v8612_v28 = vld [vmem:[#allocation189_spill] sm:$0xff] }
 0x3e9   :  { %8610 = vst [vmem:[#allocation54_spill] sm:$0xff] %v5758_v42  ;;  %v905_v1 = vadd.f32 %v904_v8, %v5598_v22  ;;  %v1100_v48 = vrot.slane %v1097_v26, 7  ;;  %v1174_v13 = vmul.f32 %v1165_v52, %v1146_v55  ;;  %v1148_v40 = vmul.f32 %v1146_v55, %v1138_v47  ;;  %v8613_v22 = vld [vmem:[#allocation183_spill] sm:$0xff]  ;;  %v8614_v8 = vld [vmem:[#allocation186_spill] sm:$0xff]  ;;  %v8616_v52 = vld [vmem:[#allocation193_spill] sm:$0xff] }
 0x3ea   :  { %v960_v49 = vmul.f32 %v958_v17, %v5565_v23  ;;  %v1069_v58 = vrot.slane %v1066_v7, 7  ;;  %v1125_v19 = vrot.slane %v1122_v30, 7  ;;  %v1204_v35 = vmul.f32 %v5745_v34, %v1194_v4  ;;  %v8615_v7 = vld [vmem:[#allocation197_spill] sm:$0xff]  ;;  %2370 = vrot.lane.b32.xlu1 %v4439_v53, %s3855_s5 }
 0x3eb   :  { %v1016_v18 = vmul.f32 %v1014_v63, %v5610_v59  ;;  %v991_v41 = vmul.f32 %v989_v3, %v5610_v59  ;;  %v1047_v31 = vmul.f32 %v1045_v15, %v5690_v46  ;;  %v1096_v33 = vadd.f32 %v8612_v28, %v1091_v2 }
 0x3ec   :  { %v5761_v25 = vpop.permute.xlu2 %2150  ;;  %v1065_v26 = vadd.f32 %v8613_v22, %v1061_v39  ;;  %v1121_v54 = vadd.f32 %v8614_v8, %v1117_v51  ;;  %v1166_v23 = vsel %vm1137_vm11, %v8602_v14, %v8603_v24  ;;  %v1139_v59 = vsel %vm1137_vm11, %v8604_v56, %v8605_v21  ;;  %v8617_v24 = vld [vmem:[#allocation195_spill] sm:$0xff] }
 0x3ed   :  { %8611 = vst [vmem:[#allocation57_spill] sm:$0xff] %v5761_v25  ;;  %v1101_v17 = vsel %vm708_vm3, %v1096_v33, %v1100_v48  ;;  %v1178_v30 = vadd.f32 %v8615_v7, %v1174_v13  ;;  %v1153_v47 = vadd.f32 %v8616_v52, %v1148_v40  ;;  %v1195_v63 = vsel %vm1193_vm12, %v8607_v6, %v8608_v11  ;;  %v8618_v11 = vld [vmem:[#allocation191_spill] sm:$0xff]  ;;  %v8623_v33 = vld [vmem:[#allocation192_spill] sm:$0xff] }
 0x3ee   :  { %v1070_v2 = vsel %vm708_vm3, %v1065_v26, %v1069_v58  ;;  %v1126_v14 = vsel %vm708_vm3, %v1121_v54, %v1125_v19  ;;  %v1209_v4 = vadd.f32 %v8617_v24, %v1204_v35  ;;  %v936_v13 = vadd.f32 %v935_v60, %v5633_v38  ;;  %v8624_v26 = vld [vmem:[#allocation81_spill] sm:$0xff] }
 0x3ef   :  { %2349 = vrot.lane.b32.xlu0 %v4305_v45, %s3855_s5  ;;  %v961_v40 = vadd.f32 %v960_v49, %v5605_v5  ;;  %v1173_v56 = vmul.f32 %v1166_v23, %v1146_v55  ;;  %v1147_v21 = vmul.f32 %v1146_v55, %v1139_v59  ;;  %2403 = vrot.lane.b32.xlu2 %v4303_v44, %s3856_s16  ;;  %v5807_v5 = vpop.permute.xlu1 %2069  ;;  %v1181_v55 = vrot.slane %v1178_v30, 7  ;;  %v8627_v23 = vld [vmem:[#allocation68_spill] sm:$0xff]  ;;  %v8628_v59 = vld [vmem:[#allocation82_spill] sm:$0xff] }
 0x3f0   :  { %v1017_v58 = vadd.f32 %v1016_v18, %v905_v1  ;;  %v1103_v6 = vmul.f32 %v1101_v17, %v5709_v61  ;;  %v1130_v3 = vmul.f32 %v8618_v11, %v5677_v62  ;;  %v1203_v15 = vmul.f32 %v5745_v34, %v1195_v63  ;;  %8619 = vst [vmem:[#allocation47_spill] sm:$0xff] %v5807_v5  ;;  %v5809_v38 = vpop.permute.xlu0 %2062  ;;  %v8622_v18 = vld [vmem:[#allocation196_spill] sm:$0xff] }
 0x3f1   :  { %8620 = vst [vmem:[#allocation44_spill] sm:$0xff] %v5809_v38  ;;  %v1072_v60 = vmul.f32 %v1070_v2, %v5690_v46  ;;  %v1128_v49 = vmul.f32 %v1126_v14, %v5709_v61  ;;  %v1156_v39 = vrot.slane %v1153_v47, 7  ;;  %v992_v1 = vadd.f32 %v991_v41, %v5699_v43  ;;  %v8625_v61 = vld [vmem:[#allocation71_spill] sm:$0xff]  ;;  %v8626_v41 = vld [vmem:[#allocation194_spill] sm:$0xff]  ;;  %v8629_v2 = vld [vmem:[#allocation85_spill] sm:$0xff] }
 0x3f2   :  { %v5816_v48 = vadd.f32 %v1047_v31, %v936_v13  ;;  %v5820_v19 = vmul.f32 %v5446_v32, %v5677_v62  ;;  %v1212_v35 = vrot.slane %v1209_v4, 7  ;;  %v1177_v28 = vadd.f32 %v8622_v18, %v1173_v56  ;;  %v8630_v14 = vld [vmem:[#allocation84_spill] sm:$0xff]  ;;  %2396 = vrot.lane.b32.xlu1 %v8606_v29, %s3856_s16  ;;  %v8631_v56 = vld [vmem:[#allocation91_spill] sm:$0xff]  ;;  %v8635_v18 = vld [vmem:[#allocation74_spill] sm:$0xff] }
 0x3f3   :  { %v1152_v22 = vadd.f32 %v8623_v33, %v1147_v21  ;;  %v1258_v46 = vstv %s5769_s30  ;;  %v1250_v8 = vsel %vm1249_vm13, %v8625_v61, %v8624_v26  ;;  %v5831_v43 = vadd.f32 %v1103_v6, %v992_v1  ;;  %v8632_v21 = vld [vmem:[#allocation87_spill] sm:$0xff]  ;;  %s6621_s30 = sld [smem:[#allocation8 + $0x16]] }
 0x3f4   :  { %v5813_v51 = vpop.permute.xlu2 %2174  ;;  %v1208_v31 = vadd.f32 %v8626_v41, %v1203_v15  ;;  %v5836_v54 = vmul.f32 %v5033_v16, %v5677_v62  ;;  %v1221_v17 = vsel %vm1193_vm12, %v8628_v59, %v8627_v23  ;;  %v5844_v7 = vadd.f32 %v1072_v60, %v961_v40 }
 0x3f5   :  { %8621 = vst [vmem:[#allocation58_spill] sm:$0xff] %v5813_v51  ;;  %v5846_v30 = vadd.f32 %v1128_v49, %v1017_v58  ;;  %v1182_v52 = vsel %vm708_vm3, %v1177_v28, %v1181_v55  ;;  %v1157_v47 = vsel %vm708_vm3, %v1152_v22, %v1156_v39  ;;  %v1260_v16 = vmul.f32 %v1258_v46, %v1250_v8  ;;  %v8636_v28 = vld [vmem:[#allocation88_spill] sm:$0xff]  ;;  %v8638_v8 = vld [vmem:[#allocation43_spill] sm:$0xff] }
 0x3f6   :  { %v1213_v63 = vsel %vm708_vm3, %v1208_v31, %v1212_v35  ;;  %v1277_v24 = vsel %vm1249_vm13, %v8630_v14, %v8629_v2  ;;  %v1251_v4 = vsel %vm1249_vm13, %v8624_v26, %v8625_v61  ;;  %v1230_v13 = vmul.f32 %v1221_v17, %v5745_v34  ;;  %v8639_v17 = vld [vmem:[#allocation80_spill] sm:$0xff] }
 0x3f7   :  { %2374 = vrot.lane.b32.xlu0 %v4333_v57, %s3855_s5  ;;  %v5866_v40 = vstv %s5797_s15  ;;  %v1312_v58 = vsel %vm1305_vm14, %v8632_v21, %v8631_v56  ;;  %2426 = vrot.lane.b32.xlu2 %v4439_v53, %s3856_s16  ;;  %v1184_v6 = vmul.f32 %v1182_v52, %v1130_v3  ;;  %v1159_v15 = vmul.f32 %v1157_v47, %v1130_v3  ;;  %v5881_v55 = vpop.permute.xlu1 %2094  ;;  %v8640_v52 = vld [vmem:[#allocation94_spill] sm:$0xff]  ;;  %s3860_s5 = smov 99   ;;  %s6707_s15 = sld [smem:[#allocation8 + $0x48]] }
 0x3f8   :  { %v5875_v60 = vstv %s5805_s0  ;;  %v5879_v49 = vmul.f32 %v5543_v12, %v5677_v62  ;;  %8633 = vst [vmem:[#allocation61_spill] sm:$0xff] %v5881_v55  ;;  %v5883_v39 = vpop.permute.xlu0 %2088  ;;  %v1215_v1 = vmul.f32 %v1213_v63, %v5820_v19  ;;  %v1286_v35 = vmul.f32 %v1277_v24, %v1258_v46  ;;  %s3861_s0 = smov 98  }
 0x3f9   :  { %8634 = vst [vmem:[#allocation60_spill] sm:$0xff] %v5883_v39  ;;  %v1306_v3 = vsel %vm1305_vm14, %v8636_v28, %v8635_v18  ;;  %v1259_v22 = vmul.f32 %v1258_v46, %v1251_v4  ;;  %v1265_v12 = vadd.f32 %v5454_v37, %v1260_v16  ;;  %v1222_v26 = vsel %vm1193_vm12, %v8627_v23, %v8628_v59  ;;  %v8641_v16 = vld [vmem:[#allocation96_spill] sm:$0xff]  ;;  %v8642_v23 = vld [vmem:[#allocation83_spill] sm:$0xff]  ;;  %v8643_v4 = vld [vmem:[#allocation97_spill] sm:$0xff] }
 0x3fa   :  { %v1319_v61 = vmul.f32 %v5866_v40, %v1312_v58  ;;  %v1234_v41 = vadd.f32 %v8638_v8, %v1230_v13  ;;  %v1278_v31 = vsel %vm1249_vm13, %v8629_v2, %v8630_v14  ;;  %v1339_v47 = vsel %vm1305_vm14, %v8640_v52, %v8639_v17  ;;  %v8644_v13 = vld [vmem:[#allocation93_spill] sm:$0xff]  ;;  %v8645_v8 = vld [vmem:[#allocation90_spill] sm:$0xff]  ;;  %2405 = vrot.lane.b32.xlu1 %v4305_v45, %s3856_s16 }
 0x3fb   :  { %v5909_v37 = vstv %s5829_s17  ;;  %v1316_v63 = vmul.f32 %v5875_v60, %v1306_v3  ;;  %v1368_v59 = vsel %vm1361_vm15, %v8642_v23, %v8641_v16  ;;  %v5917_v24 = vstv %s5842_s18  ;;  %s6756_s17 = sld [smem:[#allocation8 + $0x4a]] }
 0x3fc   :  { %v5891_v33 = vpop.permute.xlu2 %2200  ;;  %v1362_v2 = vsel %vm1361_vm15, %v8644_v13, %v8643_v4  ;;  %v1229_v14 = vmul.f32 %v1222_v26, %v5745_v34  ;;  %v1290_v58 = vadd.f32 %v5448_v0, %v1286_v35  ;;  %v1313_v51 = vsel %vm1305_vm14, %v8631_v56, %v8632_v21  ;;  %v8647_v0 = vld [vmem:[#allocation40_spill] sm:$0xff]  ;;  %s6765_s18 = sld [smem:[#allocation8 + $0x19]] }
 0x3fd   :  { %8637 = vst [vmem:[#allocation63_spill] sm:$0xff] %v5891_v33  ;;  %v8646_v33 = vld [vmem:[#allocation77_spill] sm:$0xff]  ;;  %v1307_v25 = vsel %vm1305_vm14, %v8635_v18, %v8636_v28  ;;  %v1321_v39 = vadd.f32 %v1319_v61, %v1316_v63  ;;  %v1344_v34 = vmul.f32 %v1339_v47, %v5866_v40  ;;  %v1264_v35 = vadd.f32 %v8647_v0, %v1259_v22 }
 0x3fe   :  { %v1333_v3 = vsel %vm1305_vm14, %v8646_v33, %v8645_v8  ;;  %v1285_v26 = vmul.f32 %v1278_v31, %v1258_v46  ;;  %v1375_v55 = vmul.f32 %v5909_v37, %v1368_v59  ;;  %v1372_v56 = vmul.f32 %v5917_v24, %v1362_v2  ;;  %v8650_v46 = vld [vmem:[#allocation200_spill] sm:$0xff] }
 0x3ff   :  { %2398 = vrot.lane.b32.xlu0 %v4453_v27, %s3856_s16  ;;  %2452 = vrot.lane.b32.xlu2 %v8606_v29, %s3857_s19  ;;  %v1268_v21 = vrot.slane %v1265_v12, 7  ;;  %v1237_v18 = vrot.slane %v1234_v41, 7  ;;  %v1342_v28 = vmul.f32 %v1333_v3, %v5875_v60  ;;  %v1318_v61 = vmul.f32 %v5866_v40, %v1313_v51  ;;  %v5951_v47 = vpop.permute.xlu1 %2118 }
 0x400   :  { %8648 = vst [vmem:[#allocation53_spill] sm:$0xff] %v5951_v47  ;;  %v5953_v22 = vpop.permute.xlu0 %2096  ;;  %v1233_v31 = vadd.f32 %v8650_v46, %v1229_v14  ;;  %v1293_v63 = vrot.slane %v1290_v58, 7  ;;  %v1315_v59 = vmul.f32 %v5875_v60, %v1307_v25  ;;  %v1340_v12 = vsel %vm1305_vm14, %v8639_v17, %v8640_v52  ;;  %v8652_v17 = vld [vmem:[#allocation42_spill] sm:$0xff]  ;;  %v8657_v46 = vld [vmem:[#allocation103_spill] sm:$0xff] }
 0x401   :  { %8649 = vst [vmem:[#allocation50_spill] sm:$0xff] %v5953_v22  ;;  %v1324_v2 = vrot.slane %v1321_v39, 7  ;;  %v1346_v51 = vadd.f32 %v1344_v34, %v1342_v28  ;;  %v1369_v3 = vsel %vm1361_vm15, %v8641_v16, %v8642_v23  ;;  %v1363_v14 = vsel %vm1361_vm15, %v8643_v4, %v8644_v13  ;;  %v8656_v28 = vld [vmem:[#allocation86_spill] sm:$0xff]  ;;  %v8684_v22 = vld [vmem:[#allocation101_spill] sm:$0xff] }
 0x402   :  { %v5974_v25 = vadd.f32 %v1184_v6, %v5844_v7  ;;  %v1289_v52 = vadd.f32 %v8652_v17, %v1285_v26  ;;  %v1334_v39 = vsel %vm1305_vm14, %v8645_v8, %v8646_v33  ;;  %v1377_v58 = vadd.f32 %v1375_v55, %v1372_v56  ;;  %2430 = vrot.lane.b32.xlu1 %v4333_v57, %s3856_s16  ;;  %v8672_v47 = vld [vmem:[#allocation98_spill] sm:$0xff] }
 0x403   :  { %v1269_v16 = vsel %vm708_vm3, %v1264_v35, %v1268_v21  ;;  %v1238_v23 = vsel %vm708_vm3, %v1233_v31, %v1237_v18  ;;  %v1320_v34 = vadd.f32 %v1318_v61, %v1315_v59  ;;  %v1343_v4 = vmul.f32 %v1340_v12, %v5866_v40  ;;  %v8655_v18 = vld [vmem:[#allocation100_spill] sm:$0xff] }
 0x404   :  { %v5961_v41 = vpop.permute.xlu2 %2208  ;;  %v5985_v13 = vadd.f32 %v1159_v15, %v5816_v48  ;;  %v1294_v7 = vsel %vm708_vm3, %v1289_v52, %v1293_v63  ;;  %v1374_v6 = vmul.f32 %v5909_v37, %v1369_v3  ;;  %v1371_v0 = vmul.f32 %v5917_v24, %v1363_v14  ;;  %v8661_v3 = vld [vmem:[#allocation106_spill] sm:$0xff] }
 0x405   :  { %8651 = vst [vmem:[#allocation64_spill] sm:$0xff] %v5961_v41  ;;  %v5993_v55 = vadd.f32 %v1215_v1, %v5831_v43  ;;  %v1341_v33 = vmul.f32 %v1334_v39, %v5875_v60  ;;  %v1325_v8 = vsel %vm708_vm3, %v1320_v34, %v1324_v2  ;;  %v1349_v40 = vrot.slane %v1346_v51, 7  ;;  %v8660_v51 = vld [vmem:[#allocation92_spill] sm:$0xff] }
 0x406   :  { %v6002_v48 = vmul.f32 %v1269_v16, %v5836_v54  ;;  %v6005_v15 = vmul.f32 %v1238_v23, %v5820_v19  ;;  %v6009_v43 = vmul.f32 %v5586_v20, %v5677_v62  ;;  %v1380_v60 = vrot.slane %v1377_v58, 7  ;;  %v8662_v39 = vld [vmem:[#allocation108_spill] sm:$0xff]  ;;  %v8663_v58 = vld [vmem:[#allocation95_spill] sm:$0xff]  ;;  %v8665_v16 = vld [vmem:[#allocation105_spill] sm:$0xff] }
 0x407   :  { %2424 = vrot.lane.b32.xlu0 %v8559_v9, %s3856_s16  ;;  %2461 = vrot.lane.b32.xlu2 %v4305_v45, %s3857_s19  ;;  %v6016_v1 = vmul.f32 %v1294_v7, %v5836_v54  ;;  %v1345_v35 = vadd.f32 %v1343_v4, %v1341_v33  ;;  %v1426_v26 = vstv %s5949_s20  ;;  %v6020_v19 = vpop.permute.xlu1 %2144  ;;  %v6025_v20 = vmul.f32 %v1325_v8, %v5879_v49  ;;  %v8658_v54 = vld [vmem:[#allocation99_spill] sm:$0xff]  ;;  %v8666_v4 = vld [vmem:[#allocation102_spill] sm:$0xff]  ;;  %v8667_v7 = vld [vmem:[#allocation89_spill] sm:$0xff]  ;;  %s6819_s20 = sld [smem:[#allocation8 + $0x4f]] }
 0x408   :  { %8653 = vst [vmem:[#allocation67_spill] sm:$0xff] %v6020_v19  ;;  %v6022_v56 = vpop.permute.xlu0 %2123  ;;  %v1376_v21 = vadd.f32 %v1374_v6, %v1371_v0  ;;  %v1390_v61 = vsel %vm1361_vm15, %v8656_v28, %v8655_v18  ;;  %v1395_v31 = vsel %vm1361_vm15, %v8658_v54, %v8657_v46  ;;  %v6042_v12 = vmul.f32 %v5654_v36, %v5677_v62  ;;  %v8664_v62 = vld [vmem:[#allocation109_spill] sm:$0xff]  ;;  %v8678_v19 = vld [vmem:[#allocation118_spill] sm:$0xff] }
 0x409   :  { %8654 = vst [vmem:[#allocation66_spill] sm:$0xff] %v6022_v56  ;;  %v6038_v59 = vsel %vm708_vm3, %v1345_v35, %v1349_v40  ;;  %v1429_v2 = vstv %s5971_s2  ;;  %v1424_v14 = vsel %vm1417_vm0, %v8661_v3, %v8660_v51  ;;  %v1389_v52 = vsel %vm1361_vm15, %v8655_v18, %v8656_v28  ;;  %v8669_v35 = vld [vmem:[#allocation111_spill] sm:$0xff]  ;;  %s6869_s2 = sld [smem:[#allocation8 + $0x50]] }
 0x40a   :  { %v6052_v17 = vsel %vm708_vm3, %v1376_v21, %v1380_v60  ;;  %v1451_v36 = vsel %vm1417_vm0, %v8663_v58, %v8662_v39  ;;  %v1445_v23 = vsel %vm1417_vm0, %v8665_v16, %v8664_v62  ;;  %v1397_v34 = vmul.f32 %v1390_v61, %v5917_v24  ;;  %v8668_v60 = vld [vmem:[#allocation115_spill] sm:$0xff]  ;;  %2454 = vrot.lane.b32.xlu1 %v4453_v27, %s3857_s19 }
 0x40b   :  { %v1418_v6 = vsel %vm1417_vm0, %v8667_v7, %v8666_v4  ;;  %v1400_v0 = vmul.f32 %v1395_v31, %v5909_v37  ;;  %v1396_v33 = vsel %vm1361_vm15, %v8657_v46, %v8658_v54  ;;  %v1431_v8 = vmul.f32 %v1429_v2, %v1424_v14  ;;  %v8670_v31 = vld [vmem:[#allocation32_spill] sm:$0xff] }
 0x40c   :  { %v6035_v63 = vpop.permute.xlu2 %2235  ;;  %v6080_v40 = vstv %s5990_s21  ;;  %v1480_v21 = vsel %vm1473_vm1, %v8669_v35, %v8668_v60  ;;  %v1398_v18 = vmul.f32 %v1389_v52, %v5917_v24  ;;  %v1456_v28 = vmul.f32 %v1451_v36, %v1429_v2  ;;  %v8673_v24 = vld [vmem:[#allocation112_spill] sm:$0xff]  ;;  %s6879_s21 = sld [smem:[#allocation8 + $0x1f]] }
 0x40d   :  { %8659 = vst [vmem:[#allocation69_spill] sm:$0xff] %v6035_v63  ;;  %v1454_v61 = vmul.f32 %v1445_v23, %v1426_v26  ;;  %v8671_v63 = vld [vmem:[#allocation170_spill] sm:$0xff]  ;;  %v1419_v54 = vsel %vm1417_vm0, %v8666_v4, %v8667_v7  ;;  %v1428_v14 = vmul.f32 %v1426_v26, %v1418_v6  ;;  %v6097_v41 = vstv %s6011_s22  ;;  %s6920_s22 = sld [smem:[#allocation8 + $0x4b]] }
 0x40e   :  { %v1474_v52 = vsel %vm1473_vm1, %v8673_v24, %v8672_v47  ;;  %v1399_v36 = vmul.f32 %v1396_v33, %v5909_v37  ;;  %v1402_v23 = vadd.f32 %v1400_v0, %v1398_v18  ;;  %v1487_v46 = vmul.f32 %v6080_v40, %v1480_v21 }
 0x40f   :  { %2432 = vrot.lane.b32.xlu0 %v8670_v31, %s3856_s16  ;;  %2486 = vrot.lane.b32.xlu2 %v4333_v57, %s3857_s19  ;;  %v6108_v4 = vpop.permute.xlu1 %2152  ;;  %v1425_v6 = vsel %vm1417_vm0, %v8660_v51, %v8661_v3  ;;  %v1433_v56 = vadd.f32 %v1431_v8, %v1428_v14  ;;  %v1452_v37 = vsel %vm1417_vm0, %v8662_v39, %v8663_v58  ;;  %v6132_v3 = vstv %s6049_s23  ;;  %v8679_v58 = vld [vmem:[#allocation120_spill] sm:$0xff]  ;;  %v8680_v8 = vld [vmem:[#allocation107_spill] sm:$0xff]  ;;  %s6725_s16 = sld [smem:[#allocation8 + $0x17]] }
 0x410   :  { %8674 = vst [vmem:[#allocation59_spill] sm:$0xff] %v6108_v4  ;;  %v6110_v7 = vpop.permute.xlu0 %2146  ;;  %v1446_v0 = vsel %vm1417_vm0, %v8664_v62, %v8665_v16  ;;  %v1458_v21 = vadd.f32 %v1456_v28, %v1454_v61  ;;  %v1484_v18 = vmul.f32 %v6097_v41, %v1474_v52  ;;  %v1481_v39 = vsel %vm1473_vm1, %v8668_v60, %v8669_v35  ;;  %v8681_v28 = vld [vmem:[#allocation121_spill] sm:$0xff]  ;;  %v8683_v4 = vld [vmem:[#allocation114_spill] sm:$0xff]  ;;  %s6923_s23 = sld [smem:[#allocation8 + $0x1a]] }
 0x411   :  { %8675 = vst [vmem:[#allocation56_spill] sm:$0xff] %v6110_v7  ;;  %v8677_v7 = vld [vmem:[#allocation104_spill] sm:$0xff]  ;;  %v1536_v62 = vsel %vm1529_vm2, %v8680_v8, %v8679_v58  ;;  %v6143_v16 = vstv %s6066_s24  ;;  %v8682_v61 = vld [vmem:[#allocation117_spill] sm:$0xff]  ;;  %v1427_v52 = vmul.f32 %v1426_v26, %v1419_v54  ;;  %v1501_v38 = vsel %vm1473_vm1, %v8684_v22, %v8683_v4  ;;  %s3862_s24 = smov 97  }
 0x412   :  { %v1507_v51 = vsel %vm1473_vm1, %v8678_v19, %v8677_v7  ;;  %v1530_v14 = vsel %vm1529_vm2, %v8682_v61, %v8681_v28  ;;  %v1489_v60 = vadd.f32 %v1487_v46, %v1484_v18  ;;  %v1455_v35 = vmul.f32 %v1452_v37, %v1429_v2  ;;  %2480 = vrot.lane.b32.xlu1 %v8559_v9, %s3857_s19  ;;  %v6169_v37 = vld [vmem:[#allocation2 + $0x4] sm:$0x3] }
 0x413   :  { %v1453_v50 = vmul.f32 %v1446_v0, %v1426_v26  ;;  %v1475_v5 = vsel %vm1473_vm1, %v8672_v47, %v8673_v24  ;;  %v1512_v42 = vmul.f32 %v1507_v51, %v6080_v40  ;;  %v1405_v57 = vrot.slane %v1402_v23, 7 }
 0x414   :  { %v6124_v33 = vpop.permute.xlu2 %2258  ;;  %v1486_v45 = vmul.f32 %v6080_v40, %v1481_v39  ;;  %v1543_v54 = vmul.f32 %v6132_v3, %v1536_v62  ;;  %v1401_v26 = vadd.f32 %v1399_v36, %v1397_v34  ;;  %v1461_v46 = vrot.slane %v1458_v21, 7 }
 0x415   :  { %8676 = vst [vmem:[#allocation70_spill] sm:$0xff] %v6124_v33  ;;  %v1430_v33 = vmul.f32 %v1429_v2, %v1425_v6  ;;  %v1540_v6 = vmul.f32 %v6143_v16, %v1530_v14  ;;  %v1436_v2 = vrot.slane %v1433_v56, 7  ;;  %v1510_v47 = vmul.f32 %v1501_v38, %v6097_v41 }
 0x416   :  { %v1483_v23 = vmul.f32 %v6097_v41, %v1475_v5  ;;  %v1492_v0 = vrot.slane %v1489_v60, 7  ;;  %v1508_v18 = vsel %vm1473_vm1, %v8677_v7, %v8678_v19  ;;  %v1457_v38 = vadd.f32 %v1455_v35, %v1453_v50 }
 0x417   :  { %2459 = vrot.lane.b32.xlu0 %v4303_v44, %s3857_s19  ;;  %2510 = vrot.lane.b32.xlu2 %v4453_v27, %s3858_s25  ;;  %v1432_v24 = vadd.f32 %v1430_v33, %v1427_v52  ;;  %v6175_v34 = vpop.permute.xlu1 %2179  ;;  %v1514_v36 = vadd.f32 %v1512_v42, %v1510_v47  ;;  %v1537_v33 = vsel %vm1529_vm2, %v8679_v58, %v8680_v8  ;;  %v8688_v58 = vld [vmem:[#allocation187_spill] sm:$0xff]  ;;  %vm1585_vm4 = vcmp.lt.s32.totalorder %v5015_v10, 17 }
 0x418   :  { %8685 = vst [vmem:[#allocation73_spill] sm:$0xff] %v6175_v34  ;;  %v6177_v56 = vpop.permute.xlu0 %2172  ;;  %v1531_v5 = vsel %vm1529_vm2, %v8681_v28, %v8682_v61  ;;  %v1406_v19 = vsel %vm708_vm3, %v1401_v26, %v1405_v57  ;;  %v1502_v50 = vsel %vm1473_vm1, %v8683_v4, %v8684_v22  ;;  %v1488_v42 = vadd.f32 %v1486_v45, %v1483_v23  ;;  %v8695_v23 = vld [vmem:[#allocation110_spill] sm:$0xff]  ;;  %v8772_v34 = vld [vmem:[#allocation181_spill] sm:$0xff] }
 0x419   :  { %8686 = vst [vmem:[#allocation72_spill] sm:$0xff] %v6177_v56  ;;  %v1545_v7 = vadd.f32 %v1543_v54, %v1540_v6  ;;  %v1437_v51 = vsel %vm708_vm3, %v1432_v24, %v1436_v2  ;;  %v1462_v39 = vsel %vm708_vm3, %v1457_v38, %v1461_v46  ;;  %v1466_v8 = vmul.f32 %v8688_v58, %v6169_v37  ;;  %v8690_v6 = vld [vmem:[#allocation167_spill] sm:$0xff]  ;;  %v8694_v24 = vld [vmem:[#allocation124_spill] sm:$0xff] }
 0x41a   :  { %v1511_v62 = vmul.f32 %v1508_v18, %v6080_v40  ;;  %v1352_v28 = vmul.f32 %v6038_v59, %v5879_v49  ;;  %v1493_v57 = vsel %vm708_vm3, %v1488_v42, %v1492_v0  ;;  %v1542_v61 = vmul.f32 %v6132_v3, %v1537_v33  ;;  %2488 = vrot.lane.b32.xlu1 %v8670_v31, %s3857_s19  ;;  %v8697_v38 = vld [vmem:[#allocation123_spill] sm:$0xff]  ;;  %v8698_v42 = vld [vmem:[#allocation116_spill] sm:$0xff] }
 0x41b   :  { %v1539_v22 = vmul.f32 %v6143_v16, %v1531_v5  ;;  %v1383_v45 = vmul.f32 %v6052_v17, %v6009_v43  ;;  %v1408_v4 = vmul.f32 %v1406_v19, %v6009_v43  ;;  %v1509_v14 = vmul.f32 %v1502_v50, %v6097_v41  ;;  %v8700_v58 = vld [vmem:[#allocation132_spill] sm:$0xff] }
 0x41c   :  { %v6187_v21 = vpop.permute.xlu2 %2284  ;;  %v1517_v52 = vrot.slane %v1514_v36, 7  ;;  %v1241_v40 = vadd.f32 %v6005_v15, %v5846_v30  ;;  %v1439_v49 = vmul.f32 %v1437_v51, %v6042_v12  ;;  %v1464_v59 = vmul.f32 %v1462_v39, %v6042_v12 }
 0x41d   :  { %8687 = vst [vmem:[#allocation177_spill] sm:$0xff] %v6187_v21  ;;  %v1548_v60 = vrot.slane %v1545_v7, 7  ;;  %v1272_v41 = vadd.f32 %v6002_v48, %v5985_v13  ;;  %v1297_v43 = vadd.f32 %v6016_v1, %v5974_v25  ;;  %v1495_v30 = vmul.f32 %v1493_v57, %v1466_v8  ;;  %v8699_v7 = vld [vmem:[#allocation130_spill] sm:$0xff]  ;;  %v8703_v57 = vld [vmem:[#allocation129_spill] sm:$0xff] }
 0x41e   :  { %v1513_v15 = vadd.f32 %v1511_v62, %v1509_v14  ;;  %v1328_v12 = vadd.f32 %v6025_v20, %v5993_v55  ;;  %v1353_v17 = vadd.f32 %v1352_v28, %v1241_v40  ;;  %v1544_v35 = vadd.f32 %v1542_v61, %v1539_v22  ;;  %v8702_v28 = vld [vmem:[#allocation133_spill] sm:$0xff] }
 0x41f   :  { %2482 = vrot.lane.b32.xlu0 %v4439_v53, %s3857_s19  ;;  %2536 = vrot.lane.b32.xlu2 %v8559_v9, %s3858_s25  ;;  %v8689_v54 = vrot.slane %v8671_v63, 7  ;;  %v6236_v48 = vpop.permute.xlu1 %2202  ;;  %v1384_v1 = vadd.f32 %v1383_v45, %v1272_v41  ;;  %v6240_v26 = vadd.f32 %v1408_v4, %v1297_v43  ;;  %v6245_v20 = vmul.f32 %v8618_v11, %v6169_v37  ;;  %v8696_v11 = vld [vmem:[#allocation127_spill] sm:$0xff]  ;;  %v8704_v45 = vld [vmem:[#allocation126_spill] sm:$0xff]  ;;  %v8705_v4 = vld [vmem:[#allocation113_spill] sm:$0xff]  ;;  %s6806_s19 = sld [smem:[#allocation8 + $0x1e]] }
 0x420   :  { %8691 = vst [vmem:[#allocation179_spill] sm:$0xff] %v6236_v48  ;;  %v6238_v25 = vpop.permute.xlu0 %2181  ;;  %v1518_v55 = vsel %vm708_vm3, %v1513_v15, %v1517_v52  ;;  %v6251_v2 = vadd.f32 %v1439_v49, %v1328_v12  ;;  %v6253_v46 = vadd.f32 %v1464_v59, %v1353_v17  ;;  %v1549_v47 = vsel %vm708_vm3, %v1544_v35, %v1548_v60  ;;  %v8706_v15 = vld [vmem:[#allocation139_spill] sm:$0xff] }
 0x421   :  { %v6234_v13 = vsel %vm708_vm3, %v8690_v6, %v8689_v54  ;;  %8692 = vst [vmem:[#allocation175_spill] sm:$0xff] %v6238_v25  ;;  %v1558_v0 = vsel %vm1529_vm2, %v8695_v23, %v8694_v24  ;;  %v6260_v18 = vadd.f32 %v1495_v30, %v1384_v1  ;;  %v1563_v36 = vsel %vm1529_vm2, %v8697_v38, %v8696_v11  ;;  %v8707_v12 = vld [vmem:[#allocation135_spill] sm:$0xff]  ;;  %v8771_v25 = vld [vmem:[#allocation158_spill] sm:$0xff] }
 0x422   :  { %v6269_v33 = vmul.f32 %v5446_v32, %v6169_v37  ;;  %v6273_v5 = vmul.f32 %v1518_v55, %v1466_v8  ;;  %v1557_v19 = vsel %vm1529_vm2, %v8694_v24, %v8695_v23  ;;  %v1597_v50 = vstv %s6204_s26  ;;  %v8701_v8 = vld [vmem:[#allocation119_spill] sm:$0xff]  ;;  %2515 = vrot.lane.b32.xlu1 %v4303_v44, %s3858_s25  ;;  %s6997_s26 = sld [smem:[#allocation8 + $0x4c]] }
 0x423   :  { %v1592_v51 = vsel %vm1585_vm4, %v8699_v7, %v8698_v42  ;;  %v6287_v32 = vmul.f32 %v1549_v47, %v6245_v20  ;;  %v1565_v39 = vmul.f32 %v1558_v0, %v6143_v16  ;;  %v1619_v62 = vsel %vm1585_vm4, %v8701_v8, %v8700_v58  ;;  %v8711_v0 = vld [vmem:[#allocation122_spill] sm:$0xff] }
 0x424   :  { %v6249_v63 = vpop.permute.xlu2 %2293  ;;  %v1613_v61 = vsel %vm1585_vm4, %v8703_v57, %v8702_v28  ;;  %v1594_v22 = vstv %s6214_s27  ;;  %v1586_v14 = vsel %vm1585_vm4, %v8705_v4, %v8704_v45  ;;  %v1587_v52 = vsel %vm1585_vm4, %v8704_v45, %v8705_v4  ;;  %v8713_v4 = vld [vmem:[#allocation128_spill] sm:$0xff]  ;;  %s7038_s27 = sld [smem:[#allocation8 + $0x4d]] }
 0x425   :  { %8693 = vst [vmem:[#allocation182_spill] sm:$0xff] %v6249_v63  ;;  %v1568_v40 = vmul.f32 %v1563_v36, %v6132_v3  ;;  %v1566_v49 = vmul.f32 %v1557_v19, %v6143_v16  ;;  %v1564_v59 = vsel %vm1529_vm2, %v8696_v11, %v8697_v38  ;;  %v1599_v60 = vmul.f32 %v1597_v50, %v1592_v51  ;;  %v8712_v11 = vld [vmem:[#allocation136_spill] sm:$0xff] }
 0x426   :  { %vm1641_vm5 = vcmp.lt.s32.totalorder %v5015_v10, 16  ;;  %v1624_v41 = vmul.f32 %v1619_v62, %v1597_v50  ;;  %v1622_v43 = vmul.f32 %v1613_v61, %v1594_v22  ;;  %v6321_v30 = vstv %s6228_s28  ;;  %s7051_s28 = sld [smem:[#allocation8 + $0x1c]] }
 0x427   :  { %2508 = vrot.lane.b32.xlu0 %v8606_v29, %s3858_s25  ;;  %2544 = vrot.lane.b32.xlu2 %v8670_v31, %s3858_s25  ;;  %v1648_v16 = vsel %vm1641_vm5, %v8707_v12, %v8706_v15  ;;  %v6327_v17 = vpop.permute.xlu1 %2228  ;;  %v1595_v54 = vmul.f32 %v1594_v22, %v1587_v52  ;;  %v1596_v6 = vmul.f32 %v1594_v22, %v1586_v14  ;;  %v6336_v55 = vstv %s6247_s7  ;;  %v8714_v14 = vld [vmem:[#allocation142_spill] sm:$0xff]  ;;  %v8716_v52 = vld [vmem:[#allocation131_spill] sm:$0xff]  ;;  %s7064_s7 = sld [smem:[#allocation8 + $0x20]] }
 0x428   :  { %8708 = vst [vmem:[#allocation176_spill] sm:$0xff] %v6327_v17  ;;  %v6329_v35 = vpop.permute.xlu0 %2206  ;;  %v1593_v1 = vsel %vm1585_vm4, %v8698_v42, %v8699_v7  ;;  %v1567_v24 = vmul.f32 %v1564_v59, %v6132_v3  ;;  %v1570_v23 = vadd.f32 %v1568_v40, %v1566_v49  ;;  %v1642_v38 = vsel %vm1641_vm5, %v8712_v11, %v8711_v0  ;;  %v8718_v40 = vld [vmem:[#allocation141_spill] sm:$0xff] }
 0x429   :  { %8709 = vst [vmem:[#allocation178_spill] sm:$0xff] %v6329_v35  ;;  %vm1697_vm6 = vcmp.lt.s32.totalorder %v5015_v10, 15  ;;  %v1601_v36 = vadd.f32 %v1599_v60, %v1596_v6  ;;  %v1620_v19 = vsel %vm1585_vm4, %v8700_v58, %v8701_v8  ;;  %v1614_v42 = vsel %vm1585_vm4, %v8702_v28, %v8703_v57  ;;  %v8715_v8 = vld [vmem:[#allocation144_spill] sm:$0xff]  ;;  %v8717_v57 = vld [vmem:[#allocation145_spill] sm:$0xff] }
 0x42a   :  { %v1655_v3 = vmul.f32 %v6321_v30, %v1648_v16  ;;  %v1598_v7 = vmul.f32 %v1597_v50, %v1593_v1  ;;  %v1626_v51 = vadd.f32 %v1624_v41, %v1622_v43  ;;  %v6356_v62 = vstv %s6271_s8  ;;  %2538 = vrot.lane.b32.xlu1 %v4439_v53, %s3858_s25  ;;  %v8719_v43 = vld [vmem:[#allocation27_spill] sm:$0xff]  ;;  %v8720_v1 = vld [vmem:[#allocation138_spill] sm:$0xff]  ;;  %v6639_v35 = vld [vmem:[#allocation6] sm:$0x3]  ;;  %s3863_s8 = smov 96  }
 0x42b   :  { %v6359_v61 = vstv %s6284_s29  ;;  %v1652_v45 = vmul.f32 %v6336_v55, %v1642_v38  ;;  %v1675_v58 = vsel %vm1641_vm5, %v8714_v14, %v8713_v4  ;;  %v1704_v28 = vsel %vm1697_vm6, %v8716_v52, %v8715_v8  ;;  %v8721_v38 = vld [vmem:[#allocation125_spill] sm:$0xff]  ;;  %8760 = vst [vmem:[#allocation193_spill] sm:$0xff] %v6639_v35  ;;  %s7073_s29 = sld [smem:[#allocation8 + $0x51]] }
 0x42c   :  { %v6338_v47 = vpop.permute.xlu2 %2318  ;;  %v1698_v49 = vsel %vm1697_vm6, %v8718_v40, %v8717_v57  ;;  %v1623_v59 = vmul.f32 %v1620_v19, %v1597_v50  ;;  %v1621_v60 = vmul.f32 %v1614_v42, %v1594_v22  ;;  %v1649_v41 = vsel %vm1641_vm5, %v8706_v15, %v8707_v12 }
 0x42d   :  { %8710 = vst [vmem:[#allocation190_spill] sm:$0xff] %v6338_v47  ;;  %v1573_v16 = vrot.slane %v1570_v23, 7  ;;  %v1604_v6 = vrot.slane %v1601_v36, 7  ;;  %v1669_v17 = vsel %vm1641_vm5, %v8721_v38, %v8720_v1  ;;  %v1657_v50 = vadd.f32 %v1655_v3, %v1652_v45  ;;  %v3712_v45 = vld [vmem:[#allocation6 + $0x6] sm:$0x3] }
 0x42e   :  { %v1643_v22 = vsel %vm1641_vm5, %v8711_v0, %v8712_v11  ;;  %v1680_v15 = vmul.f32 %v1675_v58, %v6321_v30  ;;  %v1711_v12 = vmul.f32 %v6356_v62, %v1704_v28  ;;  %v1708_v23 = vmul.f32 %v6359_v61, %v1698_v49 }
 0x42f   :  { %2517 = vrot.lane.b32.xlu0 %v8719_v43, %s3858_s25  ;;  %2571 = vrot.lane.b32.xlu2 %v4303_v44, %s3859_s9  ;;  %v6395_v36 = vpop.permute.xlu1 %2237  ;;  %v1569_v42 = vadd.f32 %v1567_v24, %v1565_v39  ;;  %v1629_v3 = vrot.slane %v1626_v51, 7  ;;  %v6400_v47 = vmul.f32 %v3712_v45, %v6169_v37  ;;  %v1654_v63 = vmul.f32 %v6321_v30, %v1649_v41  ;;  %v8726_v41 = vld [vmem:[#allocation147_spill] sm:$0xff]  ;;  %v6460_v45 = vld [vmem:[#allocation6 + $0x8] sm:$0x3] }
 0x430   :  { %8722 = vst [vmem:[#allocation185_spill] sm:$0xff] %v6395_v36  ;;  %v6397_v19 = vpop.permute.xlu0 %2230  ;;  %v1600_v0 = vadd.f32 %v1598_v7, %v1595_v54  ;;  %v1625_v11 = vadd.f32 %v1623_v59, %v1621_v60  ;;  %v1678_v58 = vmul.f32 %v1669_v17, %v6336_v55  ;;  %v1676_v28 = vsel %vm1641_vm5, %v8713_v4, %v8714_v14  ;;  %v8725_v60 = vld [vmem:[#allocation151_spill] sm:$0xff] }
 0x431   :  { %8723 = vst [vmem:[#allocation188_spill] sm:$0xff] %v6397_v19  ;;  %v1651_v39 = vmul.f32 %v6336_v55, %v1643_v22  ;;  %v1660_v24 = vrot.slane %v1657_v50, 7  ;;  %v1705_v51 = vsel %vm1697_vm6, %v8715_v8, %v8716_v52  ;;  %v1699_v54 = vsel %vm1697_vm6, %v8717_v57, %v8718_v40  ;;  %v6615_v19 = vld [vmem:[#allocation6 + $0xc] sm:$0x3] }
 0x432   :  { %v1574_v17 = vsel %vm708_vm3, %v1569_v42, %v1573_v16  ;;  %v1605_v7 = vsel %vm708_vm3, %v1600_v0, %v1604_v6  ;;  %v1682_v4 = vadd.f32 %v1680_v15, %v1678_v58  ;;  %v1713_v14 = vadd.f32 %v1711_v12, %v1708_v23  ;;  %2564 = vrot.lane.b32.xlu1 %v8606_v29, %s3859_s9  ;;  %v8727_v6 = vld [vmem:[#allocation31_spill] sm:$0xff]  ;;  %v8728_v12 = vld [vmem:[#allocation134_spill] sm:$0xff]  ;;  %v8729_v23 = vld [vmem:[#allocation148_spill] sm:$0xff] }
 0x433   :  { %v1630_v49 = vsel %vm708_vm3, %v1625_v11, %v1629_v3  ;;  %v1670_v8 = vsel %vm1641_vm5, %v8720_v1, %v8721_v38  ;;  %v1656_v52 = vadd.f32 %v1654_v63, %v1651_v39  ;;  %v1679_v59 = vmul.f32 %v1676_v28, %v6321_v30  ;;  %8758 = vst [vmem:[#allocation186_spill] sm:$0xff] %v6615_v19 }
 0x434   :  { %v6403_v21 = vpop.permute.xlu2 %2342  ;;  %v1710_v57 = vmul.f32 %v6356_v62, %v1705_v51  ;;  %v1707_v40 = vmul.f32 %v6359_v61, %v1699_v54  ;;  %v1731_v16 = vsel %vm1697_vm6, %v8726_v41, %v8725_v60  ;;  %v1521_v63 = vadd.f32 %v6273_v5, %v6240_v26  ;;  %v8733_v51 = vld [vmem:[#allocation154_spill] sm:$0xff] }
 0x435   :  { %8724 = vst [vmem:[#allocation75_spill] sm:$0xff] %v6403_v21  ;;  %v1576_v30 = vmul.f32 %v1574_v17, %v6245_v20  ;;  %v1607_v1 = vmul.f32 %v1605_v7, %v6269_v33  ;;  %v1661_v38 = vsel %vm708_vm3, %v1656_v52, %v1660_v24  ;;  %v1677_v50 = vmul.f32 %v1670_v8, %v6336_v55  ;;  %v8732_v24 = vld [vmem:[#allocation140_spill] sm:$0xff]  ;;  %v8734_v52 = vld [vmem:[#allocation150_spill] sm:$0xff] }
 0x436   :  { %v1685_v22 = vrot.slane %v1682_v4, 7  ;;  %v1716_v15 = vrot.slane %v1713_v14, 7  ;;  %v1725_v42 = vsel %vm1697_vm6, %v8729_v23, %v8728_v12  ;;  %v1552_v5 = vadd.f32 %v6287_v32, %v6251_v2 }
 0x437   :  { %2542 = vrot.lane.b32.xlu0 %v8727_v6, %s3858_s25  ;;  %2594 = vrot.lane.b32.xlu2 %v4439_v53, %s3859_s9  ;;  %v6453_v26 = vpop.permute.xlu1 %2262  ;;  %v1632_v3 = vmul.f32 %v1630_v49, %v6269_v33  ;;  %v6464_v55 = vmul.f32 %v6460_v45, %v6169_v37  ;;  %v1736_v0 = vmul.f32 %v1731_v16, %v6356_v62  ;;  %vm1753_vm7 = vcmp.lt.s32.totalorder %v5015_v10, 14  ;;  %s6987_s25 = sld [smem:[#allocation8 + $0x1b]] }
 0x438   :  { %8730 = vst [vmem:[#allocation65_spill] sm:$0xff] %v6453_v26  ;;  %v6455_v20 = vpop.permute.xlu0 %2256  ;;  %v1663_v58 = vmul.f32 %v1661_v38, %v6400_v47  ;;  %v1681_v28 = vadd.f32 %v1679_v59, %v1677_v50  ;;  %v1712_v39 = vadd.f32 %v1710_v57, %v1707_v40  ;;  %v1734_v2 = vmul.f32 %v1725_v42, %v6359_v61  ;;  %v8735_v59 = vld [vmem:[#allocation137_spill] sm:$0xff]  ;;  %v8736_v38 = vld [vmem:[#allocation156_spill] sm:$0xff]  ;;  %v8737_v50 = vld [vmem:[#allocation143_spill] sm:$0xff] }
 0x439   :  { %8731 = vst [vmem:[#allocation62_spill] sm:$0xff] %v6455_v20  ;;  %v1732_v33 = vsel %vm1697_vm6, %v8725_v60, %v8726_v41  ;;  %v1765_v32 = vstv %s6419_s1  ;;  %v1760_v54 = vsel %vm1753_vm7, %v8733_v51, %v8732_v24  ;;  %v1577_v17 = vadd.f32 %v1576_v30, %v6253_v46  ;;  %v8775_v26 = vld [vmem:[#allocation161_spill] sm:$0xff]  ;;  %s7156_s1 = sld [smem:[#allocation8 + $0x4e]] }
 0x43a   :  { %v1608_v7 = vadd.f32 %v1607_v1, %v6260_v18  ;;  %v1686_v4 = vsel %vm708_vm3, %v1681_v28, %v1685_v22  ;;  %v1717_v14 = vsel %vm708_vm3, %v1712_v39, %v1716_v15  ;;  %v1726_v49 = vsel %vm1697_vm6, %v8728_v12, %v8729_v23  ;;  %2573 = vrot.lane.b32.xlu1 %v8719_v43, %s3859_s9  ;;  %v8738_v22 = vld [vmem:[#allocation157_spill] sm:$0xff] }
 0x43b   :  { %v1762_v8 = vstv %s6429_s10  ;;  %v1754_v57 = vsel %vm1753_vm7, %v8735_v59, %v8734_v52  ;;  %v1738_v40 = vadd.f32 %v1736_v0, %v1734_v2  ;;  %v6498_v46 = vadd.f32 %v1632_v3, %v1521_v63  ;;  %v8739_v15 = vld [vmem:[#allocation153_spill] sm:$0xff]  ;;  %s7256_s10 = sld [smem:[#allocation8 + $0x21]] }
 0x43c   :  { %v6467_v11 = vpop.permute.xlu2 %2368  ;;  %v1735_v18 = vmul.f32 %v1732_v33, %v6356_v62  ;;  %v1767_v60 = vmul.f32 %v1765_v32, %v1760_v54  ;;  %v6505_v41 = vadd.f32 %v1663_v58, %v1552_v5  ;;  %v1688_v16 = vmul.f32 %v1686_v4, %v6400_v47  ;;  %v6536_v3 = vld [vmem:[#allocation6 + $0xa] sm:$0x3]  ;;  %v8744_v4 = vld [vmem:[#allocation163_spill] sm:$0xff] }
 0x43d   :  { %v1719_v30 = vmul.f32 %v1717_v14, %v6464_v55  ;;  %v1761_v63 = vsel %vm1753_vm7, %v8732_v24, %v8733_v51  ;;  %v1733_v62 = vmul.f32 %v1726_v49, %v6359_v61  ;;  %v1764_v1 = vmul.f32 %v1762_v8, %v1754_v57  ;;  %8742 = vst [vmem:[#allocation79_spill] sm:$0xff] %v6536_v3  ;;  %v8745_v14 = vld [vmem:[#allocation159_spill] sm:$0xff] }
 0x43e   :  { %v1787_v47 = vsel %vm1753_vm7, %v8737_v50, %v8736_v38  ;;  %v1781_v12 = vsel %vm1753_vm7, %v8739_v15, %v8738_v22  ;;  %v1755_v61 = vsel %vm1753_vm7, %v8734_v52, %v8735_v59  ;;  %v1741_v5 = vrot.slane %v1738_v40, 7 }
 0x43f   :  { %2566 = vrot.lane.b32.xlu0 %v4453_v27, %s3859_s9  ;;  %2620 = vrot.lane.b32.xlu2 %v8606_v29, %s3860_s5  ;;  %v6528_v23 = vpop.permute.xlu1 %2286  ;;  %v6540_v0 = vmul.f32 %v6536_v3, %v6169_v37  ;;  %vm1809_vm8 = vcmp.lt.s32.totalorder %v5015_v10, 13  ;;  %v1737_v28 = vadd.f32 %v1735_v18, %v1733_v62  ;;  %v1766_v39 = vmul.f32 %v1765_v32, %v1761_v63  ;;  %v8746_v63 = vld [vmem:[#allocation146_spill] sm:$0xff]  ;;  %v8747_v62 = vld [vmem:[#allocation160_spill] sm:$0xff] }
 0x440   :  { %8740 = vst [vmem:[#allocation76_spill] sm:$0xff] %v6528_v23  ;;  %v6530_v42 = vpop.permute.xlu0 %2264  ;;  %v1769_v2 = vadd.f32 %v1767_v60, %v1764_v1  ;;  %v1821_v33 = vstv %s6471_s3  ;;  %v1788_v24 = vsel %vm1753_vm7, %v8736_v38, %v8737_v50  ;;  %v1792_v51 = vmul.f32 %v1787_v47, %v1765_v32  ;;  %v8748_v47 = vld [vmem:[#allocation152_spill] sm:$0xff]  ;;  %v6637_v23 = vld [vmem:[#allocation2 + $0x6] sm:$0x3]  ;;  %s3864_s3 = smov 95  }
 0x441   :  { %8741 = vst [vmem:[#allocation33_spill] sm:$0xff] %v6530_v42  ;;  %v1790_v54 = vmul.f32 %v1781_v12, %v1762_v8  ;;  %v1816_v49 = vsel %vm1809_vm8, %v8745_v14, %v8744_v4  ;;  %v6554_v52 = vadd.f32 %v1688_v16, %v1577_v17  ;;  %v6556_v59 = vadd.f32 %v1719_v30, %v1608_v7  ;;  %v8774_v42 = vld [vmem:[#allocation198_spill] sm:$0xff] }
 0x442   :  { %v1763_v57 = vmul.f32 %v1762_v8, %v1755_v61  ;;  %v1782_v40 = vsel %vm1753_vm7, %v8738_v22, %v8739_v15  ;;  %v1742_v18 = vsel %vm708_vm3, %v1737_v28, %v1741_v5  ;;  %v6564_v60 = vstv %s6496_s11  ;;  %2598 = vrot.lane.b32.xlu1 %v8727_v6, %s3859_s9  ;;  %v8749_v22 = vld [vmem:[#allocation169_spill] sm:$0xff]  ;;  %v8750_v61 = vld [vmem:[#allocation172_spill] sm:$0xff]  ;;  %v8751_v5 = vld [vmem:[#allocation155_spill] sm:$0xff]  ;;  %s7269_s11 = sld [smem:[#allocation8 + $0x52]] }
 0x443   :  { %v1810_v17 = vsel %vm1809_vm8, %v8747_v62, %v8746_v63  ;;  %vm1865_vm9 = vcmp.lt.s32.totalorder %v5015_v10, 3  ;;  %v1772_v16 = vrot.slane %v1769_v2, 7  ;;  %v1791_v30 = vmul.f32 %v1788_v24, %v1765_v32  ;;  %v8753_v2 = vld [vmem:[#allocation168_spill] sm:$0xff] }
 0x444   :  { %v6543_v58 = vpop.permute.xlu2 %2376  ;;  %v1768_v7 = vadd.f32 %v1766_v39, %v1763_v57  ;;  %v1823_v1 = vmul.f32 %v1821_v33, %v1816_v49  ;;  %v1789_v38 = vmul.f32 %v1782_v40, %v1762_v8  ;;  %v6575_v50 = vadd.f32 %v1792_v51, %v1790_v54  ;;  %v8752_v39 = vld [vmem:[#allocation173_spill] sm:$0xff]  ;;  %v8756_v40 = vld [vmem:[#allocation162_spill] sm:$0xff] }
 0x445   :  { %8743 = vst [vmem:[#allocation78_spill] sm:$0xff] %v6543_v58  ;;  %v1843_v15 = vsel %vm1809_vm8, %v8749_v22, %v8748_v47  ;;  %v6582_v12 = vstv %s6513_s12  ;;  %v1820_v32 = vmul.f32 %v6564_v60, %v1810_v17  ;;  %v1872_v28 = vsel %vm1865_vm9, %v8751_v5, %v8750_v61  ;;  %v8757_v17 = vld [vmem:[#allocation149_spill] sm:$0xff]  ;;  %s7373_s12 = sld [smem:[#allocation8 + $0x53]] }
 0x446   :  { %v6592_v8 = vstv %s6526_s13  ;;  %v1866_v24 = vsel %vm1865_vm9, %v8753_v2, %v8752_v39  ;;  %v6605_v49 = vmul.f32 %v1742_v18, %v6464_v55  ;;  %v1811_v57 = vsel %vm1809_vm8, %v8746_v63, %v8747_v62  ;;  %s3865_s13 = smov 94  }
 0x447   :  { %2592 = vrot.lane.b32.xlu0 %v8559_v9, %s3859_s9  ;;  %2629 = vrot.lane.b32.xlu2 %v8719_v43, %s3860_s5  ;;  %v6600_v51 = vpop.permute.xlu1 %2312  ;;  %v1837_v21 = vsel %vm1809_vm8, %v8757_v17, %v8756_v40  ;;  %v6619_v36 = vmul.f32 %v6615_v19, %v6169_v37  ;;  %v6626_v18 = vsel %vm708_vm3, %v1768_v7, %v1772_v16  ;;  %vm1921_vm10 = vcmp.lt.s32.totalorder %v5015_v10, 2 }
 0x448   :  { %8754 = vst [vmem:[#allocation189_spill] sm:$0xff] %v6600_v51  ;;  %v6602_v54 = vpop.permute.xlu0 %2291  ;;  %v1817_v63 = vsel %vm1809_vm8, %v8744_v4, %v8745_v14  ;;  %v1825_v62 = vadd.f32 %v1823_v1, %v1820_v32  ;;  %v1848_v51 = vmul.f32 %v1843_v15, %v1821_v33  ;;  %v1844_v37 = vsel %vm1809_vm8, %v8748_v47, %v8749_v22 }
 0x449   :  { %8755 = vst [vmem:[#allocation183_spill] sm:$0xff] %v6602_v54  ;;  %v1879_v54 = vmul.f32 %v6582_v12, %v1872_v28  ;;  %v6643_v7 = vmul.f32 %v6639_v35, %v6637_v23  ;;  %v1876_v16 = vmul.f32 %v6592_v8, %v1866_v24  ;;  %v1793_v4 = vadd.f32 %v1791_v30, %v1789_v38  ;;  %v8761_v24 = vld [vmem:[#allocation199_spill] sm:$0xff] }
 0x44a   :  { %v1797_v14 = vrot.slane %v6575_v50, 7  ;;  %v1819_v1 = vmul.f32 %v6564_v60, %v1811_v57  ;;  %v1846_v15 = vmul.f32 %v1837_v21, %v6564_v60  ;;  %v1838_v47 = vsel %vm1809_vm8, %v8756_v40, %v8757_v17  ;;  %2622 = vrot.lane.b32.xlu1 %v4453_v27, %s3860_s5  ;;  %v8763_v57 = vld [vmem:[#allocation51_spill] sm:$0xff] }
 0x44b   :  { %v1822_v22 = vmul.f32 %v1821_v33, %v1817_v63  ;;  %v1873_v32 = vsel %vm1865_vm9, %v8750_v61, %v8751_v5  ;;  %v1867_v30 = vsel %vm1865_vm9, %v8752_v39, %v8753_v2  ;;  %v1828_v38 = vrot.slane %v1825_v62, 7  ;;  %v8762_v61 = vld [vmem:[#allocation180_spill] sm:$0xff]  ;;  %v8764_v39 = vld [vmem:[#allocation171_spill] sm:$0xff]  ;;  %v8765_v2 = vld [vmem:[#allocation41_spill] sm:$0xff] }
 0x44c   :  { %v6623_v55 = vpop.permute.xlu2 %2403  ;;  %v1847_v50 = vmul.f32 %v1844_v37, %v1821_v33  ;;  %v1850_v21 = vadd.f32 %v1848_v51, %v1846_v15  ;;  %v1881_v28 = vadd.f32 %v1879_v54, %v1876_v16  ;;  %v1899_v5 = vsel %vm1865_vm9, %v8762_v61, %v8761_v24  ;;  %v8766_v51 = vld [vmem:[#allocation35_spill] sm:$0xff]  ;;  %v8767_v62 = vld [vmem:[#allocation164_spill] sm:$0xff]  ;;  %v8768_v37 = vld [vmem:[#allocation45_spill] sm:$0xff] }
 0x44d   :  { %8759 = vst [vmem:[#allocation197_spill] sm:$0xff] %v6623_v55  ;;  %v1955_v33 = vsel %vm1921_vm10, %v8764_v39, %v8763_v57  ;;  %v1949_v40 = vsel %vm1921_vm10, %v8766_v51, %v8765_v2  ;;  %v1878_v54 = vmul.f32 %v6582_v12, %v1873_v32  ;;  %v1875_v17 = vmul.f32 %v6592_v8, %v1867_v30 }
 0x44e   :  { %v1933_v63 = vstv %s6598_s14  ;;  %v1928_v16 = vsel %vm1921_vm10, %v8768_v37, %v8767_v62  ;;  %v1845_v35 = vmul.f32 %v1838_v47, %v6564_v60  ;;  %v1824_v20 = vadd.f32 %v1822_v22, %v1819_v1  ;;  %s3582_s14 = sld [smem:[#allocation8 + $0x23]] }
 0x44f   :  { %2600 = vrot.lane.b32.xlu0 %v8670_v31, %s3859_s9  ;;  %2654 = vrot.lane.b32.xlu2 %v8727_v6, %s3860_s5  ;;  %v6687_v15 = vpop.permute.xlu1 %2320  ;;  %v1893_v32 = vsel %vm1865_vm9, %v8772_v34, %v8771_v25  ;;  %v1930_v56 = vstv %s6621_s30  ;;  %v1922_v19 = vsel %vm1921_vm10, %v8775_v26, %v8774_v42  ;;  %v1960_v3 = vmul.f32 %v1955_v33, %v1933_v63  ;;  %s7132_s9 = sld [smem:[#allocation8 + $0x1d]]  ;;  %s3866_s30 = smov 93  }
 0x450   :  { %8769 = vst [vmem:[#allocation195_spill] sm:$0xff] %v6687_v15  ;;  %v6689_v48 = vpop.permute.xlu0 %2314  ;;  %v1904_v15 = vmul.f32 %v1899_v5, %v6582_v12  ;;  %v1798_v60 = vsel %vm708_vm3, %v1793_v4, %v1797_v14  ;;  %v1853_v1 = vrot.slane %v1850_v21, 7  ;;  %v1884_v47 = vrot.slane %v1881_v28, 7 }
 0x451   :  { %8770 = vst [vmem:[#allocation191_spill] sm:$0xff] %v6689_v48  ;;  %v1958_v48 = vmul.f32 %v1949_v40, %v1930_v56  ;;  %v1935_v22 = vmul.f32 %v1933_v63, %v1928_v16  ;;  %v1829_v6 = vsel %vm708_vm3, %v1824_v20, %v1828_v38  ;;  %v1849_v55 = vadd.f32 %v1847_v50, %v1845_v35 }
 0x452   :  { %v1880_v43 = vadd.f32 %v1878_v54, %v1875_v17  ;;  %v1932_v58 = vmul.f32 %v1930_v56, %v1922_v19  ;;  %v1900_v5 = vsel %vm1865_vm9, %v8761_v24, %v8762_v61  ;;  %v1956_v4 = vsel %vm1921_vm10, %v8763_v57, %v8764_v39  ;;  %2648 = vrot.lane.b32.xlu1 %v8559_v9, %s3860_s5  ;;  %v8776_v54 = vld [vmem:[#allocation48_spill] sm:$0xff]  ;;  %v8777_v17 = vld [vmem:[#allocation46_spill] sm:$0xff] }
 0x453   :  { %v1950_v35 = vsel %vm1921_vm10, %v8765_v2, %v8766_v51  ;;  %v1929_v19 = vsel %vm1921_vm10, %v8767_v62, %v8768_v37  ;;  %v1962_v14 = vadd.f32 %v1960_v3, %v1958_v48  ;;  %v1854_v38 = vsel %vm708_vm3, %v1849_v55, %v1853_v1  ;;  %v6770_v62 = vld [vmem:[#allocation6 + $0x2] sm:$0x3] }
 0x454   :  { %v6697_v30 = vpop.permute.xlu2 %2426  ;;  %v1885_v50 = vsel %vm708_vm3, %v1880_v43, %v1884_v47  ;;  %v1894_v21 = vsel %vm1865_vm9, %v8771_v25, %v8772_v34  ;;  %v1937_v28 = vadd.f32 %v1935_v22, %v1932_v58  ;;  %v1923_v48 = vsel %vm1921_vm10, %v8774_v42, %v8775_v26  ;;  %v8780_v47 = vld [vmem:[#allocation165_spill] sm:$0xff] }
 0x455   :  { %8773 = vst [vmem:[#allocation196_spill] sm:$0xff] %v6697_v30  ;;  %v1902_v30 = vmul.f32 %v1893_v32, %v6592_v8  ;;  %v1903_v3 = vmul.f32 %v1900_v5, %v6582_v12  ;;  %v1959_v55 = vmul.f32 %v1956_v4, %v1933_v63  ;;  %v1957_v24 = vmul.f32 %v1950_v35, %v1930_v56 }
 0x456   :  { %v1775_v34 = vmul.f32 %v6626_v18, %v6540_v0  ;;  %v1800_v25 = vmul.f32 %v1798_v60, %v6540_v0  ;;  %v1831_v58 = vmul.f32 %v1829_v6, %v6619_v36  ;;  %v1934_v57 = vmul.f32 %v1933_v63, %v1929_v19  ;;  %v8779_v60 = vld [vmem:[#allocation39_spill] sm:$0xff] }
 0x457   :  { %v1906_v20 = vadd.f32 %v1904_v15, %v1902_v30  ;;  %2627 = vrot.lane.b32.xlu0 %v4303_v44, %s3860_s5  ;;  %2678 = vrot.lane.b32.xlu2 %v4453_v27, %s3861_s0  ;;  %v6744_v43 = vpop.permute.xlu1 %2347  ;;  %v1856_v26 = vmul.f32 %v1854_v38, %v6619_v36  ;;  %v1901_v42 = vmul.f32 %v1894_v21, %v6592_v8  ;;  %v1965_v33 = vrot.slane %v1962_v14, 7  ;;  %v8778_v30 = vld [vmem:[#allocation174_spill] sm:$0xff] }
 0x458   :  { %v1887_v2 = vmul.f32 %v1885_v50, %v6643_v7  ;;  %v1931_v18 = vmul.f32 %v1930_v56, %v1923_v48  ;;  %v1940_v51 = vrot.slane %v1937_v28, 7  ;;  %vm1977_vm11 = vcmp.lt.s32.totalorder %v5015_v10, 1  ;;  %v8781_v50 = vld [vmem:[#allocation36_spill] sm:$0xff]  ;;  %v8782_v21 = vld [vmem:[#allocation54_spill] sm:$0xff] }
 0x459   :  { %v6746_v61 = vpop.permute.xlu0 %2340  ;;  %v1909_v12 = vrot.slane %v1906_v20, 7  ;;  %v1905_v0 = vadd.f32 %v1903_v3, %v1901_v42  ;;  %v1961_v6 = vadd.f32 %v1959_v55, %v1957_v24  ;;  %v1989_v40 = vstv %s6707_s15  ;;  %v6800_v20 = vld [vmem:[#allocation6 + $0x4] sm:$0x3]  ;;  %v8783_v24 = vld [vmem:[#allocation49_spill] sm:$0xff]  ;;  %s3583_s15 = sld [smem:[#allocation8 + $0x54]] }
 0x45a   :  { %v1984_v36 = vsel %vm1977_vm11, %v8777_v17, %v8776_v54  ;;  %v1745_v8 = vadd.f32 %v6605_v49, %v6498_v46  ;;  %v1776_v63 = vadd.f32 %v1775_v34, %v6505_v41  ;;  %v1914_v56 = vmul.f32 %v6770_v62, %v6637_v23  ;;  %2656 = vrot.lane.b32.xlu1 %v8670_v31, %s3860_s5  ;;  %v8784_v34 = vld [vmem:[#allocation184_spill] sm:$0xff] }
 0x45b   :  { %v1936_v37 = vadd.f32 %v1934_v57, %v1931_v18  ;;  %v1910_v16 = vsel %vm708_vm3, %v1905_v0, %v1909_v12  ;;  %v1966_v15 = vsel %vm708_vm3, %v1961_v6, %v1965_v33  ;;  %v1986_v32 = vstv %s6725_s16  ;;  %v8785_v0 = vld [vmem:[#allocation38_spill] sm:$0xff]  ;;  %v8786_v6 = vld [vmem:[#allocation47_spill] sm:$0xff]  ;;  %s3584_s16 = sld [smem:[#allocation8 + $0x24]] }
 0x45c   :  { %v6752_v39 = vpop.permute.xlu2 %2452  ;;  %v1978_v1 = vsel %vm1977_vm11, %v8779_v60, %v8778_v30  ;;  %v6786_v46 = vadd.f32 %v1800_v25, %v6554_v52  ;;  %v1991_v49 = vmul.f32 %v1989_v40, %v1984_v36  ;;  %v6791_v22 = vmul.f32 %v6234_v13, %v8780_v47  ;;  %v8788_v36 = vld [vmem:[#allocation44_spill] sm:$0xff]  ;;  %v8824_v47 = vld [vmem:[#allocation178_spill] sm:$0xff] }
 0x45d   :  { %v1941_v41 = vsel %vm708_vm3, %v1936_v37, %v1940_v51  ;;  %v6796_v5 = vadd.f32 %v1831_v58, %v6556_v59  ;;  %v1857_v4 = vadd.f32 %v1856_v26, %v1745_v8  ;;  %v6798_v35 = vadd.f32 %v1887_v2, %v1776_v63 }
 0x45e   :  { %v6804_v52 = vmul.f32 %v6800_v20, %v6637_v23  ;;  %v6811_v14 = vmul.f32 %v1910_v16, %v6643_v7  ;;  %v1968_v59 = vmul.f32 %v1966_v15, %v1914_v56  ;;  %v1988_v38 = vmul.f32 %v1986_v32, %v1978_v1 }
 0x45f   :  { %2650 = vrot.lane.b32.xlu0 %v4439_v53, %s3860_s5  ;;  %2704 = vrot.lane.b32.xlu2 %v8559_v9, %s3861_s0  ;;  %v2371_v13 = vpop.permute.xlu1 %2370  ;;  %v2011_v28 = vsel %vm1977_vm11, %v8782_v21, %v8781_v50  ;;  %v6821_v3 = vmul.f32 %v1941_v41, %v1914_v56  ;;  %v1979_v7 = vsel %vm1977_vm11, %v8778_v30, %v8779_v60  ;;  %vm2064_vm12 = vcmp.lt.s32.totalorder %v5015_v10, 127  ;;  %s7382_s5 = sld [smem:[#allocation8 + $0x22]] }
 0x460   :  { %v6829_v55 = vstv %s6756_s17  ;;  %v2005_v25 = vsel %vm1977_vm11, %v8784_v34, %v8783_v24  ;;  %v2006_v58 = vsel %vm1977_vm11, %v8783_v24, %v8784_v34  ;;  %v1985_v57 = vsel %vm1977_vm11, %v8776_v54, %v8777_v17  ;;  %v8787_v17 = vld [vmem:[#allocation55_spill] sm:$0xff]  ;;  %s3585_s17 = sld [smem:[#allocation8 + $0x55]] }
 0x461   :  { %v6808_v19 = vpop.permute.xlu0 %2349  ;;  %v1993_v26 = vadd.f32 %v1991_v49, %v1988_v38  ;;  %v2012_v42 = vsel %vm1977_vm11, %v8781_v50, %v8782_v21  ;;  %v2016_v12 = vmul.f32 %v2011_v28, %v1989_v40  ;;  %v6849_v33 = vmul.f32 %v6637_v23, %v6460_v45  ;;  %v8789_v49 = vld [vmem:[#allocation61_spill] sm:$0xff]  ;;  %v8791_v21 = vld [vmem:[#allocation78_spill] sm:$0xff] }
 0x462   :  { %v6852_v2 = vstv %s6765_s18  ;;  %v6854_v18 = vadd.f32 %v1968_v59, %v1857_v4  ;;  %v1987_v51 = vmul.f32 %v1986_v32, %v1979_v7  ;;  %v2072_v54 = vsel %vm2064_vm12, %v8786_v6, %v8785_v0  ;;  %2683 = vrot.lane.b32.xlu1 %v4303_v44, %s3861_s0  ;;  %s3587_s18 = sld [smem:[#allocation8 + $0x56]] }
 0x463   :  { %v2066_v8 = vsel %vm2064_vm12, %v8788_v36, %v8787_v17  ;;  %v2013_v63 = vmul.f32 %v2006_v58, %v1986_v32  ;;  %v2014_v56 = vmul.f32 %v2005_v25, %v1986_v32  ;;  %v1990_v37 = vmul.f32 %v1989_v40, %v1985_v57 }
 0x464   :  { %v6817_v48 = vpop.permute.xlu2 %2461  ;;  %vm2344_vm13 = vcmp.lt.s32.totalorder %v5015_v10, 113  ;;  %v1996_v16 = vrot.slane %v1993_v26, 7  ;;  %v2015_v15 = vmul.f32 %v2012_v42, %v1989_v40  ;;  %v2078_v1 = vmul.f32 %v6829_v55, %v2072_v54  ;;  %v8790_v40 = vld [vmem:[#allocation50_spill] sm:$0xff]  ;;  %v8793_v54 = vld [vmem:[#allocation37_spill] sm:$0xff] }
 0x465   :  { %v2372_v30 = vsel %vm2344_vm13, %v6467_v11, %v2371_v13  ;;  %v2373_v32 = vsel %vm2344_vm13, %v2371_v13, %v6467_v11  ;;  %v2018_v60 = vadd.f32 %v2016_v12, %v2014_v56  ;;  %v2075_v41 = vmul.f32 %v6852_v2, %v2066_v8  ;;  %v8792_v12 = vld [vmem:[#allocation60_spill] sm:$0xff] }
 0x466   :  { %v2099_v4 = vsel %vm2064_vm12, %v8790_v40, %v8789_v49  ;;  %v6888_v50 = vstv %s6806_s19  ;;  %v6891_v11 = vstv %s6819_s20  ;;  %v1992_v57 = vadd.f32 %v1990_v37, %v1987_v51  ;;  %s3586_s19 = sld [smem:[#allocation8 + $0x25]]  ;;  %s3868_s20 = smov 82  }
 0x467   :  { %2676 = vrot.lane.b32.xlu0 %v8606_v29, %s3861_s0  ;;  %2712 = vrot.lane.b32.xlu2 %v8670_v31, %s3861_s0  ;;  %v2397_v59 = vpop.permute.xlu1 %2396  ;;  %v2380_v24 = vmul.f32 %v2372_v30, %v6888_v50  ;;  %v2381_v34 = vmul.f32 %v2373_v32, %v6888_v50  ;;  %v2071_v26 = vsel %vm2064_vm12, %v8785_v0, %v8786_v6  ;;  %v2021_v0 = vrot.slane %v2018_v60, 7 }
 0x468   :  { %v2065_v42 = vsel %vm2064_vm12, %v8787_v17, %v8788_v36  ;;  %v2093_v8 = vsel %vm2064_vm12, %v8793_v54, %v8792_v12  ;;  %v2080_v56 = vadd.f32 %v2078_v1, %v2075_v41  ;;  %v2103_v30 = vmul.f32 %v2099_v4, %v6829_v55 }
 0x469   :  { %v2375_v38 = vpop.permute.xlu0 %2374  ;;  %v1997_v37 = vsel %vm708_vm3, %v1992_v57, %v1996_v16  ;;  %vm2120_vm14 = vcmp.lt.s32.totalorder %v5015_v10, 126  ;;  %v2101_v6 = vmul.f32 %v2093_v8, %v6852_v2  ;;  %v2098_v17 = vsel %vm2064_vm12, %v8789_v49, %v8790_v40 }
 0x46a   :  { %v2378_v28 = vsel %vm2344_vm13, %v2375_v38, %v8791_v21  ;;  %v2379_v7 = vsel %vm2344_vm13, %v8791_v21, %v2375_v38  ;;  %v2017_v38 = vadd.f32 %v2015_v15, %v2013_v63  ;;  %2706 = vrot.lane.b32.xlu1 %v4439_v53, %s3861_s0  ;;  %v8794_v63 = vld [vmem:[#allocation27_spill] sm:$0xff]  ;;  %vm2400_vm15 = vcmp.lt.s32.totalorder %v5015_v10, 112 }
 0x46b   :  { %v2382_v25 = vmul.f32 %v2378_v28, %v6891_v11  ;;  %v2383_v58 = vmul.f32 %v2379_v7, %v6891_v11  ;;  %v2077_v16 = vmul.f32 %v6829_v55, %v2071_v26  ;;  %v2074_v15 = vmul.f32 %v6852_v2, %v2065_v42 }
 0x46c   :  { %v6893_v13 = vpop.permute.xlu2 %2486  ;;  %v6939_v60 = vstv %s6869_s2  ;;  %v6942_v1 = vstv %s6879_s21  ;;  %v2083_v41 = vrot.slane %v2080_v56, 7  ;;  %v2092_v49 = vsel %vm2064_vm12, %v8792_v12, %v8793_v54  ;;  %s3588_s2 = sld [smem:[#allocation8 + $0x26]]  ;;  %s3869_s21 = smov 81  }
 0x46d   :  { %v2384_v32 = vadd.f32 %v2382_v25, %v2380_v24  ;;  %v2385_v51 = vadd.f32 %v2383_v58, %v2381_v34  ;;  %v2105_v40 = vadd.f32 %v2103_v30, %v2101_v6  ;;  %v2102_v7 = vmul.f32 %v2098_v17, %v6829_v55  ;;  %v8795_v34 = vld [vmem:[#allocation197_spill] sm:$0xff]  ;;  %v8797_v6 = vld [vmem:[#allocation59_spill] sm:$0xff] }
 0x46e   :  { %v2022_v54 = vsel %vm708_vm3, %v2017_v38, %v2021_v0  ;;  %v2079_v8 = vadd.f32 %v2077_v16, %v2074_v15  ;;  %v2100_v56 = vmul.f32 %v2092_v49, %v6852_v2  ;;  %v2132_v38 = vstv %s6920_s22  ;;  %v8800_v0 = vld [vmem:[#allocation66_spill] sm:$0xff]  ;;  %s3589_s22 = sld [smem:[#allocation8 + $0x57]] }
 0x46f   :  { %v2388_v36 = vrot.slane %v2385_v51, 7  ;;  %2685 = vrot.lane.b32.xlu0 %v8794_v63, %s3861_s0  ;;  %2739 = vrot.lane.b32.xlu2 %v4303_v44, %s3862_s24  ;;  %v2406_v21 = vpop.permute.xlu1 %2405  ;;  %v8796_v51 = vld [vmem:[#allocation57_spill] sm:$0xff]  ;;  %v8801_v16 = vld [vmem:[#allocation34_spill] sm:$0xff]  ;;  %v1999_v49 = vmul.f32 %v1997_v37, %v6804_v52  ;;  %vm2176_vm0 = vcmp.lt.s32.totalorder %v5015_v10, 125  ;;  %vm2456_vm1 = vcmp.lt.s32.totalorder %v5015_v10, 111 }
 0x470   :  { %v2407_v25 = vsel %vm2400_vm15, %v8795_v34, %v2406_v21  ;;  %v2408_v58 = vsel %vm2400_vm15, %v2406_v21, %v8795_v34  ;;  %v2155_v17 = vsel %vm2120_vm14, %v8797_v6, %v8796_v51  ;;  %v8799_v21 = vld [vmem:[#allocation56_spill] sm:$0xff]  ;;  %v2084_v34 = vsel %vm708_vm3, %v2079_v8, %v2083_v41  ;;  %v8802_v41 = vld [vmem:[#allocation31_spill] sm:$0xff] }
 0x471   :  { %v6949_v4 = vsel %vm708_vm3, %v2384_v32, %v2388_v36  ;;  %v2399_v28 = vpop.permute.xlu0 %2398  ;;  %v2413_v26 = vmul.f32 %v6939_v60, %v2407_v25  ;;  %v2414_v42 = vmul.f32 %v6939_v60, %v2408_v58  ;;  %v2108_v32 = vrot.slane %v2105_v40, 7  ;;  %v8798_v36 = vld [vmem:[#allocation67_spill] sm:$0xff] }
 0x472   :  { %v2401_v57 = vsel %vm2400_vm15, %v2397_v59, %v2399_v28  ;;  %v2402_v55 = vsel %vm2400_vm15, %v2399_v28, %v2397_v59  ;;  %v2149_v59 = vsel %vm2120_vm14, %v8799_v21, %v8798_v36  ;;  %v2128_v2 = vsel %vm2120_vm14, %v8801_v16, %v8800_v0  ;;  %2732 = vrot.lane.b32.xlu1 %v8606_v29, %s3862_s24 }
 0x473   :  { %v2410_v12 = vmul.f32 %v6942_v1, %v2401_v57  ;;  %v2411_v30 = vmul.f32 %v6942_v1, %v2402_v55  ;;  %v2024_v40 = vmul.f32 %v2022_v54, %v6804_v52  ;;  %v2129_v25 = vstv %s6923_s23  ;;  %v8803_v57 = vld [vmem:[#allocation52_spill] sm:$0xff]  ;;  %s3590_s23 = sld [smem:[#allocation8 + $0x27]] }
 0x474   :  { %v6952_v24 = vpop.permute.xlu2 %2510  ;;  %v2104_v58 = vadd.f32 %v2102_v7, %v2100_v56  ;;  %v2086_v37 = vmul.f32 %v2084_v34, %v6849_v33  ;;  %v2134_v54 = vmul.f32 %v2132_v38, %v2128_v2  ;;  %v2154_v8 = vsel %vm2120_vm14, %v8796_v51, %v8797_v6  ;;  %v8805_v34 = vld [vmem:[#allocation196_spill] sm:$0xff] }
 0x475   :  { %v2415_v28 = vadd.f32 %v2413_v26, %v2410_v12  ;;  %v2416_v15 = vadd.f32 %v2414_v42, %v2411_v30  ;;  %v8804_v26 = vld [vmem:[#allocation53_spill] sm:$0xff]  ;;  %v2159_v42 = vmul.f32 %v2155_v17, %v2132_v38  ;;  %v2157_v12 = vmul.f32 %v2149_v59, %v2129_v25 }
 0x476   :  { %v2122_v55 = vsel %vm2120_vm14, %v8804_v26, %v8803_v57  ;;  %v2109_v7 = vsel %vm708_vm3, %v2104_v58, %v2108_v32  ;;  %v2148_v17 = vsel %vm2120_vm14, %v8798_v36, %v8799_v21  ;;  %v1913_v6 = vadd.f32 %v6811_v14, %v6786_v46 }
 0x477   :  { %2710 = vrot.lane.b32.xlu0 %v8802_v41, %s3861_s0  ;;  %v2419_v52 = vrot.slane %v2416_v15, 7  ;;  %2762 = vrot.lane.b32.xlu2 %v4439_v53, %s3862_s24  ;;  %v2431_v56 = vpop.permute.xlu1 %2430  ;;  %v7026_v2 = vadd.f32 %v6821_v3, %v6796_v5  ;;  %v2131_v36 = vmul.f32 %v2129_v25, %v2122_v55  ;;  %v7030_v21 = vadd.f32 %v6791_v22, %v6854_v18  ;;  %v8809_v55 = vld [vmem:[#allocation186_spill] sm:$0xff]  ;;  %s3867_s0 = smov 83  }
 0x478   :  { %v2121_v58 = vsel %vm2120_vm14, %v8803_v57, %v8804_v26  ;;  %v2161_v46 = vadd.f32 %v2159_v42, %v2157_v12  ;;  %v2127_v5 = vsel %vm2120_vm14, %v8800_v0, %v8801_v16  ;;  %v2158_v14 = vmul.f32 %v2154_v8, %v2132_v38 }
 0x479   :  { %v2425_v30 = vpop.permute.xlu0 %2424  ;;  %v7012_v59 = vsel %vm708_vm3, %v2415_v28, %v2419_v52  ;;  %8806 = vst [vmem:[#allocation192_spill] sm:$0xff] %v7026_v2  ;;  %v2000_v28 = vadd.f32 %v1999_v49, %v6798_v35  ;;  %v2111_v52 = vmul.f32 %v2109_v7, %v6849_v33  ;;  %v2136_v22 = vadd.f32 %v2134_v54, %v2131_v36  ;;  %v8807_v49 = vld [vmem:[#allocation79_spill] sm:$0xff]  ;;  %v8811_v7 = vld [vmem:[#allocation33_spill] sm:$0xff] }
 0x47a   :  { %v2428_v32 = vsel %vm2400_vm15, %v2425_v30, %v8805_v34  ;;  %v2429_v51 = vsel %vm2400_vm15, %v8805_v34, %v2425_v30  ;;  %v2156_v3 = vmul.f32 %v2148_v17, %v2129_v25  ;;  %v2025_v35 = vadd.f32 %v2024_v40, %v1913_v6  ;;  %2741 = vrot.lane.b32.xlu1 %v8794_v63, %s3862_s24 }
 0x47b   :  { %v7044_v18 = vadd.f32 %v2086_v37, %v2000_v28  ;;  %v7048_v57 = vmul.f32 %v6637_v23, %v8807_v49  ;;  %v2130_v33 = vmul.f32 %v2129_v25, %v2121_v58  ;;  %v7054_v26 = vstv %s6987_s25  ;;  %v8810_v37 = vld [vmem:[#allocation65_spill] sm:$0xff]  ;;  %v7093_v28 = vld [vmem:[#allocation2 + $0x8] sm:$0x3]  ;;  %s3591_s25 = sld [smem:[#allocation8 + $0x58]] }
 0x47c   :  { %v7014_v15 = vpop.permute.xlu2 %2536  ;;  %v7058_v0 = vmul.f32 %v6637_v23, %v8809_v55  ;;  %v2133_v16 = vmul.f32 %v2132_v38, %v2127_v5  ;;  %v2164_v40 = vrot.slane %v2161_v46, 7  ;;  %v7068_v42 = vstv %s6997_s26  ;;  %v8814_v55 = vld [vmem:[#allocation73_spill] sm:$0xff]  ;;  %s3593_s26 = sld [smem:[#allocation8 + $0x59]] }
 0x47d   :  { %8808 = vst [vmem:[#allocation81_spill] sm:$0xff] %v7048_v57  ;;  %vm2232_vm2 = vcmp.lt.s32.totalorder %v5015_v10, 115  ;;  %v7075_v23 = vadd.f32 %v2111_v52, %v2025_v35  ;;  %v2139_v25 = vrot.slane %v2136_v22, 7  ;;  %v2160_v12 = vadd.f32 %v2158_v14, %v2156_v3  ;;  %v8812_v14 = vld [vmem:[#allocation72_spill] sm:$0xff]  ;;  %v8813_v3 = vld [vmem:[#allocation58_spill] sm:$0xff] }
 0x47e   :  { %v2267_v38 = vsel %vm2232_vm2, %v8811_v7, %v8810_v37  ;;  %v2436_v58 = vmul.f32 %v2428_v32, %v6942_v1  ;;  %v2437_v52 = vmul.f32 %v2429_v51, %v6942_v1  ;;  %v2135_v22 = vadd.f32 %v2133_v16, %v2130_v33  ;;  %v8816_v1 = vld [vmem:[#allocation62_spill] sm:$0xff] }
 0x47f   :  { %2734 = vrot.lane.b32.xlu0 %v4453_v27, %s3862_s24  ;;  %2788 = vrot.lane.b32.xlu2 %v8606_v29, %s3863_s8  ;;  %v2455_v54 = vpop.permute.xlu1 %2454  ;;  %v2178_v35 = vsel %vm2176_vm0, %v8813_v3, %v8812_v14  ;;  %v8817_v51 = vld [vmem:[#allocation70_spill] sm:$0xff]  ;;  %vm2288_vm4 = vcmp.lt.s32.totalorder %v5015_v10, 114  ;;  %vm2512_vm5 = vcmp.lt.s32.totalorder %v5015_v10, 110  ;;  %vm2568_vm6 = vcmp.lt.s32.totalorder %v5015_v10, 109 }
 0x480   :  { %v2457_v17 = vsel %vm2456_vm1, %v6752_v39, %v2455_v54  ;;  %v2458_v34 = vsel %vm2456_vm1, %v2455_v54, %v6752_v39  ;;  %v2165_v39 = vsel %vm708_vm3, %v2160_v12, %v2164_v40  ;;  %v8815_v54 = vld [vmem:[#allocation175_spill] sm:$0xff]  ;;  %v7116_v40 = vsel %vm708_vm3, %v2135_v22, %v2139_v25  ;;  %v8819_v12 = vld [vmem:[#allocation193_spill] sm:$0xff] }
 0x481   :  { %v2433_v8 = vpop.permute.xlu0 %2432  ;;  %v2184_v32 = vsel %vm2176_vm0, %v8815_v54, %v8814_v55  ;;  %8818 = vst [vmem:[#allocation71_spill] sm:$0xff] %v7116_v40  ;;  %v2167_v2 = vmul.f32 %v2165_v39, %v7048_v57  ;;  %v2468_v22 = vstv %s7073_s29  ;;  %v8820_v39 = vld [vmem:[#allocation179_spill] sm:$0xff]  ;;  %v2260_v40 = vsel %vm2232_vm2, %v8816_v1, %v8817_v51  ;;  %s3595_s29 = sld [smem:[#allocation8 + $0x5a]] }
 0x482   :  { %v2434_v6 = vsel %vm2400_vm15, %v2431_v56, %v2433_v8  ;;  %v2435_v36 = vsel %vm2400_vm15, %v2433_v8, %v2431_v56  ;;  %v7105_v56 = vstv %s7038_s27  ;;  %v7120_v8 = vmul.f32 %v8819_v12, %v7093_v28  ;;  %2766 = vrot.lane.b32.xlu1 %v8802_v41, %s3862_s24  ;;  %s3592_s27 = sld [smem:[#allocation8 + $0x28]] }
 0x483   :  { %v2438_v46 = vmul.f32 %v2434_v6, %v6939_v60  ;;  %v2439_v5 = vmul.f32 %v2435_v36, %v6939_v60  ;;  %v2261_v60 = vsel %vm2232_vm2, %v8817_v51, %v8816_v1  ;;  %v7123_v6 = vstv %s7051_s28  ;;  %s3871_s28 = smov 79  }
 0x484   :  { %v7081_v30 = vpop.permute.xlu2 %2544  ;;  %v2271_v36 = vmul.f32 %v2267_v38, %v7105_v56  ;;  %v2190_v38 = vmul.f32 %v7068_v42, %v2184_v32  ;;  %v2266_v32 = vsel %vm2232_vm2, %v8810_v37, %v8811_v7  ;;  %vm2624_vm7 = vcmp.lt.s32.totalorder %v5015_v10, 99 }
 0x485   :  { %v2440_v33 = vadd.f32 %v2438_v46, %v2436_v58  ;;  %v2441_v16 = vadd.f32 %v2439_v5, %v2437_v52  ;;  %v2177_v58 = vsel %vm2176_vm0, %v8812_v14, %v8813_v3  ;;  %v2187_v52 = vmul.f32 %v7054_v26, %v2178_v35  ;;  %v8821_v14 = vld [vmem:[#allocation63_spill] sm:$0xff] }
 0x486   :  { %v2269_v46 = vmul.f32 %v2261_v60, %v7123_v6  ;;  %v2465_v5 = vstv %s7064_s7  ;;  %v2204_v3 = vsel %vm2176_vm0, %v8821_v14, %v8820_v39  ;;  %v2183_v35 = vsel %vm2176_vm0, %v8814_v55, %v8815_v54  ;;  %s3594_s7 = sld [smem:[#allocation8 + $0x29]] }
 0x487   :  { %v2444_v25 = vrot.slane %v2441_v16, 7  ;;  %2760 = vrot.lane.b32.xlu0 %v8559_v9, %s3862_s24  ;;  %2797 = vrot.lane.b32.xlu2 %v8794_v63, %s3863_s8  ;;  %v2481_v16 = vpop.permute.xlu1 %2480  ;;  %v2466_v7 = vmul.f32 %v2465_v5, %v2457_v17  ;;  %v2467_v54 = vmul.f32 %v2465_v5, %v2458_v34  ;;  %v2205_v1 = vsel %vm2176_vm0, %v8820_v39, %v8821_v14 }
 0x488   :  { %v2273_v57 = vadd.f32 %v2271_v36, %v2269_v46  ;;  %v2189_v51 = vmul.f32 %v7068_v42, %v2183_v35  ;;  %v2192_v36 = vadd.f32 %v2190_v38, %v2187_v52  ;;  %v2270_v46 = vmul.f32 %v2266_v32, %v7105_v56 }
 0x489   :  { %v7159_v60 = vsel %vm708_vm3, %v2440_v33, %v2444_v25  ;;  %v2460_v12 = vpop.permute.xlu0 %2459  ;;  %v7188_v52 = vmul.f32 %v2204_v3, %v7054_v26  ;;  %v7192_v38 = vstv %s7132_s9  ;;  %v8827_v3 = vld [vmem:[#allocation76_spill] sm:$0xff]  ;;  %v7206_v32 = vstv %s7156_s1  ;;  %s3596_s9 = sld [smem:[#allocation8 + $0x2a]]  ;;  %s3873_s1 = smov 77  }
 0x48a   :  { %8822 = vst [vmem:[#allocation194_spill] sm:$0xff] %v7159_v60  ;;  %v2463_v55 = vsel %vm2456_vm1, %v2460_v12, %v6817_v48  ;;  %v2464_v37 = vsel %vm2456_vm1, %v6817_v48, %v2460_v12  ;;  %v8825_v60 = vld [vmem:[#allocation64_spill] sm:$0xff]  ;;  %v2168_v12 = vadd.f32 %v2167_v2, %v7030_v21  ;;  %v2276_v39 = vrot.slane %v2273_v57, 7  ;;  %2790 = vrot.lane.b32.xlu1 %v4453_v27, %s3863_s8  ;;  %v8826_v57 = vld [vmem:[#allocation177_spill] sm:$0xff] }
 0x48b   :  { %v2469_v33 = vmul.f32 %v2468_v22, %v2463_v55  ;;  %v2470_v25 = vmul.f32 %v2468_v22, %v2464_v37  ;;  %v2211_v48 = vsel %vm2176_vm0, %v8825_v60, %v8824_v47  ;;  %v2268_v55 = vmul.f32 %v2260_v40, %v7123_v6  ;;  %v8828_v37 = vld [vmem:[#allocation183_spill] sm:$0xff] }
 0x48c   :  { %v7165_v63 = vpop.permute.xlu2 %2571  ;;  %v2195_v21 = vrot.slane %v2192_v36, 7  ;;  %v2215_v40 = vmul.f32 %v2211_v48, %v7068_v42  ;;  %vm2680_vm8 = vcmp.lt.s32.totalorder %v5015_v10, 98  ;;  %vm2736_vm9 = vcmp.lt.s32.totalorder %v5015_v10, 97 }
 0x48d   :  { %8823 = vst [vmem:[#allocation68_spill] sm:$0xff] %v7165_v63  ;;  %v2186_v63 = vmul.f32 %v7054_v26, %v2177_v58  ;;  %v2471_v17 = vadd.f32 %v2469_v33, %v2466_v7  ;;  %v2472_v34 = vadd.f32 %v2470_v25, %v2467_v54  ;;  %v2213_v58 = vmul.f32 %v2205_v1, %v7054_v26  ;;  %v8829_v7 = vld [vmem:[#allocation182_spill] sm:$0xff] }
 0x48e   :  { %v2272_v35 = vadd.f32 %v2270_v46, %v2268_v55  ;;  %v2290_v26 = vsel %vm2288_vm4, %v8827_v3, %v8826_v57  ;;  %v2296_v54 = vsel %vm2288_vm4, %v8829_v7, %v8828_v37  ;;  %vm2792_vm10 = vcmp.lt.s32.totalorder %v5015_v10, 96 }
 0x48f   :  { %v2475_v14 = vrot.slane %v2472_v34, 7  ;;  %2768 = vrot.lane.b32.xlu0 %v8670_v31, %s3862_s24  ;;  %v2191_v2 = vadd.f32 %v2189_v51, %v2186_v63  ;;  %2822 = vrot.lane.b32.xlu2 %v8802_v41, %s3863_s8  ;;  %v2489_v33 = vpop.permute.xlu1 %2488  ;;  %vm2848_vm11 = vcmp.lt.s32.totalorder %v5015_v10, 95  ;;  %s3870_s24 = smov 80   ;;  %vm2904_vm12 = vcmp.lt.s32.totalorder %v5015_v10, 94 }
 0x490   :  { %v2277_v1 = vsel %vm708_vm3, %v2272_v35, %v2276_v39  ;;  %v2490_v36 = vsel %vm2456_vm1, %v6893_v13, %v2489_v33  ;;  %v2491_v46 = vsel %vm2456_vm1, %v2489_v33, %v6893_v13  ;;  %v2210_v35 = vsel %vm2176_vm0, %v8824_v47, %v8825_v60  ;;  %v8834_v47 = vld [vmem:[#allocation191_spill] sm:$0xff] }
 0x491   :  { %v7213_v63 = vsel %vm708_vm3, %v2471_v17, %v2475_v14  ;;  %v2483_v25 = vpop.permute.xlu0 %2482  ;;  %v2494_v34 = vmul.f32 %v2490_v36, %v2468_v22  ;;  %v2495_v17 = vmul.f32 %v2491_v46, %v2468_v22  ;;  %v2196_v39 = vsel %vm708_vm3, %v2191_v2, %v2195_v21  ;;  %v8832_v2 = vld [vmem:[#allocation195_spill] sm:$0xff]  ;;  %v8833_v46 = vld [vmem:[#allocation189_spill] sm:$0xff] }
 0x492   :  { %v2484_v48 = vsel %vm2456_vm1, %v2481_v16, %v2483_v25  ;;  %v2485_v55 = vsel %vm2456_vm1, %v2483_v25, %v2481_v16  ;;  %v2217_v13 = vadd.f32 %v2215_v40, %v2213_v58  ;;  %v2279_v33 = vmul.f32 %v2277_v1, %v7120_v8  ;;  %v8831_v25 = vld [vmem:[#allocation190_spill] sm:$0xff]  ;;  %2816 = vrot.lane.b32.xlu1 %v8559_v9, %s3863_s8 }
 0x493   :  { %v2492_v14 = vmul.f32 %v2484_v48, %v2465_v5  ;;  %v2493_v41 = vmul.f32 %v2485_v55, %v2465_v5  ;;  %v7237_v22 = vmul.f32 %v6800_v20, %v7093_v28  ;;  %v2299_v16 = vmul.f32 %v7192_v38, %v2290_v26 }
 0x494   :  { %v7216_v51 = vpop.permute.xlu2 %2594  ;;  %v2323_v21 = vsel %vm2288_vm4, %v8832_v2, %v8831_v25  ;;  %v2317_v5 = vsel %vm2288_vm4, %v8834_v47, %v8833_v46  ;;  %v2198_v58 = vmul.f32 %v2196_v39, %v7058_v0  ;;  %v2214_v40 = vmul.f32 %v2210_v35, %v7068_v42  ;;  %v8835_v35 = vld [vmem:[#allocation69_spill] sm:$0xff] }
 0x495   :  { %8830 = vst [vmem:[#allocation82_spill] sm:$0xff] %v7216_v51  ;;  %v2302_v51 = vmul.f32 %v7206_v32, %v2296_v54  ;;  %v2496_v36 = vadd.f32 %v2494_v34, %v2492_v14  ;;  %v2497_v60 = vadd.f32 %v2495_v17, %v2493_v41  ;;  %v2391_v20 = vmul.f32 %v6949_v4, %v7237_v22 }
 0x496   :  { %v2289_v41 = vsel %vm2288_vm4, %v8826_v57, %v8827_v3  ;;  %v2295_v4 = vsel %vm2288_vm4, %v8828_v37, %v8829_v7  ;;  %v2280_v54 = vadd.f32 %v2279_v33, %v2168_v12  ;;  %v2327_v1 = vmul.f32 %v2323_v21, %v7206_v32 }
 0x497   :  { %2795 = vrot.lane.b32.xlu0 %v4303_v44, %s3863_s8  ;;  %v2304_v42 = vadd.f32 %v2302_v51, %v2299_v16  ;;  %v2500_v26 = vrot.slane %v2497_v60, 7  ;;  %2846 = vrot.lane.b32.xlu2 %v4453_v27, %s3864_s3  ;;  %v2325_v48 = vmul.f32 %v2317_v5, %v7192_v38  ;;  %v7275_v57 = vmul.f32 %v6460_v45, %v7093_v28  ;;  %v2516_v3 = vpop.permute.xlu1 %2515  ;;  %v8838_v16 = vld [vmem:[#allocation188_spill] sm:$0xff] }
 0x498   :  { %v2220_v37 = vrot.slane %v2217_v13, 7  ;;  %v2216_v55 = vadd.f32 %v2214_v40, %v7188_v52  ;;  %v2301_v45 = vmul.f32 %v7206_v32, %v2295_v4  ;;  %v2392_v14 = vadd.f32 %v2391_v20, %v2280_v54  ;;  %v8836_v13 = vld [vmem:[#allocation185_spill] sm:$0xff] }
 0x499   :  { %v2509_v34 = vpop.permute.xlu0 %2508  ;;  %v2501_v7 = vsel %vm708_vm3, %v2496_v36, %v2500_v26  ;;  %v2240_v33 = vsel %vm2232_vm2, %v8836_v13, %v8835_v35  ;;  %v8837_v36 = vld [vmem:[#allocation176_spill] sm:$0xff]  ;;  %v2298_v5 = vmul.f32 %v7192_v38, %v2289_v41  ;;  %v2322_v52 = vsel %vm2288_vm4, %v8831_v25, %v8832_v2 }
 0x49a   :  { %v2513_v17 = vsel %vm2512_vm5, %v2509_v34, %v6952_v24  ;;  %v2514_v12 = vsel %vm2512_vm5, %v6952_v24, %v2509_v34  ;;  %v2503_v39 = vmul.f32 %v2501_v7, %v7275_v57  ;;  %v2234_v21 = vsel %vm2232_vm2, %v8838_v16, %v8837_v36  ;;  %2824 = vrot.lane.b32.xlu1 %v8670_v31, %s3863_s8  ;;  %v7333_v34 = vld [vmem:[#allocation6 + $0x6] sm:$0x3] }
 0x49b   :  { %v2307_v24 = vrot.slane %v2304_v42, 7  ;;  %v2316_v60 = vsel %vm2288_vm4, %v8833_v46, %v8834_v47  ;;  %v2329_v40 = vadd.f32 %v2327_v1, %v2325_v48  ;;  %v2199_v4 = vadd.f32 %v2198_v58, %v7044_v18 }
 0x49c   :  { %v7278_v51 = vpop.permute.xlu2 %2620  ;;  %v7306_v20 = vadd.f32 %v2503_v39, %v2392_v14  ;;  %v2221_v41 = vsel %vm708_vm3, %v2216_v55, %v2220_v37  ;;  %v2239_v42 = vsel %vm2232_vm2, %v8835_v35, %v8836_v13  ;;  %v2281_v25 = vmul.f32 %v6770_v62, %v7093_v28 }
 0x49d   :  { %v2246_v2 = vmul.f32 %v7105_v56, %v2240_v33  ;;  %v2243_v46 = vmul.f32 %v7123_v6, %v2234_v21  ;;  %v2303_v47 = vadd.f32 %v2301_v45, %v2298_v5  ;;  %v2326_v18 = vmul.f32 %v2322_v52, %v7206_v32 }
 0x49e   :  { %v2324_v58 = vmul.f32 %v2316_v60, %v7192_v38  ;;  %v2521_v26 = vstv %s7256_s10  ;;  %v2524_v62 = vstv %s7269_s11  ;;  %v2332_v1 = vrot.slane %v2329_v40, 7  ;;  %v8839_v60 = vld [vmem:[#allocation75_spill] sm:$0xff]  ;;  %s3597_s10 = sld [smem:[#allocation8 + $0x5b]] }
 0x49f   :  { %2818 = vrot.lane.b32.xlu0 %v4439_v53, %s3863_s8  ;;  %2872 = vrot.lane.b32.xlu2 %v8559_v9, %s3864_s3  ;;  %v2308_v54 = vsel %vm708_vm3, %v2303_v47, %v2307_v24  ;;  %v2352_v48 = vsel %vm2344_vm13, %v6808_v19, %v6744_v43  ;;  %v2393_v32 = vmul.f32 %v7333_v34, %v7093_v28  ;;  %v2539_v37 = vpop.permute.xlu1 %2538  ;;  %s3872_s8 = smov 78   ;;  %vm3016_vm14 = vcmp.lt.s32.totalorder %v5015_v10, 83  ;;  %s3598_s11 = sld [smem:[#allocation8 + $0x2b]] }
 0x4a0   :  { %v2540_v55 = vsel %vm2512_vm5, %v7014_v15, %v2539_v37  ;;  %v2541_v45 = vsel %vm2512_vm5, %v2539_v37, %v7014_v15  ;;  %v2522_v35 = vmul.f32 %v2521_v26, %v2513_v17  ;;  %v2523_v13 = vmul.f32 %v2521_v26, %v2514_v12 }
 0x4a1   :  { %v2518_v38 = vpop.permute.xlu0 %2517  ;;  %v2248_v5 = vadd.f32 %v2246_v2, %v2243_v46  ;;  %v2310_v24 = vmul.f32 %v2308_v54, %v2281_v25  ;;  %v2328_v52 = vadd.f32 %v2326_v18, %v2324_v58  ;;  %v2346_v40 = vsel %vm2344_vm13, %v8839_v60, %v6746_v61 }
 0x4a2   :  { %v2519_v14 = vsel %vm2512_vm5, %v2516_v3, %v2518_v38  ;;  %v2520_v39 = vsel %vm2512_vm5, %v2518_v38, %v2516_v3  ;;  %v2233_v15 = vsel %vm2232_vm2, %v8837_v36, %v8838_v16  ;;  %v2358_v47 = vmul.f32 %v6891_v11, %v2352_v48  ;;  %2851 = vrot.lane.b32.xlu1 %v4303_v44, %s3864_s3 }
 0x4a3   :  { %v2525_v33 = vmul.f32 %v2524_v62, %v2519_v14  ;;  %v2526_v21 = vmul.f32 %v2524_v62, %v2520_v39  ;;  %v2333_v12 = vsel %vm708_vm3, %v2328_v52, %v2332_v1  ;;  %v2351_v2 = vsel %vm2344_vm13, %v6744_v43, %v6808_v19 }
 0x4a4   :  { %v7337_v7 = vpop.permute.xlu2 %2629  ;;  %v2422_v46 = vmul.f32 %v7012_v59, %v2393_v32  ;;  %v2505_v18 = vmul.f32 %v8807_v49, %v7093_v28  ;;  %v2223_v58 = vmul.f32 %v2221_v41, %v7058_v0  ;;  %v2245_v36 = vmul.f32 %v7105_v56, %v2239_v42 }
 0x4a5   :  { %v2527_v3 = vadd.f32 %v2525_v33, %v2522_v35  ;;  %v2528_v17 = vadd.f32 %v2526_v21, %v2523_v13  ;;  %v2355_v16 = vmul.f32 %v6888_v50, %v2346_v40  ;;  %v2242_v43 = vmul.f32 %v7123_v6, %v2233_v15  ;;  %v8841_v15 = vld [vmem:[#allocation165_spill] sm:$0xff] }
 0x4a6   :  { %v2251_v19 = vrot.slane %v2248_v5, 7  ;;  %v2311_v59 = vadd.f32 %v2310_v24, %v2199_v4  ;;  %v2345_v49 = vsel %vm2344_vm13, %v6746_v61, %v8839_v60  ;;  %v2335_v0 = vmul.f32 %v2333_v12, %v2281_v25  ;;  %v8840_v24 = vld [vmem:[#allocation194_spill] sm:$0xff] }
 0x4a7   :  { %v2531_v54 = vrot.slane %v2528_v17, 7  ;;  %2844 = vrot.lane.b32.xlu0 %v8606_v29, %s3864_s3  ;;  %2880 = vrot.lane.b32.xlu2 %v8670_v31, %s3864_s3  ;;  %v2357_v56 = vmul.f32 %v6891_v11, %v2351_v2  ;;  %v2360_v41 = vadd.f32 %v2358_v47, %v2355_v16  ;;  %v2565_v1 = vpop.permute.xlu1 %2564  ;;  %v2548_v25 = vmul.f32 %v2540_v55, %v2521_v26  ;;  %v8846_v17 = vld [vmem:[#allocation71_spill] sm:$0xff] }
 0x4a8   :  { %v2423_v48 = vadd.f32 %v2422_v46, %v2311_v59  ;;  %v2549_v14 = vmul.f32 %v2541_v45, %v2521_v26  ;;  %v2224_v35 = vadd.f32 %v2223_v58, %v7075_v23  ;;  %v2247_v13 = vadd.f32 %v2245_v36, %v2242_v43 }
 0x4a9   :  { %v2532_v42 = vsel %vm708_vm3, %v2527_v3, %v2531_v54  ;;  %v2543_v6 = vpop.permute.xlu0 %2542  ;;  %v2354_v33 = vmul.f32 %v6888_v50, %v2345_v49  ;;  %v2363_v5 = vrot.slane %v2360_v41, 7  ;;  %v2447_v52 = vmul.f32 %v8840_v24, %v2393_v32  ;;  %v8843_v50 = vld [vmem:[#allocation27_spill] sm:$0xff]  ;;  %v8844_v32 = vld [vmem:[#allocation192_spill] sm:$0xff]  ;;  %v8845_v3 = vld [vmem:[#allocation81_spill] sm:$0xff] }
 0x4aa   :  { %v2534_v4 = vmul.f32 %v2532_v42, %v2505_v18  ;;  %v2546_v61 = vsel %vm2512_vm5, %v2543_v6, %v7081_v30  ;;  %v2547_v38 = vsel %vm2512_vm5, %v7081_v30, %v2543_v6  ;;  %v8842_v30 = vld [vmem:[#allocation166_spill] sm:$0xff]  ;;  %v2252_v26 = vsel %vm708_vm3, %v2247_v13, %v2251_v19  ;;  %2874 = vrot.lane.b32.xlu1 %v4439_v53, %s3864_s3  ;;  %v7434_v13 = vld [vmem:[#allocation6 + $0xc] sm:$0x3] }
 0x4ab   :  { %v2550_v11 = vmul.f32 %v2546_v61, %v2524_v62  ;;  %v2551_v39 = vmul.f32 %v2547_v38, %v2524_v62  ;;  %v2042_v55 = vmul.f32 %v8842_v30, %v8841_v15  ;;  %v2336_v62 = vadd.f32 %v2335_v0, %v2224_v35  ;;  %v8847_v0 = vld [vmem:[#allocation68_spill] sm:$0xff] }
 0x4ac   :  { %v7386_v37 = vpop.permute.xlu2 %2654  ;;  %v7396_v21 = vadd.f32 %v2534_v4, %v2423_v48  ;;  %v2359_v45 = vadd.f32 %v2357_v56, %v2354_v33  ;;  %v2142_v12 = vmul.f32 %v8846_v17, %v8845_v3  ;;  %v2580_v2 = vstv %s7373_s12  ;;  %s3600_s12 = sld [smem:[#allocation8 + $0x2c]] }
 0x4ad   :  { %v2552_v60 = vadd.f32 %v2550_v11, %v2548_v25  ;;  %v2553_v40 = vadd.f32 %v2551_v39, %v2549_v14  ;;  %v2043_v47 = vadd.f32 %v2042_v55, %v8844_v32  ;;  %v2577_v46 = vstv %s7382_s5  ;;  %s3601_s5 = sld [smem:[#allocation8 + $0x5d]] }
 0x4ae   :  { %v2254_v58 = vmul.f32 %v2252_v26, %v7120_v8  ;;  %v2364_v36 = vsel %vm708_vm3, %v2359_v45, %v2363_v5  ;;  %v2448_v16 = vadd.f32 %v2447_v52, %v2336_v62  ;;  %v2478_v35 = vmul.f32 %v7213_v63, %v7275_v57 }
 0x4af   :  { %v2556_v23 = vrot.slane %v2553_v40, 7  ;;  %2853 = vrot.lane.b32.xlu0 %v8843_v50, %s3864_s3  ;;  %2907 = vrot.lane.b32.xlu2 %v4303_v44, %s3865_s13  ;;  %v2574_v43 = vpop.permute.xlu1 %2573  ;;  %v2143_v38 = vadd.f32 %v2142_v12, %v2043_v47  ;;  %v2366_v25 = vmul.f32 %v2364_v36, %v7237_v22  ;;  %v2561_v33 = vmul.f32 %v7434_v13, %v7093_v28 }
 0x4b0   :  { %v2575_v56 = vsel %vm2568_vm6, %v8847_v0, %v2574_v43  ;;  %v2576_v41 = vsel %vm2568_vm6, %v2574_v43, %v8847_v0  ;;  %vm2960_vm13 = vcmp.lt.s32.totalorder %v5015_v10, 93  ;;  %vm3072_vm15 = vcmp.lt.s32.totalorder %v5015_v10, 82 }
 0x4b1   :  { %v2557_v54 = vsel %vm708_vm3, %v2552_v60, %v2556_v23  ;;  %v2567_v19 = vpop.permute.xlu0 %2566  ;;  %v2581_v42 = vmul.f32 %v2580_v2, %v2575_v56  ;;  %v2582_v6 = vmul.f32 %v2580_v2, %v2576_v41  ;;  %v2255_v39 = vadd.f32 %v2254_v58, %v2143_v38  ;;  %v8849_v60 = vld [vmem:[#allocation82_spill] sm:$0xff] }
 0x4b2   :  { %v2559_v59 = vmul.f32 %v2557_v54, %v2505_v18  ;;  %v2569_v8 = vsel %vm2568_vm6, %v2565_v1, %v2567_v19  ;;  %v2570_v48 = vsel %vm2568_vm6, %v2567_v19, %v2565_v1  ;;  %2900 = vrot.lane.b32.xlu1 %v8606_v29, %s3865_s13  ;;  %v8848_v1 = vld [vmem:[#allocation31_spill] sm:$0xff]  ;;  %v2636_v19 = vstv %s3583_s15  ;;  %s3604_s15 = sld [smem:[#allocation8 + $0x2e]] }
 0x4b3   :  { %v2578_v4 = vmul.f32 %v2577_v46, %v2569_v8  ;;  %v2579_v61 = vmul.f32 %v2577_v46, %v2570_v48  ;;  %v2367_v22 = vadd.f32 %v2366_v25, %v2255_v39  ;;  %v7489_v48 = vld [vmem:[#allocation2 + $0xa] sm:$0x3]  ;;  %vm3128_vm0 = vcmp.lt.s32.totalorder %v5015_v10, 81 }
 0x4b4   :  { %v7417_v49 = vpop.permute.xlu2 %2678  ;;  %v7429_v18 = vadd.f32 %v2559_v59, %v2448_v16  ;;  %vm3184_vm1 = vcmp.lt.s32.totalorder %v5015_v10, 80  ;;  %vm3240_vm2 = vcmp.lt.s32.totalorder %v5015_v10, 79  ;;  %vm3296_vm4 = vcmp.lt.s32.totalorder %v5015_v10, 78 }
 0x4b5   :  { %v2583_v14 = vadd.f32 %v2581_v42, %v2578_v4  ;;  %v2584_v11 = vadd.f32 %v2582_v6, %v2579_v61  ;;  %v2479_v15 = vadd.f32 %v2478_v35, %v2367_v22  ;;  %vm3352_vm5 = vcmp.lt.s32.totalorder %v5015_v10, 77 }
 0x4b7   :  { %2878 = vrot.lane.b32.xlu0 %v8848_v1, %s3864_s3  ;;  %v2587_v5 = vrot.slane %v2584_v11, 7  ;;  %2930 = vrot.lane.b32.xlu2 %v4439_v53, %s3865_s13  ;;  %v2599_v24 = vpop.permute.xlu1 %2598  ;;  %v7494_v11 = vld [vmem:[#allocation6] sm:$0x3]  ;;  %s3599_s3 = sld [smem:[#allocation8 + $0x5c]] }
 0x4b8   :  { %v2617_v39 = vmul.f32 %v7494_v11, %v7489_v48 }
 0x4b9   :  { %v2593_v52 = vpop.permute.xlu0 %2592  ;;  %v2588_v63 = vsel %vm708_vm3, %v2583_v14, %v2587_v5 }
 0x4ba   :  { %v2596_v28 = vsel %vm2568_vm6, %v2593_v52, %v8849_v60  ;;  %v2597_v40 = vsel %vm2568_vm6, %v8849_v60, %v2593_v52  ;;  %v2590_v30 = vmul.f32 %v2588_v63, %v2561_v33  ;;  %2909 = vrot.lane.b32.xlu1 %v8843_v50, %s3865_s13 }
 0x4bb   :  { %v2604_v17 = vmul.f32 %v2596_v28, %v2577_v46  ;;  %v2605_v12 = vmul.f32 %v2597_v40, %v2577_v46 }
 0x4bc   :  { %v7445_v57 = vpop.permute.xlu2 %2704  ;;  %v7453_v55 = vadd.f32 %v2590_v30, %v2479_v15 }
 0x4bf   :  { %2902 = vrot.lane.b32.xlu0 %v4453_v27, %s3865_s13  ;;  %2956 = vrot.lane.b32.xlu2 %v8606_v29, %s3866_s30  ;;  %v2623_v26 = vpop.permute.xlu1 %2622 }
 0x4c0   :  { %v2625_v23 = vsel %vm2624_vm7, %v7278_v51, %v2623_v26  ;;  %v2626_v32 = vsel %vm2624_vm7, %v2623_v26, %v7278_v51  ;;  %v2633_v51 = vstv %s3582_s14  ;;  %s3603_s14 = sld [smem:[#allocation8 + $0x5e]] }
 0x4c1   :  { %v2601_v62 = vpop.permute.xlu0 %2600  ;;  %v2634_v42 = vmul.f32 %v2633_v51, %v2625_v23  ;;  %v2635_v6 = vmul.f32 %v2633_v51, %v2626_v32 }
 0x4c2   :  { %v2602_v47 = vsel %vm2568_vm6, %v2599_v24, %v2601_v62  ;;  %v2603_v3 = vsel %vm2568_vm6, %v2601_v62, %v2599_v24  ;;  %2934 = vrot.lane.b32.xlu1 %v8848_v1, %s3865_s13 }
 0x4c3   :  { %v2606_v58 = vmul.f32 %v2602_v47, %v2580_v2  ;;  %v2607_v36 = vmul.f32 %v2603_v3, %v2580_v2 }
 0x4c4   :  { %v7462_v45 = vpop.permute.xlu2 %2712 }
 0x4c5   :  { %v2608_v16 = vadd.f32 %v2606_v58, %v2604_v17  ;;  %v2609_v54 = vadd.f32 %v2607_v36, %v2605_v12 }
 0x4c7   :  { %v2612_v43 = vrot.slane %v2609_v54, 7  ;;  %2928 = vrot.lane.b32.xlu0 %v8559_v9, %s3865_s13  ;;  %2965 = vrot.lane.b32.xlu2 %v8843_v50, %s3866_s30  ;;  %v2649_v0 = vpop.permute.xlu1 %2648  ;;  %v2692_v54 = vstv %s3585_s17  ;;  %s3608_s17 = sld [smem:[#allocation8 + $0x30]] }
 0x4c9   :  { %v2613_v59 = vsel %vm708_vm3, %v2608_v16, %v2612_v43  ;;  %v2628_v46 = vpop.permute.xlu0 %2627  ;;  %v2689_v16 = vstv %s3584_s16  ;;  %s3607_s16 = sld [smem:[#allocation8 + $0x60]] }
 0x4ca   :  { %v2615_v56 = vmul.f32 %v2613_v59, %v2561_v33  ;;  %v2631_v41 = vsel %vm2624_vm7, %v2628_v46, %v7337_v7  ;;  %v2632_v8 = vsel %vm2624_vm7, %v7337_v7, %v2628_v46  ;;  %2958 = vrot.lane.b32.xlu1 %v4453_v27, %s3866_s30 }
 0x4cb   :  { %v2637_v4 = vmul.f32 %v2636_v19, %v2631_v41  ;;  %v2638_v61 = vmul.f32 %v2636_v19, %v2632_v8 }
 0x4cc   :  { %v7481_v2 = vpop.permute.xlu2 %2739  ;;  %v7492_v38 = vadd.f32 %v2615_v56, %v7306_v20 }
 0x4cd   :  { %v2639_v25 = vadd.f32 %v2637_v4, %v2634_v42  ;;  %v2640_v14 = vadd.f32 %v2638_v61, %v2635_v6  ;;  %v7557_v4 = vld [vmem:[#allocation6 + $0x2] sm:$0x3] }
 0x4ce   :  { %v2673_v61 = vmul.f32 %v7557_v4, %v7489_v48 }
 0x4cf   :  { %v2643_v35 = vrot.slane %v2640_v14, 7  ;;  %2936 = vrot.lane.b32.xlu0 %v8670_v31, %s3865_s13  ;;  %2990 = vrot.lane.b32.xlu2 %v8848_v1, %s3866_s30  ;;  %v2657_v7 = vpop.permute.xlu1 %2656  ;;  %s3602_s13 = sld [smem:[#allocation8 + $0x2d]] }
 0x4d0   :  { %v2658_v24 = vsel %vm2624_vm7, %v7386_v37, %v2657_v7  ;;  %v2659_v52 = vsel %vm2624_vm7, %v2657_v7, %v7386_v37 }
 0x4d1   :  { %v2644_v20 = vsel %vm708_vm3, %v2639_v25, %v2643_v35  ;;  %v2651_v33 = vpop.permute.xlu0 %2650  ;;  %v2662_v60 = vmul.f32 %v2658_v24, %v2636_v19  ;;  %v2663_v28 = vmul.f32 %v2659_v52, %v2636_v19 }
 0x4d2   :  { %v2646_v5 = vmul.f32 %v2644_v20, %v2617_v39  ;;  %v2652_v63 = vsel %vm2624_vm7, %v2649_v0, %v2651_v33  ;;  %v2653_v40 = vsel %vm2624_vm7, %v2651_v33, %v2649_v0  ;;  %2984 = vrot.lane.b32.xlu1 %v8559_v9, %s3866_s30 }
 0x4d3   :  { %v2660_v15 = vmul.f32 %v2652_v63, %v2633_v51  ;;  %v2661_v26 = vmul.f32 %v2653_v40, %v2633_v51 }
 0x4d4   :  { %v7505_v22 = vpop.permute.xlu2 %2762  ;;  %v7518_v30 = vadd.f32 %v2646_v5, %v7396_v21 }
 0x4d5   :  { %v2664_v62 = vadd.f32 %v2662_v60, %v2660_v15  ;;  %v2665_v23 = vadd.f32 %v2663_v28, %v2661_v26  ;;  %v2745_v26 = vstv %s3586_s19 }
 0x4d7   :  { %2963 = vrot.lane.b32.xlu0 %v4303_v44, %s3866_s30  ;;  %v2668_v37 = vrot.slane %v2665_v23, 7  ;;  %3014 = vrot.lane.b32.xlu2 %v4453_v27, %s3867_s0  ;;  %v2684_v21 = vpop.permute.xlu1 %2683 }
 0x4d9   :  { %v2677_v32 = vpop.permute.xlu0 %2676  ;;  %v2669_v47 = vsel %vm708_vm3, %v2664_v62, %v2668_v37 }
 0x4da   :  { %v2681_v17 = vsel %vm2680_vm8, %v2677_v32, %v7417_v49  ;;  %v2682_v12 = vsel %vm2680_vm8, %v7417_v49, %v2677_v32  ;;  %v2671_v58 = vmul.f32 %v2669_v47, %v2617_v39  ;;  %2992 = vrot.lane.b32.xlu1 %v8670_v31, %s3866_s30 }
 0x4db   :  { %v2690_v46 = vmul.f32 %v2689_v16, %v2681_v17  ;;  %v2691_v56 = vmul.f32 %v2689_v16, %v2682_v12 }
 0x4dc   :  { %v7528_v3 = vpop.permute.xlu2 %2788  ;;  %v7537_v36 = vadd.f32 %v2671_v58, %v7429_v18 }
 0x4df   :  { %2986 = vrot.lane.b32.xlu0 %v4439_v53, %s3866_s30  ;;  %3040 = vrot.lane.b32.xlu2 %v8559_v9, %s3867_s0  ;;  %v2707_v43 = vpop.permute.xlu1 %2706  ;;  %s3605_s30 = sld [smem:[#allocation8 + $0x5f]] }
 0x4e0   :  { %v2708_v49 = vsel %vm2680_vm8, %v7445_v57, %v2707_v43  ;;  %v2709_v18 = vsel %vm2680_vm8, %v2707_v43, %v7445_v57 }
 0x4e1   :  { %v2686_v51 = vpop.permute.xlu0 %2685  ;;  %v2716_v5 = vmul.f32 %v2708_v49, %v2689_v16  ;;  %v2717_v24 = vmul.f32 %v2709_v18, %v2689_v16 }
 0x4e2   :  { %v2687_v59 = vsel %vm2680_vm8, %v2684_v21, %v2686_v51  ;;  %v2688_v0 = vsel %vm2680_vm8, %v2686_v51, %v2684_v21  ;;  %3019 = vrot.lane.b32.xlu1 %v4303_v44, %s3867_s0 }
 0x4e3   :  { %v2693_v41 = vmul.f32 %v2692_v54, %v2687_v59  ;;  %v2694_v8 = vmul.f32 %v2692_v54, %v2688_v0  ;;  %v7602_v59 = vld [vmem:[#allocation6 + $0x4] sm:$0x3] }
 0x4e4   :  { %v7545_v19 = vpop.permute.xlu2 %2797 }
 0x4e5   :  { %v2695_v42 = vadd.f32 %v2693_v41, %v2690_v46  ;;  %v2696_v6 = vadd.f32 %v2694_v8, %v2691_v56 }
 0x4e7   :  { %v2699_v25 = vrot.slane %v2696_v6, 7  ;;  %3012 = vrot.lane.b32.xlu0 %v8606_v29, %s3867_s0  ;;  %3048 = vrot.lane.b32.xlu2 %v8670_v31, %s3867_s0  ;;  %v2733_v14 = vpop.permute.xlu1 %2732 }
 0x4e9   :  { %v2700_v57 = vsel %vm708_vm3, %v2695_v42, %v2699_v25  ;;  %v2711_v39 = vpop.permute.xlu0 %2710 }
 0x4ea   :  { %v2702_v35 = vmul.f32 %v2700_v57, %v2673_v61  ;;  %v2714_v7 = vsel %vm2680_vm8, %v2711_v39, %v7462_v45  ;;  %v2715_v33 = vsel %vm2680_vm8, %v7462_v45, %v2711_v39  ;;  %3042 = vrot.lane.b32.xlu1 %v4439_v53, %s3867_s0  ;;  %v2748_v45 = vstv %s3587_s18  ;;  %s3609_s18 = sld [smem:[#allocation8 + $0x61]] }
 0x4eb   :  { %v2718_v52 = vmul.f32 %v2714_v7, %v2692_v54  ;;  %v2719_v63 = vmul.f32 %v2715_v33, %v2692_v54 }
 0x4ec   :  { %v7568_v20 = vpop.permute.xlu2 %2822  ;;  %v7577_v60 = vadd.f32 %v2702_v35, %v7453_v55 }
 0x4ed   :  { %v2720_v28 = vadd.f32 %v2718_v52, %v2716_v5  ;;  %v2721_v40 = vadd.f32 %v2719_v63, %v2717_v24 }
 0x4ef   :  { %v2724_v15 = vrot.slane %v2721_v40, 7  ;;  %3021 = vrot.lane.b32.xlu0 %v8843_v50, %s3867_s0  ;;  %3075 = vrot.lane.b32.xlu2 %v4303_v44, %s3868_s20  ;;  %v2742_v62 = vpop.permute.xlu1 %2741  ;;  %v2804_v40 = vstv %s3589_s22 }
 0x4f0   :  { %v2743_v32 = vsel %vm2736_vm9, %v7481_v2, %v2742_v62  ;;  %v2744_v47 = vsel %vm2736_vm9, %v2742_v62, %v7481_v2  ;;  %v2729_v2 = vmul.f32 %v7602_v59, %v7489_v48 }
 0x4f1   :  { %v2725_v55 = vsel %vm708_vm3, %v2720_v28, %v2724_v15  ;;  %v2735_v23 = vpop.permute.xlu0 %2734  ;;  %v2749_v12 = vmul.f32 %v2748_v45, %v2743_v32  ;;  %v2750_v58 = vmul.f32 %v2748_v45, %v2744_v47 }
 0x4f2   :  { %v2727_v37 = vmul.f32 %v2725_v55, %v2673_v61  ;;  %v2737_v17 = vsel %vm2736_vm9, %v2733_v14, %v2735_v23  ;;  %v2738_v16 = vsel %vm2736_vm9, %v2735_v23, %v2733_v14  ;;  %3068 = vrot.lane.b32.xlu1 %v8606_v29, %s3868_s20 }
 0x4f3   :  { %v2746_v54 = vmul.f32 %v2745_v26, %v2737_v17  ;;  %v2747_v51 = vmul.f32 %v2745_v26, %v2738_v16 }
 0x4f4   :  { %v7587_v21 = vpop.permute.xlu2 %2846  ;;  %v7600_v43 = vadd.f32 %v2727_v37, %v7492_v38 }
 0x4f5   :  { %v2751_v49 = vadd.f32 %v2749_v12, %v2746_v54  ;;  %v2752_v18 = vadd.f32 %v2750_v58, %v2747_v51  ;;  %v2785_v51 = vmul.f32 %v7333_v34, %v7489_v48 }
 0x4f7   :  { %3046 = vrot.lane.b32.xlu0 %v8848_v1, %s3867_s0  ;;  %v2755_v0 = vrot.slane %v2752_v18, 7  ;;  %3098 = vrot.lane.b32.xlu2 %v4439_v53, %s3868_s20  ;;  %v2767_v38 = vpop.permute.xlu1 %2766  ;;  %s3606_s0 = sld [smem:[#allocation8 + $0x2f]] }
 0x4f9   :  { %v2761_v46 = vpop.permute.xlu0 %2760  ;;  %v2756_v56 = vsel %vm708_vm3, %v2751_v49, %v2755_v0 }
 0x4fa   :  { %v2764_v8 = vsel %vm2736_vm9, %v2761_v46, %v7505_v22  ;;  %v2765_v42 = vsel %vm2736_vm9, %v7505_v22, %v2761_v46  ;;  %v2758_v6 = vmul.f32 %v2756_v56, %v2729_v2  ;;  %3077 = vrot.lane.b32.xlu1 %v8843_v50, %s3868_s20 }
 0x4fb   :  { %v2772_v7 = vmul.f32 %v2764_v8, %v2745_v26  ;;  %v2773_v33 = vmul.f32 %v2765_v42, %v2745_v26 }
 0x4fc   :  { %v7613_v41 = vpop.permute.xlu2 %2872  ;;  %v7622_v61 = vadd.f32 %v2758_v6, %v7518_v30 }
 0x4ff   :  { %3070 = vrot.lane.b32.xlu0 %v4453_v27, %s3868_s20  ;;  %3124 = vrot.lane.b32.xlu2 %v8606_v29, %s3869_s21  ;;  %v2791_v25 = vpop.permute.xlu1 %2790 }
 0x500   :  { %v2793_v30 = vsel %vm2792_vm10, %v7528_v3, %v2791_v25  ;;  %v2794_v14 = vsel %vm2792_vm10, %v2791_v25, %v7528_v3  ;;  %v2801_v3 = vstv %s3588_s2  ;;  %s3490_s2 = sshll.u32 %s8109_s6, 4  ;;  %s3491_s2 = int_to_ptr.hbm [resolvable:$true] %s3490_s2 }
 0x501   :  { %v2769_v22 = vpop.permute.xlu0 %2768  ;;  %v2802_v32 = vmul.f32 %v2801_v3, %v2793_v30  ;;  %v2803_v47 = vmul.f32 %v2801_v3, %v2794_v14 }
 0x502   :  { %v2770_v39 = vsel %vm2736_vm9, %v2767_v38, %v2769_v22  ;;  %v2771_v35 = vsel %vm2736_vm9, %v2769_v22, %v2767_v38  ;;  %3102 = vrot.lane.b32.xlu1 %v8848_v1, %s3868_s20 }
 0x503   :  { %v2774_v5 = vmul.f32 %v2770_v39, %v2748_v45  ;;  %v2775_v24 = vmul.f32 %v2771_v35, %v2748_v45 }
 0x504   :  { %v7631_v57 = vpop.permute.xlu2 %2880 }
 0x505   :  { %v2776_v52 = vadd.f32 %v2774_v5, %v2772_v7  ;;  %v2777_v63 = vadd.f32 %v2775_v24, %v2773_v33 }
 0x507   :  { %v2780_v28 = vrot.slane %v2777_v63, 7  ;;  %3096 = vrot.lane.b32.xlu0 %v8559_v9, %s3868_s20  ;;  %3133 = vrot.lane.b32.xlu2 %v8843_v50, %s3869_s21  ;;  %v2817_v55 = vpop.permute.xlu1 %2816  ;;  %v2857_v63 = vstv %s3590_s23  ;;  %s3875_s23 = smov 256  }
 0x509   :  { %v2781_v15 = vsel %vm708_vm3, %v2776_v52, %v2780_v28  ;;  %v2796_v26 = vpop.permute.xlu0 %2795  ;;  %v2860_v28 = vstv %s3591_s25 }
 0x50a   :  { %v2783_v62 = vmul.f32 %v2781_v15, %v2729_v2  ;;  %v2799_v23 = vsel %vm2792_vm10, %v2796_v26, %v7545_v19  ;;  %v2800_v37 = vsel %vm2792_vm10, %v7545_v19, %v2796_v26  ;;  %3126 = vrot.lane.b32.xlu1 %v4453_v27, %s3869_s21 }
 0x50b   :  { %v2805_v17 = vmul.f32 %v2804_v40, %v2799_v23  ;;  %v2806_v12 = vmul.f32 %v2804_v40, %v2800_v37 }
 0x50c   :  { %v7650_v45 = vpop.permute.xlu2 %2907  ;;  %v7659_v58 = vadd.f32 %v2783_v62, %v7537_v36 }
 0x50d   :  { %v2807_v16 = vadd.f32 %v2805_v17, %v2802_v32  ;;  %v2808_v54 = vadd.f32 %v2806_v12, %v2803_v47  ;;  %v7722_v12 = vld [vmem:[#allocation6 + $0x8] sm:$0x3] }
 0x50f   :  { %v2811_v49 = vrot.slane %v2808_v54, 7  ;;  %3104 = vrot.lane.b32.xlu0 %v8670_v31, %s3868_s20  ;;  %3158 = vrot.lane.b32.xlu2 %v8848_v1, %s3869_s21  ;;  %v2825_v18 = vpop.permute.xlu1 %2824 }
 0x510   :  { %v2826_v34 = vsel %vm2792_vm10, %v7568_v20, %v2825_v18  ;;  %v2827_v38 = vsel %vm2792_vm10, %v2825_v18, %v7568_v20 }
 0x511   :  { %v2812_v19 = vsel %vm708_vm3, %v2807_v16, %v2811_v49  ;;  %v2819_v36 = vpop.permute.xlu0 %2818  ;;  %v2830_v56 = vmul.f32 %v2826_v34, %v2804_v40  ;;  %v2831_v8 = vmul.f32 %v2827_v38, %v2804_v40  ;;  %v2841_v16 = vmul.f32 %v7722_v12, %v7489_v48 }
 0x512   :  { %v2814_v2 = vmul.f32 %v2812_v19, %v2785_v51  ;;  %v2820_v46 = vsel %vm2792_vm10, %v2817_v55, %v2819_v36  ;;  %v2821_v42 = vsel %vm2792_vm10, %v2819_v36, %v2817_v55  ;;  %3152 = vrot.lane.b32.xlu1 %v8559_v9, %s3869_s21 }
 0x513   :  { %v2828_v6 = vmul.f32 %v2820_v46, %v2801_v3  ;;  %v2829_v22 = vmul.f32 %v2821_v42, %v2801_v3 }
 0x514   :  { %v7670_v0 = vpop.permute.xlu2 %2930  ;;  %v7683_v25 = vadd.f32 %v2814_v2, %v7577_v60 }
 0x515   :  { %v2832_v30 = vadd.f32 %v2830_v56, %v2828_v6  ;;  %v2833_v14 = vadd.f32 %v2831_v8, %v2829_v22 }
 0x517   :  { %3131 = vrot.lane.b32.xlu0 %v4303_v44, %s3869_s21  ;;  %v2836_v20 = vrot.slane %v2833_v14, 7  ;;  %3182 = vrot.lane.b32.xlu2 %v4453_v27, %s3870_s24  ;;  %v2852_v60 = vpop.permute.xlu1 %2851 }
 0x519   :  { %v2845_v39 = vpop.permute.xlu0 %2844  ;;  %v2837_v35 = vsel %vm708_vm3, %v2832_v30, %v2836_v20  ;;  %v2913_v30 = vstv %s3592_s27 }
 0x51a   :  { %v2849_v33 = vsel %vm2848_vm11, %v2845_v39, %v7587_v21  ;;  %v2850_v5 = vsel %vm2848_vm11, %v7587_v21, %v2845_v39  ;;  %v2839_v24 = vmul.f32 %v2837_v35, %v2785_v51  ;;  %3160 = vrot.lane.b32.xlu1 %v8670_v31, %s3869_s21 }
 0x51b   :  { %v2858_v62 = vmul.f32 %v2857_v63, %v2849_v33  ;;  %v2859_v23 = vmul.f32 %v2857_v63, %v2850_v5 }
 0x51c   :  { %v7693_v7 = vpop.permute.xlu2 %2956  ;;  %v7702_v52 = vadd.f32 %v2839_v24, %v7600_v43 }
 0x51f   :  { %3154 = vrot.lane.b32.xlu0 %v4439_v53, %s3869_s21  ;;  %3208 = vrot.lane.b32.xlu2 %v8559_v9, %s3870_s24  ;;  %v2875_v3 = vpop.permute.xlu1 %2874  ;;  %s3874_s21 = smov [#allocation9]  }
 0x520   :  { %v2876_v21 = vsel %vm2848_vm11, %v7613_v41, %v2875_v3  ;;  %v2877_v43 = vsel %vm2848_vm11, %v2875_v3, %v7613_v41  ;;  %s3488_s22 = sshll.u32 %s3874_s21, 4  ;;  %s3489_s22 = int_to_ptr.vmem [resolvable:$true] %s3488_s22 }
 0x521   :  { %v2854_v40 = vpop.permute.xlu0 %2853  ;;  %v2884_v34 = vmul.f32 %v2876_v21, %v2857_v63  ;;  %v2885_v38 = vmul.f32 %v2877_v43, %v2857_v63 }
 0x522   :  { %v2855_v55 = vsel %vm2848_vm11, %v2852_v60, %v2854_v40  ;;  %v2856_v26 = vsel %vm2848_vm11, %v2854_v40, %v2852_v60  ;;  %3187 = vrot.lane.b32.xlu1 %v4303_v44, %s3870_s24 }
 0x523   :  { %v2861_v37 = vmul.f32 %v2860_v28, %v2855_v55  ;;  %v2862_v32 = vmul.f32 %v2860_v28, %v2856_v26  ;;  %v7767_v26 = vld [vmem:[#allocation6 + $0xa] sm:$0x3] }
 0x524   :  { %v7710_v15 = vpop.permute.xlu2 %2965 }
 0x525   :  { %v2863_v47 = vadd.f32 %v2861_v37, %v2858_v62  ;;  %v2864_v17 = vadd.f32 %v2862_v32, %v2859_v23 }
 0x527   :  { %v2867_v54 = vrot.slane %v2864_v17, 7  ;;  %3180 = vrot.lane.b32.xlu0 %v8606_v29, %s3870_s24  ;;  %3216 = vrot.lane.b32.xlu2 %v8670_v31, %s3870_s24  ;;  %v2901_v51 = vpop.permute.xlu1 %2900 }
 0x529   :  { %v2868_v41 = vsel %vm708_vm3, %v2863_v47, %v2867_v54  ;;  %v2879_v49 = vpop.permute.xlu0 %2878 }
 0x52a   :  { %v2870_v19 = vmul.f32 %v2868_v41, %v2841_v16  ;;  %v2882_v36 = vsel %vm2848_vm11, %v2879_v49, %v7631_v57  ;;  %v2883_v2 = vsel %vm2848_vm11, %v7631_v57, %v2879_v49  ;;  %3210 = vrot.lane.b32.xlu1 %v4439_v53, %s3870_s24  ;;  %v2916_v57 = vstv %s3593_s26 }
 0x52b   :  { %v2886_v46 = vmul.f32 %v2882_v36, %v2860_v28  ;;  %v2887_v56 = vmul.f32 %v2883_v2, %v2860_v28 }
 0x52c   :  { %v7733_v18 = vpop.permute.xlu2 %2990  ;;  %v7742_v8 = vadd.f32 %v2870_v19, %v7622_v61 }
 0x52d   :  { %v2888_v42 = vadd.f32 %v2886_v46, %v2884_v34  ;;  %v2889_v6 = vadd.f32 %v2887_v56, %v2885_v38 }
 0x52f   :  { %v2892_v22 = vrot.slane %v2889_v6, 7  ;;  %3189 = vrot.lane.b32.xlu0 %v8843_v50, %s3870_s24  ;;  %3243 = vrot.lane.b32.xlu2 %v4303_v44, %s3871_s28  ;;  %v2910_v14 = vpop.permute.xlu1 %2909  ;;  %v2969_v6 = vstv %s3594_s7 }
 0x530   :  { %v2911_v39 = vsel %vm2904_vm12, %v7650_v45, %v2910_v14  ;;  %v2912_v35 = vsel %vm2904_vm12, %v2910_v14, %v7650_v45  ;;  %v2897_v45 = vmul.f32 %v7767_v26, %v7489_v48 }
 0x531   :  { %v2893_v61 = vsel %vm708_vm3, %v2888_v42, %v2892_v22  ;;  %v2903_v20 = vpop.permute.xlu0 %2902  ;;  %v2917_v5 = vmul.f32 %v2916_v57, %v2911_v39  ;;  %v2918_v24 = vmul.f32 %v2916_v57, %v2912_v35  ;;  %v2972_v22 = vstv %s3595_s29 }
 0x532   :  { %v2895_v60 = vmul.f32 %v2893_v61, %v2841_v16  ;;  %v2905_v33 = vsel %vm2904_vm12, %v2901_v51, %v2903_v20  ;;  %v2906_v63 = vsel %vm2904_vm12, %v2903_v20, %v2901_v51  ;;  %3236 = vrot.lane.b32.xlu1 %v8606_v29, %s3871_s28 }
 0x533   :  { %v2914_v28 = vmul.f32 %v2913_v30, %v2905_v33  ;;  %v2915_v21 = vmul.f32 %v2913_v30, %v2906_v63 }
 0x534   :  { %v7763_v3 = vadd.f32 %v2895_v60, %v7659_v58  ;;  %v7765_v40 = vpop.permute.xlu2 %3014 }
 0x535   :  { %v2919_v43 = vadd.f32 %v2917_v5, %v2914_v28  ;;  %v2920_v55 = vadd.f32 %v2918_v24, %v2915_v21  ;;  %v2953_v21 = vmul.f32 %v7434_v13, %v7489_v48 }
 0x537   :  { %3214 = vrot.lane.b32.xlu0 %v8848_v1, %s3870_s24  ;;  %v2923_v62 = vrot.slane %v2920_v55, 7  ;;  %3266 = vrot.lane.b32.xlu2 %v4439_v53, %s3871_s28  ;;  %v2935_v58 = vpop.permute.xlu1 %2934 }
 0x539   :  { %v2929_v23 = vpop.permute.xlu0 %2928  ;;  %v2924_v37 = vsel %vm708_vm3, %v2919_v43, %v2923_v62 }
 0x53a   :  { %v2932_v32 = vsel %vm2904_vm12, %v2929_v23, %v7670_v0  ;;  %v2933_v47 = vsel %vm2904_vm12, %v7670_v0, %v2929_v23  ;;  %v2926_v17 = vmul.f32 %v2924_v37, %v2897_v45  ;;  %3245 = vrot.lane.b32.xlu1 %v8843_v50, %s3871_s28 }
 0x53b   :  { %v2940_v36 = vmul.f32 %v2932_v32, %v2913_v30  ;;  %v2941_v2 = vmul.f32 %v2933_v47, %v2913_v30 }
 0x53c   :  { %v7785_v16 = vadd.f32 %v2926_v17, %v7683_v25  ;;  %v7787_v54 = vpop.permute.xlu2 %3040 }
 0x53f   :  { %3238 = vrot.lane.b32.xlu0 %v4453_v27, %s3871_s28  ;;  %3292 = vrot.lane.b32.xlu2 %v8606_v29, %s3872_s8  ;;  %v2959_v0 = vpop.permute.xlu1 %2958 }
 0x540   :  { %v2961_v25 = vsel %vm2960_vm13, %v7693_v7, %v2959_v0  ;;  %v2962_v51 = vsel %vm2960_vm13, %v2959_v0, %v7693_v7 }
 0x541   :  { %v2937_v41 = vpop.permute.xlu0 %2936  ;;  %v2970_v39 = vmul.f32 %v2969_v6, %v2961_v25  ;;  %v2971_v35 = vmul.f32 %v2969_v6, %v2962_v51 }
 0x542   :  { %v2938_v49 = vsel %vm2904_vm12, %v2935_v58, %v2937_v41  ;;  %v2939_v19 = vsel %vm2904_vm12, %v2937_v41, %v2935_v58  ;;  %3270 = vrot.lane.b32.xlu1 %v8848_v1, %s3871_s28 }
 0x543   :  { %v2942_v34 = vmul.f32 %v2938_v49, %v2916_v57  ;;  %v2943_v38 = vmul.f32 %v2939_v19, %v2916_v57 }
 0x544   :  { %v7810_v7 = vpop.permute.xlu2 %3048 }
 0x545   :  { %v2944_v46 = vadd.f32 %v2942_v34, %v2940_v36  ;;  %v2945_v56 = vadd.f32 %v2943_v38, %v2941_v2 }
 0x547   :  { %v2948_v42 = vrot.slane %v2945_v56, 7  ;;  %3264 = vrot.lane.b32.xlu0 %v8559_v9, %s3871_s28  ;;  %3301 = vrot.lane.b32.xlu2 %v8843_v50, %s3872_s8  ;;  %v2985_v61 = vpop.permute.xlu1 %2984 }
 0x549   :  { %v2949_v30 = vsel %vm708_vm3, %v2944_v46, %v2948_v42  ;;  %v2964_v57 = vpop.permute.xlu0 %2963  ;;  %v3028_v46 = vstv %s3597_s10 }
 0x54a   :  { %v2951_v14 = vmul.f32 %v2949_v30, %v2897_v45  ;;  %v2967_v20 = vsel %vm2960_vm13, %v2964_v57, %v7710_v15  ;;  %v2968_v60 = vsel %vm2960_vm13, %v7710_v15, %v2964_v57  ;;  %3294 = vrot.lane.b32.xlu1 %v4453_v27, %s3872_s8 }
 0x54b   :  { %v2973_v33 = vmul.f32 %v2972_v22, %v2967_v20  ;;  %v2974_v5 = vmul.f32 %v2972_v22, %v2968_v60 }
 0x54c   :  { %v7822_v24 = vadd.f32 %v2951_v14, %v7702_v52  ;;  %v7833_v45 = vpop.permute.xlu2 %3075 }
 0x54d   :  { %v2975_v63 = vadd.f32 %v2973_v33, %v2970_v39  ;;  %v2976_v28 = vadd.f32 %v2974_v5, %v2971_v35 }
 0x54f   :  { %v2979_v43 = vrot.slane %v2976_v28, 7  ;;  %3272 = vrot.lane.b32.xlu0 %v8670_v31, %s3871_s28  ;;  %3326 = vrot.lane.b32.xlu2 %v8848_v1, %s3872_s8  ;;  %v2993_v55 = vpop.permute.xlu1 %2992 }
 0x550   :  { %v2994_v13 = vsel %vm2960_vm13, %v7733_v18, %v2993_v55  ;;  %v2995_v48 = vsel %vm2960_vm13, %v2993_v55, %v7733_v18 }
 0x551   :  { %v2980_v15 = vsel %vm708_vm3, %v2975_v63, %v2979_v43  ;;  %v2987_v52 = vpop.permute.xlu0 %2986  ;;  %v2998_v23 = vmul.f32 %v2994_v13, %v2972_v22  ;;  %v2999_v37 = vmul.f32 %v2995_v48, %v2972_v22  ;;  %v3081_v48 = vstv %s3598_s11 }
 0x552   :  { %v2982_v62 = vmul.f32 %v2980_v15, %v2953_v21  ;;  %v2988_v58 = vsel %vm2960_vm13, %v2985_v61, %v2987_v52  ;;  %v2989_v32 = vsel %vm2960_vm13, %v2987_v52, %v2985_v61  ;;  %3320 = vrot.lane.b32.xlu1 %v8559_v9, %s3872_s8 }
 0x553   :  { %v2996_v47 = vmul.f32 %v2988_v58, %v2969_v6  ;;  %v2997_v0 = vmul.f32 %v2989_v32, %v2969_v6 }
 0x554   :  { %v7846_v17 = vadd.f32 %v2982_v62, %v7742_v8  ;;  %v7862_v34 = vpop.permute.xlu2 %3098 }
 0x555   :  { %v3000_v41 = vadd.f32 %v2998_v23, %v2996_v47  ;;  %v3001_v25 = vadd.f32 %v2999_v37, %v2997_v0 }
 0x557   :  { %3299 = vrot.lane.b32.xlu0 %v4303_v44, %s3872_s8  ;;  %v3004_v18 = vrot.slane %v3001_v25, 7  ;;  %3350 = vrot.lane.b32.xlu2 %v4453_v27, %s3873_s1  ;;  %v3020_v8 = vpop.permute.xlu1 %3019  ;;  %v3025_v27 = vstv %s3596_s9 }
 0x559   :  { %v3013_v51 = vpop.permute.xlu0 %3012  ;;  %v3005_v49 = vsel %vm708_vm3, %v3000_v41, %v3004_v18 }
 0x55a   :  { %v3017_v19 = vsel %vm3016_vm14, %v3013_v51, %v7765_v40  ;;  %v3018_v36 = vsel %vm3016_vm14, %v7765_v40, %v3013_v51  ;;  %v3007_v2 = vmul.f32 %v3005_v49, %v2953_v21  ;;  %3328 = vrot.lane.b32.xlu1 %v8670_v31, %s3872_s8 }
 0x55b   :  { %v3026_v30 = vmul.f32 %v3025_v27, %v3017_v19  ;;  %v3027_v61 = vmul.f32 %v3025_v27, %v3018_v36 }
 0x55c   :  { %v7865_v38 = vadd.f32 %v3007_v2, %v7763_v3  ;;  %v3125_v39 = vpop.permute.xlu2 %3124 }
 0x55f   :  { %3322 = vrot.lane.b32.xlu0 %v4439_v53, %s3872_s8  ;;  %3376 = vrot.lane.b32.xlu2 %v8559_v9, %s3873_s1  ;;  %v3043_v56 = vpop.permute.xlu1 %3042  ;;  %v7883_v9 = vld [vmem:[#allocation2 + $0xc] sm:$0x3] }
 0x560   :  { %v3044_v40 = vsel %vm3016_vm14, %v7787_v54, %v3043_v56  ;;  %v3045_v3 = vsel %vm3016_vm14, %v3043_v56, %v7787_v54  ;;  %v3009_v35 = vmul.f32 %v7494_v11, %v7883_v9  ;;  %v3065_v19 = vmul.f32 %v7557_v4, %v7883_v9 }
 0x561   :  { %v3022_v42 = vpop.permute.xlu0 %3021  ;;  %v3052_v21 = vmul.f32 %v3044_v40, %v3025_v27 }
 0x562   :  { %v3023_v6 = vsel %vm3016_vm14, %v3020_v8, %v3022_v42  ;;  %v3024_v22 = vsel %vm3016_vm14, %v3022_v42, %v3020_v8  ;;  %3355 = vrot.lane.b32.xlu1 %v4303_v44, %s3873_s1 }
 0x563   :  { %v3029_v57 = vmul.f32 %v3028_v46, %v3023_v6  ;;  %v3030_v14 = vmul.f32 %v3028_v46, %v3024_v22 }
 0x564   :  { %v3134_v13 = vpop.permute.xlu2 %3133 }
 0x565   :  { %v3031_v20 = vadd.f32 %v3029_v57, %v3026_v30  ;;  %v3032_v60 = vadd.f32 %v3030_v14, %v3027_v61 }
 0x567   :  { %v3035_v33 = vrot.slane %v3032_v60, 7  ;;  %3348 = vrot.lane.b32.xlu0 %v8606_v29, %s3873_s1  ;;  %3384 = vrot.lane.b32.xlu2 %v8670_v31, %s3873_s1  ;;  %v3069_v5 = vpop.permute.xlu1 %3068  ;;  %v3053_v29 = vmul.f32 %v3045_v3, %v3025_v27 }
 0x569   :  { %v3036_v54 = vsel %vm708_vm3, %v3031_v20, %v3035_v33  ;;  %v3047_v63 = vpop.permute.xlu0 %3046  ;;  %v3137_v33 = vstv %s3600_s12 }
 0x56a   :  { %v3038_v28 = vmul.f32 %v3036_v54, %v3009_v35  ;;  %v3050_v11 = vsel %vm3016_vm14, %v3047_v63, %v7810_v7  ;;  %v3051_v44 = vsel %vm3016_vm14, %v7810_v7, %v3047_v63  ;;  %3378 = vrot.lane.b32.xlu1 %v4439_v53, %s3873_s1  ;;  %v3084_v7 = vstv %s3599_s3 }
 0x56b   :  { %v3054_v43 = vmul.f32 %v3050_v11, %v3028_v46  ;;  %v3055_v15 = vmul.f32 %v3051_v44, %v3028_v46  ;;  %v3140_v54 = vstv %s3601_s5 }
 0x56c   :  { %v7901_v31 = vadd.f32 %v3038_v28, %v7785_v16  ;;  %v3159_v27 = vpop.permute.xlu2 %3158 }
 0x56d   :  { %v3056_v55 = vadd.f32 %v3054_v43, %v3052_v21  ;;  %v3057_v52 = vadd.f32 %v3055_v15, %v3053_v29 }
 0x56f   :  { %v3060_v62 = vrot.slane %v3057_v52, 7  ;;  %3357 = vrot.lane.b32.xlu0 %v8843_v50, %s3873_s1  ;;  %v3078_v23 = vpop.permute.xlu1 %3077 }
 0x570   :  { %v3079_v32 = vsel %vm3072_vm15, %v7833_v45, %v3078_v23  ;;  %v3080_v53 = vsel %vm3072_vm15, %v3078_v23, %v7833_v45 }
 0x571   :  { %v3061_v58 = vsel %vm708_vm3, %v3056_v55, %v3060_v62  ;;  %v3071_v37 = vpop.permute.xlu0 %3070  ;;  %v3085_v47 = vmul.f32 %v3084_v7, %v3079_v32  ;;  %v3086_v0 = vmul.f32 %v3084_v7, %v3080_v53 }
 0x572   :  { %v3063_v16 = vmul.f32 %v3061_v58, %v3009_v35  ;;  %v3073_v50 = vsel %vm3072_vm15, %v3069_v5, %v3071_v37  ;;  %v3074_v41 = vsel %vm3072_vm15, %v3071_v37, %v3069_v5 }
 0x573   :  { %v3082_v25 = vmul.f32 %v3081_v48, %v3073_v50  ;;  %v3083_v8 = vmul.f32 %v3081_v48, %v3074_v41 }
 0x574   :  { %v7920_v18 = vadd.f32 %v3063_v16, %v7822_v24  ;;  %v3183_v14 = vpop.permute.xlu2 %3182 }
 0x575   :  { %v3087_v51 = vadd.f32 %v3085_v47, %v3082_v25  ;;  %v3088_v49 = vadd.f32 %v3086_v0, %v3083_v8 }
 0x577   :  { %3382 = vrot.lane.b32.xlu0 %v8848_v1, %s3873_s1  ;;  %v3091_v45 = vrot.slane %v3088_v49, 7  ;;  %v3103_v36 = vpop.permute.xlu1 %3102 }
 0x579   :  { %v3097_v2 = vpop.permute.xlu0 %3096  ;;  %v3092_v46 = vsel %vm708_vm3, %v3087_v51, %v3091_v45 }
 0x57a   :  { %v3100_v24 = vsel %vm3072_vm15, %v3097_v2, %v7862_v34  ;;  %v3101_v56 = vsel %vm3072_vm15, %v7862_v34, %v3097_v2  ;;  %v3094_v42 = vmul.f32 %v3092_v46, %v3065_v19 }
 0x57b   :  { %v3109_v30 = vmul.f32 %v3101_v56, %v3081_v48  ;;  %v3193_v56 = vstv %s3602_s13 }
 0x57c   :  { %v7934_v4 = vadd.f32 %v3094_v42, %v7846_v17  ;;  %v3108_v17 = vmul.f32 %v3100_v24, %v3081_v48  ;;  %v3121_v48 = vmul.f32 %v7602_v59, %v7883_v9  ;;  %v3196_v42 = vstv %s3603_s14 }
 0x57f   :  { %v3127_v1 = vpop.permute.xlu1 %3126 }
 0x580   :  { %v3129_v3 = vsel %vm3128_vm0, %v3125_v39, %v3127_v1  ;;  %v3130_v6 = vsel %vm3128_vm0, %v3127_v1, %v3125_v39 }
 0x581   :  { %v3105_v40 = vpop.permute.xlu0 %3104  ;;  %v3138_v21 = vmul.f32 %v3137_v33, %v3129_v3  ;;  %v3139_v29 = vmul.f32 %v3137_v33, %v3130_v6 }
 0x582   :  { %v3106_v22 = vsel %vm3072_vm15, %v3103_v36, %v3105_v40  ;;  %v3107_v34 = vsel %vm3072_vm15, %v3105_v40, %v3103_v36 }
 0x583   :  { %v3110_v61 = vmul.f32 %v3106_v22, %v3084_v7  ;;  %v3111_v57 = vmul.f32 %v3107_v34, %v3084_v7  ;;  %v3209_v7 = vpop.permute.xlu2 %3208 }
 0x585   :  { %v3112_v20 = vadd.f32 %v3110_v61, %v3108_v17  ;;  %v3113_v60 = vadd.f32 %v3111_v57, %v3109_v30 }
 0x587   :  { %v3116_v35 = vrot.slane %v3113_v60, 7  ;;  %v3153_v63 = vpop.permute.xlu1 %3152  ;;  %v3727_v60 = vld [vmem:[#allocation6 + $0x6] sm:$0x3] }
 0x589   :  { %v3117_v5 = vsel %vm708_vm3, %v3112_v20, %v3116_v35  ;;  %v3132_v39 = vpop.permute.xlu0 %3131  ;;  %v3177_v35 = vmul.f32 %v3727_v60, %v7883_v9 }
 0x58a   :  { %v3119_v28 = vmul.f32 %v3117_v5, %v3065_v19  ;;  %v3135_v11 = vsel %vm3128_vm0, %v3132_v39, %v3134_v13  ;;  %v3136_v44 = vsel %vm3128_vm0, %v3134_v13, %v3132_v39 }
 0x58b   :  { %v3141_v43 = vmul.f32 %v3140_v54, %v3135_v11  ;;  %v3142_v15 = vmul.f32 %v3140_v54, %v3136_v44  ;;  %v3217_v49 = vpop.permute.xlu2 %3216 }
 0x58c   :  { %v7951_v55 = vadd.f32 %v3119_v28, %v7865_v38 }
 0x58d   :  { %v3143_v52 = vadd.f32 %v3141_v43, %v3138_v21  ;;  %v3144_v62 = vadd.f32 %v3142_v15, %v3139_v29 }
 0x58f   :  { %v3147_v58 = vrot.slane %v3144_v62, 7  ;;  %v3161_v37 = vpop.permute.xlu1 %3160 }
 0x590   :  { %v3162_v13 = vsel %vm3128_vm0, %v3159_v27, %v3161_v37  ;;  %v3163_v53 = vsel %vm3128_vm0, %v3161_v37, %v3159_v27 }
 0x591   :  { %v3148_v23 = vsel %vm708_vm3, %v3143_v52, %v3147_v58  ;;  %v3155_v16 = vpop.permute.xlu0 %3154  ;;  %v3166_v50 = vmul.f32 %v3162_v13, %v3140_v54  ;;  %v3167_v47 = vmul.f32 %v3163_v53, %v3140_v54 }
 0x592   :  { %v3150_v32 = vmul.f32 %v3148_v23, %v3121_v48  ;;  %v3156_v38 = vsel %vm3128_vm0, %v3153_v63, %v3155_v16  ;;  %v3157_v59 = vsel %vm3128_vm0, %v3155_v16, %v3153_v63 }
 0x593   :  { %v3164_v0 = vmul.f32 %v3156_v38, %v3137_v33  ;;  %v3165_v25 = vmul.f32 %v3157_v59, %v3137_v33  ;;  %v3244_v3 = vpop.permute.xlu2 %3243 }
 0x594   :  { %v7965_v41 = vadd.f32 %v3150_v32, %v7901_v31 }
 0x595   :  { %v3168_v8 = vadd.f32 %v3166_v50, %v3164_v0  ;;  %v3169_v51 = vadd.f32 %v3167_v47, %v3165_v25 }
 0x597   :  { %v3172_v19 = vrot.slane %v3169_v51, 7  ;;  %v3188_v45 = vpop.permute.xlu1 %3187  ;;  %v3249_v51 = vstv %s3604_s15 }
 0x599   :  { %v3181_v36 = vpop.permute.xlu0 %3180  ;;  %v3173_v2 = vsel %vm708_vm3, %v3168_v8, %v3172_v19  ;;  %v3252_v8 = vstv %s3605_s30 }
 0x59a   :  { %v3185_v27 = vsel %vm3184_vm1, %v3181_v36, %v3183_v14  ;;  %v3186_v31 = vsel %vm3184_vm1, %v3183_v14, %v3181_v36  ;;  %v3175_v46 = vmul.f32 %v3173_v2, %v3121_v48 }
 0x59b   :  { %v3194_v30 = vmul.f32 %v3193_v56, %v3185_v27  ;;  %v7990_v15 = vpop.permute.xlu2 %3266 }
 0x59c   :  { %v7974_v24 = vadd.f32 %v3175_v46, %v7920_v18  ;;  %v3195_v18 = vmul.f32 %v3193_v56, %v3186_v31 }
 0x59f   :  { %v3211_v1 = vpop.permute.xlu1 %3210 }
 0x5a0   :  { %v3212_v6 = vsel %vm3184_vm1, %v3209_v7, %v3211_v1  ;;  %v3213_v22 = vsel %vm3184_vm1, %v3211_v1, %v3209_v7 }
 0x5a1   :  { %v3190_v40 = vpop.permute.xlu0 %3189  ;;  %v3220_v44 = vmul.f32 %v3212_v6, %v3193_v56  ;;  %v3221_v21 = vmul.f32 %v3213_v22, %v3193_v56 }
 0x5a2   :  { %v3191_v34 = vsel %vm3184_vm1, %v3188_v45, %v3190_v40  ;;  %v3192_v17 = vsel %vm3184_vm1, %v3190_v40, %v3188_v45  ;;  %v3308_v40 = vstv %s3607_s16 }
 0x5a3   :  { %v3197_v61 = vmul.f32 %v3196_v42, %v3191_v34  ;;  %v3198_v57 = vmul.f32 %v3196_v42, %v3192_v17  ;;  %v3293_v13 = vpop.permute.xlu2 %3292  ;;  %v3305_v34 = vstv %s3606_s0 }
 0x5a5   :  { %v3199_v14 = vadd.f32 %v3197_v61, %v3194_v30  ;;  %v3200_v20 = vadd.f32 %v3198_v57, %v3195_v18  ;;  %v8021_v57 = vmul.f32 %v7722_v12, %v7883_v9 }
 0x5a7   :  { %v3203_v33 = vrot.slane %v3200_v20, 7  ;;  %v3237_v5 = vpop.permute.xlu1 %3236 }
 0x5a9   :  { %v3204_v54 = vsel %vm708_vm3, %v3199_v14, %v3203_v33  ;;  %v3215_v63 = vpop.permute.xlu0 %3214 }
 0x5aa   :  { %v3206_v39 = vmul.f32 %v3204_v54, %v3177_v35  ;;  %v3218_v28 = vsel %vm3184_vm1, %v3215_v63, %v3217_v49  ;;  %v3219_v11 = vsel %vm3184_vm1, %v3217_v49, %v3215_v63 }
 0x5ab   :  { %v3222_v29 = vmul.f32 %v3218_v28, %v3196_v42  ;;  %v3223_v43 = vmul.f32 %v3219_v11, %v3196_v42  ;;  %v3302_v50 = vpop.permute.xlu2 %3301 }
 0x5ac   :  { %v7993_v52 = vadd.f32 %v3206_v39, %v7934_v4 }
 0x5ad   :  { %v3224_v62 = vadd.f32 %v3222_v29, %v3220_v44  ;;  %v3225_v7 = vadd.f32 %v3223_v43, %v3221_v21 }
 0x5af   :  { %v3228_v48 = vrot.slane %v3225_v7, 7  ;;  %v3246_v23 = vpop.permute.xlu1 %3245  ;;  %v3361_v7 = vstv %s3608_s17 }
 0x5b0   :  { %v3247_v27 = vsel %vm3240_vm2, %v3244_v3, %v3246_v23 }
 0x5b1   :  { %v3229_v58 = vsel %vm708_vm3, %v3224_v62, %v3228_v48  ;;  %v3239_v37 = vpop.permute.xlu0 %3238  ;;  %v3253_v42 = vmul.f32 %v3252_v8, %v3247_v27 }
 0x5b2   :  { %v3231_v16 = vmul.f32 %v3229_v58, %v3177_v35  ;;  %v3242_v49 = vsel %vm3240_vm2, %v3239_v37, %v3237_v5  ;;  %v3241_v31 = vsel %vm3240_vm2, %v3237_v5, %v3239_v37  ;;  %v8031_v5 = vmul.f32 %v7767_v26, %v7883_v9 }
 0x5b3   :  { %v8002_v25 = vpop.permute.xlu2 %3326  ;;  %v3251_v45 = vmul.f32 %v3249_v51, %v3242_v49  ;;  %v3250_v1 = vmul.f32 %v3249_v51, %v3241_v31  ;;  %v3364_v58 = vstv %s3609_s18 }
 0x5b4   :  { %v7997_v32 = vadd.f32 %v3231_v16, %v7951_v55  ;;  %v3248_v55 = vsel %vm3240_vm2, %v3246_v23, %v3244_v3 }
 0x5b5   :  { %v3254_v19 = vmul.f32 %v3252_v8, %v3248_v55  ;;  %v3255_v61 = vadd.f32 %v3253_v42, %v3250_v1 }
 0x5b7   :  { %v3271_v53 = vpop.permute.xlu1 %3270  ;;  %v3256_v46 = vadd.f32 %v3254_v19, %v3251_v45 }
 0x5b9   :  { %v3265_v38 = vpop.permute.xlu0 %3264  ;;  %v3259_v22 = vrot.slane %v3256_v46, 7 }
 0x5ba   :  { %v3269_v14 = vsel %vm3240_vm2, %v7990_v15, %v3265_v38  ;;  %v3268_v26 = vsel %vm3240_vm2, %v3265_v38, %v7990_v15 }
 0x5bb   :  { %v3351_v56 = vpop.permute.xlu2 %3350  ;;  %v3260_v35 = vsel %vm708_vm3, %v3255_v61, %v3259_v22  ;;  %v3277_v12 = vmul.f32 %v3269_v14, %v3249_v51  ;;  %v3276_v19 = vmul.f32 %v3268_v26, %v3249_v51  ;;  %v3728_v22 = vld [vmem:[#allocation6 + $0xc] sm:$0x3] }
 0x5bc   :  { %v3262_v44 = vmul.f32 %v3260_v35, %v8021_v57 }
 0x5bf   :  { %v3295_v47 = vpop.permute.xlu1 %3294 }
 0x5c0   :  { %v3298_v17 = vsel %vm3296_vm4, %v3295_v47, %v3293_v13  ;;  %v3297_v39 = vsel %vm3296_vm4, %v3293_v13, %v3295_v47 }
 0x5c1   :  { %v3273_v59 = vpop.permute.xlu0 %3272  ;;  %v3307_v20 = vmul.f32 %v3305_v34, %v3298_v17  ;;  %v3306_v23 = vmul.f32 %v3305_v34, %v3297_v39  ;;  %v3345_v17 = vmul.f32 %v3728_v22, %v7883_v9 }
 0x5c2   :  { %v3275_v3 = vsel %vm3240_vm2, %v3273_v59, %v3271_v53  ;;  %v3274_v29 = vsel %vm3240_vm2, %v3271_v53, %v3273_v59 }
 0x5c3   :  { %v3279_v33 = vmul.f32 %v3275_v3, %v3252_v8  ;;  %v3377_v21 = vpop.permute.xlu2 %3376  ;;  %v3278_v47 = vmul.f32 %v3274_v29, %v3252_v8 }
 0x5c5   :  { %v3281_v62 = vadd.f32 %v3279_v33, %v3277_v12 }
 0x5c7   :  { %v7999_v4 = vpop.permute.xlu1 %3320  ;;  %v3284_v45 = vrot.slane %v3281_v62, 7 }
 0x5c9   :  { %v3300_v0 = vpop.permute.xlu0 %3299 }
 0x5ca   :  { %v3304_v6 = vsel %vm3296_vm4, %v3302_v50, %v3300_v0  ;;  %v3303_v54 = vsel %vm3296_vm4, %v3300_v0, %v3302_v50 }
 0x5cb   :  { %v3310_v30 = vmul.f32 %v3308_v40, %v3304_v6  ;;  %v3309_v43 = vmul.f32 %v3308_v40, %v3303_v54  ;;  %v3280_v6 = vadd.f32 %v3278_v47, %v3276_v19 }
 0x5cd   :  { %v3312_v63 = vadd.f32 %v3310_v30, %v3307_v20  ;;  %v3311_v38 = vadd.f32 %v3309_v43, %v3306_v23  ;;  %v3285_v61 = vsel %vm708_vm3, %v3280_v6, %v3284_v45  ;;  %v8852_v6 = vld [vmem:[#allocation15_spill] sm:$0xff] }
 0x5cf   :  { %v3329_v36 = vpop.permute.xlu1 %3328  ;;  %v3315_v37 = vrot.slane %v3312_v63, 7 }
 0x5d0   :  { %v3331_v28 = vsel %vm3296_vm4, %v3329_v36, %v8002_v25  ;;  %v3330_v27 = vsel %vm3296_vm4, %v8002_v25, %v3329_v36 }
 0x5d1   :  { %v3323_v2 = vpop.permute.xlu0 %3322  ;;  %v3335_v16 = vmul.f32 %v3331_v28, %v3308_v40  ;;  %v3316_v31 = vsel %vm708_vm3, %v3311_v38, %v3315_v37  ;;  %v3334_v51 = vmul.f32 %v3330_v27, %v3308_v40 }
 0x5d2   :  { %v3325_v11 = vsel %vm3296_vm4, %v3323_v2, %v7999_v4  ;;  %v3324_v8 = vsel %vm3296_vm4, %v7999_v4, %v3323_v2  ;;  %v3318_v25 = vmul.f32 %v3316_v31, %v8031_v5  ;;  %v3263_v4 = vadd.f32 %v3262_v44, %v7965_v41  ;;  %v3385_v2 = vpop.permute.xlu2 %3384 }
 0x5d3   :  { %v3333_v13 = vmul.f32 %v3325_v11, %v3305_v34  ;;  %v3332_v3 = vmul.f32 %v3324_v8, %v3305_v34 }
 0x5d4   :  { %v3319_v12 = vadd.f32 %v3318_v25, %v7993_v52 }
 0x5d5   :  { %v3337_v46 = vadd.f32 %v3335_v16, %v3333_v13  ;;  %v3336_v33 = vadd.f32 %v3334_v51, %v3332_v3 }
 0x5d7   :  { %v3356_v60 = vpop.permute.xlu1 %3355  ;;  %v3340_v14 = vrot.slane %v3337_v46, 7  ;;  %v8850_v46 = vld [vmem:[#allocation17_spill] sm:$0xff] }
 0x5d9   :  { %v3349_v18 = vpop.permute.xlu0 %3348  ;;  %v3341_v28 = vsel %vm708_vm3, %v3336_v33, %v3340_v14 }
 0x5da   :  { %v3354_v48 = vsel %vm3352_vm5, %v3351_v56, %v3349_v18  ;;  %v3353_v0 = vsel %vm3352_vm5, %v3349_v18, %v3351_v56  ;;  %v3343_v62 = vmul.f32 %v3341_v28, %v8031_v5  ;;  %v8860_v28 = vld [vmem:[#allocation25_spill] sm:$0xff] }
 0x5db   :  { %v3363_v59 = vmul.f32 %v3361_v7, %v3354_v48  ;;  %v3362_v56 = vmul.f32 %v3361_v7, %v3353_v0 }
 0x5dc   :  { %v3344_v52 = vadd.f32 %v3343_v62, %v7997_v32 }
 0x5df   :  { %v3379_v42 = vpop.permute.xlu1 %3378 }
 0x5e0   :  { %v3381_v36 = vsel %vm3352_vm5, %v3379_v42, %v3377_v21  ;;  %v3380_v9 = vsel %vm3352_vm5, %v3377_v21, %v3379_v42  ;;  %v3287_v21 = vmul.f32 %v3285_v61, %v8021_v57  ;;  %v8851_v42 = vld [vmem:[#allocation18_spill] sm:$0xff]  ;;  %v8856_v61 = vld [vmem:[#allocation21_spill] sm:$0xff] }
 0x5e1   :  { %v3358_v50 = vpop.permute.xlu0 %3357  ;;  %v3389_v54 = vmul.f32 %v3381_v36, %v3361_v7  ;;  %v3388_v11 = vmul.f32 %v3380_v9, %v3361_v7 }
 0x5e2   :  { %v3359_v15 = vsel %vm3352_vm5, %v3356_v60, %v3358_v50  ;;  %v3360_v53 = vsel %vm3352_vm5, %v3358_v50, %v3356_v60  ;;  %v3288_v23 = vadd.f32 %v3287_v21, %v7974_v24 }
 0x5e3   :  { %v3365_v55 = vmul.f32 %v3364_v58, %v3359_v15  ;;  %v3366_v49 = vmul.f32 %v3364_v58, %v3360_v53 }
 0x5e5   :  { %v3368_v1 = vadd.f32 %v3366_v49, %v3363_v59  ;;  %v3367_v30 = vadd.f32 %v3365_v55, %v3362_v56 }
 0x5e7   :  { %v3371_v18 = vrot.slane %v3368_v1, 7 }
 0x5e9   :  { %v3372_v20 = vsel %vm708_vm3, %v3367_v30, %v3371_v18  ;;  %v3383_v60 = vpop.permute.xlu0 %3382  ;;  %v8854_v30 = vld [vmem:[#allocation19_spill] sm:$0xff] }
 0x5ea   :  { %v3374_v40 = vmul.f32 %v3372_v20, %v3345_v17  ;;  %v3386_v34 = vsel %vm3352_vm5, %v3383_v60, %v3385_v2  ;;  %v3387_v35 = vsel %vm3352_vm5, %v3385_v2, %v3383_v60  ;;  %v8857_v60 = vld [vmem:[#allocation22_spill] sm:$0xff] }
 0x5eb   :  { %v3390_v41 = vmul.f32 %v3386_v34, %v3364_v58  ;;  %v3391_v63 = vmul.f32 %v3387_v35, %v3364_v58 }
 0x5ec   :  { %v3375_v39 = vadd.f32 %v3374_v40, %v3263_v4  ;;  %v8855_v4 = vld [vmem:[#allocation20_spill] sm:$0xff] }
 0x5ed   :  { %v3393_v44 = vadd.f32 %v3391_v63, %v3389_v54  ;;  %v3392_v29 = vadd.f32 %v3390_v41, %v3388_v11  ;;  %v8858_v41 = vld [vmem:[#allocation23_spill] sm:$0xff] }
 0x5ee   :  { %v3401_v26 = vadd.f32 %v3375_v39, %v3319_v12  ;;  %v8859_v12 = vld [vmem:[#allocation24_spill] sm:$0xff] }
 0x5ef   :  { %v3396_v43 = vrot.slane %v3393_v44, 7  ;;  %v8861_v44 = vld [vmem:[#allocation26_spill] sm:$0xff] }
 0x5f0   :  { %v3610_v10 = vmul.f32 -1.442695, %v3401_v26  ;;  %v8862_v26 = vld [vmem:[#allocation28_spill] sm:$0xff] }
 0x5f1   :  { %v3397_v48 = vsel %vm708_vm3, %v3392_v29, %v3396_v43  ;;  %v8863_v43 = vld [vmem:[#allocation29_spill] sm:$0xff] }
 0x5f2   :  { %3704 = vpow2.f32 %v3610_v10  ;;  %v3399_v58 = vmul.f32 %v3397_v48, %v3345_v17  ;;  %v8853_v17 = vld [vmem:[#allocation16_spill] sm:$0xff]  ;;  %v8864_v10 = vld [vmem:[#allocation30_spill] sm:$0xff] }
 0x5f4   :  { %v3400_v37 = vadd.f32 %v3399_v58, %v3288_v23  ;;  %v8865_v23 = vld [vmem:[#allocation14_spill] sm:$0xff] }
 0x5f6   :  { %v3442_v16 = vadd.f32 %v3400_v37, %v3344_v52 }
 0x5f8   :  { %v3705_v7 = vpop.eup %3704  ;;  %v3611_v13 = vmul.f32 -1.442695, %v3442_v16 }
 0x5f9   :  { %v3405_v50 = vadd.f32 1.0, %v3705_v7 }
 0x5fa   :  { %3706 = vpow2.f32 %v3611_v13 }
 0x5fb   :  { %3708 = vrcp.f32 %v3405_v50  ;;  %v3417_v53 = vand.u32 2147483648, %v3405_v50  ;;  %v3415_v24 = vand.u32 2147483647, %v3405_v50  ;;  %vm3411_vm6 = vweird.f32 %v3405_v50 }
 0x5fd   :  { %v3418_v55 = vor.u32 1.1754944e-38, %v3417_v53  ;;  %vm3416_vm8 = vcmp.eq.f32.partialorder %v3415_v24, 8.507059e+37 }
 0x600   :  { %v3707_v57 = vpop.eup %3706 }
 0x601   :  { %v3709_v47 = vpop.eup %3708  ;;  %v3446_v0 = vadd.f32 1.0, %v3707_v57 }
 0x602   :  { %v3407_v5 = vmul.f32 %v3709_v47, %v3405_v50  ;;  %vm3412_vm3 = vweird.f32 %v3709_v47 }
 0x603   :  { %3710 = vrcp.f32 %v3446_v0  ;;  %vm3413_vm7 = vmor %vm3411_vm6, %vm3412_vm3  ;;  %v3458_v3 = vand.u32 2147483648, %v3446_v0  ;;  %v3456_v36 = vand.u32 2147483647, %v3446_v0  ;;  %vm3452_vm10 = vweird.f32 %v3446_v0 }
 0x604   :  { %v3408_v15 = vsub.f32 1.0, %v3407_v5 }
 0x605   :  { %v3459_v40 = vor.u32 1.1754944e-38, %v3458_v3  ;;  %vm3457_vm12 = vcmp.eq.f32.partialorder %v3456_v36, 8.507059e+37 }
 0x606   :  { %v3409_v38 = vmul.f32 %v3709_v47, %v3408_v15 }
 0x608   :  { %v3410_v59 = vadd.f32 %v3709_v47, %v3409_v38 }
 0x609   :  { %v3711_v32 = vpop.eup %3710 }
 0x60a   :  { %v3414_v49 = vsel %vm3413_vm7, %v3709_v47, %v3410_v59  ;;  %v3448_v19 = vmul.f32 %v3711_v32, %v3446_v0  ;;  %vm3453_vm9 = vweird.f32 %v3711_v32 }
 0x60b   :  { %v3419_v45 = vsel %vm3416_vm8, %v3418_v55, %v3414_v49  ;;  %vm3454_vm11 = vmor %vm3452_vm10, %vm3453_vm9 }
 0x60c   :  { %v3422_v27 = vperm.slane %v3419_v45, 0  ;;  %v3423_v8 = vperm.slane %v3419_v45, 1  ;;  %v3449_v31 = vsub.f32 1.0, %v3448_v19 }
 0x60e   :  { %v3426_v56 = vmul.f32 %v3422_v27, %v8850_v46  ;;  %v3427_v1 = vmul.f32 %v3423_v8, %v8851_v42  ;;  %v3428_v22 = vmul.f32 %v3422_v27, %v8852_v6  ;;  %v3429_v51 = vmul.f32 %v3423_v8, %v8853_v17 }
 0x60f   :  { %v3430_v18 = vmul.f32 %v3422_v27, %v8854_v30  ;;  %v3450_v25 = vmul.f32 %v3711_v32, %v3449_v31  ;;  %v3431_v2 = vmul.f32 %v3423_v8, %v8855_v4  ;;  %v3432_v14 = vmul.f32 %v3422_v27, %v8856_v61 }
 0x610   :  { %3434 = vst [vmem:[#allocation9] sm:$0xff] %v3426_v56  ;;  %v3433_v9 = vmul.f32 %v3423_v8, %v8857_v60 }
 0x611   :  { %3435 = vst [vmem:[#allocation9 + $0x8] sm:$0xff] %v3427_v1  ;;  %v3451_v20 = vadd.f32 %v3711_v32, %v3450_v25 }
 0x612   :  { %3436 = vst [vmem:[#allocation9 + $0x10] sm:$0xff] %v3428_v22 }
 0x613   :  { %3437 = vst [vmem:[#allocation9 + $0x18] sm:$0xff] %v3429_v51  ;;  %v3455_v34 = vsel %vm3454_vm11, %v3711_v32, %v3451_v20 }
 0x614   :  { %3438 = vst [vmem:[#allocation9 + $0x20] sm:$0xff] %v3430_v18  ;;  %v3460_v35 = vsel %vm3457_vm12, %v3459_v40, %v3455_v34 }
 0x615   :  { %3439 = vst [vmem:[#allocation9 + $0x28] sm:$0xff] %v3431_v2  ;;  %v3463_v33 = vperm.slane %v3460_v35, 0  ;;  %v3464_v54 = vperm.slane %v3460_v35, 1 }
 0x616   :  { %3440 = vst [vmem:[#allocation9 + $0x30] sm:$0xff] %v3432_v14 }
 0x617   :  { %3441 = vst [vmem:[#allocation9 + $0x38] sm:$0xff] %v3433_v9  ;;  %v3467_v63 = vmul.f32 %v3463_v33, %v8858_v41  ;;  %v3468_v39 = vmul.f32 %v3464_v54, %v8859_v12  ;;  %v3469_v11 = vmul.f32 %v3463_v33, %v8860_v28  ;;  %v3470_v21 = vmul.f32 %v3464_v54, %v8861_v44 }
 0x618   :  { %v3471_v29 = vmul.f32 %v3463_v33, %v8862_v26  ;;  %v3472_v62 = vmul.f32 %v3464_v54, %v8863_v43  ;;  %v3473_v48 = vmul.f32 %v3463_v33, %v8864_v10  ;;  %v3474_v58 = vmul.f32 %v3464_v54, %v8865_v23 }
 0x619   :  { %3476 = vst [vmem:[#allocation9 + $0x40] sm:$0xff] %v3467_v63 }
 0x61a   :  { %3477 = vst [vmem:[#allocation9 + $0x48] sm:$0xff] %v3468_v39 }
 0x61b   :  { %3478 = vst [vmem:[#allocation9 + $0x50] sm:$0xff] %v3469_v11 }
 0x61c   :  { %3479 = vst [vmem:[#allocation9 + $0x58] sm:$0xff] %v3470_v21 }
 0x61d   :  { %3480 = vst [vmem:[#allocation9 + $0x60] sm:$0xff] %v3471_v29 }
 0x61e   :  { %3481 = vst [vmem:[#allocation9 + $0x68] sm:$0xff] %v3472_v62 }
 0x61f   :  { %3482 = vst [vmem:[#allocation9 + $0x70] sm:$0xff] %v3473_v48 }
 0x620   :  { %3483 = vst [vmem:[#allocation9 + $0x78] sm:$0xff] %v3474_v58 }
 0x621   :  { %3496 = dma.vmem_to_hbm [thread:$0]  %s3489_s22, 2048, %s3491_s2, [#allocation4], %s3875_s23, %s3875_s23, %s3844_s4  }
 0x622   :  { %3819 = dma.done.wait [#allocation4], 2048  }
 0x623   :  { %3820 = vsyncadd [#allocation4], 4294965248 }
 0x624   :  { %3501 = vsyncpa [#allocation3], 1 }
 0x625   :  { %3502 = vsyncpa [#allocation7], 1 }
 0x626   :  { %3503 = vsyncpa [#allocation4], 1 }
 0x627   :  { %3504 = vsyncpa [#allocation5], 1 }

</bundles_post_ra>
